<compile_context>
chip_gen: v7x
topology: tpu7x:2x2x1
jax: 0.10.0
libtpu: 0.0.40
codegen_flags: <defaults>
</compile_context>

<pallas_src>
import functools

import jax
import jax.numpy as jnp
from jax import lax
from jax.experimental import pallas as pl
from jax.experimental.pallas import tpu as pltpu


COMPUTE_DTYPE = jnp.bfloat16   # MXU operand dtype (accumulation stays f32)
CIN_PAD = 16                   # pad first-layer contraction dim to a multiple of this
BN_EPS = 1e-5


# --------------------------------------------------------------------------- #
# Fused SharedMLP (+ optional neighbour max-pool) Pallas kernel               #
# --------------------------------------------------------------------------- #
def _fused_mlp_kernel(*refs, num_layers, relu_flags, pool, compute_dtype):
    """refs = (x, w0, b0, w1, b1, ..., out).

    x  : (Cin, L)   bf16  -- channels on sublanes, (batch*)points on lanes
    wi : (Ci+1, Ci) bf16,  bi : (Ci+1, 1) f32
    out: (Cout, L') f32

    pool:
      None                 -> no pooling, L' = L
      ("slabs",  n, width) -> max across n lane-slabs of `width` (L = n*width,
                              the reduced index is the SLOW lane component);
                              L' = width.  Used for the neighbour (K) max.
      ("groups", n, width) -> per-contiguous-group max (L = n*width); L' = n.
                              Used for the global (per-batch) max.
    """
    x_ref, o_ref = refs[0], refs[-1]
    params = refs[1:-1]

    y = x_ref[...]
    for li in range(num_layers):
        w = params[2 * li][...]
        b = params[2 * li + 1][...]
        y = jnp.dot(w, y.astype(compute_dtype),
                    preferred_element_type=jnp.float32) + b
        if relu_flags[li]:
            y = jnp.maximum(y, 0.0)

    if pool is None:
        o_ref[...] = y.astype(o_ref.dtype)
    elif pool[0] == "slabs":
        _, n, width = pool
        m = y[:, 0:width]
        for s in range(1, n):                       # cheap VPU maxima over lane slabs
            m = jnp.maximum(m, y[:, s * width:(s + 1) * width])
        o_ref[...] = m.astype(o_ref.dtype)
    else:                                           # "groups": per-batch global max
        _, n, width = pool
        for g in range(n):
            col = jnp.max(y[:, g * width:(g + 1) * width], axis=1, keepdims=True)
            o_ref[:, g:g + 1] = col.astype(o_ref.dtype)


def fused_mlp(x2d, layers, relu_flags=None, pool=None):
    """Run a whole SharedMLP chain (+ optional pooling) as one pallas_call.

    x2d    : (Cin, L) float array (cast to bf16 here).
    layers : list of (w, b); w (Cout, Cin') bf16, b (Cout, 1) f32, pre-cast.
    """
    num_layers = len(layers)
    if relu_flags is None:
        relu_flags = (True,) * num_layers
    cin, L = x2d.shape
    cin_w = layers[0][0].shape[1]
    if cin_w != cin:   # first-layer weight was zero-padded at construction
        x2d = jnp.pad(x2d, ((0, cin_w - cin), (0, 0)))
    cout = layers[-1][0].shape[0]
    if pool is None:
        out_l = L
    elif pool[0] == "slabs":
        out_l = pool[2]
    else:
        out_l = pool[1]

    args = [x2d.astype(COMPUTE_DTYPE)]
    for w, b in layers:
        args.append(w)
        args.append(b)

    kernel = functools.partial(
        _fused_mlp_kernel, num_layers=num_layers, relu_flags=tuple(relu_flags),
        pool=pool, compute_dtype=COMPUTE_DTYPE)
    # Whole arrays fit trivially in VMEM at these sizes -> single-step call,
    # no grid / BlockSpec tiling needed.
    return pl.pallas_call(
        kernel,
        out_shape=jax.ShapeDtypeStruct((cout, out_l), jnp.float32),
    )(*args)


# --------------------------------------------------------------------------- #
# Batch folding helpers                                                       #
# --------------------------------------------------------------------------- #
def fold_batch(x):
    """(B, C, P) -> (C, B*P), batch-major along lanes."""
    B, C, P = x.shape
    return jnp.transpose(x, (1, 0, 2)).reshape(C, B * P)


def unfold_batch(y, B):
    """(C, B*P) -> (B, C, P)."""
    C, L = y.shape
    return jnp.transpose(y.reshape(C, B, L // B), (1, 0, 2))


# --------------------------------------------------------------------------- #
# Plain-JAX glue: sampling / grouping / interpolation                         #
# --------------------------------------------------------------------------- #
def farthest_point_sample(xyz_t, num_centroids):
    """xyz_t: (B, N, 3) -> centroid indices (B, S). Deterministic, starts at idx 0."""
    B, N, _ = xyz_t.shape
    idxs0 = jnp.zeros((B, num_centroids), jnp.int32)
    dists0 = jnp.full((B, N), 1e10, jnp.float32)
    last0 = jnp.zeros((B,), jnp.int32)

    def body(i, state):
        dists, idxs, last = state
        last_pt = jax.vmap(lambda x, j: x[j])(xyz_t, last)              # (B, 3)
        d = jnp.sum((xyz_t - last_pt[:, None, :]) ** 2, axis=-1)        # (B, N)
        dists = jnp.minimum(dists, d)
        nxt = jnp.argmax(dists, axis=-1).astype(jnp.int32)
        idxs = idxs.at[:, i].set(nxt)
        return dists, idxs, nxt

    _, idxs, _ = lax.fori_loop(1, num_centroids, body, (dists0, idxs0, last0))
    return idxs


def gather_points(x, idx):
    """x: (B, C, N), idx: (B, ...) int -> (B, C, ...)."""
    return jax.vmap(lambda xi, ii: xi[:, ii])(x, idx)


def ball_query(xyz, new_xyz, radius, k):
    """xyz: (B,3,N), new_xyz: (B,3,S) -> first-k in-ball neighbour indices (B, S, k)."""
    B, _, N = xyz.shape
    p = jnp.transpose(xyz, (0, 2, 1))        # (B, N, 3)
    q = jnp.transpose(new_xyz, (0, 2, 1))    # (B, S, 3)
    dist2 = jnp.sum((q[:, :, None, :] - p[:, None, :, :]) ** 2, axis=-1)  # (B,S,N)
    in_ball = dist2 < (radius ** 2)
    ar = jnp.arange(N, dtype=jnp.int32)[None, None, :]
    neg_keys = jnp.where(in_ball, -ar, -N)               # larger = smaller index in ball
    topk, _ = lax.top_k(neg_keys, k)                     # O(N*k), no full sort over N
    cand = -topk                                         # ascending first-k in-ball indices
    first = cand[:, :, :1]
    idx = jnp.where(cand == N, first, cand)              # pad with first neighbour
    idx = jnp.where(idx == N, 0, idx)                    # guard (empty ball; centroid is
    return idx.astype(jnp.int32)                         #  itself in-ball, so rare)


# --------------------------------------------------------------------------- #
# Parameter construction (deterministic, synthetic)                           #
# --------------------------------------------------------------------------- #
def _round_up(x, m):
    return ((x + m - 1) // m) * m


def xavier_uniform(key, shape):
    fan_out, fan_in = shape
    a = jnp.sqrt(6.0 / (fan_in + fan_out))
    return jax.random.uniform(key, shape, jnp.float32, -a, a)


def make_mlp_params(key, in_c, channels, fold_bn=True):
    """Build [(W_bf16, b_f32)] for a SharedMLP (1x1 conv + eval-mode BN folded in).

    The first layer's contraction dim is zero-padded to a multiple of CIN_PAD so
    the MXU never sees a ragged K; weights/biases are pre-cast & pre-reshaped
    once here (not per forward call).
    """
    params = []
    c = in_c
    bn_scale = 1.0 / jnp.sqrt(1.0 + BN_EPS)
    for li, out_c in enumerate(channels):
        key, k = jax.random.split(key)
        w = xavier_uniform(k, (out_c, c))
        if fold_bn:
            w = w * bn_scale
        if li == 0:
            c_pad = _round_up(c, CIN_PAD)
            if c_pad != c:
                w = jnp.pad(w, ((0, 0), (0, c_pad - c)))
        w = w.astype(COMPUTE_DTYPE)
        b = jnp.zeros((out_c, 1), jnp.float32)
        params.append((w, b))
        c = out_c
    return params, c, key


# --------------------------------------------------------------------------- #
# Model                                                                       #
# --------------------------------------------------------------------------- #
class PointNet2MSGPartSegPallas:
    def __init__(self, key, in_channels=3, num_classes=4, num_seg_classes=6,
                 num_centroids=(32, 16, 0),
                 radius_list=((0.1, 0.2, 0.4), (0.4, 0.8), -1.0),
                 num_neighbours_list=((8, 16, 16), (16, 16), -1),
                 sa_channels_list=(((16, 16, 32), (16, 16, 32), (16, 32, 32)),
                                   ((32, 32, 64), (32, 48, 64)),
                                   (64, 64, 128)),
                 fp_channels=((64, 64), (64, 32), (32, 32)),
                 num_fp_neighbours=(0, 3, 3),
                 seg_channels=(32,),
                 use_xyz=True, use_one_hot=True):
        assert len(radius_list) == len(num_centroids)
        assert len(num_neighbours_list) == len(num_centroids)
        assert len(sa_channels_list) == len(num_centroids)
        assert len(fp_channels) == len(num_centroids)
        assert len(num_fp_neighbours) == len(fp_channels)

        self.in_channels = in_channels
        self.num_classes = num_classes
        self.num_seg_classes = num_seg_classes
        self.use_xyz = use_xyz
        self.use_one_hot = use_one_hot
        self.num_centroids = num_centroids
        self.radius_list = radius_list
        self.num_neighbours_list = num_neighbours_list
        self.num_fp_neighbours = num_fp_neighbours

        # ---- SA (set abstraction) modules ----
        feature_channels = in_channels - 3
        self.sa_msg_params = []
        sa_out_channels = []
        for ind in range(len(num_centroids) - 1):
            scale_params = []
            out_total = 0
            for mlp_channels in sa_channels_list[ind]:
                in_c = feature_channels + (3 if use_xyz else 0)
                params, out_c, key = make_mlp_params(key, in_c, mlp_channels)
                scale_params.append(params)
                out_total += out_c
            self.sa_msg_params.append(scale_params)
            sa_out_channels.append(out_total)
            feature_channels = out_total
        in_c = feature_channels + (3 if use_xyz else 0)
        self.sa_global_params, out_c, key = make_mlp_params(key, in_c,
                                                            sa_channels_list[-1])
        sa_out_channels.append(out_c)

        # ---- FP (feature propagation) modules ----
        c0 = in_channels if use_xyz else in_channels - 3
        if use_one_hot:
            c0 += num_classes
        inter_channels = [c0] + sa_out_channels
        feature_channels = inter_channels[-1]
        self.fp_params = []
        for ind in range(len(fp_channels)):
            in_c = feature_channels + inter_channels[-2 - ind]
            params, out_c, key = make_mlp_params(key, in_c, fp_channels[ind])
            self.fp_params.append(params)
            feature_channels = out_c

        # ---- segmentation head (fused with seg_logit in forward) ----
        self.mlp_seg_params, out_c, key = make_mlp_params(key, feature_channels,
                                                          seg_channels)
        key, k = jax.random.split(key)
        self.seg_w = xavier_uniform(k, (num_seg_classes, out_c)).astype(COMPUTE_DTYPE)
        self.seg_b = jnp.zeros((num_seg_classes, 1), jnp.float32)
        # TODO(synk): dropout (p=0.5) in mlp_seg is omitted — eval-mode identity.

    # ---- module forwards -------------------------------------------------- #
    def _sa_module_msg(self, xyz, feature, scale_params, num_centroids,
                       radius_list, num_neighbours_list):
        B = xyz.shape[0]
        S = num_centroids
        xyz_t = jnp.transpose(xyz, (0, 2, 1))
        centroid_idx = farthest_point_sample(xyz_t, S)                  # (B, S)
        new_xyz = gather_points(xyz, centroid_idx)                      # (B, 3, S)
        feats = []
        for params, radius, k in zip(scale_params, radius_list,
                                     num_neighbours_list):
            gidx = ball_query(xyz, new_xyz, radius, k)                  # (B, S, k)
            gxyz = gather_points(xyz, gidx) - new_xyz[:, :, :, None]    # (B,3,S,k)
            if feature is not None:
                gfeat = gather_points(feature, gidx)                    # (B,C,S,k)
                gfeat = (jnp.concatenate([gxyz, gfeat], axis=1)
                         if self.use_xyz else gfeat)
            else:
                gfeat = gxyz
            c_in = gfeat.shape[1]
            # (B, C, S, K) -> (C, K, B, S) -> (C, K*B*S): neighbour index is the
            # SLOW lane component so the K-max becomes K-1 lane-slab maxima
            # fused into the same kernel as the MLP chain.
            x2d = jnp.transpose(gfeat, (1, 3, 0, 2)).reshape(c_in, k * B * S)
            pooled = fused_mlp(x2d, params, pool=("slabs", k, B * S))   # (Cout, B*S)
            feats.append(unfold_batch(pooled, B))                       # (B, Cout, S)
        return new_xyz, jnp.concatenate(feats, axis=1)

    def _sa_module_global(self, xyz, feature, params):
        B, _, S = xyz.shape
        x = jnp.concatenate([xyz, feature], axis=1) if self.use_xyz else feature
        x2d = fold_batch(x)                                             # (C, B*S)
        pooled = fused_mlp(x2d, params, pool=("groups", B, S))          # (Cout, B)
        feature_out = jnp.transpose(pooled, (1, 0))[:, :, None]         # (B, Cout, 1)
        new_xyz = jnp.zeros((B, 3, 1), jnp.float32)  # unused downstream (FP0 k=0)
        return new_xyz, feature_out

    def _fp_module(self, dense_xyz, sparse_xyz, dense_feature, sparse_feature,
                   params, num_neighbors):
        B, _, Nd = dense_xyz.shape
        if num_neighbors == 0:
            interpolated = jnp.broadcast_to(
                sparse_feature, (B, sparse_feature.shape[1], Nd))
        else:
            d = jnp.transpose(dense_xyz, (0, 2, 1))
            s = jnp.transpose(sparse_xyz, (0, 2, 1))
            dist2 = jnp.sum((d[:, :, None, :] - s[:, None, :, :]) ** 2, axis=-1)
            neg_d, idx = lax.top_k(-dist2, num_neighbors)               # (B,Nd,k)
            dist_k = -neg_d
            inv = 1.0 / jnp.maximum(dist_k, 1e-10)
            w_int = inv / jnp.sum(inv, axis=-1, keepdims=True)
            gathered = gather_points(sparse_feature, idx)               # (B,C,Nd,k)
            interpolated = jnp.sum(gathered * w_int[:, None, :, :], axis=-1)
        if dense_feature is not None:
            x = jnp.concatenate([interpolated, dense_feature], axis=1)
        else:
            x = interpolated
        y = fused_mlp(fold_batch(x), params)                            # fused MLP chain
        return unfold_batch(y, B)

    # ---- full forward ------------------------------------------------------ #
    def forward(self, points, cls_label):
        B, C, N = points.shape
        xyz = points[:, 0:3, :]
        feature = points[:, 3:, :] if C > 3 else None

        inter_xyz = [xyz]
        feat0 = points if self.use_xyz else feature
        if self.use_one_hot:
            one_hot = jax.nn.one_hot(cls_label, self.num_classes,
                                     dtype=points.dtype)                # (B, num_classes)
            one_hot_exp = jnp.broadcast_to(one_hot[:, :, None],
                                           (B, self.num_classes, N))
            feat0 = jnp.concatenate([feat0, one_hot_exp], axis=1)
        inter_feature = [feat0]

        # set abstraction (MSG) layers
        for ind, scale_params in enumerate(self.sa_msg_params):
            xyz, feature = self._sa_module_msg(
                xyz, feature, scale_params, self.num_centroids[ind],
                self.radius_list[ind], self.num_neighbours_list[ind])
            inter_xyz.append(xyz)
            inter_feature.append(feature)
        # global set abstraction layer
        xyz, feature = self._sa_module_global(xyz, feature, self.sa_global_params)
        inter_xyz.append(xyz)
        inter_feature.append(feature)

        # feature propagation layers
        sparse_xyz, sparse_feature = xyz, feature
        for fp_ind, params in enumerate(self.fp_params):
            dense_xyz = inter_xyz[-2 - fp_ind]
            dense_feature = inter_feature[-2 - fp_ind]
            fp_feature = self._fp_module(dense_xyz, sparse_xyz, dense_feature,
                                         sparse_feature, params,
                                         self.num_fp_neighbours[fp_ind])
            sparse_xyz = dense_xyz
            sparse_feature = fp_feature

        # segmentation head: mlp_seg (+ReLU) and seg_logit (no ReLU) fused into
        # one pallas_call.
        x2d = fold_batch(sparse_feature)
        layers = list(self.mlp_seg_params) + [(self.seg_w, self.seg_b)]
        relu_flags = (True,) * len(self.mlp_seg_params) + (False,)
        y = fused_mlp(x2d, layers, relu_flags=relu_flags)               # (num_seg, B*N)
        seg_logit = unfold_batch(y, B)                                  # (B, num_seg, N)
        return {"seg_logit": seg_logit}

    # TODO(synk): the FPS / ball-query / gather glue still runs as plain XLA ops;
    # fusing the gathers into the SA kernels via PrefetchScalarGridSpec (indices
    # in SMEM) and batching the MSG scales into one block-diagonal matmul are
    # further possible optimizations not applied here.


# --------------------------------------------------------------------------- #
if __name__ == "__main__":
    key = jax.random.PRNGKey(0)
    B, N = 2, 128
    in_channels, num_classes, num_seg_classes = 3, 4, 6

    k_pts, k_params = jax.random.split(key)
    points = jax.random.uniform(k_pts, (B, in_channels, N), jnp.float32)  # (B, 3, N)
    cls_label = jnp.array([1, 3], dtype=jnp.int32)                        # (B,)

    model = PointNet2MSGPartSegPallas(
        k_params, in_channels=in_channels, num_classes=num_classes,
        num_seg_classes=num_seg_classes)

    forward = jax.jit(model.forward)
    preds = forward(points, cls_label)
    seg_logit = jax.block_until_ready(preds["seg_logit"])

    assert seg_logit.shape == (B, num_seg_classes, N), seg_logit.shape
    assert bool(jnp.all(jnp.isfinite(seg_logit)))
    print("KERNEL_OK")
</pallas_src>

<mosaic_0001>
module attributes {stable_mosaic.version = 11 : i64} {
  func.func @_fused_mlp_kernel(%arg0: memref<16x1024xbf16, #tpu.memory_space<vmem>>, %arg1: memref<16x16xbf16, #tpu.memory_space<vmem>>, %arg2: memref<16x1xf32, #tpu.memory_space<vmem>>, %arg3: memref<32x16xbf16, #tpu.memory_space<vmem>>, %arg4: memref<32x1xf32, #tpu.memory_space<vmem>>, %arg5: memref<32x32xbf16, #tpu.memory_space<vmem>>, %arg6: memref<32x1xf32, #tpu.memory_space<vmem>>, %arg7: memref<32x64xf32, #tpu.memory_space<vmem>>) attributes {dimension_semantics = [], scalar_prefetch = 0 : i64, scratch_operands = 0 : i64, tpu.core_type = #tpu.core_type<tc>} {
    %c0 = arith.constant 0 : index
    %c0_0 = arith.constant 0 : index
    %0 = vector.load %arg0[%c0, %c0_0] : memref<16x1024xbf16, #tpu.memory_space<vmem>>, vector<16x1024xbf16>
    %c0_1 = arith.constant 0 : index
    %c0_2 = arith.constant 0 : index
    %1 = vector.load %arg1[%c0_1, %c0_2] : memref<16x16xbf16, #tpu.memory_space<vmem>>, vector<16x16xbf16>
    %c0_3 = arith.constant 0 : index
    %c0_4 = arith.constant 0 : index
    %2 = vector.load %arg2[%c0_3, %c0_4] : memref<16x1xf32, #tpu.memory_space<vmem>>, vector<16x1xf32>
    %cst = arith.constant dense<0.000000e+00> : vector<16x1024xf32>
    %3 = tpu.matmul %1, %0, %cst {dimension_numbers = #tpu.dot_dimension_numbers<[1], [0], [0], [1], [0, 0, 1, 1], [], []>} : vector<16x16xbf16>, vector<16x1024xbf16>, vector<16x1024xf32> -> vector<16x1024xf32>
    %4 = vector.broadcast %2 : vector<16x1xf32> to vector<16x1024xf32>
    %5 = arith.addf %3, %4 : vector<16x1024xf32>
    %cst_5 = arith.constant 0.000000e+00 : f32
    %6 = vector.broadcast %cst_5 : f32 to vector<16x1024xf32>
    %7 = arith.maximumf %5, %6 : vector<16x1024xf32>
    %c0_6 = arith.constant 0 : index
    %c0_7 = arith.constant 0 : index
    %8 = vector.load %arg3[%c0_6, %c0_7] : memref<32x16xbf16, #tpu.memory_space<vmem>>, vector<32x16xbf16>
    %c0_8 = arith.constant 0 : index
    %c0_9 = arith.constant 0 : index
    %9 = vector.load %arg4[%c0_8, %c0_9] : memref<32x1xf32, #tpu.memory_space<vmem>>, vector<32x1xf32>
    %10 = arith.truncf %7 : vector<16x1024xf32> to vector<16x1024xbf16>
    %cst_10 = arith.constant dense<0.000000e+00> : vector<32x1024xf32>
    %11 = tpu.matmul %8, %10, %cst_10 {dimension_numbers = #tpu.dot_dimension_numbers<[1], [0], [0], [1], [0, 0, 1, 1], [], []>} : vector<32x16xbf16>, vector<16x1024xbf16>, vector<32x1024xf32> -> vector<32x1024xf32>
    %12 = vector.broadcast %9 : vector<32x1xf32> to vector<32x1024xf32>
    %13 = arith.addf %11, %12 : vector<32x1024xf32>
    %cst_11 = arith.constant 0.000000e+00 : f32
    %14 = vector.broadcast %cst_11 : f32 to vector<32x1024xf32>
    %15 = arith.maximumf %13, %14 : vector<32x1024xf32>
    %c0_12 = arith.constant 0 : index
    %c0_13 = arith.constant 0 : index
    %16 = vector.load %arg5[%c0_12, %c0_13] : memref<32x32xbf16, #tpu.memory_space<vmem>>, vector<32x32xbf16>
    %c0_14 = arith.constant 0 : index
    %c0_15 = arith.constant 0 : index
    %17 = vector.load %arg6[%c0_14, %c0_15] : memref<32x1xf32, #tpu.memory_space<vmem>>, vector<32x1xf32>
    %18 = arith.truncf %15 : vector<32x1024xf32> to vector<32x1024xbf16>
    %cst_16 = arith.constant dense<0.000000e+00> : vector<32x1024xf32>
    %19 = tpu.matmul %16, %18, %cst_16 {dimension_numbers = #tpu.dot_dimension_numbers<[1], [0], [0], [1], [0, 0, 1, 1], [], []>} : vector<32x32xbf16>, vector<32x1024xbf16>, vector<32x1024xf32> -> vector<32x1024xf32>
    %20 = vector.broadcast %17 : vector<32x1xf32> to vector<32x1024xf32>
    %21 = arith.addf %19, %20 : vector<32x1024xf32>
    %cst_17 = arith.constant 0.000000e+00 : f32
    %22 = vector.broadcast %cst_17 : f32 to vector<32x1024xf32>
    %23 = arith.maximumf %21, %22 : vector<32x1024xf32>
    %24 = vector.extract_strided_slice %23 {offsets = [0, 0], sizes = [32, 64], strides = [1, 1]} : vector<32x1024xf32> to vector<32x64xf32>
    %25 = vector.extract_strided_slice %23 {offsets = [0, 64], sizes = [32, 64], strides = [1, 1]} : vector<32x1024xf32> to vector<32x64xf32>
    %26 = arith.maximumf %24, %25 : vector<32x64xf32>
    %27 = vector.extract_strided_slice %23 {offsets = [0, 128], sizes = [32, 64], strides = [1, 1]} : vector<32x1024xf32> to vector<32x64xf32>
    %28 = arith.maximumf %26, %27 : vector<32x64xf32>
    %29 = vector.extract_strided_slice %23 {offsets = [0, 192], sizes = [32, 64], strides = [1, 1]} : vector<32x1024xf32> to vector<32x64xf32>
    %30 = arith.maximumf %28, %29 : vector<32x64xf32>
    %31 = vector.extract_strided_slice %23 {offsets = [0, 256], sizes = [32, 64], strides = [1, 1]} : vector<32x1024xf32> to vector<32x64xf32>
    %32 = arith.maximumf %30, %31 : vector<32x64xf32>
    %33 = vector.extract_strided_slice %23 {offsets = [0, 320], sizes = [32, 64], strides = [1, 1]} : vector<32x1024xf32> to vector<32x64xf32>
    %34 = arith.maximumf %32, %33 : vector<32x64xf32>
    %35 = vector.extract_strided_slice %23 {offsets = [0, 384], sizes = [32, 64], strides = [1, 1]} : vector<32x1024xf32> to vector<32x64xf32>
    %36 = arith.maximumf %34, %35 : vector<32x64xf32>
    %37 = vector.extract_strided_slice %23 {offsets = [0, 448], sizes = [32, 64], strides = [1, 1]} : vector<32x1024xf32> to vector<32x64xf32>
    %38 = arith.maximumf %36, %37 : vector<32x64xf32>
    %39 = vector.extract_strided_slice %23 {offsets = [0, 512], sizes = [32, 64], strides = [1, 1]} : vector<32x1024xf32> to vector<32x64xf32>
    %40 = arith.maximumf %38, %39 : vector<32x64xf32>
    %41 = vector.extract_strided_slice %23 {offsets = [0, 576], sizes = [32, 64], strides = [1, 1]} : vector<32x1024xf32> to vector<32x64xf32>
    %42 = arith.maximumf %40, %41 : vector<32x64xf32>
    %43 = vector.extract_strided_slice %23 {offsets = [0, 640], sizes = [32, 64], strides = [1, 1]} : vector<32x1024xf32> to vector<32x64xf32>
    %44 = arith.maximumf %42, %43 : vector<32x64xf32>
    %45 = vector.extract_strided_slice %23 {offsets = [0, 704], sizes = [32, 64], strides = [1, 1]} : vector<32x1024xf32> to vector<32x64xf32>
    %46 = arith.maximumf %44, %45 : vector<32x64xf32>
    %47 = vector.extract_strided_slice %23 {offsets = [0, 768], sizes = [32, 64], strides = [1, 1]} : vector<32x1024xf32> to vector<32x64xf32>
    %48 = arith.maximumf %46, %47 : vector<32x64xf32>
    %49 = vector.extract_strided_slice %23 {offsets = [0, 832], sizes = [32, 64], strides = [1, 1]} : vector<32x1024xf32> to vector<32x64xf32>
    %50 = arith.maximumf %48, %49 : vector<32x64xf32>
    %51 = vector.extract_strided_slice %23 {offsets = [0, 896], sizes = [32, 64], strides = [1, 1]} : vector<32x1024xf32> to vector<32x64xf32>
    %52 = arith.maximumf %50, %51 : vector<32x64xf32>
    %53 = vector.extract_strided_slice %23 {offsets = [0, 960], sizes = [32, 64], strides = [1, 1]} : vector<32x1024xf32> to vector<32x64xf32>
    %54 = arith.maximumf %52, %53 : vector<32x64xf32>
    %c0_18 = arith.constant 0 : index
    %c0_19 = arith.constant 0 : index
    %55 = vector.load %arg7[%c0_18, %c0_19] : memref<32x64xf32, #tpu.memory_space<vmem>>, vector<32x64xf32>
    tpu.vector_store %arg7[%c0_18, %c0_19], %54 {strides = array<i32>} : memref<32x64xf32, #tpu.memory_space<vmem>>, vector<32x64xf32>,
    return
  }
}

module attributes {stable_mosaic.version = 11 : i64} {
  func.func @_fused_mlp_kernel(%arg0: memref<16x1024xbf16, #tpu.memory_space<vmem>>, %arg1: memref<16x16xbf16, #tpu.memory_space<vmem>>, %arg2: memref<16x1xf32, #tpu.memory_space<vmem>>, %arg3: memref<16x16xbf16, #tpu.memory_space<vmem>>, %arg4: memref<16x1xf32, #tpu.memory_space<vmem>>, %arg5: memref<32x16xbf16, #tpu.memory_space<vmem>>, %arg6: memref<32x1xf32, #tpu.memory_space<vmem>>, %arg7: memref<32x64xf32, #tpu.memory_space<vmem>>) attributes {dimension_semantics = [], scalar_prefetch = 0 : i64, scratch_operands = 0 : i64, tpu.core_type = #tpu.core_type<tc>} {
    %c0 = arith.constant 0 : index
    %c0_0 = arith.constant 0 : index
    %0 = vector.load %arg0[%c0, %c0_0] : memref<16x1024xbf16, #tpu.memory_space<vmem>>, vector<16x1024xbf16>
    %c0_1 = arith.constant 0 : index
    %c0_2 = arith.constant 0 : index
    %1 = vector.load %arg1[%c0_1, %c0_2] : memref<16x16xbf16, #tpu.memory_space<vmem>>, vector<16x16xbf16>
    %c0_3 = arith.constant 0 : index
    %c0_4 = arith.constant 0 : index
    %2 = vector.load %arg2[%c0_3, %c0_4] : memref<16x1xf32, #tpu.memory_space<vmem>>, vector<16x1xf32>
    %cst = arith.constant dense<0.000000e+00> : vector<16x1024xf32>
    %3 = tpu.matmul %1, %0, %cst {dimension_numbers = #tpu.dot_dimension_numbers<[1], [0], [0], [1], [0, 0, 1, 1], [], []>} : vector<16x16xbf16>, vector<16x1024xbf16>, vector<16x1024xf32> -> vector<16x1024xf32>
    %4 = vector.broadcast %2 : vector<16x1xf32> to vector<16x1024xf32>
    %5 = arith.addf %3, %4 : vector<16x1024xf32>
    %cst_5 = arith.constant 0.000000e+00 : f32
    %6 = vector.broadcast %cst_5 : f32 to vector<16x1024xf32>
    %7 = arith.maximumf %5, %6 : vector<16x1024xf32>
    %c0_6 = arith.constant 0 : index
    %c0_7 = arith.constant 0 : index
    %8 = vector.load %arg3[%c0_6, %c0_7] : memref<16x16xbf16, #tpu.memory_space<vmem>>, vector<16x16xbf16>
    %c0_8 = arith.constant 0 : index
    %c0_9 = arith.constant 0 : index
    %9 = vector.load %arg4[%c0_8, %c0_9] : memref<16x1xf32, #tpu.memory_space<vmem>>, vector<16x1xf32>
    %10 = arith.truncf %7 : vector<16x1024xf32> to vector<16x1024xbf16>
    %cst_10 = arith.constant dense<0.000000e+00> : vector<16x1024xf32>
    %11 = tpu.matmul %8, %10, %cst_10 {dimension_numbers = #tpu.dot_dimension_numbers<[1], [0], [0], [1], [0, 0, 1, 1], [], []>} : vector<16x16xbf16>, vector<16x1024xbf16>, vector<16x1024xf32> -> vector<16x1024xf32>
    %12 = vector.broadcast %9 : vector<16x1xf32> to vector<16x1024xf32>
    %13 = arith.addf %11, %12 : vector<16x1024xf32>
    %cst_11 = arith.constant 0.000000e+00 : f32
    %14 = vector.broadcast %cst_11 : f32 to vector<16x1024xf32>
    %15 = arith.maximumf %13, %14 : vector<16x1024xf32>
    %c0_12 = arith.constant 0 : index
    %c0_13 = arith.constant 0 : index
    %16 = vector.load %arg5[%c0_12, %c0_13] : memref<32x16xbf16, #tpu.memory_space<vmem>>, vector<32x16xbf16>
    %c0_14 = arith.constant 0 : index
    %c0_15 = arith.constant 0 : index
    %17 = vector.load %arg6[%c0_14, %c0_15] : memref<32x1xf32, #tpu.memory_space<vmem>>, vector<32x1xf32>
    %18 = arith.truncf %15 : vector<16x1024xf32> to vector<16x1024xbf16>
    %cst_16 = arith.constant dense<0.000000e+00> : vector<32x1024xf32>
    %19 = tpu.matmul %16, %18, %cst_16 {dimension_numbers = #tpu.dot_dimension_numbers<[1], [0], [0], [1], [0, 0, 1, 1], [], []>} : vector<32x16xbf16>, vector<16x1024xbf16>, vector<32x1024xf32> -> vector<32x1024xf32>
    %20 = vector.broadcast %17 : vector<32x1xf32> to vector<32x1024xf32>
    %21 = arith.addf %19, %20 : vector<32x1024xf32>
    %cst_17 = arith.constant 0.000000e+00 : f32
    %22 = vector.broadcast %cst_17 : f32 to vector<32x1024xf32>
    %23 = arith.maximumf %21, %22 : vector<32x1024xf32>
    %24 = vector.extract_strided_slice %23 {offsets = [0, 0], sizes = [32, 64], strides = [1, 1]} : vector<32x1024xf32> to vector<32x64xf32>
    %25 = vector.extract_strided_slice %23 {offsets = [0, 64], sizes = [32, 64], strides = [1, 1]} : vector<32x1024xf32> to vector<32x64xf32>
    %26 = arith.maximumf %24, %25 : vector<32x64xf32>
    %27 = vector.extract_strided_slice %23 {offsets = [0, 128], sizes = [32, 64], strides = [1, 1]} : vector<32x1024xf32> to vector<32x64xf32>
    %28 = arith.maximumf %26, %27 : vector<32x64xf32>
    %29 = vector.extract_strided_slice %23 {offsets = [0, 192], sizes = [32, 64], strides = [1, 1]} : vector<32x1024xf32> to vector<32x64xf32>
    %30 = arith.maximumf %28, %29 : vector<32x64xf32>
    %31 = vector.extract_strided_slice %23 {offsets = [0, 256], sizes = [32, 64], strides = [1, 1]} : vector<32x1024xf32> to vector<32x64xf32>
    %32 = arith.maximumf %30, %31 : vector<32x64xf32>
    %33 = vector.extract_strided_slice %23 {offsets = [0, 320], sizes = [32, 64], strides = [1, 1]} : vector<32x1024xf32> to vector<32x64xf32>
    %34 = arith.maximumf %32, %33 : vector<32x64xf32>
    %35 = vector.extract_strided_slice %23 {offsets = [0, 384], sizes = [32, 64], strides = [1, 1]} : vector<32x1024xf32> to vector<32x64xf32>
    %36 = arith.maximumf %34, %35 : vector<32x64xf32>
    %37 = vector.extract_strided_slice %23 {offsets = [0, 448], sizes = [32, 64], strides = [1, 1]} : vector<32x1024xf32> to vector<32x64xf32>
    %38 = arith.maximumf %36, %37 : vector<32x64xf32>
    %39 = vector.extract_strided_slice %23 {offsets = [0, 512], sizes = [32, 64], strides = [1, 1]} : vector<32x1024xf32> to vector<32x64xf32>
    %40 = arith.maximumf %38, %39 : vector<32x64xf32>
    %41 = vector.extract_strided_slice %23 {offsets = [0, 576], sizes = [32, 64], strides = [1, 1]} : vector<32x1024xf32> to vector<32x64xf32>
    %42 = arith.maximumf %40, %41 : vector<32x64xf32>
    %43 = vector.extract_strided_slice %23 {offsets = [0, 640], sizes = [32, 64], strides = [1, 1]} : vector<32x1024xf32> to vector<32x64xf32>
    %44 = arith.maximumf %42, %43 : vector<32x64xf32>
    %45 = vector.extract_strided_slice %23 {offsets = [0, 704], sizes = [32, 64], strides = [1, 1]} : vector<32x1024xf32> to vector<32x64xf32>
    %46 = arith.maximumf %44, %45 : vector<32x64xf32>
    %47 = vector.extract_strided_slice %23 {offsets = [0, 768], sizes = [32, 64], strides = [1, 1]} : vector<32x1024xf32> to vector<32x64xf32>
    %48 = arith.maximumf %46, %47 : vector<32x64xf32>
    %49 = vector.extract_strided_slice %23 {offsets = [0, 832], sizes = [32, 64], strides = [1, 1]} : vector<32x1024xf32> to vector<32x64xf32>
    %50 = arith.maximumf %48, %49 : vector<32x64xf32>
    %51 = vector.extract_strided_slice %23 {offsets = [0, 896], sizes = [32, 64], strides = [1, 1]} : vector<32x1024xf32> to vector<32x64xf32>
    %52 = arith.maximumf %50, %51 : vector<32x64xf32>
    %53 = vector.extract_strided_slice %23 {offsets = [0, 960], sizes = [32, 64], strides = [1, 1]} : vector<32x1024xf32> to vector<32x64xf32>
    %54 = arith.maximumf %52, %53 : vector<32x64xf32>
    %c0_18 = arith.constant 0 : index
    %c0_19 = arith.constant 0 : index
    %55 = vector.load %arg7[%c0_18, %c0_19] : memref<32x64xf32, #tpu.memory_space<vmem>>, vector<32x64xf32>
    tpu.vector_store %arg7[%c0_18, %c0_19], %54 {strides = array<i32>} : memref<32x64xf32, #tpu.memory_space<vmem>>, vector<32x64xf32>,
    return
  }
}

module attributes {stable_mosaic.version = 11 : i64} {
  func.func @_fused_mlp_kernel(%arg0: memref<16x512xbf16, #tpu.memory_space<vmem>>, %arg1: memref<16x16xbf16, #tpu.memory_space<vmem>>, %arg2: memref<16x1xf32, #tpu.memory_space<vmem>>, %arg3: memref<16x16xbf16, #tpu.memory_space<vmem>>, %arg4: memref<16x1xf32, #tpu.memory_space<vmem>>, %arg5: memref<32x16xbf16, #tpu.memory_space<vmem>>, %arg6: memref<32x1xf32, #tpu.memory_space<vmem>>, %arg7: memref<32x64xf32, #tpu.memory_space<vmem>>) attributes {dimension_semantics = [], scalar_prefetch = 0 : i64, scratch_operands = 0 : i64, tpu.core_type = #tpu.core_type<tc>} {
    %c0 = arith.constant 0 : index
    %c0_0 = arith.constant 0 : index
    %0 = vector.load %arg0[%c0, %c0_0] : memref<16x512xbf16, #tpu.memory_space<vmem>>, vector<16x512xbf16>
    %c0_1 = arith.constant 0 : index
    %c0_2 = arith.constant 0 : index
    %1 = vector.load %arg1[%c0_1, %c0_2] : memref<16x16xbf16, #tpu.memory_space<vmem>>, vector<16x16xbf16>
    %c0_3 = arith.constant 0 : index
    %c0_4 = arith.constant 0 : index
    %2 = vector.load %arg2[%c0_3, %c0_4] : memref<16x1xf32, #tpu.memory_space<vmem>>, vector<16x1xf32>
    %cst = arith.constant dense<0.000000e+00> : vector<16x512xf32>
    %3 = tpu.matmul %1, %0, %cst {dimension_numbers = #tpu.dot_dimension_numbers<[1], [0], [0], [1], [0, 0, 1, 1], [], []>} : vector<16x16xbf16>, vector<16x512xbf16>, vector<16x512xf32> -> vector<16x512xf32>
    %4 = vector.broadcast %2 : vector<16x1xf32> to vector<16x512xf32>
    %5 = arith.addf %3, %4 : vector<16x512xf32>
    %cst_5 = arith.constant 0.000000e+00 : f32
    %6 = vector.broadcast %cst_5 : f32 to vector<16x512xf32>
    %7 = arith.maximumf %5, %6 : vector<16x512xf32>
    %c0_6 = arith.constant 0 : index
    %c0_7 = arith.constant 0 : index
    %8 = vector.load %arg3[%c0_6, %c0_7] : memref<16x16xbf16, #tpu.memory_space<vmem>>, vector<16x16xbf16>
    %c0_8 = arith.constant 0 : index
    %c0_9 = arith.constant 0 : index
    %9 = vector.load %arg4[%c0_8, %c0_9] : memref<16x1xf32, #tpu.memory_space<vmem>>, vector<16x1xf32>
    %10 = arith.truncf %7 : vector<16x512xf32> to vector<16x512xbf16>
    %cst_10 = arith.constant dense<0.000000e+00> : vector<16x512xf32>
    %11 = tpu.matmul %8, %10, %cst_10 {dimension_numbers = #tpu.dot_dimension_numbers<[1], [0], [0], [1], [0, 0, 1, 1], [], []>} : vector<16x16xbf16>, vector<16x512xbf16>, vector<16x512xf32> -> vector<16x512xf32>
    %12 = vector.broadcast %9 : vector<16x1xf32> to vector<16x512xf32>
    %13 = arith.addf %11, %12 : vector<16x512xf32>
    %cst_11 = arith.constant 0.000000e+00 : f32
    %14 = vector.broadcast %cst_11 : f32 to vector<16x512xf32>
    %15 = arith.maximumf %13, %14 : vector<16x512xf32>
    %c0_12 = arith.constant 0 : index
    %c0_13 = arith.constant 0 : index
    %16 = vector.load %arg5[%c0_12, %c0_13] : memref<32x16xbf16, #tpu.memory_space<vmem>>, vector<32x16xbf16>
    %c0_14 = arith.constant 0 : index
    %c0_15 = arith.constant 0 : index
    %17 = vector.load %arg6[%c0_14, %c0_15] : memref<32x1xf32, #tpu.memory_space<vmem>>, vector<32x1xf32>
    %18 = arith.truncf %15 : vector<16x512xf32> to vector<16x512xbf16>
    %cst_16 = arith.constant dense<0.000000e+00> : vector<32x512xf32>
    %19 = tpu.matmul %16, %18, %cst_16 {dimension_numbers = #tpu.dot_dimension_numbers<[1], [0], [0], [1], [0, 0, 1, 1], [], []>} : vector<32x16xbf16>, vector<16x512xbf16>, vector<32x512xf32> -> vector<32x512xf32>
    %20 = vector.broadcast %17 : vector<32x1xf32> to vector<32x512xf32>
    %21 = arith.addf %19, %20 : vector<32x512xf32>
    %cst_17 = arith.constant 0.000000e+00 : f32
    %22 = vector.broadcast %cst_17 : f32 to vector<32x512xf32>
    %23 = arith.maximumf %21, %22 : vector<32x512xf32>
    %24 = vector.extract_strided_slice %23 {offsets = [0, 0], sizes = [32, 64], strides = [1, 1]} : vector<32x512xf32> to vector<32x64xf32>
    %25 = vector.extract_strided_slice %23 {offsets = [0, 64], sizes = [32, 64], strides = [1, 1]} : vector<32x512xf32> to vector<32x64xf32>
    %26 = arith.maximumf %24, %25 : vector<32x64xf32>
    %27 = vector.extract_strided_slice %23 {offsets = [0, 128], sizes = [32, 64], strides = [1, 1]} : vector<32x512xf32> to vector<32x64xf32>
    %28 = arith.maximumf %26, %27 : vector<32x64xf32>
    %29 = vector.extract_strided_slice %23 {offsets = [0, 192], sizes = [32, 64], strides = [1, 1]} : vector<32x512xf32> to vector<32x64xf32>
    %30 = arith.maximumf %28, %29 : vector<32x64xf32>
    %31 = vector.extract_strided_slice %23 {offsets = [0, 256], sizes = [32, 64], strides = [1, 1]} : vector<32x512xf32> to vector<32x64xf32>
    %32 = arith.maximumf %30, %31 : vector<32x64xf32>
    %33 = vector.extract_strided_slice %23 {offsets = [0, 320], sizes = [32, 64], strides = [1, 1]} : vector<32x512xf32> to vector<32x64xf32>
    %34 = arith.maximumf %32, %33 : vector<32x64xf32>
    %35 = vector.extract_strided_slice %23 {offsets = [0, 384], sizes = [32, 64], strides = [1, 1]} : vector<32x512xf32> to vector<32x64xf32>
    %36 = arith.maximumf %34, %35 : vector<32x64xf32>
    %37 = vector.extract_strided_slice %23 {offsets = [0, 448], sizes = [32, 64], strides = [1, 1]} : vector<32x512xf32> to vector<32x64xf32>
    %38 = arith.maximumf %36, %37 : vector<32x64xf32>
    %c0_18 = arith.constant 0 : index
    %c0_19 = arith.constant 0 : index
    %39 = vector.load %arg7[%c0_18, %c0_19] : memref<32x64xf32, #tpu.memory_space<vmem>>, vector<32x64xf32>
    tpu.vector_store %arg7[%c0_18, %c0_19], %38 {strides = array<i32>} : memref<32x64xf32, #tpu.memory_space<vmem>>, vector<32x64xf32>,
    return
  }
}

module attributes {stable_mosaic.version = 11 : i64} {
  func.func @_fused_mlp_kernel(%arg0: memref<112x512xbf16, #tpu.memory_space<vmem>>, %arg1: memref<32x112xbf16, #tpu.memory_space<vmem>>, %arg2: memref<32x1xf32, #tpu.memory_space<vmem>>, %arg3: memref<48x32xbf16, #tpu.memory_space<vmem>>, %arg4: memref<48x1xf32, #tpu.memory_space<vmem>>, %arg5: memref<64x48xbf16, #tpu.memory_space<vmem>>, %arg6: memref<64x1xf32, #tpu.memory_space<vmem>>, %arg7: memref<64x32xf32, #tpu.memory_space<vmem>>) attributes {dimension_semantics = [], scalar_prefetch = 0 : i64, scratch_operands = 0 : i64, tpu.core_type = #tpu.core_type<tc>} {
    %c0 = arith.constant 0 : index
    %c0_0 = arith.constant 0 : index
    %0 = vector.load %arg0[%c0, %c0_0] : memref<112x512xbf16, #tpu.memory_space<vmem>>, vector<112x512xbf16>
    %c0_1 = arith.constant 0 : index
    %c0_2 = arith.constant 0 : index
    %1 = vector.load %arg1[%c0_1, %c0_2] : memref<32x112xbf16, #tpu.memory_space<vmem>>, vector<32x112xbf16>
    %c0_3 = arith.constant 0 : index
    %c0_4 = arith.constant 0 : index
    %2 = vector.load %arg2[%c0_3, %c0_4] : memref<32x1xf32, #tpu.memory_space<vmem>>, vector<32x1xf32>
    %cst = arith.constant dense<0.000000e+00> : vector<32x512xf32>
    %3 = tpu.matmul %1, %0, %cst {dimension_numbers = #tpu.dot_dimension_numbers<[1], [0], [0], [1], [0, 0, 1, 1], [], []>} : vector<32x112xbf16>, vector<112x512xbf16>, vector<32x512xf32> -> vector<32x512xf32>
    %4 = vector.broadcast %2 : vector<32x1xf32> to vector<32x512xf32>
    %5 = arith.addf %3, %4 : vector<32x512xf32>
    %cst_5 = arith.constant 0.000000e+00 : f32
    %6 = vector.broadcast %cst_5 : f32 to vector<32x512xf32>
    %7 = arith.maximumf %5, %6 : vector<32x512xf32>
    %c0_6 = arith.constant 0 : index
    %c0_7 = arith.constant 0 : index
    %8 = vector.load %arg3[%c0_6, %c0_7] : memref<48x32xbf16, #tpu.memory_space<vmem>>, vector<48x32xbf16>
    %c0_8 = arith.constant 0 : index
    %c0_9 = arith.constant 0 : index
    %9 = vector.load %arg4[%c0_8, %c0_9] : memref<48x1xf32, #tpu.memory_space<vmem>>, vector<48x1xf32>
    %10 = arith.truncf %7 : vector<32x512xf32> to vector<32x512xbf16>
    %cst_10 = arith.constant dense<0.000000e+00> : vector<48x512xf32>
    %11 = tpu.matmul %8, %10, %cst_10 {dimension_numbers = #tpu.dot_dimension_numbers<[1], [0], [0], [1], [0, 0, 1, 1], [], []>} : vector<48x32xbf16>, vector<32x512xbf16>, vector<48x512xf32> -> vector<48x512xf32>
    %12 = vector.broadcast %9 : vector<48x1xf32> to vector<48x512xf32>
    %13 = arith.addf %11, %12 : vector<48x512xf32>
    %cst_11 = arith.constant 0.000000e+00 : f32
    %14 = vector.broadcast %cst_11 : f32 to vector<48x512xf32>
    %15 = arith.maximumf %13, %14 : vector<48x512xf32>
    %c0_12 = arith.constant 0 : index
    %c0_13 = arith.constant 0 : index
    %16 = vector.load %arg5[%c0_12, %c0_13] : memref<64x48xbf16, #tpu.memory_space<vmem>>, vector<64x48xbf16>
    %c0_14 = arith.constant 0 : index
    %c0_15 = arith.constant 0 : index
    %17 = vector.load %arg6[%c0_14, %c0_15] : memref<64x1xf32, #tpu.memory_space<vmem>>, vector<64x1xf32>
    %18 = arith.truncf %15 : vector<48x512xf32> to vector<48x512xbf16>
    %cst_16 = arith.constant dense<0.000000e+00> : vector<64x512xf32>
    %19 = tpu.matmul %16, %18, %cst_16 {dimension_numbers = #tpu.dot_dimension_numbers<[1], [0], [0], [1], [0, 0, 1, 1], [], []>} : vector<64x48xbf16>, vector<48x512xbf16>, vector<64x512xf32> -> vector<64x512xf32>
    %20 = vector.broadcast %17 : vector<64x1xf32> to vector<64x512xf32>
    %21 = arith.addf %19, %20 : vector<64x512xf32>
    %cst_17 = arith.constant 0.000000e+00 : f32
    %22 = vector.broadcast %cst_17 : f32 to vector<64x512xf32>
    %23 = arith.maximumf %21, %22 : vector<64x512xf32>
    %24 = vector.extract_strided_slice %23 {offsets = [0, 0], sizes = [64, 32], strides = [1, 1]} : vector<64x512xf32> to vector<64x32xf32>
    %25 = vector.extract_strided_slice %23 {offsets = [0, 32], sizes = [64, 32], strides = [1, 1]} : vector<64x512xf32> to vector<64x32xf32>
    %26 = arith.maximumf %24, %25 : vector<64x32xf32>
    %27 = vector.extract_strided_slice %23 {offsets = [0, 64], sizes = [64, 32], strides = [1, 1]} : vector<64x512xf32> to vector<64x32xf32>
    %28 = arith.maximumf %26, %27 : vector<64x32xf32>
    %29 = vector.extract_strided_slice %23 {offsets = [0, 96], sizes = [64, 32], strides = [1, 1]} : vector<64x512xf32> to vector<64x32xf32>
    %30 = arith.maximumf %28, %29 : vector<64x32xf32>
    %31 = vector.extract_strided_slice %23 {offsets = [0, 128], sizes = [64, 32], strides = [1, 1]} : vector<64x512xf32> to vector<64x32xf32>
    %32 = arith.maximumf %30, %31 : vector<64x32xf32>
    %33 = vector.extract_strided_slice %23 {offsets = [0, 160], sizes = [64, 32], strides = [1, 1]} : vector<64x512xf32> to vector<64x32xf32>
    %34 = arith.maximumf %32, %33 : vector<64x32xf32>
    %35 = vector.extract_strided_slice %23 {offsets = [0, 192], sizes = [64, 32], strides = [1, 1]} : vector<64x512xf32> to vector<64x32xf32>
    %36 = arith.maximumf %34, %35 : vector<64x32xf32>
    %37 = vector.extract_strided_slice %23 {offsets = [0, 224], sizes = [64, 32], strides = [1, 1]} : vector<64x512xf32> to vector<64x32xf32>
    %38 = arith.maximumf %36, %37 : vector<64x32xf32>
    %39 = vector.extract_strided_slice %23 {offsets = [0, 256], sizes = [64, 32], strides = [1, 1]} : vector<64x512xf32> to vector<64x32xf32>
    %40 = arith.maximumf %38, %39 : vector<64x32xf32>
    %41 = vector.extract_strided_slice %23 {offsets = [0, 288], sizes = [64, 32], strides = [1, 1]} : vector<64x512xf32> to vector<64x32xf32>
    %42 = arith.maximumf %40, %41 : vector<64x32xf32>
    %43 = vector.extract_strided_slice %23 {offsets = [0, 320], sizes = [64, 32], strides = [1, 1]} : vector<64x512xf32> to vector<64x32xf32>
    %44 = arith.maximumf %42, %43 : vector<64x32xf32>
    %45 = vector.extract_strided_slice %23 {offsets = [0, 352], sizes = [64, 32], strides = [1, 1]} : vector<64x512xf32> to vector<64x32xf32>
    %46 = arith.maximumf %44, %45 : vector<64x32xf32>
    %47 = vector.extract_strided_slice %23 {offsets = [0, 384], sizes = [64, 32], strides = [1, 1]} : vector<64x512xf32> to vector<64x32xf32>
    %48 = arith.maximumf %46, %47 : vector<64x32xf32>
    %49 = vector.extract_strided_slice %23 {offsets = [0, 416], sizes = [64, 32], strides = [1, 1]} : vector<64x512xf32> to vector<64x32xf32>
    %50 = arith.maximumf %48, %49 : vector<64x32xf32>
    %51 = vector.extract_strided_slice %23 {offsets = [0, 448], sizes = [64, 32], strides = [1, 1]} : vector<64x512xf32> to vector<64x32xf32>
    %52 = arith.maximumf %50, %51 : vector<64x32xf32>
    %53 = vector.extract_strided_slice %23 {offsets = [0, 480], sizes = [64, 32], strides = [1, 1]} : vector<64x512xf32> to vector<64x32xf32>
    %54 = arith.maximumf %52, %53 : vector<64x32xf32>
    %c0_18 = arith.constant 0 : index
    %c0_19 = arith.constant 0 : index
    %55 = vector.load %arg7[%c0_18, %c0_19] : memref<64x32xf32, #tpu.memory_space<vmem>>, vector<64x32xf32>
    tpu.vector_store %arg7[%c0_18, %c0_19], %54 {strides = array<i32>} : memref<64x32xf32, #tpu.memory_space<vmem>>, vector<64x32xf32>,
    return
  }
}

module attributes {stable_mosaic.version = 11 : i64} {
  func.func @_fused_mlp_kernel(%arg0: memref<112x512xbf16, #tpu.memory_space<vmem>>, %arg1: memref<32x112xbf16, #tpu.memory_space<vmem>>, %arg2: memref<32x1xf32, #tpu.memory_space<vmem>>, %arg3: memref<32x32xbf16, #tpu.memory_space<vmem>>, %arg4: memref<32x1xf32, #tpu.memory_space<vmem>>, %arg5: memref<64x32xbf16, #tpu.memory_space<vmem>>, %arg6: memref<64x1xf32, #tpu.memory_space<vmem>>, %arg7: memref<64x32xf32, #tpu.memory_space<vmem>>) attributes {dimension_semantics = [], scalar_prefetch = 0 : i64, scratch_operands = 0 : i64, tpu.core_type = #tpu.core_type<tc>} {
    %c0 = arith.constant 0 : index
    %c0_0 = arith.constant 0 : index
    %0 = vector.load %arg0[%c0, %c0_0] : memref<112x512xbf16, #tpu.memory_space<vmem>>, vector<112x512xbf16>
    %c0_1 = arith.constant 0 : index
    %c0_2 = arith.constant 0 : index
    %1 = vector.load %arg1[%c0_1, %c0_2] : memref<32x112xbf16, #tpu.memory_space<vmem>>, vector<32x112xbf16>
    %c0_3 = arith.constant 0 : index
    %c0_4 = arith.constant 0 : index
    %2 = vector.load %arg2[%c0_3, %c0_4] : memref<32x1xf32, #tpu.memory_space<vmem>>, vector<32x1xf32>
    %cst = arith.constant dense<0.000000e+00> : vector<32x512xf32>
    %3 = tpu.matmul %1, %0, %cst {dimension_numbers = #tpu.dot_dimension_numbers<[1], [0], [0], [1], [0, 0, 1, 1], [], []>} : vector<32x112xbf16>, vector<112x512xbf16>, vector<32x512xf32> -> vector<32x512xf32>
    %4 = vector.broadcast %2 : vector<32x1xf32> to vector<32x512xf32>
    %5 = arith.addf %3, %4 : vector<32x512xf32>
    %cst_5 = arith.constant 0.000000e+00 : f32
    %6 = vector.broadcast %cst_5 : f32 to vector<32x512xf32>
    %7 = arith.maximumf %5, %6 : vector<32x512xf32>
    %c0_6 = arith.constant 0 : index
    %c0_7 = arith.constant 0 : index
    %8 = vector.load %arg3[%c0_6, %c0_7] : memref<32x32xbf16, #tpu.memory_space<vmem>>, vector<32x32xbf16>
    %c0_8 = arith.constant 0 : index
    %c0_9 = arith.constant 0 : index
    %9 = vector.load %arg4[%c0_8, %c0_9] : memref<32x1xf32, #tpu.memory_space<vmem>>, vector<32x1xf32>
    %10 = arith.truncf %7 : vector<32x512xf32> to vector<32x512xbf16>
    %cst_10 = arith.constant dense<0.000000e+00> : vector<32x512xf32>
    %11 = tpu.matmul %8, %10, %cst_10 {dimension_numbers = #tpu.dot_dimension_numbers<[1], [0], [0], [1], [0, 0, 1, 1], [], []>} : vector<32x32xbf16>, vector<32x512xbf16>, vector<32x512xf32> -> vector<32x512xf32>
    %12 = vector.broadcast %9 : vector<32x1xf32> to vector<32x512xf32>
    %13 = arith.addf %11, %12 : vector<32x512xf32>
    %cst_11 = arith.constant 0.000000e+00 : f32
    %14 = vector.broadcast %cst_11 : f32 to vector<32x512xf32>
    %15 = arith.maximumf %13, %14 : vector<32x512xf32>
    %c0_12 = arith.constant 0 : index
    %c0_13 = arith.constant 0 : index
    %16 = vector.load %arg5[%c0_12, %c0_13] : memref<64x32xbf16, #tpu.memory_space<vmem>>, vector<64x32xbf16>
    %c0_14 = arith.constant 0 : index
    %c0_15 = arith.constant 0 : index
    %17 = vector.load %arg6[%c0_14, %c0_15] : memref<64x1xf32, #tpu.memory_space<vmem>>, vector<64x1xf32>
    %18 = arith.truncf %15 : vector<32x512xf32> to vector<32x512xbf16>
    %cst_16 = arith.constant dense<0.000000e+00> : vector<64x512xf32>
    %19 = tpu.matmul %16, %18, %cst_16 {dimension_numbers = #tpu.dot_dimension_numbers<[1], [0], [0], [1], [0, 0, 1, 1], [], []>} : vector<64x32xbf16>, vector<32x512xbf16>, vector<64x512xf32> -> vector<64x512xf32>
    %20 = vector.broadcast %17 : vector<64x1xf32> to vector<64x512xf32>
    %21 = arith.addf %19, %20 : vector<64x512xf32>
    %cst_17 = arith.constant 0.000000e+00 : f32
    %22 = vector.broadcast %cst_17 : f32 to vector<64x512xf32>
    %23 = arith.maximumf %21, %22 : vector<64x512xf32>
    %24 = vector.extract_strided_slice %23 {offsets = [0, 0], sizes = [64, 32], strides = [1, 1]} : vector<64x512xf32> to vector<64x32xf32>
    %25 = vector.extract_strided_slice %23 {offsets = [0, 32], sizes = [64, 32], strides = [1, 1]} : vector<64x512xf32> to vector<64x32xf32>
    %26 = arith.maximumf %24, %25 : vector<64x32xf32>
    %27 = vector.extract_strided_slice %23 {offsets = [0, 64], sizes = [64, 32], strides = [1, 1]} : vector<64x512xf32> to vector<64x32xf32>
    %28 = arith.maximumf %26, %27 : vector<64x32xf32>
    %29 = vector.extract_strided_slice %23 {offsets = [0, 96], sizes = [64, 32], strides = [1, 1]} : vector<64x512xf32> to vector<64x32xf32>
    %30 = arith.maximumf %28, %29 : vector<64x32xf32>
    %31 = vector.extract_strided_slice %23 {offsets = [0, 128], sizes = [64, 32], strides = [1, 1]} : vector<64x512xf32> to vector<64x32xf32>
    %32 = arith.maximumf %30, %31 : vector<64x32xf32>
    %33 = vector.extract_strided_slice %23 {offsets = [0, 160], sizes = [64, 32], strides = [1, 1]} : vector<64x512xf32> to vector<64x32xf32>
    %34 = arith.maximumf %32, %33 : vector<64x32xf32>
    %35 = vector.extract_strided_slice %23 {offsets = [0, 192], sizes = [64, 32], strides = [1, 1]} : vector<64x512xf32> to vector<64x32xf32>
    %36 = arith.maximumf %34, %35 : vector<64x32xf32>
    %37 = vector.extract_strided_slice %23 {offsets = [0, 224], sizes = [64, 32], strides = [1, 1]} : vector<64x512xf32> to vector<64x32xf32>
    %38 = arith.maximumf %36, %37 : vector<64x32xf32>
    %39 = vector.extract_strided_slice %23 {offsets = [0, 256], sizes = [64, 32], strides = [1, 1]} : vector<64x512xf32> to vector<64x32xf32>
    %40 = arith.maximumf %38, %39 : vector<64x32xf32>
    %41 = vector.extract_strided_slice %23 {offsets = [0, 288], sizes = [64, 32], strides = [1, 1]} : vector<64x512xf32> to vector<64x32xf32>
    %42 = arith.maximumf %40, %41 : vector<64x32xf32>
    %43 = vector.extract_strided_slice %23 {offsets = [0, 320], sizes = [64, 32], strides = [1, 1]} : vector<64x512xf32> to vector<64x32xf32>
    %44 = arith.maximumf %42, %43 : vector<64x32xf32>
    %45 = vector.extract_strided_slice %23 {offsets = [0, 352], sizes = [64, 32], strides = [1, 1]} : vector<64x512xf32> to vector<64x32xf32>
    %46 = arith.maximumf %44, %45 : vector<64x32xf32>
    %47 = vector.extract_strided_slice %23 {offsets = [0, 384], sizes = [64, 32], strides = [1, 1]} : vector<64x512xf32> to vector<64x32xf32>
    %48 = arith.maximumf %46, %47 : vector<64x32xf32>
    %49 = vector.extract_strided_slice %23 {offsets = [0, 416], sizes = [64, 32], strides = [1, 1]} : vector<64x512xf32> to vector<64x32xf32>
    %50 = arith.maximumf %48, %49 : vector<64x32xf32>
    %51 = vector.extract_strided_slice %23 {offsets = [0, 448], sizes = [64, 32], strides = [1, 1]} : vector<64x512xf32> to vector<64x32xf32>
    %52 = arith.maximumf %50, %51 : vector<64x32xf32>
    %53 = vector.extract_strided_slice %23 {offsets = [0, 480], sizes = [64, 32], strides = [1, 1]} : vector<64x512xf32> to vector<64x32xf32>
    %54 = arith.maximumf %52, %53 : vector<64x32xf32>
    %c0_18 = arith.constant 0 : index
    %c0_19 = arith.constant 0 : index
    %55 = vector.load %arg7[%c0_18, %c0_19] : memref<64x32xf32, #tpu.memory_space<vmem>>, vector<64x32xf32>
    tpu.vector_store %arg7[%c0_18, %c0_19], %54 {strides = array<i32>} : memref<64x32xf32, #tpu.memory_space<vmem>>, vector<64x32xf32>,
    return
  }
}

module attributes {stable_mosaic.version = 11 : i64} {
  func.func @_fused_mlp_kernel(%arg0: memref<144x32xbf16, #tpu.memory_space<vmem>>, %arg1: memref<64x144xbf16, #tpu.memory_space<vmem>>, %arg2: memref<64x1xf32, #tpu.memory_space<vmem>>, %arg3: memref<64x64xbf16, #tpu.memory_space<vmem>>, %arg4: memref<64x1xf32, #tpu.memory_space<vmem>>, %arg5: memref<128x64xbf16, #tpu.memory_space<vmem>>, %arg6: memref<128x1xf32, #tpu.memory_space<vmem>>, %arg7: memref<128x2xf32, #tpu.memory_space<vmem>>) attributes {dimension_semantics = [], scalar_prefetch = 0 : i64, scratch_operands = 0 : i64, tpu.core_type = #tpu.core_type<tc>} {
    %c0 = arith.constant 0 : index
    %c0_0 = arith.constant 0 : index
    %0 = vector.load %arg0[%c0, %c0_0] : memref<144x32xbf16, #tpu.memory_space<vmem>>, vector<144x32xbf16>
    %c0_1 = arith.constant 0 : index
    %c0_2 = arith.constant 0 : index
    %1 = vector.load %arg1[%c0_1, %c0_2] : memref<64x144xbf16, #tpu.memory_space<vmem>>, vector<64x144xbf16>
    %c0_3 = arith.constant 0 : index
    %c0_4 = arith.constant 0 : index
    %2 = vector.load %arg2[%c0_3, %c0_4] : memref<64x1xf32, #tpu.memory_space<vmem>>, vector<64x1xf32>
    %cst = arith.constant dense<0.000000e+00> : vector<64x32xf32>
    %3 = tpu.matmul %1, %0, %cst {dimension_numbers = #tpu.dot_dimension_numbers<[1], [0], [0], [1], [0, 0, 1, 1], [], []>} : vector<64x144xbf16>, vector<144x32xbf16>, vector<64x32xf32> -> vector<64x32xf32>
    %4 = vector.broadcast %2 : vector<64x1xf32> to vector<64x32xf32>
    %5 = arith.addf %3, %4 : vector<64x32xf32>
    %cst_5 = arith.constant 0.000000e+00 : f32
    %6 = vector.broadcast %cst_5 : f32 to vector<64x32xf32>
    %7 = arith.maximumf %5, %6 : vector<64x32xf32>
    %c0_6 = arith.constant 0 : index
    %c0_7 = arith.constant 0 : index
    %8 = vector.load %arg3[%c0_6, %c0_7] : memref<64x64xbf16, #tpu.memory_space<vmem>>, vector<64x64xbf16>
    %c0_8 = arith.constant 0 : index
    %c0_9 = arith.constant 0 : index
    %9 = vector.load %arg4[%c0_8, %c0_9] : memref<64x1xf32, #tpu.memory_space<vmem>>, vector<64x1xf32>
    %10 = arith.truncf %7 : vector<64x32xf32> to vector<64x32xbf16>
    %cst_10 = arith.constant dense<0.000000e+00> : vector<64x32xf32>
    %11 = tpu.matmul %8, %10, %cst_10 {dimension_numbers = #tpu.dot_dimension_numbers<[1], [0], [0], [1], [0, 0, 1, 1], [], []>} : vector<64x64xbf16>, vector<64x32xbf16>, vector<64x32xf32> -> vector<64x32xf32>
    %12 = vector.broadcast %9 : vector<64x1xf32> to vector<64x32xf32>
    %13 = arith.addf %11, %12 : vector<64x32xf32>
    %cst_11 = arith.constant 0.000000e+00 : f32
    %14 = vector.broadcast %cst_11 : f32 to vector<64x32xf32>
    %15 = arith.maximumf %13, %14 : vector<64x32xf32>
    %c0_12 = arith.constant 0 : index
    %c0_13 = arith.constant 0 : index
    %16 = vector.load %arg5[%c0_12, %c0_13] : memref<128x64xbf16, #tpu.memory_space<vmem>>, vector<128x64xbf16>
    %c0_14 = arith.constant 0 : index
    %c0_15 = arith.constant 0 : index
    %17 = vector.load %arg6[%c0_14, %c0_15] : memref<128x1xf32, #tpu.memory_space<vmem>>, vector<128x1xf32>
    %18 = arith.truncf %15 : vector<64x32xf32> to vector<64x32xbf16>
    %cst_16 = arith.constant dense<0.000000e+00> : vector<128x32xf32>
    %19 = tpu.matmul %16, %18, %cst_16 {dimension_numbers = #tpu.dot_dimension_numbers<[1], [0], [0], [1], [0, 0, 1, 1], [], []>} : vector<128x64xbf16>, vector<64x32xbf16>, vector<128x32xf32> -> vector<128x32xf32>
    %20 = vector.broadcast %17 : vector<128x1xf32> to vector<128x32xf32>
    %21 = arith.addf %19, %20 : vector<128x32xf32>
    %cst_17 = arith.constant 0.000000e+00 : f32
    %22 = vector.broadcast %cst_17 : f32 to vector<128x32xf32>
    %23 = arith.maximumf %21, %22 : vector<128x32xf32>
    %24 = vector.extract_strided_slice %23 {offsets = [0, 0], sizes = [128, 16], strides = [1, 1]} : vector<128x32xf32> to vector<128x16xf32>
    %cst_18 = arith.constant dense<0xFF800000> : vector<128xf32>
    %25 = vector.multi_reduction <maximumf>, %24, %cst_18 [1] : vector<128x16xf32> to vector<128xf32>
    %26 = vector.shape_cast %25 : vector<128xf32> to vector<128x1xf32>
    %c0_19 = arith.constant 0 : index
    %c0_20 = arith.constant 0 : index
    %27 = vector.load %arg7[%c0_19, %c0_20] : memref<128x2xf32, #tpu.memory_space<vmem>>, vector<128x1xf32>
    tpu.vector_store %arg7[%c0_19, %c0_20], %26 {strides = array<i32>} : memref<128x2xf32, #tpu.memory_space<vmem>>, vector<128x1xf32>,
    %28 = vector.extract_strided_slice %23 {offsets = [0, 16], sizes = [128, 16], strides = [1, 1]} : vector<128x32xf32> to vector<128x16xf32>
    %cst_21 = arith.constant dense<0xFF800000> : vector<128xf32>
    %29 = vector.multi_reduction <maximumf>, %28, %cst_21 [1] : vector<128x16xf32> to vector<128xf32>
    %30 = vector.shape_cast %29 : vector<128xf32> to vector<128x1xf32>
    %c0_22 = arith.constant 0 : index
    %c1 = arith.constant 1 : index
    %31 = vector.load %arg7[%c0_22, %c1] : memref<128x2xf32, #tpu.memory_space<vmem>>, vector<128x1xf32>
    tpu.vector_store %arg7[%c0_22, %c1], %30 {strides = array<i32>} : memref<128x2xf32, #tpu.memory_space<vmem>>, vector<128x1xf32>,
    return
  }
}

module attributes {stable_mosaic.version = 11 : i64} {
  func.func @_fused_mlp_kernel(%arg0: memref<256x32xbf16, #tpu.memory_space<vmem>>, %arg1: memref<64x256xbf16, #tpu.memory_space<vmem>>, %arg2: memref<64x1xf32, #tpu.memory_space<vmem>>, %arg3: memref<64x64xbf16, #tpu.memory_space<vmem>>, %arg4: memref<64x1xf32, #tpu.memory_space<vmem>>, %arg5: memref<64x32xf32, #tpu.memory_space<vmem>>) attributes {dimension_semantics = [], scalar_prefetch = 0 : i64, scratch_operands = 0 : i64, tpu.core_type = #tpu.core_type<tc>} {
    %c0 = arith.constant 0 : index
    %c0_0 = arith.constant 0 : index
    %0 = vector.load %arg0[%c0, %c0_0] : memref<256x32xbf16, #tpu.memory_space<vmem>>, vector<256x32xbf16>
    %c0_1 = arith.constant 0 : index
    %c0_2 = arith.constant 0 : index
    %1 = vector.load %arg1[%c0_1, %c0_2] : memref<64x256xbf16, #tpu.memory_space<vmem>>, vector<64x256xbf16>
    %c0_3 = arith.constant 0 : index
    %c0_4 = arith.constant 0 : index
    %2 = vector.load %arg2[%c0_3, %c0_4] : memref<64x1xf32, #tpu.memory_space<vmem>>, vector<64x1xf32>
    %cst = arith.constant dense<0.000000e+00> : vector<64x32xf32>
    %3 = tpu.matmul %1, %0, %cst {dimension_numbers = #tpu.dot_dimension_numbers<[1], [0], [0], [1], [0, 0, 1, 1], [], []>} : vector<64x256xbf16>, vector<256x32xbf16>, vector<64x32xf32> -> vector<64x32xf32>
    %4 = vector.broadcast %2 : vector<64x1xf32> to vector<64x32xf32>
    %5 = arith.addf %3, %4 : vector<64x32xf32>
    %cst_5 = arith.constant 0.000000e+00 : f32
    %6 = vector.broadcast %cst_5 : f32 to vector<64x32xf32>
    %7 = arith.maximumf %5, %6 : vector<64x32xf32>
    %c0_6 = arith.constant 0 : index
    %c0_7 = arith.constant 0 : index
    %8 = vector.load %arg3[%c0_6, %c0_7] : memref<64x64xbf16, #tpu.memory_space<vmem>>, vector<64x64xbf16>
    %c0_8 = arith.constant 0 : index
    %c0_9 = arith.constant 0 : index
    %9 = vector.load %arg4[%c0_8, %c0_9] : memref<64x1xf32, #tpu.memory_space<vmem>>, vector<64x1xf32>
    %10 = arith.truncf %7 : vector<64x32xf32> to vector<64x32xbf16>
    %cst_10 = arith.constant dense<0.000000e+00> : vector<64x32xf32>
    %11 = tpu.matmul %8, %10, %cst_10 {dimension_numbers = #tpu.dot_dimension_numbers<[1], [0], [0], [1], [0, 0, 1, 1], [], []>} : vector<64x64xbf16>, vector<64x32xbf16>, vector<64x32xf32> -> vector<64x32xf32>
    %12 = vector.broadcast %9 : vector<64x1xf32> to vector<64x32xf32>
    %13 = arith.addf %11, %12 : vector<64x32xf32>
    %cst_11 = arith.constant 0.000000e+00 : f32
    %14 = vector.broadcast %cst_11 : f32 to vector<64x32xf32>
    %15 = arith.maximumf %13, %14 : vector<64x32xf32>
    %c0_12 = arith.constant 0 : index
    %c0_13 = arith.constant 0 : index
    %16 = vector.load %arg5[%c0_12, %c0_13] : memref<64x32xf32, #tpu.memory_space<vmem>>, vector<64x32xf32>
    tpu.vector_store %arg5[%c0_12, %c0_13], %15 {strides = array<i32>} : memref<64x32xf32, #tpu.memory_space<vmem>>, vector<64x32xf32>,
    return
  }
}

module attributes {stable_mosaic.version = 11 : i64} {
  func.func @_fused_mlp_kernel(%arg0: memref<160x64xbf16, #tpu.memory_space<vmem>>, %arg1: memref<64x160xbf16, #tpu.memory_space<vmem>>, %arg2: memref<64x1xf32, #tpu.memory_space<vmem>>, %arg3: memref<32x64xbf16, #tpu.memory_space<vmem>>, %arg4: memref<32x1xf32, #tpu.memory_space<vmem>>, %arg5: memref<32x64xf32, #tpu.memory_space<vmem>>) attributes {dimension_semantics = [], scalar_prefetch = 0 : i64, scratch_operands = 0 : i64, tpu.core_type = #tpu.core_type<tc>} {
    %c0 = arith.constant 0 : index
    %c0_0 = arith.constant 0 : index
    %0 = vector.load %arg0[%c0, %c0_0] : memref<160x64xbf16, #tpu.memory_space<vmem>>, vector<160x64xbf16>
    %c0_1 = arith.constant 0 : index
    %c0_2 = arith.constant 0 : index
    %1 = vector.load %arg1[%c0_1, %c0_2] : memref<64x160xbf16, #tpu.memory_space<vmem>>, vector<64x160xbf16>
    %c0_3 = arith.constant 0 : index
    %c0_4 = arith.constant 0 : index
    %2 = vector.load %arg2[%c0_3, %c0_4] : memref<64x1xf32, #tpu.memory_space<vmem>>, vector<64x1xf32>
    %cst = arith.constant dense<0.000000e+00> : vector<64x64xf32>
    %3 = tpu.matmul %1, %0, %cst {dimension_numbers = #tpu.dot_dimension_numbers<[1], [0], [0], [1], [0, 0, 1, 1], [], []>} : vector<64x160xbf16>, vector<160x64xbf16>, vector<64x64xf32> -> vector<64x64xf32>
    %4 = vector.broadcast %2 : vector<64x1xf32> to vector<64x64xf32>
    %5 = arith.addf %3, %4 : vector<64x64xf32>
    %cst_5 = arith.constant 0.000000e+00 : f32
    %6 = vector.broadcast %cst_5 : f32 to vector<64x64xf32>
    %7 = arith.maximumf %5, %6 : vector<64x64xf32>
    %c0_6 = arith.constant 0 : index
    %c0_7 = arith.constant 0 : index
    %8 = vector.load %arg3[%c0_6, %c0_7] : memref<32x64xbf16, #tpu.memory_space<vmem>>, vector<32x64xbf16>
    %c0_8 = arith.constant 0 : index
    %c0_9 = arith.constant 0 : index
    %9 = vector.load %arg4[%c0_8, %c0_9] : memref<32x1xf32, #tpu.memory_space<vmem>>, vector<32x1xf32>
    %10 = arith.truncf %7 : vector<64x64xf32> to vector<64x64xbf16>
    %cst_10 = arith.constant dense<0.000000e+00> : vector<32x64xf32>
    %11 = tpu.matmul %8, %10, %cst_10 {dimension_numbers = #tpu.dot_dimension_numbers<[1], [0], [0], [1], [0, 0, 1, 1], [], []>} : vector<32x64xbf16>, vector<64x64xbf16>, vector<32x64xf32> -> vector<32x64xf32>
    %12 = vector.broadcast %9 : vector<32x1xf32> to vector<32x64xf32>
    %13 = arith.addf %11, %12 : vector<32x64xf32>
    %cst_11 = arith.constant 0.000000e+00 : f32
    %14 = vector.broadcast %cst_11 : f32 to vector<32x64xf32>
    %15 = arith.maximumf %13, %14 : vector<32x64xf32>
    %c0_12 = arith.constant 0 : index
    %c0_13 = arith.constant 0 : index
    %16 = vector.load %arg5[%c0_12, %c0_13] : memref<32x64xf32, #tpu.memory_space<vmem>>, vector<32x64xf32>
    tpu.vector_store %arg5[%c0_12, %c0_13], %15 {strides = array<i32>} : memref<32x64xf32, #tpu.memory_space<vmem>>, vector<32x64xf32>,
    return
  }
}

module attributes {stable_mosaic.version = 11 : i64} {
  func.func @_fused_mlp_kernel(%arg0: memref<48x256xbf16, #tpu.memory_space<vmem>>, %arg1: memref<32x48xbf16, #tpu.memory_space<vmem>>, %arg2: memref<32x1xf32, #tpu.memory_space<vmem>>, %arg3: memref<32x32xbf16, #tpu.memory_space<vmem>>, %arg4: memref<32x1xf32, #tpu.memory_space<vmem>>, %arg5: memref<32x256xf32, #tpu.memory_space<vmem>>) attributes {dimension_semantics = [], scalar_prefetch = 0 : i64, scratch_operands = 0 : i64, tpu.core_type = #tpu.core_type<tc>} {
    %c0 = arith.constant 0 : index
    %c0_0 = arith.constant 0 : index
    %0 = vector.load %arg0[%c0, %c0_0] : memref<48x256xbf16, #tpu.memory_space<vmem>>, vector<48x256xbf16>
    %c0_1 = arith.constant 0 : index
    %c0_2 = arith.constant 0 : index
    %1 = vector.load %arg1[%c0_1, %c0_2] : memref<32x48xbf16, #tpu.memory_space<vmem>>, vector<32x48xbf16>
    %c0_3 = arith.constant 0 : index
    %c0_4 = arith.constant 0 : index
    %2 = vector.load %arg2[%c0_3, %c0_4] : memref<32x1xf32, #tpu.memory_space<vmem>>, vector<32x1xf32>
    %cst = arith.constant dense<0.000000e+00> : vector<32x256xf32>
    %3 = tpu.matmul %1, %0, %cst {dimension_numbers = #tpu.dot_dimension_numbers<[1], [0], [0], [1], [0, 0, 1, 1], [], []>} : vector<32x48xbf16>, vector<48x256xbf16>, vector<32x256xf32> -> vector<32x256xf32>
    %4 = vector.broadcast %2 : vector<32x1xf32> to vector<32x256xf32>
    %5 = arith.addf %3, %4 : vector<32x256xf32>
    %cst_5 = arith.constant 0.000000e+00 : f32
    %6 = vector.broadcast %cst_5 : f32 to vector<32x256xf32>
    %7 = arith.maximumf %5, %6 : vector<32x256xf32>
    %c0_6 = arith.constant 0 : index
    %c0_7 = arith.constant 0 : index
    %8 = vector.load %arg3[%c0_6, %c0_7] : memref<32x32xbf16, #tpu.memory_space<vmem>>, vector<32x32xbf16>
    %c0_8 = arith.constant 0 : index
    %c0_9 = arith.constant 0 : index
    %9 = vector.load %arg4[%c0_8, %c0_9] : memref<32x1xf32, #tpu.memory_space<vmem>>, vector<32x1xf32>
    %10 = arith.truncf %7 : vector<32x256xf32> to vector<32x256xbf16>
    %cst_10 = arith.constant dense<0.000000e+00> : vector<32x256xf32>
    %11 = tpu.matmul %8, %10, %cst_10 {dimension_numbers = #tpu.dot_dimension_numbers<[1], [0], [0], [1], [0, 0, 1, 1], [], []>} : vector<32x32xbf16>, vector<32x256xbf16>, vector<32x256xf32> -> vector<32x256xf32>
    %12 = vector.broadcast %9 : vector<32x1xf32> to vector<32x256xf32>
    %13 = arith.addf %11, %12 : vector<32x256xf32>
    %cst_11 = arith.constant 0.000000e+00 : f32
    %14 = vector.broadcast %cst_11 : f32 to vector<32x256xf32>
    %15 = arith.maximumf %13, %14 : vector<32x256xf32>
    %c0_12 = arith.constant 0 : index
    %c0_13 = arith.constant 0 : index
    %16 = vector.load %arg5[%c0_12, %c0_13] : memref<32x256xf32, #tpu.memory_space<vmem>>, vector<32x256xf32>
    tpu.vector_store %arg5[%c0_12, %c0_13], %15 {strides = array<i32>} : memref<32x256xf32, #tpu.memory_space<vmem>>, vector<32x256xf32>,
    return
  }
}

module attributes {stable_mosaic.version = 11 : i64} {
  func.func @_fused_mlp_kernel(%arg0: memref<32x256xbf16, #tpu.memory_space<vmem>>, %arg1: memref<32x32xbf16, #tpu.memory_space<vmem>>, %arg2: memref<32x1xf32, #tpu.memory_space<vmem>>, %arg3: memref<6x32xbf16, #tpu.memory_space<vmem>>, %arg4: memref<6x1xf32, #tpu.memory_space<vmem>>, %arg5: memref<6x256xf32, #tpu.memory_space<vmem>>) attributes {dimension_semantics = [], scalar_prefetch = 0 : i64, scratch_operands = 0 : i64, tpu.core_type = #tpu.core_type<tc>} {
    %c0 = arith.constant 0 : index
    %c0_0 = arith.constant 0 : index
    %0 = vector.load %arg0[%c0, %c0_0] : memref<32x256xbf16, #tpu.memory_space<vmem>>, vector<32x256xbf16>
    %c0_1 = arith.constant 0 : index
    %c0_2 = arith.constant 0 : index
    %1 = vector.load %arg1[%c0_1, %c0_2] : memref<32x32xbf16, #tpu.memory_space<vmem>>, vector<32x32xbf16>
    %c0_3 = arith.constant 0 : index
    %c0_4 = arith.constant 0 : index
    %2 = vector.load %arg2[%c0_3, %c0_4] : memref<32x1xf32, #tpu.memory_space<vmem>>, vector<32x1xf32>
    %cst = arith.constant dense<0.000000e+00> : vector<32x256xf32>
    %3 = tpu.matmul %1, %0, %cst {dimension_numbers = #tpu.dot_dimension_numbers<[1], [0], [0], [1], [0, 0, 1, 1], [], []>} : vector<32x32xbf16>, vector<32x256xbf16>, vector<32x256xf32> -> vector<32x256xf32>
    %4 = vector.broadcast %2 : vector<32x1xf32> to vector<32x256xf32>
    %5 = arith.addf %3, %4 : vector<32x256xf32>
    %cst_5 = arith.constant 0.000000e+00 : f32
    %6 = vector.broadcast %cst_5 : f32 to vector<32x256xf32>
    %7 = arith.maximumf %5, %6 : vector<32x256xf32>
    %c0_6 = arith.constant 0 : index
    %c0_7 = arith.constant 0 : index
    %8 = vector.load %arg3[%c0_6, %c0_7] : memref<6x32xbf16, #tpu.memory_space<vmem>>, vector<6x32xbf16>
    %c0_8 = arith.constant 0 : index
    %c0_9 = arith.constant 0 : index
    %9 = vector.load %arg4[%c0_8, %c0_9] : memref<6x1xf32, #tpu.memory_space<vmem>>, vector<6x1xf32>
    %10 = arith.truncf %7 : vector<32x256xf32> to vector<32x256xbf16>
    %cst_10 = arith.constant dense<0.000000e+00> : vector<6x256xf32>
    %11 = tpu.matmul %8, %10, %cst_10 {dimension_numbers = #tpu.dot_dimension_numbers<[1], [0], [0], [1], [0, 0, 1, 1], [], []>} : vector<6x32xbf16>, vector<32x256xbf16>, vector<6x256xf32> -> vector<6x256xf32>
    %12 = vector.broadcast %9 : vector<6x1xf32> to vector<6x256xf32>
    %13 = arith.addf %11, %12 : vector<6x256xf32>
    %c0_11 = arith.constant 0 : index
    %c0_12 = arith.constant 0 : index
    %14 = vector.load %arg5[%c0_11, %c0_12] : memref<6x256xf32, #tpu.memory_space<vmem>>, vector<6x256xf32>
    tpu.vector_store %arg5[%c0_11, %c0_12], %13 {strides = array<i32>} : memref<6x256xf32, #tpu.memory_space<vmem>>, vector<6x256xf32>,
    return
  }
}

</mosaic_0001>

<bundles_post_ra>
// kernel: custom-call.26
= control target key start
LH: loop header
LB: loop body
LE: loop exit
PB: predicated region body
PF: predicated region fallthrough
CT: control target
= control target key end

     0   :  { %s6_s0 = inlined_call_operand.vmem [shape: f32[2,128], index: 0, kind: output, shape index: {}]  }

// kernel: forward.12
= control target key start
LH: loop header
LB: loop body
LE: loop exit
PB: predicated region body
PF: predicated region fallthrough
CT: control target
= control target key end

     0   :  { %v1126_v3 = vmov 0   ;;  %vm94_vm0 = vcmask 130048   ;;  %vm636_vm1 = vcmask 261120   ;;  %vm1075_vm2 = vcmask 523264   ;;  %s1475_s0 = inlined_call_operand.vmem [shape: bf16[16,1024], index: 0, kind: input, shape index: {}]   ;;  %s1476_s1 = inlined_call_operand.vmem [shape: bf16[16,16], index: 1, kind: input, shape index: {}]   ;;  %s1477_s2 = inlined_call_operand.vmem [shape: f32[16,1], index: 2, kind: input, shape index: {}]   ;;  %s1478_s4 = inlined_call_operand.vmem [shape: f32[32,1], index: 4, kind: input, shape index: {}, may-alias: {4,6}]   ;;  %s1479_s6 = inlined_call_operand.vmem [shape: f32[32,1], index: 6, kind: input, shape index: {}, may-alias: {4,6}]   ;;  %s1480_s3 = inlined_call_operand.vmem [shape: bf16[32,16], index: 3, kind: input, shape index: {}]   ;;  %s1481_s5 = inlined_call_operand.vmem [shape: bf16[32,32], index: 5, kind: input, shape index: {}]   ;;  %s1482_s7 = inlined_call_operand.vmem [shape: f32[32,64], index: 7, kind: output, shape index: {}]  }
   0x1   :  { %v27_v0 = vld [vmem:[%s1475_s0] sm:$0xff]  ;;  %v28_v2 = vld [vmem:[%s1475_s0 + $0x8] sm:$0xff]  ;;  %130 = vmatprep.mubr.bf16.mxu0 %v1126_v3  ;;  %173 = vmatprep.mubr.bf16.mxu1 %v1126_v3  ;;  %v29_v10 = vld [vmem:[%s1475_s0 + $0x10] sm:$0xff] }
   0x2   :  { %v31_v1 = vld [vmem:[%s1475_s0 + $0x20] sm:$0xff]  ;;  %v32_v5 = vld [vmem:[%s1475_s0 + $0x28] sm:$0xff]  ;;  %1119 = vset.pattern.permute.xlu0 %v1126_v3  ;;  %1120 = vset.pattern.permute.xlu1 %v1126_v3  ;;  %v33_v11 = vld [vmem:[%s1475_s0 + $0x30] sm:$0xff] }
   0x3   :  { %v1086_v4 = vcombine.high %v27_v0, %v31_v1  ;;  %v1085_v6 = vcombine.low %v27_v0, %v31_v1  ;;  %v1088_v7 = vcombine.high %v28_v2, %v32_v5  ;;  %v1087_v8 = vcombine.low %v28_v2, %v32_v5  ;;  %v1121_v9 = vld [vmem:[%s1476_s1] sm:$0xff]   ;;  %v30_v13 = vld [vmem:[%s1475_s0 + $0x18] sm:$0xff]  ;;  %v38_v19 = vld [vmem:[%s1477_s2 + $0x8] sm:$0xff] }
   0x4   :  { %v1090_v12 = vcombine.high %v29_v10, %v33_v11  ;;  %v34_v14 = vld [vmem:[%s1475_s0 + $0x38] sm:$0xff]  ;;  %v37_v15 = vld [vmem:[%s1477_s2] sm:$0xff]  ;;  %v1089_v16 = vcombine.low %v29_v10, %v33_v11  ;;  %v292_v20 = vld [vmem:[%s1478_s4 + $0x10] sm:$0xff] }
   0x5   :  { %98 = vmatprep.subr.bf16.mxu0 %v1086_v4  ;;  %141 = vmatprep.subr.bf16.mxu1 %v1088_v7  ;;  %v1092_v17 = vcombine.high %v30_v13, %v34_v14  ;;  %v1091_v18 = vcombine.low %v30_v13, %v34_v14  ;;  %v586_v21 = vld [vmem:[%s1479_s6] sm:$0xff]  ;;  %v588_v22 = vld [vmem:[%s1479_s6 + $0x10] sm:$0xff]  ;;  %v291_v24 = vld [vmem:[%s1478_s4 + $0x8] sm:$0xff] }
   0x6   :  { %99 = vmatpush1.bf16.msra.mxu0 %v1085_v6  ;;  %142 = vmatpush1.bf16.msra.mxu1 %v1087_v8  ;;  %v290_v23 = vld [vmem:[%s1478_s4] sm:$0xff]  ;;  %v293_v25 = vld [vmem:[%s1478_s4 + $0x18] sm:$0xff]  ;;  %v587_v26 = vld [vmem:[%s1479_s6 + $0x8] sm:$0xff] }
   0x7   :  { %184 = vmatprep.subr.bf16.mxu0 %v1090_v12  ;;  %227 = vmatprep.subr.bf16.mxu1 %v1092_v17  ;;  %v589_v27 = vld [vmem:[%s1479_s6 + $0x18] sm:$0xff]  ;;  %v1122_v2 = vld [vmem:[%s1480_s3] sm:$0xff]  }
   0x8   :  { %41 = vperm.xlu0 %1119, %v37_v15   ;;  %304 = vperm.xlu1 %1120, %v290_v23  }
   0x9   :  { %1093 = vmatmul.mubr.msk.bf16.vlgmr.msra.gmra.mrb[0].mxu0 %vm94_vm0, %v1121_v9  ;;  %1094 = vmatmul.mubr.msk.bf16.vlgmr.msra.gmra.mrb[0].mxu1 %vm94_vm0, %v1121_v9 }
   0xa   :  { %185 = vmatpush1.bf16.msra.mxu0 %v1089_v16  ;;  %228 = vmatpush1.bf16.msra.mxu1 %v1091_v18 }
   0xb   :  { %216 = vmatprep.mubr.bf16.mxu0 %v1126_v3  ;;  %259 = vmatprep.mubr.bf16.mxu1 %v1126_v3 }
   0xc   :  { %46 = vperm.xlu0 %1119, %v38_v19   ;;  %309 = vperm.xlu1 %1120, %v291_v24   ;;  %v1123_v24 = vld [vmem:[%s1480_s3 + $0x8] sm:$0xff]  }
  0x10   :  { %314 = vperm.xlu0 %1119, %v292_v20   ;;  %319 = vperm.xlu1 %1120, %v293_v25  }
  0x11   :  { %1095 = vmatmul.mubr.msk.bf16.vlgmr.msra.gmra.mrb[4].mxu0 %vm94_vm0, %v1121_v9  ;;  %1096 = vmatmul.mubr.msk.bf16.vlgmr.msra.gmra.mrb[4].mxu1 %vm94_vm0, %v1121_v9 }
  0x12   :  { %370 = vmatprep.mubr.bf16.mxu0 %v1126_v3  ;;  %423 = vmatprep.mubr.bf16.mxu1 %v1126_v3 }
  0x14   :  { %608 = vperm.xlu0 %1119, %v586_v21   ;;  %613 = vperm.xlu1 %1120, %v587_v26  }
  0x18   :  { %618 = vperm.xlu0 %1119, %v588_v22   ;;  %623 = vperm.xlu1 %1120, %v589_v27  }
  0x87   :  { %v42_v28 = vpop.permute.xlu0 %41  ;;  %v1259_v25 = vpop.permute.xlu1 %304 }
  0x8b   :  { %v47_v29 = vpop.permute.xlu0 %46  ;;  %v1261_v26 = vpop.permute.xlu1 %309 }
  0xdc   :  { %v132_v30 = vpop.f32.mrb[0].mxu0  ;;  %v175_v32 = vpop.f32.mrb[0].mxu1 }
  0xdd   :  { %v133_v31 = vadd.f32 %v132_v30, %v42_v28  ;;  %v134_v33 = vpop.f32.mrb[1].mxu0  ;;  %v176_v34 = vadd.f32 %v175_v32, %v42_v28  ;;  %v177_v36 = vpop.f32.mrb[1].mxu1 }
  0xde   :  { %v135_v35 = vadd.f32 %v134_v33, %v42_v28  ;;  %v136_v37 = vpop.f32.mrb[2].mxu0  ;;  %v178_v38 = vadd.f32 %v177_v36, %v42_v28  ;;  %v179_v40 = vpop.f32.mrb[2].mxu1 }
  0xdf   :  { %v137_v39 = vadd.f32 %v136_v37, %v47_v29  ;;  %v138_v41 = vpop.f32.mrb[3].mxu0  ;;  %v180_v42 = vadd.f32 %v179_v40, %v47_v29  ;;  %v181_v44 = vpop.f32.mrb[3].mxu1  ;;  %v270_v45 = vmax.f32 %v133_v31, 0.0  ;;  %v272_v48 = vmax.f32 %v176_v34, 0.0 }
  0xe0   :  { %v139_v43 = vadd.f32 %v138_v41, %v47_v29  ;;  %v182_v47 = vadd.f32 %v181_v44, %v47_v29  ;;  %v271_v49 = vmax.f32 %v135_v35, 0.0  ;;  %v273_v52 = vmax.f32 %v178_v38, 0.0 }
  0xe1   :  { %v278_v46 = vmax.f32 %v137_v39, 0.0  ;;  %v280_v50 = vmax.f32 %v180_v42, 0.0 }
  0xe2   :  { %v279_v51 = vmax.f32 %v139_v43, 0.0  ;;  %v281_v54 = vmax.f32 %v182_v47, 0.0 }
  0xe3   :  { %v294_v53 = vpack.c.bf16 %v278_v46, %v270_v45  ;;  %v296_v55 = vpack.c.bf16 %v280_v50, %v272_v48  ;;  %v1271_v50 = vpop.permute.xlu0 %314 }
  0xe4   :  { %v295_v56 = vpack.c.bf16 %v279_v51, %v271_v49  ;;  %v218_v57 = vpop.f32.mrb[4].mxu0  ;;  %v297_v58 = vpack.c.bf16 %v281_v54, %v273_v52  ;;  %v261_v60 = vpop.f32.mrb[4].mxu1 }
  0xe5   :  { %v219_v59 = vadd.f32 %v218_v57, %v42_v28  ;;  %v220_v61 = vpop.f32.mrb[5].mxu0  ;;  %v262_v62 = vadd.f32 %v261_v60, %v42_v28  ;;  %v263_v0 = vpop.f32.mrb[5].mxu1 }
  0xe6   :  { %v221_v63 = vadd.f32 %v220_v61, %v42_v28  ;;  %v222_v1 = vpop.f32.mrb[6].mxu0  ;;  %338 = vmatprep.subr.bf16.mxu0 %v295_v56  ;;  %v264_v4 = vadd.f32 %v263_v0, %v42_v28  ;;  %v265_v6 = vpop.f32.mrb[6].mxu1  ;;  %391 = vmatprep.subr.bf16.mxu1 %v297_v58 }
  0xe7   :  { %v223_v5 = vadd.f32 %v222_v1, %v47_v29  ;;  %v224_v7 = vpop.f32.mrb[7].mxu0  ;;  %339 = vmatpush1.bf16.msra.mxu0 %v294_v53  ;;  %v266_v8 = vadd.f32 %v265_v6, %v47_v29  ;;  %v267_v10 = vpop.f32.mrb[7].mxu1  ;;  %392 = vmatpush1.bf16.msra.mxu1 %v296_v55  ;;  %v274_v11 = vmax.f32 %v219_v59, 0.0  ;;  %v276_v14 = vmax.f32 %v262_v62, 0.0 }
  0xe8   :  { %v225_v9 = vadd.f32 %v224_v7, %v47_v29  ;;  %v268_v13 = vadd.f32 %v267_v10, %v47_v29  ;;  %v275_v15 = vmax.f32 %v221_v63, 0.0  ;;  %v277_v18 = vmax.f32 %v264_v4, 0.0  ;;  %v1273_v53 = vpop.permute.xlu1 %319 }
  0xe9   :  { %v282_v12 = vmax.f32 %v223_v5, 0.0  ;;  %v284_v16 = vmax.f32 %v266_v8, 0.0 }
  0xea   :  { %v283_v17 = vmax.f32 %v225_v9, 0.0  ;;  %1099 = vmatmul.mubr.msk.bf16.vlgmr.msra.gmra.mrb[8].mxu0 %vm94_vm0, %v1122_v2  ;;  %v285_v20 = vmax.f32 %v268_v13, 0.0  ;;  %1101 = vmatmul.mubr.msk.bf16.vlgmr.msra.gmra.mrb[8].mxu1 %vm94_vm0, %v1122_v2 }
  0xeb   :  { %v298_v19 = vpack.c.bf16 %v282_v12, %v274_v11  ;;  %380 = vmatprep.mubr.bf16.mxu0 %v1126_v3  ;;  %v300_v21 = vpack.c.bf16 %v284_v16, %v276_v14  ;;  %433 = vmatprep.mubr.bf16.mxu1 %v1126_v3 }
  0xec   :  { %v299_v22 = vpack.c.bf16 %v283_v17, %v275_v15  ;;  %v301_v23 = vpack.c.bf16 %v285_v20, %v277_v18 }
  0xee   :  { %444 = vmatprep.subr.bf16.mxu0 %v299_v22  ;;  %497 = vmatprep.subr.bf16.mxu1 %v301_v23 }
  0xef   :  { %445 = vmatpush1.bf16.msra.mxu0 %v298_v19  ;;  %498 = vmatpush1.bf16.msra.mxu1 %v300_v21 }
  0xf2   :  { %1100 = vmatmul.mubr.msk.bf16.gmra.mrb[12].mxu0 %vm94_vm0, %v1123_v24  ;;  %1102 = vmatmul.mubr.msk.bf16.gmra.mrb[12].mxu1 %vm94_vm0, %v1123_v24 }
  0xf3   :  { %476 = vmatprep.mubr.bf16.mxu0 %v1126_v3  ;;  %529 = vmatprep.mubr.bf16.mxu1 %v1126_v3 }
  0xfa   :  { %1103 = vmatmul.mubr.msk.bf16.vlgmr.msra.gmra.mrb[16].mxu0 %vm94_vm0, %v1122_v2  ;;  %1105 = vmatmul.mubr.msk.bf16.vlgmr.msra.gmra.mrb[16].mxu1 %vm94_vm0, %v1122_v2 }
  0xfb   :  { %486 = vmatprep.mubr.bf16.mxu0 %v1126_v3  ;;  %539 = vmatprep.mubr.bf16.mxu1 %v1126_v3 }
 0x102   :  { %1104 = vmatmul.mubr.msk.bf16.gmra.mrb[20].mxu0 %vm94_vm0, %v1123_v24  ;;  %1106 = vmatmul.mubr.msk.bf16.gmra.mrb[20].mxu1 %vm94_vm0, %v1123_v24 }
 0x103   :  { %675 = vmatprep.mubr.bf16.mxu0 %v1126_v3  ;;  %728 = vmatprep.mubr.bf16.mxu1 %v1126_v3 }
 0x1bd   :  { %v372_v27 = vpop.f32.mrb[8].mxu0  ;;  %v425_v29 = vpop.f32.mrb[8].mxu1 }
 0x1be   :  { %v373_v28 = vadd.f32 %v372_v27, %v1259_v25  ;;  %v374_v30 = vpop.f32.mrb[9].mxu0  ;;  %v426_v31 = vadd.f32 %v425_v29, %v1259_v25  ;;  %v427_v33 = vpop.f32.mrb[9].mxu1 }
 0x1bf   :  { %v375_v32 = vadd.f32 %v374_v30, %v1259_v25  ;;  %v376_v34 = vpop.f32.mrb[10].mxu0  ;;  %v428_v35 = vadd.f32 %v427_v33, %v1259_v25  ;;  %v429_v37 = vpop.f32.mrb[10].mxu1 }
 0x1c0   :  { %v377_v36 = vadd.f32 %v376_v34, %v1261_v26  ;;  %v378_v38 = vpop.f32.mrb[11].mxu0  ;;  %v552_v39 = vmax.f32 %v426_v31, 0.0  ;;  %v430_v40 = vadd.f32 %v429_v37, %v1261_v26  ;;  %v431_v42 = vpop.f32.mrb[11].mxu1  ;;  %v550_v43 = vmax.f32 %v373_v28, 0.0 }
 0x1c1   :  { %v379_v41 = vadd.f32 %v378_v38, %v1261_v26  ;;  %v553_v44 = vmax.f32 %v428_v35, 0.0  ;;  %v432_v46 = vadd.f32 %v431_v42, %v1261_v26  ;;  %v551_v47 = vmax.f32 %v375_v32, 0.0  ;;  %v1289_v32 = vld [vmem:[%s1481_s5] sm:$0xff]  }
 0x1c2   :  { %v558_v45 = vmax.f32 %v377_v36, 0.0  ;;  %v560_v48 = vmax.f32 %v430_v40, 0.0 }
 0x1c3   :  { %v559_v49 = vmax.f32 %v379_v41, 0.0  ;;  %v561_v52 = vmax.f32 %v432_v46, 0.0 }
 0x1c4   :  { %v590_v51 = vpack.c.bf16 %v558_v45, %v550_v43  ;;  %v592_v54 = vpack.c.bf16 %v560_v48, %v552_v39 }
 0x1c5   :  { %v591_v55 = vpack.c.bf16 %v559_v49, %v551_v47  ;;  %v382_v56 = vpop.f32.mrb[12].mxu0  ;;  %v593_v57 = vpack.c.bf16 %v561_v52, %v553_v44  ;;  %v435_v59 = vpop.f32.mrb[12].mxu1 }
 0x1c6   :  { %v383_v58 = vadd.f32 %v382_v56, %v1271_v50  ;;  %v384_v60 = vpop.f32.mrb[13].mxu0  ;;  %v436_v61 = vadd.f32 %v435_v59, %v1271_v50  ;;  %v437_v63 = vpop.f32.mrb[13].mxu1 }
 0x1c7   :  { %v385_v62 = vadd.f32 %v384_v60, %v1271_v50  ;;  %v386_v0 = vpop.f32.mrb[14].mxu0  ;;  %643 = vmatprep.subr.bf16.mxu0 %v591_v55  ;;  %v438_v1 = vadd.f32 %v437_v63, %v1271_v50  ;;  %v439_v4 = vpop.f32.mrb[14].mxu1  ;;  %696 = vmatprep.subr.bf16.mxu1 %v593_v57 }
 0x1c8   :  { %v387_v2 = vadd.f32 %v386_v0, %v1273_v53  ;;  %v388_v5 = vpop.f32.mrb[15].mxu0  ;;  %644 = vmatpush1.bf16.msra.mxu0 %v590_v51  ;;  %v440_v6 = vadd.f32 %v439_v4, %v1273_v53  ;;  %v441_v8 = vpop.f32.mrb[15].mxu1  ;;  %697 = vmatpush1.bf16.msra.mxu1 %v592_v54  ;;  %v566_v9 = vmax.f32 %v383_v58, 0.0  ;;  %v568_v12 = vmax.f32 %v436_v61, 0.0  ;;  %v1125_v61 = vld [vmem:[%s1481_s5 + $0x8] sm:$0xff]   ;;  %s1127_s5 = smov 64  }
 0x1c9   :  { %v389_v7 = vadd.f32 %v388_v5, %v1273_v53  ;;  %v442_v11 = vadd.f32 %v441_v8, %v1273_v53  ;;  %v567_v13 = vmax.f32 %v385_v62, 0.0  ;;  %v569_v16 = vmax.f32 %v438_v1, 0.0 }
 0x1ca   :  { %v574_v10 = vmax.f32 %v387_v2, 0.0  ;;  %v576_v14 = vmax.f32 %v440_v6, 0.0 }
 0x1cb   :  { %v575_v15 = vmax.f32 %v389_v7, 0.0  ;;  %v577_v18 = vmax.f32 %v442_v11, 0.0 }
 0x1cc   :  { %v598_v17 = vpack.c.bf16 %v574_v10, %v566_v9  ;;  %v600_v19 = vpack.c.bf16 %v576_v14, %v568_v12 }
 0x1cd   :  { %v599_v20 = vpack.c.bf16 %v575_v15, %v567_v13  ;;  %v478_v21 = vpop.f32.mrb[16].mxu0  ;;  %v601_v22 = vpack.c.bf16 %v577_v18, %v569_v16  ;;  %v531_v24 = vpop.f32.mrb[16].mxu1 }
 0x1ce   :  { %v479_v23 = vadd.f32 %v478_v21, %v1259_v25  ;;  %v480_v27 = vpop.f32.mrb[17].mxu0  ;;  %v532_v28 = vadd.f32 %v531_v24, %v1259_v25  ;;  %v533_v30 = vpop.f32.mrb[17].mxu1 }
 0x1cf   :  { %v481_v29 = vadd.f32 %v480_v27, %v1259_v25  ;;  %v482_v31 = vpop.f32.mrb[18].mxu0  ;;  %645 = vmatprep.subr.bf16.mxu0 %v599_v20  ;;  %v534_v33 = vadd.f32 %v533_v30, %v1259_v25  ;;  %v535_v35 = vpop.f32.mrb[18].mxu1  ;;  %698 = vmatprep.subr.bf16.mxu1 %v601_v22 }
 0x1d0   :  { %v483_v34 = vadd.f32 %v482_v31, %v1261_v26  ;;  %v484_v36 = vpop.f32.mrb[19].mxu0  ;;  %646 = vmatpush1.bf16.msra.mxu0 %v598_v17  ;;  %v536_v37 = vadd.f32 %v535_v35, %v1261_v26  ;;  %v537_v39 = vpop.f32.mrb[19].mxu1  ;;  %699 = vmatpush1.bf16.msra.mxu1 %v600_v19  ;;  %v554_v40 = vmax.f32 %v479_v23, 0.0  ;;  %v556_v43 = vmax.f32 %v532_v28, 0.0 }
 0x1d1   :  { %v485_v38 = vadd.f32 %v484_v36, %v1261_v26  ;;  %v538_v42 = vadd.f32 %v537_v39, %v1261_v26  ;;  %v555_v44 = vmax.f32 %v481_v29, 0.0  ;;  %v557_v46 = vmax.f32 %v534_v33, 0.0  ;;  %v1327_v18 = vpop.permute.xlu1 %613 }
 0x1d2   :  { %v562_v41 = vmax.f32 %v483_v34, 0.0  ;;  %v564_v25 = vmax.f32 %v536_v37, 0.0 }
 0x1d3   :  { %v563_v45 = vmax.f32 %v485_v38, 0.0  ;;  %1109 = vmatmul.mubr.msk.bf16.vlgmr.msra.gmra.mrb[24].mxu0 %vm636_vm1, %v1289_v32  ;;  %v565_v48 = vmax.f32 %v538_v42, 0.0  ;;  %1111 = vmatmul.mubr.msk.bf16.vlgmr.msra.gmra.mrb[24].mxu1 %vm636_vm1, %v1289_v32 }
 0x1d4   :  { %v594_v47 = vpack.c.bf16 %v562_v41, %v554_v40  ;;  %685 = vmatprep.mubr.bf16.mxu0 %v1126_v3  ;;  %v596_v49 = vpack.c.bf16 %v564_v25, %v556_v43  ;;  %738 = vmatprep.mubr.bf16.mxu1 %v1126_v3 }
 0x1d5   :  { %v595_v51 = vpack.c.bf16 %v563_v45, %v555_v44  ;;  %v488_v52 = vpop.f32.mrb[20].mxu0  ;;  %v597_v26 = vpack.c.bf16 %v565_v48, %v557_v46  ;;  %v541_v55 = vpop.f32.mrb[20].mxu1 }
 0x1d6   :  { %v489_v54 = vadd.f32 %v488_v52, %v1271_v50  ;;  %v490_v56 = vpop.f32.mrb[21].mxu0  ;;  %v542_v57 = vadd.f32 %v541_v55, %v1271_v50  ;;  %v543_v59 = vpop.f32.mrb[21].mxu1 }
 0x1d7   :  { %v491_v58 = vadd.f32 %v490_v56, %v1271_v50  ;;  %v492_v60 = vpop.f32.mrb[22].mxu0  ;;  %749 = vmatprep.subr.bf16.mxu0 %v595_v51  ;;  %v544_v62 = vadd.f32 %v543_v59, %v1271_v50  ;;  %v545_v0 = vpop.f32.mrb[22].mxu1  ;;  %802 = vmatprep.subr.bf16.mxu1 %v597_v26 }
 0x1d8   :  { %v493_v63 = vadd.f32 %v492_v60, %v1273_v53  ;;  %v494_v1 = vpop.f32.mrb[23].mxu0  ;;  %750 = vmatpush1.bf16.msra.mxu0 %v594_v47  ;;  %v546_v2 = vadd.f32 %v545_v0, %v1273_v53  ;;  %v547_v5 = vpop.f32.mrb[23].mxu1  ;;  %803 = vmatpush1.bf16.msra.mxu1 %v596_v49  ;;  %v570_v6 = vmax.f32 %v489_v54, 0.0  ;;  %v572_v9 = vmax.f32 %v542_v57, 0.0 }
 0x1d9   :  { %v495_v4 = vadd.f32 %v494_v1, %v1273_v53  ;;  %v548_v8 = vadd.f32 %v547_v5, %v1273_v53  ;;  %v571_v10 = vmax.f32 %v491_v58, 0.0  ;;  %v573_v12 = vmax.f32 %v544_v62, 0.0  ;;  %v1325_v53 = vpop.permute.xlu0 %608  ;;  %v1341_v44 = vpop.permute.xlu1 %623 }
 0x1da   :  { %v578_v7 = vmax.f32 %v493_v63, 0.0  ;;  %v580_v11 = vmax.f32 %v546_v2, 0.0 }
 0x1db   :  { %v579_v50 = vmax.f32 %v495_v4, 0.0  ;;  %1110 = vmatmul.mubr.msk.bf16.gmra.mrb[28].mxu0 %vm636_vm1, %v1125_v61  ;;  %v581_v14 = vmax.f32 %v548_v8, 0.0  ;;  %1112 = vmatmul.mubr.msk.bf16.gmra.mrb[28].mxu1 %vm636_vm1, %v1125_v61 }
 0x1dc   :  { %v602_v13 = vpack.c.bf16 %v578_v7, %v570_v6  ;;  %781 = vmatprep.mubr.bf16.mxu0 %v1126_v3  ;;  %v604_v15 = vpack.c.bf16 %v580_v11, %v572_v9  ;;  %834 = vmatprep.mubr.bf16.mxu1 %v1126_v3 }
 0x1dd   :  { %v603_v16 = vpack.c.bf16 %v579_v50, %v571_v10  ;;  %v605_v17 = vpack.c.bf16 %v581_v14, %v573_v12  ;;  %v1338_v43 = vpop.permute.xlu0 %618 }
 0x1df   :  { %751 = vmatprep.subr.bf16.mxu0 %v603_v16  ;;  %804 = vmatprep.subr.bf16.mxu1 %v605_v17 }
 0x1e0   :  { %752 = vmatpush1.bf16.msra.mxu0 %v602_v13  ;;  %805 = vmatpush1.bf16.msra.mxu1 %v604_v15 }
 0x1e3   :  { %1113 = vmatmul.mubr.msk.bf16.vlgmr.msra.gmra.mrb[32].mxu0 %vm636_vm1, %v1289_v32  ;;  %1115 = vmatmul.mubr.msk.bf16.vlgmr.msra.gmra.mrb[32].mxu1 %vm636_vm1, %v1289_v32 }
 0x1e4   :  { %791 = vmatprep.mubr.bf16.mxu0 %v1126_v3  ;;  %844 = vmatprep.mubr.bf16.mxu1 %v1126_v3 }
 0x1eb   :  { %1114 = vmatmul.mubr.msk.bf16.gmra.mrb[36].mxu0 %vm636_vm1, %v1125_v61  ;;  %1116 = vmatmul.mubr.msk.bf16.gmra.mrb[36].mxu1 %vm636_vm1, %v1125_v61 }
 0x2a6   :  { %v677_v19 = vpop.f32.mrb[24].mxu0  ;;  %v730_v21 = vpop.f32.mrb[24].mxu1 }
 0x2a7   :  { %v678_v20 = vadd.f32 %v677_v19, %v1325_v53  ;;  %v679_v22 = vpop.f32.mrb[25].mxu0  ;;  %v731_v23 = vadd.f32 %v730_v21, %v1325_v53  ;;  %v732_v27 = vpop.f32.mrb[25].mxu1 }
 0x2a8   :  { %v680_v24 = vadd.f32 %v679_v22, %v1325_v53  ;;  %v681_v28 = vpop.f32.mrb[26].mxu0  ;;  %v733_v29 = vadd.f32 %v732_v27, %v1325_v53  ;;  %v734_v31 = vpop.f32.mrb[26].mxu1 }
 0x2a9   :  { %v855_v3 = vmax.f32 %v678_v20, 0.0  ;;  %v682_v30 = vadd.f32 %v681_v28, %v1327_v18  ;;  %v683_v32 = vpop.f32.mrb[27].mxu0  ;;  %v857_v33 = vmax.f32 %v731_v23, 0.0  ;;  %v735_v35 = vadd.f32 %v734_v31, %v1327_v18  ;;  %v736_v37 = vpop.f32.mrb[27].mxu1 }
 0x2aa   :  { %v856_v34 = vmax.f32 %v680_v24, 0.0  ;;  %v684_v36 = vadd.f32 %v683_v32, %v1327_v18  ;;  %v737_v39 = vadd.f32 %v736_v37, %v1327_v18  ;;  %v858_v45 = vmax.f32 %v733_v29, 0.0 }
 0x2ab   :  { %v863_v38 = vmax.f32 %v682_v30, 0.0  ;;  %891 = vrot.lane.b32.xlu0 %v855_v3, %s1127_s5  ;;  %v903_v40 = vmax.f32 %v855_v3, %v857_v33  ;;  %v865_v41 = vmax.f32 %v735_v35, 0.0 }
 0x2ac   :  { %v864_v42 = vmax.f32 %v684_v36, 0.0  ;;  %v866_v48 = vmax.f32 %v737_v39, 0.0 }
 0x2ad   :  { %893 = vrot.lane.b32.xlu1 %v863_v38, %s1127_s5  ;;  %v907_v25 = vmax.f32 %v903_v40, %v856_v34  ;;  %v904_v46 = vmax.f32 %v863_v38, %v865_v41 }
 0x2ae   :  { %v687_v47 = vpop.f32.mrb[28].mxu0  ;;  %v740_v51 = vpop.f32.mrb[28].mxu1 }
 0x2af   :  { %v688_v49 = vadd.f32 %v687_v47, %v1338_v43  ;;  %v689_v52 = vpop.f32.mrb[29].mxu0  ;;  %939 = vrot.lane.b32.xlu0 %v857_v33, %s1127_s5  ;;  %v927_v26 = vmax.f32 %v907_v25, %v858_v45  ;;  %v908_v54 = vmax.f32 %v904_v46, %v864_v42  ;;  %v1346_v55 = vadd.f32 %v740_v51, %v1338_v43  ;;  %v742_v57 = vpop.f32.mrb[29].mxu1 }
 0x2b0   :  { %v1349_v56 = vadd.f32 %v689_v52, %v1338_v43  ;;  %v691_v58 = vpop.f32.mrb[30].mxu0  ;;  %v1352_v60 = vadd.f32 %v742_v57, %v1338_v43  ;;  %v744_v62 = vpop.f32.mrb[30].mxu1 }
 0x2b1   :  { %v871_v59 = vmax.f32 %v688_v49, 0.0  ;;  %v692_v61 = vadd.f32 %v691_v58, %v1341_v44  ;;  %v693_v63 = vpop.f32.mrb[31].mxu0  ;;  %941 = vrot.lane.b32.xlu1 %v865_v41, %s1127_s5  ;;  %v928_v0 = vmax.f32 %v908_v54, %v866_v48  ;;  %v873_v1 = vmax.f32 %v1346_v55, 0.0  ;;  %v746_v5 = vpop.f32.mrb[31].mxu1 }
 0x2b2   :  { %v872_v2 = vmax.f32 %v1349_v56, 0.0  ;;  %v1359_v4 = vadd.f32 %v744_v62, %v1341_v44  ;;  %v1362_v7 = vadd.f32 %v693_v63, %v1341_v44  ;;  %v1367_v10 = vadd.f32 %v746_v5, %v1341_v44 }
 0x2b3   :  { %v879_v6 = vmax.f32 %v692_v61, 0.0  ;;  %915 = vrot.lane.b32.xlu0 %v856_v34, %s1127_s5  ;;  %v905_v8 = vmax.f32 %v871_v59, %v873_v1  ;;  %v874_v12 = vmax.f32 %v1352_v60, 0.0 }
 0x2b4   :  { %v881_v9 = vmax.f32 %v1359_v4, 0.0  ;;  %v880_v11 = vmax.f32 %v1362_v7, 0.0  ;;  %v882_v21 = vmax.f32 %v1367_v10, 0.0 }
 0x2b5   :  { %917 = vrot.lane.b32.xlu1 %v864_v42, %s1127_s5  ;;  %v909_v50 = vmax.f32 %v905_v8, %v872_v2 }
 0x2b6   :  { %v906_v13 = vmax.f32 %v879_v6, %v881_v9  ;;  %v783_v14 = vpop.f32.mrb[32].mxu0  ;;  %v836_v16 = vpop.f32.mrb[32].mxu1 }
 0x2b7   :  { %v1375_v15 = vadd.f32 %v783_v14, %v1325_v53  ;;  %v785_v17 = vpop.f32.mrb[33].mxu0  ;;  %963 = vrot.lane.b32.xlu0 %v858_v45, %s1127_s5  ;;  %v929_v19 = vmax.f32 %v909_v50, %v874_v12  ;;  %v1384_v22 = vadd.f32 %v836_v16, %v1325_v53  ;;  %v838_v23 = vpop.f32.mrb[33].mxu1 }
 0x2b8   :  { %v910_v20 = vmax.f32 %v906_v13, %v880_v11  ;;  %v787_v24 = vpop.f32.mrb[34].mxu0  ;;  %v1388_v28 = vadd.f32 %v785_v17, %v1325_v53  ;;  %v840_v29 = vpop.f32.mrb[34].mxu1  ;;  %v1397_v32 = vadd.f32 %v838_v23, %v1325_v53 }
 0x2b9   :  { %v859_v27 = vmax.f32 %v1375_v15, 0.0  ;;  %v1391_v3 = vadd.f32 %v787_v24, %v1327_v18  ;;  %v789_v30 = vpop.f32.mrb[35].mxu0  ;;  %965 = vrot.lane.b32.xlu1 %v866_v48, %s1127_s5  ;;  %v841_v33 = vadd.f32 %v840_v29, %v1327_v18  ;;  %v842_v34 = vpop.f32.mrb[35].mxu1  ;;  %v861_v36 = vmax.f32 %v1384_v22, 0.0 }
 0x2ba   :  { %v930_v31 = vmax.f32 %v910_v20, %v882_v21  ;;  %v790_v38 = vadd.f32 %v789_v30, %v1327_v18  ;;  %v1407_v39 = vadd.f32 %v842_v34, %v1327_v18  ;;  %v860_v53 = vmax.f32 %v1388_v28, 0.0 }
 0x2bb   :  { %v931_v35 = vmax.f32 %v927_v26, %v859_v27  ;;  %v867_v37 = vmax.f32 %v1391_v3, 0.0  ;;  %895 = vrot.lane.b32.xlu0 %v871_v59, %s1127_s5  ;;  %v869_v42 = vmax.f32 %v841_v33, 0.0  ;;  %v862_v25 = vmax.f32 %v1397_v32, 0.0 }
 0x2bc   :  { %v868_v48 = vmax.f32 %v790_v38, 0.0  ;;  %v870_v18 = vmax.f32 %v1407_v39, 0.0 }
 0x2bd   :  { %v951_v40 = vmax.f32 %v931_v35, %v861_v36  ;;  %v932_v41 = vmax.f32 %v928_v0, %v867_v37  ;;  %897 = vrot.lane.b32.xlu1 %v879_v6, %s1127_s5 }
 0x2be   :  { %v793_v45 = vpop.f32.mrb[36].mxu0  ;;  %v846_v51 = vpop.f32.mrb[36].mxu1 }
 0x2bf   :  { %v955_v46 = vmax.f32 %v951_v40, %v860_v53  ;;  %v952_v47 = vmax.f32 %v932_v41, %v869_v42  ;;  %v794_v49 = vadd.f32 %v793_v45, %v1338_v43  ;;  %v795_v52 = vpop.f32.mrb[37].mxu0  ;;  %943 = vrot.lane.b32.xlu0 %v873_v1, %s1127_s5  ;;  %v847_v26 = vadd.f32 %v846_v51, %v1338_v43  ;;  %v848_v54 = vpop.f32.mrb[37].mxu1 }
 0x2c0   :  { %v797_v55 = vpop.f32.mrb[38].mxu0  ;;  %v796_v61 = vadd.f32 %v795_v52, %v1338_v43  ;;  %v850_v62 = vpop.f32.mrb[38].mxu1  ;;  %v849_v50 = vadd.f32 %v848_v54, %v1338_v43 }
 0x2c1   :  { %v1416_v57 = vmax.f32 %v955_v46, %v862_v25  ;;  %v956_v58 = vmax.f32 %v952_v47, %v868_v48  ;;  %v875_v59 = vmax.f32 %v794_v49, 0.0  ;;  %v799_v63 = vpop.f32.mrb[39].mxu0  ;;  %945 = vrot.lane.b32.xlu1 %v881_v9, %s1127_s5  ;;  %v798_v0 = vadd.f32 %v797_v55, %v1341_v44  ;;  %v852_v4 = vpop.f32.mrb[39].mxu1 }
 0x2c2   :  { %v851_v1 = vadd.f32 %v850_v62, %v1341_v44  ;;  %v877_v8 = vmax.f32 %v847_v26, 0.0  ;;  %v800_v14 = vadd.f32 %v799_v63, %v1341_v44  ;;  %v876_v9 = vmax.f32 %v796_v61, 0.0 }
 0x2c3   :  { %v1422_v5 = vmax.f32 %v956_v58, %v870_v18  ;;  %v933_v6 = vmax.f32 %v929_v19, %v875_v59  ;;  %919 = vrot.lane.b32.xlu0 %v872_v2, %s1127_s5  ;;  %v883_v13 = vmax.f32 %v798_v0, 0.0  ;;  %v853_v19 = vadd.f32 %v852_v4, %v1341_v44 }
 0x2c4   :  { %v885_v20 = vmax.f32 %v851_v1, 0.0  ;;  %v878_v23 = vmax.f32 %v849_v50, 0.0  ;;  %v884_v56 = vmax.f32 %v800_v14, 0.0 }
 0x2c5   :  { %v953_v16 = vmax.f32 %v933_v6, %v877_v8  ;;  %921 = vrot.lane.b32.xlu1 %v880_v11, %s1127_s5  ;;  %v934_v17 = vmax.f32 %v930_v31, %v883_v13  ;;  %v886_v7 = vmax.f32 %v853_v19, 0.0 }
 0x2c7   :  { %v957_v22 = vmax.f32 %v953_v16, %v876_v9  ;;  %967 = vrot.lane.b32.xlu0 %v874_v12, %s1127_s5  ;;  %v954_v43 = vmax.f32 %v934_v17, %v885_v20 }
 0x2c9   :  { %v977_v2 = vmax.f32 %v957_v22, %v878_v23  ;;  %969 = vrot.lane.b32.xlu1 %v882_v21, %s1127_s5  ;;  %v958_v24 = vmax.f32 %v954_v43, %v884_v56 }
 0x2cb   :  { %987 = vrot.lane.b32.xlu0 %v859_v27, %s1127_s5  ;;  %v978_v44 = vmax.f32 %v958_v24, %v886_v7 }
 0x2cd   :  { %989 = vrot.lane.b32.xlu1 %v867_v37, %s1127_s5 }
 0x2cf   :  { %1035 = vrot.lane.b32.xlu0 %v861_v36, %s1127_s5 }
 0x2d1   :  { %1037 = vrot.lane.b32.xlu1 %v869_v42, %s1127_s5 }
 0x2d3   :  { %1011 = vrot.lane.b32.xlu0 %v860_v53, %s1127_s5 }
 0x2d5   :  { %1013 = vrot.lane.b32.xlu1 %v868_v48, %s1127_s5 }
 0x2d7   :  { %991 = vrot.lane.b32.xlu0 %v875_v59, %s1127_s5 }
 0x2d9   :  { %993 = vrot.lane.b32.xlu1 %v883_v13, %s1127_s5 }
 0x2db   :  { %1039 = vrot.lane.b32.xlu0 %v877_v8, %s1127_s5 }
 0x2dd   :  { %1041 = vrot.lane.b32.xlu1 %v885_v20, %s1127_s5 }
 0x2df   :  { %1015 = vrot.lane.b32.xlu0 %v876_v9, %s1127_s5 }
 0x2e1   :  { %1017 = vrot.lane.b32.xlu1 %v884_v56, %s1127_s5 }
 0x2e3   :  { %1059 = vrot.lane.b32.xlu0 %v862_v25, %s1127_s5 }
 0x2e5   :  { %1061 = vrot.lane.b32.xlu1 %v870_v18, %s1127_s5 }
 0x2e7   :  { %1063 = vrot.lane.b32.xlu0 %v878_v23, %s1127_s5 }
 0x2e9   :  { %1065 = vrot.lane.b32.xlu1 %v886_v7, %s1127_s5 }
 0x31d   :  { %v892_v60 = vpop.permute.xlu0 %891 }
 0x31e   :  { %v979_v41 = vmax.f32 %v1416_v57, %v892_v60 }
 0x31f   :  { %v894_v10 = vpop.permute.xlu1 %893 }
 0x320   :  { %v980_v25 = vmax.f32 %v1422_v5, %v894_v10 }
 0x321   :  { %v940_v11 = vpop.permute.xlu0 %939 }
 0x322   :  { %v999_v45 = vmax.f32 %v979_v41, %v940_v11 }
 0x323   :  { %v942_v12 = vpop.permute.xlu1 %941 }
 0x324   :  { %v1000_v47 = vmax.f32 %v980_v25, %v942_v12 }
 0x325   :  { %v916_v15 = vpop.permute.xlu0 %915 }
 0x326   :  { %v1003_v48 = vmax.f32 %v999_v45, %v916_v15 }
 0x327   :  { %v918_v21 = vpop.permute.xlu1 %917 }
 0x328   :  { %v1004_v52 = vmax.f32 %v1000_v47, %v918_v21 }
 0x329   :  { %v964_v27 = vpop.permute.xlu0 %963 }
 0x32a   :  { %v1023_v18 = vmax.f32 %v1003_v48, %v964_v27 }
 0x32b   :  { %v966_v28 = vpop.permute.xlu1 %965 }
 0x32c   :  { %v1024_v58 = vmax.f32 %v1004_v52, %v966_v28 }
 0x32d   :  { %v896_v3 = vpop.permute.xlu0 %895 }
 0x32e   :  { %v981_v49 = vmax.f32 %v977_v2, %v896_v3 }
 0x32f   :  { %v898_v29 = vpop.permute.xlu1 %897 }
 0x330   :  { %v982_v26 = vmax.f32 %v978_v44, %v898_v29 }
 0x331   :  { %v944_v30 = vpop.permute.xlu0 %943 }
 0x332   :  { %v1001_v54 = vmax.f32 %v981_v49, %v944_v30 }
 0x333   :  { %v946_v31 = vpop.permute.xlu1 %945 }
 0x334   :  { %v1002_v59 = vmax.f32 %v982_v26, %v946_v31 }
 0x335   :  { %v920_v32 = vpop.permute.xlu0 %919 }
 0x336   :  { %v1005_v61 = vmax.f32 %v1001_v54, %v920_v32 }
 0x337   :  { %v922_v33 = vpop.permute.xlu1 %921 }
 0x338   :  { %v1006_v57 = vmax.f32 %v1002_v59, %v922_v33 }
 0x339   :  { %v968_v34 = vpop.permute.xlu0 %967 }
 0x33a   :  { %v1025_v0 = vmax.f32 %v1005_v61, %v968_v34 }
 0x33b   :  { %v970_v35 = vpop.permute.xlu1 %969 }
 0x33c   :  { %v1026_v6 = vmax.f32 %v1006_v57, %v970_v35 }
 0x33d   :  { %v988_v36 = vpop.permute.xlu0 %987 }
 0x33e   :  { %v1027_v62 = vmax.f32 %v1023_v18, %v988_v36 }
 0x33f   :  { %v990_v37 = vpop.permute.xlu1 %989 }
 0x340   :  { %v1028_v1 = vmax.f32 %v1024_v58, %v990_v37 }
 0x341   :  { %v1036_v38 = vpop.permute.xlu0 %1035 }
 0x342   :  { %v1047_v4 = vmax.f32 %v1027_v62, %v1036_v38 }
 0x343   :  { %v1038_v39 = vpop.permute.xlu1 %1037 }
 0x344   :  { %v1048_v8 = vmax.f32 %v1028_v1, %v1038_v39 }
 0x345   :  { %v1012_v40 = vpop.permute.xlu0 %1011 }
 0x346   :  { %v1051_v50 = vmax.f32 %v1047_v4, %v1012_v40 }
 0x347   :  { %v1014_v53 = vpop.permute.xlu1 %1013 }
 0x348   :  { %v1052_v16 = vmax.f32 %v1048_v8, %v1014_v53 }
 0x349   :  { %v992_v42 = vpop.permute.xlu0 %991 }
 0x34a   :  { %v1029_v13 = vmax.f32 %v1025_v0, %v992_v42 }
 0x34b   :  { %v994_v46 = vpop.permute.xlu1 %993 }
 0x34c   :  { %v1030_v9 = vmax.f32 %v1026_v6, %v994_v46 }
 0x34d   :  { %v1040_v51 = vpop.permute.xlu0 %1039 }
 0x34e   :  { %v1049_v17 = vmax.f32 %v1029_v13, %v1040_v51 }
 0x34f   :  { %v1042_v55 = vpop.permute.xlu1 %1041 }
 0x350   :  { %v1050_v22 = vmax.f32 %v1030_v9, %v1042_v55 }
 0x351   :  { %v1016_v63 = vpop.permute.xlu0 %1015 }
 0x352   :  { %v1053_v23 = vmax.f32 %v1049_v17, %v1016_v63 }
 0x353   :  { %v1018_v5 = vpop.permute.xlu1 %1017 }
 0x354   :  { %v1054_v2 = vmax.f32 %v1050_v22, %v1018_v5 }
 0x355   :  { %v1060_v14 = vpop.permute.xlu0 %1059 }
 0x356   :  { %v1071_v20 = vmax.f32 %v1051_v50, %v1060_v14 }
 0x357   :  { %v1062_v19 = vpop.permute.xlu1 %1061 }
 0x358   :  { %1076 = vst.msk [vmem:[%s1482_s7] sm:$0xff] %vm1075_vm2, %v1071_v20  ;;  %v1072_v43 = vmax.f32 %v1052_v16, %v1062_v19 }
 0x359   :  { %v1064_v56 = vpop.permute.xlu0 %1063 }
 0x35a   :  { %1077 = vst.msk [vmem:[%s1482_s7 + $0x8] sm:$0xff] %vm1075_vm2, %v1072_v43  ;;  %v1073_v24 = vmax.f32 %v1053_v23, %v1064_v56 }
 0x35b   :  { %v1066_v7 = vpop.permute.xlu1 %1065 }
 0x35c   :  { %1078 = vst.msk [vmem:[%s1482_s7 + $0x10] sm:$0xff] %vm1075_vm2, %v1073_v24  ;;  %v1074_v44 = vmax.f32 %v1054_v2, %v1066_v7 }
 0x35e   :  { %1079 = vst.msk [vmem:[%s1482_s7 + $0x18] sm:$0xff] %vm1075_vm2, %v1074_v44 }

// kernel: forward.11
= control target key start
LH: loop header
LB: loop body
LE: loop exit
PB: predicated region body
PF: predicated region fallthrough
CT: control target
= control target key end

     0   :  { %v1033_v3 = vmov 0   ;;  %vm94_vm0 = vcmask 130048   ;;  %vm988_vm1 = vcmask 523264   ;;  %s1319_s0 = inlined_call_operand.vmem [shape: bf16[16,1024], index: 0, kind: input, shape index: {}]   ;;  %s1320_s1 = inlined_call_operand.vmem [shape: bf16[16,16], index: 1, kind: input, shape index: {}]   ;;  %s1321_s2 = inlined_call_operand.vmem [shape: f32[16,1], index: 2, kind: input, shape index: {}, may-alias: {2,4}]   ;;  %s1322_s6 = inlined_call_operand.vmem [shape: f32[32,1], index: 6, kind: input, shape index: {}]   ;;  %s1323_s3 = inlined_call_operand.vmem [shape: bf16[16,16], index: 3, kind: input, shape index: {}]   ;;  %s1324_s4 = inlined_call_operand.vmem [shape: f32[16,1], index: 4, kind: input, shape index: {}, may-alias: {2,4}]   ;;  %s1325_s5 = inlined_call_operand.vmem [shape: bf16[32,16], index: 5, kind: input, shape index: {}]   ;;  %s1326_s7 = inlined_call_operand.vmem [shape: f32[32,64], index: 7, kind: output, shape index: {}]  }
   0x1   :  { %v27_v0 = vld [vmem:[%s1319_s0] sm:$0xff]  ;;  %v28_v2 = vld [vmem:[%s1319_s0 + $0x8] sm:$0xff]  ;;  %130 = vmatprep.mubr.bf16.mxu0 %v1033_v3  ;;  %173 = vmatprep.mubr.bf16.mxu1 %v1033_v3  ;;  %v29_v10 = vld [vmem:[%s1319_s0 + $0x10] sm:$0xff] }
   0x2   :  { %v31_v1 = vld [vmem:[%s1319_s0 + $0x20] sm:$0xff]  ;;  %v32_v5 = vld [vmem:[%s1319_s0 + $0x28] sm:$0xff]  ;;  %1027 = vset.pattern.permute.xlu0 %v1033_v3  ;;  %1028 = vset.pattern.permute.xlu1 %v1033_v3  ;;  %v33_v11 = vld [vmem:[%s1319_s0 + $0x30] sm:$0xff] }
   0x3   :  { %v999_v4 = vcombine.high %v27_v0, %v31_v1  ;;  %v998_v6 = vcombine.low %v27_v0, %v31_v1  ;;  %v1001_v7 = vcombine.high %v28_v2, %v32_v5  ;;  %v1000_v8 = vcombine.low %v28_v2, %v32_v5  ;;  %v1029_v9 = vld [vmem:[%s1320_s1] sm:$0xff]   ;;  %v30_v13 = vld [vmem:[%s1319_s0 + $0x18] sm:$0xff]  ;;  %v38_v19 = vld [vmem:[%s1321_s2 + $0x8] sm:$0xff] }
   0x4   :  { %v1003_v12 = vcombine.high %v29_v10, %v33_v11  ;;  %v34_v14 = vld [vmem:[%s1319_s0 + $0x38] sm:$0xff]  ;;  %v37_v15 = vld [vmem:[%s1321_s2] sm:$0xff]  ;;  %v1002_v16 = vcombine.low %v29_v10, %v33_v11  ;;  %v510_v21 = vld [vmem:[%s1322_s6 + $0x10] sm:$0xff] }
   0x5   :  { %98 = vmatprep.subr.bf16.mxu0 %v999_v4  ;;  %141 = vmatprep.subr.bf16.mxu1 %v1001_v7  ;;  %v1005_v17 = vcombine.high %v30_v13, %v34_v14  ;;  %v1004_v18 = vcombine.low %v30_v13, %v34_v14  ;;  %v508_v20 = vld [vmem:[%s1322_s6] sm:$0xff]  ;;  %v289_v23 = vld [vmem:[%s1324_s4 + $0x8] sm:$0xff]  ;;  %v511_v25 = vld [vmem:[%s1322_s6 + $0x18] sm:$0xff] }
   0x6   :  { %99 = vmatpush1.bf16.msra.mxu0 %v998_v6  ;;  %142 = vmatpush1.bf16.msra.mxu1 %v1000_v8  ;;  %v288_v22 = vld [vmem:[%s1324_s4] sm:$0xff]  ;;  %v509_v24 = vld [vmem:[%s1322_s6 + $0x8] sm:$0xff] }
   0x7   :  { %184 = vmatprep.subr.bf16.mxu0 %v1003_v12  ;;  %227 = vmatprep.subr.bf16.mxu1 %v1005_v17  ;;  %v1030_v0 = vld [vmem:[%s1323_s3] sm:$0xff]  }
   0x8   :  { %41 = vperm.xlu0 %1027, %v37_v15   ;;  %300 = vperm.xlu1 %1028, %v288_v22  }
   0x9   :  { %1006 = vmatmul.mubr.msk.bf16.vlgmr.msra.gmra.mrb[0].mxu0 %vm94_vm0, %v1029_v9  ;;  %1007 = vmatmul.mubr.msk.bf16.vlgmr.msra.gmra.mrb[0].mxu1 %vm94_vm0, %v1029_v9 }
   0xa   :  { %185 = vmatpush1.bf16.msra.mxu0 %v1002_v16  ;;  %228 = vmatpush1.bf16.msra.mxu1 %v1004_v18 }
   0xb   :  { %216 = vmatprep.mubr.bf16.mxu0 %v1033_v3  ;;  %259 = vmatprep.mubr.bf16.mxu1 %v1033_v3 }
   0xc   :  { %46 = vperm.xlu0 %1027, %v38_v19   ;;  %305 = vperm.xlu1 %1028, %v289_v23  }
  0x10   :  { %522 = vperm.xlu0 %1027, %v508_v20   ;;  %527 = vperm.xlu1 %1028, %v509_v24  }
  0x11   :  { %1008 = vmatmul.mubr.msk.bf16.vlgmr.msra.gmra.mrb[4].mxu0 %vm94_vm0, %v1029_v9  ;;  %1009 = vmatmul.mubr.msk.bf16.vlgmr.msra.gmra.mrb[4].mxu1 %vm94_vm0, %v1029_v9 }
  0x12   :  { %348 = vmatprep.mubr.bf16.mxu0 %v1033_v3  ;;  %391 = vmatprep.mubr.bf16.mxu1 %v1033_v3 }
  0x14   :  { %532 = vperm.xlu0 %1027, %v510_v21   ;;  %537 = vperm.xlu1 %1028, %v511_v25  }
  0x87   :  { %v42_v26 = vpop.permute.xlu0 %41  ;;  %v301_v22 = vpop.permute.xlu1 %300 }
  0x8b   :  { %v47_v27 = vpop.permute.xlu0 %46  ;;  %v306_v23 = vpop.permute.xlu1 %305 }
  0xdc   :  { %v132_v28 = vpop.f32.mrb[0].mxu0  ;;  %v175_v30 = vpop.f32.mrb[0].mxu1 }
  0xdd   :  { %v133_v29 = vadd.f32 %v132_v28, %v42_v26  ;;  %v134_v31 = vpop.f32.mrb[1].mxu0  ;;  %v176_v32 = vadd.f32 %v175_v30, %v42_v26  ;;  %v177_v34 = vpop.f32.mrb[1].mxu1 }
  0xde   :  { %v135_v33 = vadd.f32 %v134_v31, %v42_v26  ;;  %v136_v35 = vpop.f32.mrb[2].mxu0  ;;  %v178_v36 = vadd.f32 %v177_v34, %v42_v26  ;;  %v179_v38 = vpop.f32.mrb[2].mxu1 }
  0xdf   :  { %v137_v37 = vadd.f32 %v136_v35, %v47_v27  ;;  %v138_v39 = vpop.f32.mrb[3].mxu0  ;;  %v180_v40 = vadd.f32 %v179_v38, %v47_v27  ;;  %v181_v42 = vpop.f32.mrb[3].mxu1  ;;  %v270_v43 = vmax.f32 %v133_v29, 0.0  ;;  %v272_v46 = vmax.f32 %v176_v32, 0.0 }
  0xe0   :  { %v139_v41 = vadd.f32 %v138_v39, %v47_v27  ;;  %v182_v45 = vadd.f32 %v181_v42, %v47_v27  ;;  %v271_v47 = vmax.f32 %v135_v33, 0.0  ;;  %v273_v50 = vmax.f32 %v178_v36, 0.0 }
  0xe1   :  { %v278_v44 = vmax.f32 %v137_v37, 0.0  ;;  %v280_v48 = vmax.f32 %v180_v40, 0.0 }
  0xe2   :  { %v279_v49 = vmax.f32 %v139_v41, 0.0  ;;  %v281_v52 = vmax.f32 %v182_v45, 0.0 }
  0xe3   :  { %v290_v51 = vpack.c.bf16 %v278_v44, %v270_v43  ;;  %v292_v53 = vpack.c.bf16 %v280_v48, %v272_v46 }
  0xe4   :  { %v291_v54 = vpack.c.bf16 %v279_v49, %v271_v47  ;;  %v218_v55 = vpop.f32.mrb[4].mxu0  ;;  %v293_v56 = vpack.c.bf16 %v281_v52, %v273_v50  ;;  %v261_v58 = vpop.f32.mrb[4].mxu1 }
  0xe5   :  { %v219_v57 = vadd.f32 %v218_v55, %v42_v26  ;;  %v220_v59 = vpop.f32.mrb[5].mxu0  ;;  %v262_v60 = vadd.f32 %v261_v58, %v42_v26  ;;  %v263_v62 = vpop.f32.mrb[5].mxu1 }
  0xe6   :  { %v221_v61 = vadd.f32 %v220_v59, %v42_v26  ;;  %v222_v63 = vpop.f32.mrb[6].mxu0  ;;  %316 = vmatprep.subr.bf16.mxu0 %v291_v54  ;;  %v264_v1 = vadd.f32 %v263_v62, %v42_v26  ;;  %v265_v4 = vpop.f32.mrb[6].mxu1  ;;  %359 = vmatprep.subr.bf16.mxu1 %v293_v56 }
  0xe7   :  { %v223_v2 = vadd.f32 %v222_v63, %v47_v27  ;;  %v224_v5 = vpop.f32.mrb[7].mxu0  ;;  %317 = vmatpush1.bf16.msra.mxu0 %v290_v51  ;;  %v266_v6 = vadd.f32 %v265_v4, %v47_v27  ;;  %v267_v8 = vpop.f32.mrb[7].mxu1  ;;  %360 = vmatpush1.bf16.msra.mxu1 %v292_v53  ;;  %v274_v9 = vmax.f32 %v219_v57, 0.0  ;;  %v276_v12 = vmax.f32 %v262_v60, 0.0  ;;  %v1031_v60 = vld [vmem:[%s1325_s5] sm:$0xff]  }
  0xe8   :  { %v225_v7 = vadd.f32 %v224_v5, %v47_v27  ;;  %v268_v11 = vadd.f32 %v267_v8, %v47_v27  ;;  %v275_v13 = vmax.f32 %v221_v61, 0.0  ;;  %v277_v16 = vmax.f32 %v264_v1, 0.0 }
  0xe9   :  { %v282_v10 = vmax.f32 %v223_v2, 0.0  ;;  %v284_v14 = vmax.f32 %v266_v6, 0.0 }
  0xea   :  { %v283_v15 = vmax.f32 %v225_v7, 0.0  ;;  %1011 = vmatmul.mubr.msk.bf16.vlgmr.msra.gmra.mrb[8].mxu0 %vm94_vm0, %v1030_v0  ;;  %v285_v18 = vmax.f32 %v268_v11, 0.0  ;;  %1012 = vmatmul.mubr.msk.bf16.vlgmr.msra.gmra.mrb[8].mxu1 %vm94_vm0, %v1030_v0 }
  0xeb   :  { %v294_v17 = vpack.c.bf16 %v282_v10, %v274_v9  ;;  %434 = vmatprep.mubr.bf16.mxu0 %v1033_v3  ;;  %v296_v19 = vpack.c.bf16 %v284_v14, %v276_v12  ;;  %477 = vmatprep.mubr.bf16.mxu1 %v1033_v3 }
  0xec   :  { %v295_v20 = vpack.c.bf16 %v283_v15, %v275_v13  ;;  %v297_v21 = vpack.c.bf16 %v285_v18, %v277_v16  ;;  %v1032_v18 = vld [vmem:[%s1325_s5 + $0x8] sm:$0xff]   ;;  %s1034_s5 = smov 64  }
  0xee   :  { %402 = vmatprep.subr.bf16.mxu0 %v295_v20  ;;  %445 = vmatprep.subr.bf16.mxu1 %v297_v21  ;;  %v1171_v20 = vpop.permute.xlu1 %527 }
  0xef   :  { %403 = vmatpush1.bf16.msra.mxu0 %v294_v17  ;;  %446 = vmatpush1.bf16.msra.mxu1 %v296_v19  ;;  %v1169_v19 = vpop.permute.xlu0 %522 }
  0xf2   :  { %1013 = vmatmul.mubr.msk.bf16.vlgmr.msra.gmra.mrb[12].mxu0 %vm94_vm0, %v1030_v0  ;;  %1014 = vmatmul.mubr.msk.bf16.vlgmr.msra.gmra.mrb[12].mxu1 %vm94_vm0, %v1030_v0 }
  0xf3   :  { %588 = vmatprep.mubr.bf16.mxu0 %v1033_v3  ;;  %641 = vmatprep.mubr.bf16.mxu1 %v1033_v3 }
 0x1bd   :  { %v350_v24 = vpop.f32.mrb[8].mxu0  ;;  %v393_v26 = vpop.f32.mrb[8].mxu1 }
 0x1be   :  { %v351_v25 = vadd.f32 %v350_v24, %v301_v22  ;;  %v352_v27 = vpop.f32.mrb[9].mxu0  ;;  %v394_v28 = vadd.f32 %v393_v26, %v301_v22  ;;  %v395_v30 = vpop.f32.mrb[9].mxu1 }
 0x1bf   :  { %v353_v29 = vadd.f32 %v352_v27, %v301_v22  ;;  %v354_v31 = vpop.f32.mrb[10].mxu0  ;;  %v396_v32 = vadd.f32 %v395_v30, %v301_v22  ;;  %v397_v34 = vpop.f32.mrb[10].mxu1 }
 0x1c0   :  { %v355_v33 = vadd.f32 %v354_v31, %v306_v23  ;;  %v356_v35 = vpop.f32.mrb[11].mxu0  ;;  %v398_v36 = vadd.f32 %v397_v34, %v306_v23  ;;  %v399_v38 = vpop.f32.mrb[11].mxu1  ;;  %v488_v39 = vmax.f32 %v351_v25, 0.0  ;;  %v490_v42 = vmax.f32 %v394_v28, 0.0 }
 0x1c1   :  { %v357_v37 = vadd.f32 %v356_v35, %v306_v23  ;;  %v400_v41 = vadd.f32 %v399_v38, %v306_v23  ;;  %v489_v43 = vmax.f32 %v353_v29, 0.0  ;;  %v491_v46 = vmax.f32 %v396_v32, 0.0 }
 0x1c2   :  { %v496_v40 = vmax.f32 %v355_v33, 0.0  ;;  %v498_v44 = vmax.f32 %v398_v36, 0.0 }
 0x1c3   :  { %v497_v45 = vmax.f32 %v357_v37, 0.0  ;;  %v499_v48 = vmax.f32 %v400_v41, 0.0 }
 0x1c4   :  { %v512_v47 = vpack.c.bf16 %v496_v40, %v488_v39  ;;  %v514_v49 = vpack.c.bf16 %v498_v44, %v490_v42  ;;  %v1185_v44 = vpop.permute.xlu1 %537 }
 0x1c5   :  { %v513_v50 = vpack.c.bf16 %v497_v45, %v489_v43  ;;  %v436_v51 = vpop.f32.mrb[12].mxu0  ;;  %v515_v52 = vpack.c.bf16 %v499_v48, %v491_v46  ;;  %v479_v54 = vpop.f32.mrb[12].mxu1 }
 0x1c6   :  { %v437_v53 = vadd.f32 %v436_v51, %v301_v22  ;;  %v438_v55 = vpop.f32.mrb[13].mxu0  ;;  %v480_v56 = vadd.f32 %v479_v54, %v301_v22  ;;  %v481_v58 = vpop.f32.mrb[13].mxu1 }
 0x1c7   :  { %v439_v57 = vadd.f32 %v438_v55, %v301_v22  ;;  %v440_v59 = vpop.f32.mrb[14].mxu0  ;;  %556 = vmatprep.subr.bf16.mxu0 %v513_v50  ;;  %v482_v61 = vadd.f32 %v481_v58, %v301_v22  ;;  %v483_v63 = vpop.f32.mrb[14].mxu1  ;;  %609 = vmatprep.subr.bf16.mxu1 %v515_v52 }
 0x1c8   :  { %v441_v62 = vadd.f32 %v440_v59, %v306_v23  ;;  %v442_v0 = vpop.f32.mrb[15].mxu0  ;;  %557 = vmatpush1.bf16.msra.mxu0 %v512_v47  ;;  %v484_v1 = vadd.f32 %v483_v63, %v306_v23  ;;  %v485_v4 = vpop.f32.mrb[15].mxu1  ;;  %610 = vmatpush1.bf16.msra.mxu1 %v514_v49  ;;  %v492_v5 = vmax.f32 %v437_v53, 0.0  ;;  %v494_v8 = vmax.f32 %v480_v56, 0.0 }
 0x1c9   :  { %v443_v2 = vadd.f32 %v442_v0, %v306_v23  ;;  %v486_v7 = vadd.f32 %v485_v4, %v306_v23  ;;  %v493_v9 = vmax.f32 %v439_v57, 0.0  ;;  %v495_v12 = vmax.f32 %v482_v61, 0.0  ;;  %v1182_v43 = vpop.permute.xlu0 %532 }
 0x1ca   :  { %v500_v6 = vmax.f32 %v441_v62, 0.0  ;;  %v502_v10 = vmax.f32 %v484_v1, 0.0 }
 0x1cb   :  { %v501_v11 = vmax.f32 %v443_v2, 0.0  ;;  %1017 = vmatmul.mubr.msk.bf16.vlgmr.msra.gmra.mrb[16].mxu0 %vm94_vm0, %v1031_v60  ;;  %v503_v14 = vmax.f32 %v486_v7, 0.0  ;;  %1019 = vmatmul.mubr.msk.bf16.vlgmr.msra.gmra.mrb[16].mxu1 %vm94_vm0, %v1031_v60 }
 0x1cc   :  { %v516_v13 = vpack.c.bf16 %v500_v6, %v492_v5  ;;  %598 = vmatprep.mubr.bf16.mxu0 %v1033_v3  ;;  %v518_v15 = vpack.c.bf16 %v502_v10, %v494_v8  ;;  %651 = vmatprep.mubr.bf16.mxu1 %v1033_v3 }
 0x1cd   :  { %v517_v16 = vpack.c.bf16 %v501_v11, %v493_v9  ;;  %v519_v17 = vpack.c.bf16 %v503_v14, %v495_v12 }
 0x1cf   :  { %662 = vmatprep.subr.bf16.mxu0 %v517_v16  ;;  %715 = vmatprep.subr.bf16.mxu1 %v519_v17 }
 0x1d0   :  { %663 = vmatpush1.bf16.msra.mxu0 %v516_v13  ;;  %716 = vmatpush1.bf16.msra.mxu1 %v518_v15 }
 0x1d3   :  { %1018 = vmatmul.mubr.msk.bf16.gmra.mrb[20].mxu0 %vm94_vm0, %v1032_v18  ;;  %1020 = vmatmul.mubr.msk.bf16.gmra.mrb[20].mxu1 %vm94_vm0, %v1032_v18 }
 0x1d4   :  { %694 = vmatprep.mubr.bf16.mxu0 %v1033_v3  ;;  %747 = vmatprep.mubr.bf16.mxu1 %v1033_v3 }
 0x1db   :  { %1021 = vmatmul.mubr.msk.bf16.vlgmr.msra.gmra.mrb[24].mxu0 %vm94_vm0, %v1031_v60  ;;  %1023 = vmatmul.mubr.msk.bf16.vlgmr.msra.gmra.mrb[24].mxu1 %vm94_vm0, %v1031_v60 }
 0x1dc   :  { %704 = vmatprep.mubr.bf16.mxu0 %v1033_v3  ;;  %757 = vmatprep.mubr.bf16.mxu1 %v1033_v3 }
 0x1e3   :  { %1022 = vmatmul.mubr.msk.bf16.gmra.mrb[28].mxu0 %vm94_vm0, %v1032_v18  ;;  %1024 = vmatmul.mubr.msk.bf16.gmra.mrb[28].mxu1 %vm94_vm0, %v1032_v18 }
 0x29e   :  { %v590_v21 = vpop.f32.mrb[16].mxu0  ;;  %v643_v23 = vpop.f32.mrb[16].mxu1 }
 0x29f   :  { %v591_v22 = vadd.f32 %v590_v21, %v1169_v19  ;;  %v592_v24 = vpop.f32.mrb[17].mxu0  ;;  %v644_v25 = vadd.f32 %v643_v23, %v1169_v19  ;;  %v645_v27 = vpop.f32.mrb[17].mxu1 }
 0x2a0   :  { %v593_v26 = vadd.f32 %v592_v24, %v1169_v19  ;;  %v594_v28 = vpop.f32.mrb[18].mxu0  ;;  %v646_v29 = vadd.f32 %v645_v27, %v1169_v19  ;;  %v647_v31 = vpop.f32.mrb[18].mxu1 }
 0x2a1   :  { %v768_v3 = vmax.f32 %v591_v22, 0.0  ;;  %v595_v30 = vadd.f32 %v594_v28, %v1171_v20  ;;  %v596_v32 = vpop.f32.mrb[19].mxu0  ;;  %v770_v33 = vmax.f32 %v644_v25, 0.0  ;;  %v648_v35 = vadd.f32 %v647_v31, %v1171_v20  ;;  %v649_v37 = vpop.f32.mrb[19].mxu1 }
 0x2a2   :  { %v769_v34 = vmax.f32 %v593_v26, 0.0  ;;  %v597_v36 = vadd.f32 %v596_v32, %v1171_v20  ;;  %v650_v39 = vadd.f32 %v649_v37, %v1171_v20  ;;  %v771_v46 = vmax.f32 %v646_v29, 0.0 }
 0x2a3   :  { %v776_v38 = vmax.f32 %v595_v30, 0.0  ;;  %804 = vrot.lane.b32.xlu0 %v768_v3, %s1034_s5  ;;  %v816_v40 = vmax.f32 %v768_v3, %v770_v33  ;;  %v778_v41 = vmax.f32 %v648_v35, 0.0 }
 0x2a4   :  { %v777_v42 = vmax.f32 %v597_v36, 0.0  ;;  %v779_v49 = vmax.f32 %v650_v39, 0.0 }
 0x2a5   :  { %806 = vrot.lane.b32.xlu1 %v776_v38, %s1034_s5  ;;  %v820_v45 = vmax.f32 %v816_v40, %v769_v34  ;;  %v817_v47 = vmax.f32 %v776_v38, %v778_v41 }
 0x2a6   :  { %v600_v48 = vpop.f32.mrb[20].mxu0  ;;  %v653_v51 = vpop.f32.mrb[20].mxu1 }
 0x2a7   :  { %v601_v50 = vadd.f32 %v600_v48, %v1182_v43  ;;  %v602_v52 = vpop.f32.mrb[21].mxu0  ;;  %852 = vrot.lane.b32.xlu0 %v770_v33, %s1034_s5  ;;  %v840_v53 = vmax.f32 %v820_v45, %v771_v46  ;;  %v821_v54 = vmax.f32 %v817_v47, %v777_v42  ;;  %v1190_v55 = vadd.f32 %v653_v51, %v1182_v43  ;;  %v655_v57 = vpop.f32.mrb[21].mxu1 }
 0x2a8   :  { %v1193_v56 = vadd.f32 %v602_v52, %v1182_v43  ;;  %v604_v58 = vpop.f32.mrb[22].mxu0  ;;  %v1196_v60 = vadd.f32 %v655_v57, %v1182_v43  ;;  %v657_v62 = vpop.f32.mrb[22].mxu1 }
 0x2a9   :  { %v784_v59 = vmax.f32 %v601_v50, 0.0  ;;  %v605_v61 = vadd.f32 %v604_v58, %v1185_v44  ;;  %v606_v63 = vpop.f32.mrb[23].mxu0  ;;  %854 = vrot.lane.b32.xlu1 %v778_v41, %s1034_s5  ;;  %v841_v0 = vmax.f32 %v821_v54, %v779_v49  ;;  %v786_v1 = vmax.f32 %v1190_v55, 0.0  ;;  %v659_v5 = vpop.f32.mrb[23].mxu1 }
 0x2aa   :  { %v785_v2 = vmax.f32 %v1193_v56, 0.0  ;;  %v1203_v4 = vadd.f32 %v657_v62, %v1185_v44  ;;  %v1206_v7 = vadd.f32 %v606_v63, %v1185_v44  ;;  %v1211_v10 = vadd.f32 %v659_v5, %v1185_v44 }
 0x2ab   :  { %v792_v6 = vmax.f32 %v605_v61, 0.0  ;;  %828 = vrot.lane.b32.xlu0 %v769_v34, %s1034_s5  ;;  %v818_v8 = vmax.f32 %v784_v59, %v786_v1  ;;  %v787_v13 = vmax.f32 %v1196_v60, 0.0 }
 0x2ac   :  { %v794_v9 = vmax.f32 %v1203_v4, 0.0  ;;  %v793_v11 = vmax.f32 %v1206_v7, 0.0  ;;  %v795_v23 = vmax.f32 %v1211_v10, 0.0 }
 0x2ad   :  { %830 = vrot.lane.b32.xlu1 %v777_v42, %s1034_s5  ;;  %v822_v12 = vmax.f32 %v818_v8, %v785_v2 }
 0x2ae   :  { %v819_v14 = vmax.f32 %v792_v6, %v794_v9  ;;  %v696_v15 = vpop.f32.mrb[24].mxu0  ;;  %v749_v17 = vpop.f32.mrb[24].mxu1 }
 0x2af   :  { %v1219_v16 = vadd.f32 %v696_v15, %v1169_v19  ;;  %v698_v18 = vpop.f32.mrb[25].mxu0  ;;  %876 = vrot.lane.b32.xlu0 %v771_v46, %s1034_s5  ;;  %v842_v21 = vmax.f32 %v822_v12, %v787_v13  ;;  %v1228_v24 = vadd.f32 %v749_v17, %v1169_v19  ;;  %v751_v25 = vpop.f32.mrb[25].mxu1 }
 0x2b0   :  { %v823_v22 = vmax.f32 %v819_v14, %v793_v11  ;;  %v700_v26 = vpop.f32.mrb[26].mxu0  ;;  %v1232_v28 = vadd.f32 %v698_v18, %v1169_v19  ;;  %v753_v29 = vpop.f32.mrb[26].mxu1  ;;  %v1241_v32 = vadd.f32 %v751_v25, %v1169_v19 }
 0x2b1   :  { %v772_v27 = vmax.f32 %v1219_v16, 0.0  ;;  %v1235_v3 = vadd.f32 %v700_v26, %v1171_v20  ;;  %v702_v30 = vpop.f32.mrb[27].mxu0  ;;  %878 = vrot.lane.b32.xlu1 %v779_v49, %s1034_s5  ;;  %v754_v33 = vadd.f32 %v753_v29, %v1171_v20  ;;  %v755_v34 = vpop.f32.mrb[27].mxu1  ;;  %v774_v36 = vmax.f32 %v1228_v24, 0.0 }
 0x2b2   :  { %v843_v31 = vmax.f32 %v823_v22, %v795_v23  ;;  %v703_v38 = vadd.f32 %v702_v30, %v1171_v20  ;;  %v1251_v39 = vadd.f32 %v755_v34, %v1171_v20  ;;  %v773_v19 = vmax.f32 %v1232_v28, 0.0 }
 0x2b3   :  { %v844_v35 = vmax.f32 %v840_v53, %v772_v27  ;;  %v780_v37 = vmax.f32 %v1235_v3, 0.0  ;;  %808 = vrot.lane.b32.xlu0 %v784_v59, %s1034_s5  ;;  %v782_v42 = vmax.f32 %v754_v33, 0.0  ;;  %v775_v45 = vmax.f32 %v1241_v32, 0.0 }
 0x2b4   :  { %v781_v49 = vmax.f32 %v703_v38, 0.0  ;;  %v783_v20 = vmax.f32 %v1251_v39, 0.0 }
 0x2b5   :  { %v864_v40 = vmax.f32 %v844_v35, %v774_v36  ;;  %v845_v41 = vmax.f32 %v841_v0, %v780_v37  ;;  %810 = vrot.lane.b32.xlu1 %v792_v6, %s1034_s5 }
 0x2b6   :  { %v706_v46 = vpop.f32.mrb[28].mxu0  ;;  %v759_v51 = vpop.f32.mrb[28].mxu1 }
 0x2b7   :  { %v868_v47 = vmax.f32 %v864_v40, %v773_v19  ;;  %v865_v48 = vmax.f32 %v845_v41, %v782_v42  ;;  %v707_v50 = vadd.f32 %v706_v46, %v1182_v43  ;;  %v708_v52 = vpop.f32.mrb[29].mxu0  ;;  %856 = vrot.lane.b32.xlu0 %v786_v1, %s1034_s5  ;;  %v760_v53 = vadd.f32 %v759_v51, %v1182_v43  ;;  %v761_v54 = vpop.f32.mrb[29].mxu1 }
 0x2b8   :  { %v710_v55 = vpop.f32.mrb[30].mxu0  ;;  %v709_v61 = vadd.f32 %v708_v52, %v1182_v43  ;;  %v763_v62 = vpop.f32.mrb[30].mxu1  ;;  %v762_v12 = vadd.f32 %v761_v54, %v1182_v43 }
 0x2b9   :  { %v1260_v57 = vmax.f32 %v868_v47, %v775_v45  ;;  %v869_v58 = vmax.f32 %v865_v48, %v781_v49  ;;  %v788_v59 = vmax.f32 %v707_v50, 0.0  ;;  %v712_v63 = vpop.f32.mrb[31].mxu0  ;;  %858 = vrot.lane.b32.xlu1 %v794_v9, %s1034_s5  ;;  %v711_v0 = vadd.f32 %v710_v55, %v1185_v44  ;;  %v765_v4 = vpop.f32.mrb[31].mxu1 }
 0x2ba   :  { %v764_v1 = vadd.f32 %v763_v62, %v1185_v44  ;;  %v790_v8 = vmax.f32 %v760_v53, 0.0  ;;  %v713_v15 = vadd.f32 %v712_v63, %v1185_v44  ;;  %v789_v9 = vmax.f32 %v709_v61, 0.0 }
 0x2bb   :  { %v1266_v5 = vmax.f32 %v869_v58, %v783_v20  ;;  %v846_v6 = vmax.f32 %v842_v21, %v788_v59  ;;  %832 = vrot.lane.b32.xlu0 %v785_v2, %s1034_s5  ;;  %v796_v14 = vmax.f32 %v711_v0, 0.0  ;;  %v766_v21 = vadd.f32 %v765_v4, %v1185_v44 }
 0x2bc   :  { %v798_v22 = vmax.f32 %v764_v1, 0.0  ;;  %v791_v25 = vmax.f32 %v762_v12, 0.0  ;;  %v797_v56 = vmax.f32 %v713_v15, 0.0 }
 0x2bd   :  { %v866_v17 = vmax.f32 %v846_v6, %v790_v8  ;;  %834 = vrot.lane.b32.xlu1 %v793_v11, %s1034_s5  ;;  %v847_v18 = vmax.f32 %v843_v31, %v796_v14  ;;  %v799_v7 = vmax.f32 %v766_v21, 0.0 }
 0x2bf   :  { %v870_v24 = vmax.f32 %v866_v17, %v789_v9  ;;  %880 = vrot.lane.b32.xlu0 %v787_v13, %s1034_s5  ;;  %v867_v43 = vmax.f32 %v847_v18, %v798_v22 }
 0x2c1   :  { %v890_v2 = vmax.f32 %v870_v24, %v791_v25  ;;  %882 = vrot.lane.b32.xlu1 %v795_v23, %s1034_s5  ;;  %v871_v26 = vmax.f32 %v867_v43, %v797_v56 }
 0x2c3   :  { %900 = vrot.lane.b32.xlu0 %v772_v27, %s1034_s5  ;;  %v891_v44 = vmax.f32 %v871_v26, %v799_v7 }
 0x2c5   :  { %902 = vrot.lane.b32.xlu1 %v780_v37, %s1034_s5 }
 0x2c7   :  { %948 = vrot.lane.b32.xlu0 %v774_v36, %s1034_s5 }
 0x2c9   :  { %950 = vrot.lane.b32.xlu1 %v782_v42, %s1034_s5 }
 0x2cb   :  { %924 = vrot.lane.b32.xlu0 %v773_v19, %s1034_s5 }
 0x2cd   :  { %926 = vrot.lane.b32.xlu1 %v781_v49, %s1034_s5 }
 0x2cf   :  { %904 = vrot.lane.b32.xlu0 %v788_v59, %s1034_s5 }
 0x2d1   :  { %906 = vrot.lane.b32.xlu1 %v796_v14, %s1034_s5 }
 0x2d3   :  { %952 = vrot.lane.b32.xlu0 %v790_v8, %s1034_s5 }
 0x2d5   :  { %954 = vrot.lane.b32.xlu1 %v798_v22, %s1034_s5 }
 0x2d7   :  { %928 = vrot.lane.b32.xlu0 %v789_v9, %s1034_s5 }
 0x2d9   :  { %930 = vrot.lane.b32.xlu1 %v797_v56, %s1034_s5 }
 0x2db   :  { %972 = vrot.lane.b32.xlu0 %v775_v45, %s1034_s5 }
 0x2dd   :  { %974 = vrot.lane.b32.xlu1 %v783_v20, %s1034_s5 }
 0x2df   :  { %976 = vrot.lane.b32.xlu0 %v791_v25, %s1034_s5 }
 0x2e1   :  { %978 = vrot.lane.b32.xlu1 %v799_v7, %s1034_s5 }
 0x315   :  { %v805_v60 = vpop.permute.xlu0 %804 }
 0x316   :  { %v892_v41 = vmax.f32 %v1260_v57, %v805_v60 }
 0x317   :  { %v807_v10 = vpop.permute.xlu1 %806 }
 0x318   :  { %v893_v45 = vmax.f32 %v1266_v5, %v807_v10 }
 0x319   :  { %v853_v11 = vpop.permute.xlu0 %852 }
 0x31a   :  { %v912_v46 = vmax.f32 %v892_v41, %v853_v11 }
 0x31b   :  { %v855_v13 = vpop.permute.xlu1 %854 }
 0x31c   :  { %v913_v48 = vmax.f32 %v893_v45, %v855_v13 }
 0x31d   :  { %v829_v16 = vpop.permute.xlu0 %828 }
 0x31e   :  { %v916_v49 = vmax.f32 %v912_v46, %v829_v16 }
 0x31f   :  { %v831_v23 = vpop.permute.xlu1 %830 }
 0x320   :  { %v917_v52 = vmax.f32 %v913_v48, %v831_v23 }
 0x321   :  { %v877_v27 = vpop.permute.xlu0 %876 }
 0x322   :  { %v936_v20 = vmax.f32 %v916_v49, %v877_v27 }
 0x323   :  { %v879_v28 = vpop.permute.xlu1 %878 }
 0x324   :  { %v937_v58 = vmax.f32 %v917_v52, %v879_v28 }
 0x325   :  { %v809_v3 = vpop.permute.xlu0 %808 }
 0x326   :  { %v894_v50 = vmax.f32 %v890_v2, %v809_v3 }
 0x327   :  { %v811_v29 = vpop.permute.xlu1 %810 }
 0x328   :  { %v895_v53 = vmax.f32 %v891_v44, %v811_v29 }
 0x329   :  { %v857_v30 = vpop.permute.xlu0 %856 }
 0x32a   :  { %v914_v54 = vmax.f32 %v894_v50, %v857_v30 }
 0x32b   :  { %v859_v31 = vpop.permute.xlu1 %858 }
 0x32c   :  { %v915_v59 = vmax.f32 %v895_v53, %v859_v31 }
 0x32d   :  { %v833_v32 = vpop.permute.xlu0 %832 }
 0x32e   :  { %v918_v61 = vmax.f32 %v914_v54, %v833_v32 }
 0x32f   :  { %v835_v33 = vpop.permute.xlu1 %834 }
 0x330   :  { %v919_v57 = vmax.f32 %v915_v59, %v835_v33 }
 0x331   :  { %v881_v34 = vpop.permute.xlu0 %880 }
 0x332   :  { %v938_v0 = vmax.f32 %v918_v61, %v881_v34 }
 0x333   :  { %v883_v35 = vpop.permute.xlu1 %882 }
 0x334   :  { %v939_v6 = vmax.f32 %v919_v57, %v883_v35 }
 0x335   :  { %v901_v36 = vpop.permute.xlu0 %900 }
 0x336   :  { %v940_v62 = vmax.f32 %v936_v20, %v901_v36 }
 0x337   :  { %v903_v37 = vpop.permute.xlu1 %902 }
 0x338   :  { %v941_v1 = vmax.f32 %v937_v58, %v903_v37 }
 0x339   :  { %v949_v38 = vpop.permute.xlu0 %948 }
 0x33a   :  { %v960_v4 = vmax.f32 %v940_v62, %v949_v38 }
 0x33b   :  { %v951_v39 = vpop.permute.xlu1 %950 }
 0x33c   :  { %v961_v8 = vmax.f32 %v941_v1, %v951_v39 }
 0x33d   :  { %v925_v40 = vpop.permute.xlu0 %924 }
 0x33e   :  { %v964_v12 = vmax.f32 %v960_v4, %v925_v40 }
 0x33f   :  { %v927_v19 = vpop.permute.xlu1 %926 }
 0x340   :  { %v965_v17 = vmax.f32 %v961_v8, %v927_v19 }
 0x341   :  { %v905_v42 = vpop.permute.xlu0 %904 }
 0x342   :  { %v942_v14 = vmax.f32 %v938_v0, %v905_v42 }
 0x343   :  { %v907_v47 = vpop.permute.xlu1 %906 }
 0x344   :  { %v943_v9 = vmax.f32 %v939_v6, %v907_v47 }
 0x345   :  { %v953_v51 = vpop.permute.xlu0 %952 }
 0x346   :  { %v962_v18 = vmax.f32 %v942_v14, %v953_v51 }
 0x347   :  { %v955_v55 = vpop.permute.xlu1 %954 }
 0x348   :  { %v963_v24 = vmax.f32 %v943_v9, %v955_v55 }
 0x349   :  { %v929_v63 = vpop.permute.xlu0 %928 }
 0x34a   :  { %v966_v25 = vmax.f32 %v962_v18, %v929_v63 }
 0x34b   :  { %v931_v5 = vpop.permute.xlu1 %930 }
 0x34c   :  { %v967_v2 = vmax.f32 %v963_v24, %v931_v5 }
 0x34d   :  { %v973_v15 = vpop.permute.xlu0 %972 }
 0x34e   :  { %v984_v22 = vmax.f32 %v964_v12, %v973_v15 }
 0x34f   :  { %v975_v21 = vpop.permute.xlu1 %974 }
 0x350   :  { %989 = vst.msk [vmem:[%s1326_s7] sm:$0xff] %vm988_vm1, %v984_v22  ;;  %v985_v43 = vmax.f32 %v965_v17, %v975_v21 }
 0x351   :  { %v977_v56 = vpop.permute.xlu0 %976 }
 0x352   :  { %990 = vst.msk [vmem:[%s1326_s7 + $0x8] sm:$0xff] %vm988_vm1, %v985_v43  ;;  %v986_v26 = vmax.f32 %v966_v25, %v977_v56 }
 0x353   :  { %v979_v7 = vpop.permute.xlu1 %978 }
 0x354   :  { %991 = vst.msk [vmem:[%s1326_s7 + $0x10] sm:$0xff] %vm988_vm1, %v986_v26  ;;  %v987_v44 = vmax.f32 %v967_v2, %v979_v7 }
 0x356   :  { %992 = vst.msk [vmem:[%s1326_s7 + $0x18] sm:$0xff] %vm988_vm1, %v987_v44 }

// kernel: custom-call.27
= control target key start
LH: loop header
LB: loop body
LE: loop exit
PB: predicated region body
PF: predicated region fallthrough
CT: control target
= control target key end

     0   :  { %s6_s0 = inlined_call_operand.vmem [shape: f32[2,32], index: 0, kind: output, shape index: {}]  }

// kernel: forward.10
= control target key start
LH: loop header
LB: loop body
LE: loop exit
PB: predicated region body
PF: predicated region fallthrough
CT: control target
= control target key end

     0   :  { %v589_v1 = vmov 0   ;;  %vm70_vm0 = vcmask 130048   ;;  %vm550_vm1 = vcmask 523264   ;;  %s749_s0 = inlined_call_operand.vmem [shape: bf16[16,512], index: 0, kind: input, shape index: {}]   ;;  %s750_s1 = inlined_call_operand.vmem [shape: bf16[16,16], index: 1, kind: input, shape index: {}]   ;;  %s751_s2 = inlined_call_operand.vmem [shape: f32[16,1], index: 2, kind: input, shape index: {}, may-alias: {2,4}]   ;;  %s752_s6 = inlined_call_operand.vmem [shape: f32[32,1], index: 6, kind: input, shape index: {}]   ;;  %s753_s3 = inlined_call_operand.vmem [shape: bf16[16,16], index: 3, kind: input, shape index: {}]   ;;  %s754_s4 = inlined_call_operand.vmem [shape: f32[16,1], index: 4, kind: input, shape index: {}, may-alias: {2,4}]   ;;  %s755_s5 = inlined_call_operand.vmem [shape: bf16[32,16], index: 5, kind: input, shape index: {}]   ;;  %s756_s7 = inlined_call_operand.vmem [shape: f32[32,64], index: 7, kind: output, shape index: {}]  }
   0x1   :  { %v579_v0 = vld [vmem:[%s749_s0 + $0x4] ss:$16 sps:$4 sm:$0xff]   ;;  %106 = vmatprep.mubr.bf16.mxu0 %v589_v1  ;;  %149 = vmatprep.mubr.bf16.mxu1 %v589_v1  ;;  %v581_v2 = vld [vmem:[%s749_s0 + $0xc] ss:$16 sps:$4 sm:$0xff]   ;;  %v583_v3 = vld [vmem:[%s749_s0] ss:$16 sps:$4 sm:$0xff]  }
   0x2   :  { %577 = vset.pattern.permute.xlu0 %v589_v1  ;;  %578 = vset.pattern.permute.xlu1 %v589_v1  ;;  %v584_v4 = vld [vmem:[%s749_s0 + $0x8] ss:$16 sps:$4 sm:$0xff]   ;;  %v585_v5 = vld [vmem:[%s750_s1] sm:$0xff]   ;;  %v294_v9 = vld [vmem:[%s752_s6 + $0x10] sm:$0xff] }
   0x3   :  { %74 = vmatprep.subr.bf16.mxu0 %v579_v0  ;;  %117 = vmatprep.subr.bf16.mxu1 %v581_v2  ;;  %v33_v6 = vld [vmem:[%s751_s2] sm:$0xff]  ;;  %v34_v7 = vld [vmem:[%s751_s2 + $0x8] sm:$0xff]  ;;  %v295_v13 = vld [vmem:[%s752_s6 + $0x18] sm:$0xff] }
   0x4   :  { %75 = vmatpush1.bf16.msra.mxu0 %v583_v3  ;;  %118 = vmatpush1.bf16.msra.mxu1 %v584_v4  ;;  %v292_v8 = vld [vmem:[%s752_s6] sm:$0xff]  ;;  %v171_v11 = vld [vmem:[%s754_s4 + $0x8] sm:$0xff] }
   0x5   :  { %37 = vperm.xlu0 %577, %v33_v6   ;;  %v170_v10 = vld [vmem:[%s754_s4] sm:$0xff]  ;;  %v293_v12 = vld [vmem:[%s752_s6 + $0x8] sm:$0xff] }
   0x6   :  { %178 = vperm.xlu1 %578, %v170_v10   ;;  %v586_v44 = vld [vmem:[%s753_s3] sm:$0xff]  }
   0x7   :  { %564 = vmatmul.mubr.msk.bf16.vlgmr.msra.gmra.mrb[0].mxu0 %vm70_vm0, %v585_v5  ;;  %565 = vmatmul.mubr.msk.bf16.vlgmr.msra.gmra.mrb[0].mxu1 %vm70_vm0, %v585_v5 }
   0x8   :  { %226 = vmatprep.mubr.bf16.mxu0 %v589_v1  ;;  %269 = vmatprep.mubr.bf16.mxu1 %v589_v1 }
   0x9   :  { %42 = vperm.xlu0 %577, %v34_v7  }
   0xa   :  { %183 = vperm.xlu1 %578, %v171_v11  }
   0xd   :  { %302 = vperm.xlu0 %577, %v292_v8  }
   0xe   :  { %307 = vperm.xlu1 %578, %v293_v12   ;;  %v587_v12 = vld [vmem:[%s755_s5] sm:$0xff]  }
  0x11   :  { %312 = vperm.xlu0 %577, %v294_v9  }
  0x12   :  { %317 = vperm.xlu1 %578, %v295_v13   ;;  %v588_v13 = vld [vmem:[%s755_s5 + $0x8] sm:$0xff]   ;;  %s590_s5 = smov 64  }
  0x84   :  { %v38_v14 = vpop.permute.xlu0 %37 }
  0x85   :  { %v179_v45 = vpop.permute.xlu1 %178 }
  0x88   :  { %v43_v15 = vpop.permute.xlu0 %42 }
  0x89   :  { %v184_v46 = vpop.permute.xlu1 %183 }
  0xda   :  { %v108_v16 = vpop.f32.mrb[0].mxu0  ;;  %v151_v17 = vpop.f32.mrb[0].mxu1 }
  0xdb   :  { %v109_v18 = vadd.f32 %v108_v16, %v38_v14  ;;  %v152_v19 = vadd.f32 %v151_v17, %v38_v14  ;;  %v110_v20 = vpop.f32.mrb[1].mxu0  ;;  %v153_v21 = vpop.f32.mrb[1].mxu1 }
  0xdc   :  { %v111_v22 = vadd.f32 %v110_v20, %v38_v14  ;;  %v154_v23 = vadd.f32 %v153_v21, %v38_v14  ;;  %v112_v24 = vpop.f32.mrb[2].mxu0  ;;  %v155_v25 = vpop.f32.mrb[2].mxu1 }
  0xdd   :  { %v113_v26 = vadd.f32 %v112_v24, %v43_v15  ;;  %v156_v27 = vadd.f32 %v155_v25, %v43_v15  ;;  %v114_v28 = vpop.f32.mrb[3].mxu0  ;;  %v157_v29 = vpop.f32.mrb[3].mxu1  ;;  %v160_v32 = vmax.f32 %v109_v18, 0.0  ;;  %v162_v33 = vmax.f32 %v152_v19, 0.0 }
  0xde   :  { %v115_v30 = vadd.f32 %v114_v28, %v43_v15  ;;  %v158_v31 = vadd.f32 %v157_v29, %v43_v15  ;;  %v161_v36 = vmax.f32 %v111_v22, 0.0  ;;  %v163_v37 = vmax.f32 %v154_v23, 0.0  ;;  %v303_v14 = vpop.permute.xlu0 %302  ;;  %v308_v15 = vpop.permute.xlu1 %307 }
  0xdf   :  { %v164_v34 = vmax.f32 %v113_v26, 0.0  ;;  %v166_v35 = vmax.f32 %v156_v27, 0.0 }
  0xe0   :  { %v165_v38 = vmax.f32 %v115_v30, 0.0  ;;  %v167_v39 = vmax.f32 %v158_v31, 0.0 }
  0xe1   :  { %v172_v40 = vpack.c.bf16 %v164_v34, %v160_v32  ;;  %v174_v41 = vpack.c.bf16 %v166_v35, %v162_v33 }
  0xe2   :  { %v173_v42 = vpack.c.bf16 %v165_v38, %v161_v36  ;;  %v175_v43 = vpack.c.bf16 %v167_v39, %v163_v37  ;;  %v313_v29 = vpop.permute.xlu0 %312 }
  0xe4   :  { %194 = vmatprep.subr.bf16.mxu0 %v173_v42  ;;  %237 = vmatprep.subr.bf16.mxu1 %v175_v43 }
  0xe5   :  { %195 = vmatpush1.bf16.msra.mxu0 %v172_v40  ;;  %238 = vmatpush1.bf16.msra.mxu1 %v174_v41 }
  0xe8   :  { %567 = vmatmul.mubr.msk.bf16.vlgmr.msra.gmra.mrb[4].mxu0 %vm70_vm0, %v586_v44  ;;  %568 = vmatmul.mubr.msk.bf16.vlgmr.msra.gmra.mrb[4].mxu1 %vm70_vm0, %v586_v44  ;;  %v318_v44 = vpop.permute.xlu1 %317 }
  0xe9   :  { %368 = vmatprep.mubr.bf16.mxu0 %v589_v1  ;;  %421 = vmatprep.mubr.bf16.mxu1 %v589_v1 }
 0x1bb   :  { %v228_v47 = vpop.f32.mrb[4].mxu0  ;;  %v271_v48 = vpop.f32.mrb[4].mxu1 }
 0x1bc   :  { %v229_v49 = vadd.f32 %v228_v47, %v179_v45  ;;  %v272_v50 = vadd.f32 %v271_v48, %v179_v45  ;;  %v230_v51 = vpop.f32.mrb[5].mxu0  ;;  %v273_v52 = vpop.f32.mrb[5].mxu1 }
 0x1bd   :  { %v231_v53 = vadd.f32 %v230_v51, %v179_v45  ;;  %v274_v54 = vadd.f32 %v273_v52, %v179_v45  ;;  %v232_v55 = vpop.f32.mrb[6].mxu0  ;;  %v275_v56 = vpop.f32.mrb[6].mxu1 }
 0x1be   :  { %v233_v57 = vadd.f32 %v232_v55, %v184_v46  ;;  %v276_v58 = vadd.f32 %v275_v56, %v184_v46  ;;  %v234_v59 = vpop.f32.mrb[7].mxu0  ;;  %v277_v60 = vpop.f32.mrb[7].mxu1  ;;  %v280_v63 = vmax.f32 %v229_v49, 0.0  ;;  %v282_v0 = vmax.f32 %v272_v50, 0.0 }
 0x1bf   :  { %v235_v61 = vadd.f32 %v234_v59, %v184_v46  ;;  %v278_v62 = vadd.f32 %v277_v60, %v184_v46  ;;  %v281_v4 = vmax.f32 %v231_v53, 0.0  ;;  %v283_v5 = vmax.f32 %v274_v54, 0.0 }
 0x1c0   :  { %v284_v2 = vmax.f32 %v233_v57, 0.0  ;;  %v286_v3 = vmax.f32 %v276_v58, 0.0 }
 0x1c1   :  { %v285_v6 = vmax.f32 %v235_v61, 0.0  ;;  %v287_v7 = vmax.f32 %v278_v62, 0.0 }
 0x1c2   :  { %v296_v8 = vpack.c.bf16 %v284_v2, %v280_v63  ;;  %v298_v9 = vpack.c.bf16 %v286_v3, %v282_v0 }
 0x1c3   :  { %v297_v10 = vpack.c.bf16 %v285_v6, %v281_v4  ;;  %v299_v11 = vpack.c.bf16 %v287_v7, %v283_v5 }
 0x1c5   :  { %336 = vmatprep.subr.bf16.mxu0 %v297_v10  ;;  %389 = vmatprep.subr.bf16.mxu1 %v299_v11 }
 0x1c6   :  { %337 = vmatpush1.bf16.msra.mxu0 %v296_v8  ;;  %390 = vmatpush1.bf16.msra.mxu1 %v298_v9 }
 0x1c9   :  { %571 = vmatmul.mubr.msk.bf16.vlgmr.msra.gmra.mrb[8].mxu0 %vm70_vm0, %v587_v12  ;;  %573 = vmatmul.mubr.msk.bf16.vlgmr.msra.gmra.mrb[8].mxu1 %vm70_vm0, %v587_v12 }
 0x1ca   :  { %378 = vmatprep.mubr.bf16.mxu0 %v589_v1  ;;  %431 = vmatprep.mubr.bf16.mxu1 %v589_v1 }
 0x1d1   :  { %572 = vmatmul.mubr.msk.bf16.gmra.mrb[12].mxu0 %vm70_vm0, %v588_v13  ;;  %574 = vmatmul.mubr.msk.bf16.gmra.mrb[12].mxu1 %vm70_vm0, %v588_v13 }
 0x29c   :  { %v370_v16 = vpop.f32.mrb[8].mxu0  ;;  %v423_v17 = vpop.f32.mrb[8].mxu1 }
 0x29d   :  { %v697_v18 = vadd.f32 %v370_v16, %v303_v14  ;;  %v372_v19 = vpop.f32.mrb[9].mxu0  ;;  %v425_v20 = vpop.f32.mrb[9].mxu1  ;;  %v700_v23 = vadd.f32 %v423_v17, %v303_v14 }
 0x29e   :  { %v374_v21 = vpop.f32.mrb[10].mxu0  ;;  %v427_v22 = vpop.f32.mrb[10].mxu1  ;;  %v373_v31 = vadd.f32 %v372_v19, %v303_v14  ;;  %v426_v55 = vadd.f32 %v425_v20, %v303_v14 }
 0x29f   :  { %v442_v1 = vmax.f32 %v697_v18, 0.0  ;;  %v702_v24 = vadd.f32 %v374_v21, %v308_v15  ;;  %v376_v25 = vpop.f32.mrb[11].mxu0  ;;  %v429_v26 = vpop.f32.mrb[11].mxu1  ;;  %v705_v28 = vadd.f32 %v427_v22, %v308_v15  ;;  %v444_v30 = vmax.f32 %v700_v23, 0.0 }
 0x2a0   :  { %v377_v35 = vadd.f32 %v376_v25, %v308_v15  ;;  %v443_v40 = vmax.f32 %v373_v31, 0.0  ;;  %v430_v57 = vadd.f32 %v429_v26, %v308_v15  ;;  %v445_v59 = vmax.f32 %v426_v55, 0.0 }
 0x2a1   :  { %v446_v27 = vmax.f32 %v702_v24, 0.0  ;;  %462 = vrot.lane.b32.xlu0 %v442_v1, %s590_s5  ;;  %v448_v34 = vmax.f32 %v705_v28, 0.0 }
 0x2a2   :  { %v447_v45 = vmax.f32 %v377_v35, 0.0  ;;  %v449_v61 = vmax.f32 %v430_v57, 0.0 }
 0x2a3   :  { %464 = vrot.lane.b32.xlu1 %v446_v27, %s590_s5 }
 0x2a4   :  { %v380_v32 = vpop.f32.mrb[12].mxu0  ;;  %v433_v33 = vpop.f32.mrb[12].mxu1 }
 0x2a5   :  { %v382_v36 = vpop.f32.mrb[13].mxu0  ;;  %v435_v37 = vpop.f32.mrb[13].mxu1  ;;  %510 = vrot.lane.b32.xlu0 %v444_v30, %s590_s5  ;;  %v381_v41 = vadd.f32 %v380_v32, %v313_v29  ;;  %v434_v48 = vadd.f32 %v433_v33, %v313_v29 }
 0x2a6   :  { %v384_v38 = vpop.f32.mrb[14].mxu0  ;;  %v437_v39 = vpop.f32.mrb[14].mxu1  ;;  %v383_v52 = vadd.f32 %v382_v36, %v313_v29  ;;  %v436_v60 = vadd.f32 %v435_v37, %v313_v29 }
 0x2a7   :  { %v386_v42 = vpop.f32.mrb[15].mxu0  ;;  %v439_v43 = vpop.f32.mrb[15].mxu1  ;;  %512 = vrot.lane.b32.xlu1 %v448_v34, %s590_s5  ;;  %v385_v46 = vadd.f32 %v384_v38, %v318_v44  ;;  %v450_v47 = vmax.f32 %v381_v41, 0.0  ;;  %v438_v50 = vadd.f32 %v437_v39, %v318_v44  ;;  %v452_v51 = vmax.f32 %v434_v48, 0.0 }
 0x2a8   :  { %v387_v54 = vadd.f32 %v386_v42, %v318_v44  ;;  %v451_v56 = vmax.f32 %v383_v52, 0.0  ;;  %v440_v62 = vadd.f32 %v439_v43, %v318_v44  ;;  %v453_v63 = vmax.f32 %v436_v60, 0.0 }
 0x2a9   :  { %486 = vrot.lane.b32.xlu0 %v443_v40, %s590_s5  ;;  %v454_v49 = vmax.f32 %v385_v46, 0.0  ;;  %v456_v53 = vmax.f32 %v438_v50, 0.0 }
 0x2aa   :  { %v455_v58 = vmax.f32 %v387_v54, 0.0  ;;  %v457_v0 = vmax.f32 %v440_v62, 0.0 }
 0x2ab   :  { %488 = vrot.lane.b32.xlu1 %v447_v45, %s590_s5 }
 0x2ad   :  { %466 = vrot.lane.b32.xlu0 %v450_v47, %s590_s5 }
 0x2af   :  { %468 = vrot.lane.b32.xlu1 %v454_v49, %s590_s5 }
 0x2b1   :  { %514 = vrot.lane.b32.xlu0 %v452_v51, %s590_s5 }
 0x2b3   :  { %516 = vrot.lane.b32.xlu1 %v456_v53, %s590_s5 }
 0x2b5   :  { %490 = vrot.lane.b32.xlu0 %v451_v56, %s590_s5 }
 0x2b7   :  { %492 = vrot.lane.b32.xlu1 %v455_v58, %s590_s5 }
 0x2b9   :  { %534 = vrot.lane.b32.xlu0 %v445_v59, %s590_s5 }
 0x2bb   :  { %536 = vrot.lane.b32.xlu1 %v449_v61, %s590_s5 }
 0x2bd   :  { %538 = vrot.lane.b32.xlu0 %v453_v63, %s590_s5 }
 0x2bf   :  { %540 = vrot.lane.b32.xlu1 %v457_v0, %s590_s5 }
 0x313   :  { %v463_v2 = vpop.permute.xlu0 %462 }
 0x314   :  { %v474_v5 = vmax.f32 %v442_v1, %v463_v2 }
 0x315   :  { %v465_v3 = vpop.permute.xlu1 %464 }
 0x316   :  { %v475_v7 = vmax.f32 %v446_v27, %v465_v3  ;;  %v478_v9 = vmax.f32 %v474_v5, %v443_v40 }
 0x317   :  { %v511_v4 = vpop.permute.xlu0 %510 }
 0x318   :  { %v479_v12 = vmax.f32 %v475_v7, %v447_v45 }
 0x319   :  { %v513_v6 = vpop.permute.xlu1 %512 }
 0x31b   :  { %v487_v8 = vpop.permute.xlu0 %486 }
 0x31c   :  { %v498_v11 = vmax.f32 %v478_v9, %v487_v8 }
 0x31d   :  { %v489_v10 = vpop.permute.xlu1 %488 }
 0x31e   :  { %v499_v14 = vmax.f32 %v479_v12, %v489_v10  ;;  %v502_v16 = vmax.f32 %v498_v11, %v444_v30 }
 0x31f   :  { %v467_v13 = vpop.permute.xlu0 %466 }
 0x320   :  { %v476_v17 = vmax.f32 %v450_v47, %v467_v13  ;;  %v503_v20 = vmax.f32 %v499_v14, %v448_v34  ;;  %v522_v1 = vmax.f32 %v502_v16, %v511_v4 }
 0x321   :  { %v469_v15 = vpop.permute.xlu1 %468 }
 0x322   :  { %v477_v21 = vmax.f32 %v454_v49, %v469_v15  ;;  %v480_v18 = vmax.f32 %v476_v17, %v451_v56  ;;  %v523_v27 = vmax.f32 %v503_v20, %v513_v6  ;;  %v526_v32 = vmax.f32 %v522_v1, %v445_v59 }
 0x323   :  { %v515_v19 = vpop.permute.xlu0 %514 }
 0x324   :  { %v481_v26 = vmax.f32 %v477_v21, %v455_v58  ;;  %v527_v30 = vmax.f32 %v523_v27, %v449_v61 }
 0x325   :  { %v517_v22 = vpop.permute.xlu1 %516 }
 0x327   :  { %v491_v24 = vpop.permute.xlu0 %490 }
 0x328   :  { %v500_v25 = vmax.f32 %v480_v18, %v491_v24 }
 0x329   :  { %v493_v28 = vpop.permute.xlu1 %492 }
 0x32a   :  { %v504_v29 = vmax.f32 %v500_v25, %v452_v51  ;;  %v501_v31 = vmax.f32 %v481_v26, %v493_v28 }
 0x32b   :  { %v535_v33 = vpop.permute.xlu0 %534 }
 0x32c   :  { %v505_v35 = vmax.f32 %v501_v31, %v456_v53  ;;  %v546_v23 = vmax.f32 %v526_v32, %v535_v33  ;;  %v524_v36 = vmax.f32 %v504_v29, %v515_v19 }
 0x32d   :  { %v537_v37 = vpop.permute.xlu1 %536 }
 0x32e   :  { %551 = vst.msk [vmem:[%s756_s7] sm:$0xff] %vm550_vm1, %v546_v23  ;;  %v547_v34 = vmax.f32 %v527_v30, %v537_v37  ;;  %v528_v38 = vmax.f32 %v524_v36, %v453_v63  ;;  %v525_v39 = vmax.f32 %v505_v35, %v517_v22 }
 0x32f   :  { %v539_v40 = vpop.permute.xlu0 %538 }
 0x330   :  { %552 = vst.msk [vmem:[%s756_s7 + $0x8] sm:$0xff] %vm550_vm1, %v547_v34  ;;  %v548_v41 = vmax.f32 %v528_v38, %v539_v40  ;;  %v529_v42 = vmax.f32 %v525_v39, %v457_v0 }
 0x331   :  { %v541_v43 = vpop.permute.xlu1 %540 }
 0x332   :  { %553 = vst.msk [vmem:[%s756_s7 + $0x10] sm:$0xff] %vm550_vm1, %v548_v41  ;;  %v549_v44 = vmax.f32 %v529_v42, %v541_v43 }
 0x334   :  { %554 = vst.msk [vmem:[%s756_s7 + $0x18] sm:$0xff] %vm550_vm1, %v549_v44 }

// kernel: forward.14
= control target key start
LH: loop header
LB: loop body
LE: loop exit
PB: predicated region body
PF: predicated region fallthrough
CT: control target
= control target key end

     0   :  { %v1430_v1 = vmov 0   ;;  %vm233_vm0 = vcmask 916480   ;;  %vm427_vm1 = vcmask 261120   ;;  %vm675_vm2 = vcmask 392192   ;;  %s1432_s11 = smov 64   ;;  %s1433_s12 = smov 32   ;;  %s2120_s0 = inlined_call_operand.vmem [shape: bf16[112,512], index: 0, kind: input, shape index: {}]   ;;  %s2121_s1 = inlined_call_operand.vmem [shape: bf16[32,112], index: 1, kind: input, shape index: {}]   ;;  %s2122_s2 = inlined_call_operand.vmem [shape: f32[32,1], index: 2, kind: input, shape index: {}]   ;;  %s2123_s4 = inlined_call_operand.vmem [shape: f32[48,1], index: 4, kind: input, shape index: {}]   ;;  %s2124_s6 = inlined_call_operand.vmem [shape: f32[64,1], index: 6, kind: input, shape index: {}]   ;;  %s2125_s3 = inlined_call_operand.vmem [shape: bf16[48,32], index: 3, kind: input, shape index: {}]   ;;  %s2126_s5 = inlined_call_operand.vmem [shape: bf16[64,48], index: 5, kind: input, shape index: {}]   ;;  %s2127_s7 = inlined_call_operand.vmem [shape: f32[64,32], index: 7, kind: output, shape index: {}]  }
   0x1   :  { %v1379_v0 = vld [vmem:[%s2120_s0 + $0x4] ss:$16 sps:$4 sm:$0xff]   ;;  %272 = vmatprep.mubr.bf16.mxu0 %v1430_v1  ;;  %325 = vmatprep.mubr.bf16.mxu1 %v1430_v1  ;;  %v1381_v2 = vld [vmem:[%s2120_s0 + $0xc] ss:$16 sps:$4 sm:$0xff]   ;;  %v1383_v3 = vld [vmem:[%s2120_s0] ss:$16 sps:$4 sm:$0xff]  }
   0x2   :  { %1377 = vset.pattern.permute.xlu0 %v1430_v1  ;;  %1378 = vset.pattern.permute.xlu1 %v1430_v1  ;;  %v1384_v4 = vld [vmem:[%s2120_s0 + $0x8] ss:$16 sps:$4 sm:$0xff]   ;;  %v1385_v5 = vld [vmem:[%s2120_s0 + $0x24] ss:$16 sps:$4 sm:$0xff]   ;;  %v1387_v6 = vld [vmem:[%s2120_s0 + $0x2c] ss:$16 sps:$4 sm:$0xff]  }
   0x3   :  { %240 = vmatprep.subr.bf16.mxu0 %v1379_v0  ;;  %293 = vmatprep.subr.bf16.mxu1 %v1381_v2  ;;  %v1389_v7 = vld [vmem:[%s2120_s0 + $0x20] ss:$16 sps:$4 sm:$0xff]   ;;  %v1390_v8 = vld [vmem:[%s2120_s0 + $0x28] ss:$16 sps:$4 sm:$0xff]   ;;  %v1391_v9 = vld [vmem:[%s2120_s0 + $0x44] ss:$16 sps:$4 sm:$0xff]  }
   0x4   :  { %241 = vmatpush1.bf16.msra.mxu0 %v1383_v3  ;;  %294 = vmatpush1.bf16.msra.mxu1 %v1384_v4  ;;  %v1393_v10 = vld [vmem:[%s2120_s0 + $0x4c] ss:$16 sps:$4 sm:$0xff]   ;;  %v1395_v11 = vld [vmem:[%s2120_s0 + $0x40] ss:$16 sps:$4 sm:$0xff]   ;;  %v1396_v12 = vld [vmem:[%s2120_s0 + $0x48] ss:$16 sps:$4 sm:$0xff]  }
   0x5   :  { %242 = vmatprep.subr.bf16.mxu0 %v1385_v5  ;;  %295 = vmatprep.subr.bf16.mxu1 %v1387_v6  ;;  %v1397_v13 = vld [vmem:[%s2120_s0 + $0x64] ss:$16 sps:$4 sm:$0xff]   ;;  %v1399_v14 = vld [vmem:[%s2120_s0 + $0x6c] ss:$16 sps:$4 sm:$0xff]   ;;  %v1401_v15 = vld [vmem:[%s2120_s0 + $0x60] ss:$16 sps:$4 sm:$0xff]  }
   0x6   :  { %v1402_v16 = vld [vmem:[%s2120_s0 + $0x68] ss:$16 sps:$4 sm:$0xff]   ;;  %v1403_v17 = vld [vmem:[%s2120_s0 + $0x84] ss:$16 sps:$4 sm:$0xff]   ;;  %v1405_v18 = vld [vmem:[%s2120_s0 + $0x8c] ss:$16 sps:$4 sm:$0xff]  }
   0x7   :  { %v1407_v19 = vld [vmem:[%s2120_s0 + $0x80] ss:$16 sps:$4 sm:$0xff]   ;;  %v1408_v20 = vld [vmem:[%s2120_s0 + $0x88] ss:$16 sps:$4 sm:$0xff]   ;;  %v1409_v21 = vld [vmem:[%s2120_s0 + $0xa4] ss:$16 sps:$4 sm:$0xff]  }
   0x8   :  { %243 = vmatpush1.bf16.msra.mxu0 %v1389_v7  ;;  %296 = vmatpush1.bf16.msra.mxu1 %v1390_v8  ;;  %v1411_v22 = vld [vmem:[%s2120_s0 + $0xac] ss:$16 sps:$4 sm:$0xff]   ;;  %v1413_v23 = vld [vmem:[%s2120_s0 + $0xa0] ss:$16 sps:$4 sm:$0xff]   ;;  %v1414_v24 = vld [vmem:[%s2120_s0 + $0xa8] ss:$16 sps:$4 sm:$0xff]  }
   0x9   :  { %244 = vmatprep.subr.bf16.mxu0 %v1391_v9  ;;  %297 = vmatprep.subr.bf16.mxu1 %v1393_v10  ;;  %v59_v25 = vld [vmem:[%s2122_s2] sm:$0xff]  ;;  %v1417_v27 = vld [vmem:[%s2120_s0 + $0xcc] ss:$16 sps:$4 sm:$0xff]   ;;  %v61_v28 = vld [vmem:[%s2122_s2 + $0x10] sm:$0xff] }
   0xa   :  { %v1415_v26 = vld [vmem:[%s2120_s0 + $0xc4] ss:$16 sps:$4 sm:$0xff]   ;;  %65 = vperm.xlu0 %1377, %v59_v25   ;;  %75 = vperm.xlu1 %1378, %v61_v28   ;;  %v60_v29 = vld [vmem:[%s2122_s2 + $0x8] sm:$0xff]  ;;  %v62_v30 = vld [vmem:[%s2122_s2 + $0x18] sm:$0xff] }
   0xb   :  { %v1419_v31 = vld [vmem:[%s2120_s0 + $0xc0] ss:$16 sps:$4 sm:$0xff]   ;;  %v1420_v32 = vld [vmem:[%s2120_s0 + $0xc8] ss:$16 sps:$4 sm:$0xff]  }
   0xc   :  { %245 = vmatpush1.bf16.msra.mxu0 %v1395_v11  ;;  %298 = vmatpush1.bf16.msra.mxu1 %v1396_v12  ;;  %v1421_v33 = vld [vmem:[%s2121_s1] sm:$0xff]   ;;  %v369_v35 = vld [vmem:[%s2123_s4 + $0x8] sm:$0xff]  ;;  %v370_v36 = vld [vmem:[%s2123_s4 + $0x10] sm:$0xff] }
   0xd   :  { %246 = vmatprep.subr.bf16.mxu0 %v1397_v13  ;;  %299 = vmatprep.subr.bf16.mxu1 %v1399_v14  ;;  %v368_v34 = vld [vmem:[%s2123_s4] sm:$0xff]  ;;  %v371_v37 = vld [vmem:[%s2123_s4 + $0x18] sm:$0xff]  ;;  %v1422_v38 = vld [vmem:[%s2121_s1 + $0x8] sm:$0xff]  }
   0xe   :  { %70 = vperm.xlu0 %1377, %v60_v29   ;;  %80 = vperm.xlu1 %1378, %v62_v30   ;;  %v372_v39 = vld [vmem:[%s2123_s4 + $0x20] sm:$0xff]  ;;  %v373_v40 = vld [vmem:[%s2123_s4 + $0x28] sm:$0xff]  ;;  %v597_v43 = vld [vmem:[%s2124_s6 + $0x10] sm:$0xff] }
   0xf   :  { %v595_v41 = vld [vmem:[%s2124_s6] sm:$0xff]  ;;  %v596_v42 = vld [vmem:[%s2124_s6 + $0x8] sm:$0xff]  ;;  %v598_v44 = vld [vmem:[%s2124_s6 + $0x18] sm:$0xff] }
  0x10   :  { %247 = vmatpush1.bf16.msra.mxu0 %v1401_v15  ;;  %300 = vmatpush1.bf16.msra.mxu1 %v1402_v16  ;;  %v599_v45 = vld [vmem:[%s2124_s6 + $0x20] sm:$0xff]  ;;  %v600_v46 = vld [vmem:[%s2124_s6 + $0x28] sm:$0xff]  ;;  %v601_v47 = vld [vmem:[%s2124_s6 + $0x30] sm:$0xff] }
  0x11   :  { %248 = vmatprep.subr.bf16.mxu0 %v1403_v17  ;;  %301 = vmatprep.subr.bf16.mxu1 %v1405_v18  ;;  %v602_v48 = vld [vmem:[%s2124_s6 + $0x38] sm:$0xff] }
  0x12   :  { %384 = vperm.xlu0 %1377, %v368_v34   ;;  %389 = vperm.xlu1 %1378, %v369_v35  }
  0x14   :  { %249 = vmatpush1.bf16.msra.mxu0 %v1407_v19  ;;  %302 = vmatpush1.bf16.msra.mxu1 %v1408_v20 }
  0x15   :  { %250 = vmatprep.subr.bf16.mxu0 %v1409_v21  ;;  %303 = vmatprep.subr.bf16.mxu1 %v1411_v22 }
  0x16   :  { %394 = vperm.xlu0 %1377, %v370_v36   ;;  %399 = vperm.xlu1 %1378, %v371_v37  }
  0x18   :  { %251 = vmatpush1.bf16.msra.mxu0 %v1413_v23  ;;  %304 = vmatpush1.bf16.msra.mxu1 %v1414_v24 }
  0x19   :  { %252 = vmatprep.subr.bf16.mxu0 %v1415_v26  ;;  %305 = vmatprep.subr.bf16.mxu1 %v1417_v27 }
  0x1a   :  { %404 = vperm.xlu0 %1377, %v372_v39   ;;  %409 = vperm.xlu1 %1378, %v373_v40  }
  0x1c   :  { %253 = vmatpush1.bf16.msra.mxu0 %v1419_v31  ;;  %306 = vmatpush1.bf16.msra.mxu1 %v1420_v32 }
  0x1e   :  { %617 = vperm.xlu0 %1377, %v595_v41   ;;  %622 = vperm.xlu1 %1378, %v596_v42  }
  0x1f   :  { %1348 = vmatmul.mubr.msk.bf16.vlgmr.msra.gmra.mrb[0].mxu0 %vm233_vm0, %v1421_v33  ;;  %1350 = vmatmul.mubr.msk.bf16.vlgmr.msra.gmra.mrb[0].mxu1 %vm233_vm0, %v1421_v33 }
  0x20   :  { %282 = vmatprep.mubr.bf16.mxu0 %v1430_v1  ;;  %335 = vmatprep.mubr.bf16.mxu1 %v1430_v1 }
  0x22   :  { %627 = vperm.xlu0 %1377, %v597_v43   ;;  %632 = vperm.xlu1 %1378, %v598_v44  }
  0x26   :  { %637 = vperm.xlu0 %1377, %v599_v45   ;;  %642 = vperm.xlu1 %1378, %v600_v46   ;;  %v1423_v46 = vld [vmem:[%s2125_s3] sm:$0xff]  }
  0x27   :  { %1349 = vmatmul.mubr.msk.bf16.gmra.mrb[4].mxu0 %vm233_vm0, %v1422_v38  ;;  %1351 = vmatmul.mubr.msk.bf16.gmra.mrb[4].mxu1 %vm233_vm0, %v1422_v38 }
  0x28   :  { %469 = vmatprep.mubr.bf16.mxu0 %v1430_v1  ;;  %532 = vmatprep.mubr.bf16.mxu1 %v1430_v1 }
  0x2a   :  { %647 = vperm.xlu0 %1377, %v601_v47   ;;  %652 = vperm.xlu1 %1378, %v602_v48   ;;  %v1424_v47 = vld [vmem:[%s2125_s3 + $0x8] sm:$0xff]   ;;  %v1425_v48 = vld [vmem:[%s2125_s3 + $0x10] sm:$0xff]  }
  0x89   :  { %v66_v49 = vpop.permute.xlu0 %65  ;;  %v76_v51 = vpop.permute.xlu1 %75 }
  0x8d   :  { %v71_v50 = vpop.permute.xlu0 %70  ;;  %v81_v13 = vpop.permute.xlu1 %80 }
  0xf2   :  { %v274_v52 = vpop.f32.mrb[0].mxu0  ;;  %v327_v53 = vpop.f32.mrb[0].mxu1 }
  0xf3   :  { %v275_v54 = vadd.f32 %v274_v52, %v66_v49  ;;  %v328_v55 = vadd.f32 %v327_v53, %v66_v49  ;;  %v276_v56 = vpop.f32.mrb[1].mxu0  ;;  %v329_v57 = vpop.f32.mrb[1].mxu1 }
  0xf4   :  { %v277_v58 = vadd.f32 %v276_v56, %v66_v49  ;;  %v330_v59 = vadd.f32 %v329_v57, %v66_v49  ;;  %v278_v60 = vpop.f32.mrb[2].mxu0  ;;  %v331_v61 = vpop.f32.mrb[2].mxu1 }
  0xf5   :  { %v348_v62 = vmax.f32 %v328_v55, 0.0  ;;  %v279_v63 = vadd.f32 %v278_v60, %v71_v50  ;;  %v332_v0 = vadd.f32 %v331_v61, %v71_v50  ;;  %v280_v2 = vpop.f32.mrb[3].mxu0  ;;  %v333_v3 = vpop.f32.mrb[3].mxu1  ;;  %v346_v7 = vmax.f32 %v275_v54, 0.0 }
  0xf6   :  { %v349_v4 = vmax.f32 %v330_v59, 0.0  ;;  %v281_v5 = vadd.f32 %v280_v2, %v71_v50  ;;  %v334_v6 = vadd.f32 %v333_v3, %v71_v50  ;;  %v347_v10 = vmax.f32 %v277_v58, 0.0  ;;  %v385_v49 = vpop.permute.xlu0 %384  ;;  %v390_v50 = vpop.permute.xlu1 %389 }
  0xf7   :  { %v350_v8 = vmax.f32 %v279_v63, 0.0  ;;  %v352_v9 = vmax.f32 %v332_v0, 0.0 }
  0xf8   :  { %v351_v11 = vmax.f32 %v281_v5, 0.0  ;;  %v353_v12 = vmax.f32 %v334_v6, 0.0 }
  0xf9   :  { %v374_v14 = vpack.c.bf16 %v350_v8, %v346_v7  ;;  %v376_v15 = vpack.c.bf16 %v352_v9, %v348_v62 }
  0xfa   :  { %v375_v16 = vpack.c.bf16 %v351_v11, %v347_v10  ;;  %v377_v17 = vpack.c.bf16 %v353_v12, %v349_v4  ;;  %v284_v18 = vpop.f32.mrb[4].mxu0  ;;  %v337_v19 = vpop.f32.mrb[4].mxu1 }
  0xfb   :  { %v285_v20 = vadd.f32 %v284_v18, %v76_v51  ;;  %v338_v21 = vadd.f32 %v337_v19, %v76_v51  ;;  %v286_v22 = vpop.f32.mrb[5].mxu0  ;;  %v339_v23 = vpop.f32.mrb[5].mxu1 }
  0xfc   :  { %v287_v24 = vadd.f32 %v286_v22, %v76_v51  ;;  %v340_v25 = vadd.f32 %v339_v23, %v76_v51  ;;  %v288_v26 = vpop.f32.mrb[6].mxu0  ;;  %v341_v27 = vpop.f32.mrb[6].mxu1  ;;  %437 = vmatprep.subr.bf16.mxu0 %v375_v16  ;;  %500 = vmatprep.subr.bf16.mxu1 %v377_v17 }
  0xfd   :  { %v289_v28 = vadd.f32 %v288_v26, %v81_v13  ;;  %v342_v29 = vadd.f32 %v341_v27, %v81_v13  ;;  %v290_v30 = vpop.f32.mrb[7].mxu0  ;;  %v343_v31 = vpop.f32.mrb[7].mxu1  ;;  %438 = vmatpush1.bf16.msra.mxu0 %v374_v14  ;;  %501 = vmatpush1.bf16.msra.mxu1 %v376_v15  ;;  %v354_v34 = vmax.f32 %v285_v20, 0.0  ;;  %v356_v35 = vmax.f32 %v338_v21, 0.0 }
  0xfe   :  { %v291_v32 = vadd.f32 %v290_v30, %v81_v13  ;;  %v344_v33 = vadd.f32 %v343_v31, %v81_v13  ;;  %v355_v38 = vmax.f32 %v287_v24, 0.0  ;;  %v357_v39 = vmax.f32 %v340_v25, 0.0  ;;  %v395_v12 = vpop.permute.xlu0 %394  ;;  %v400_v13 = vpop.permute.xlu1 %399 }
  0xff   :  { %v358_v36 = vmax.f32 %v289_v28, 0.0  ;;  %v360_v37 = vmax.f32 %v342_v29, 0.0 }
 0x100   :  { %v359_v40 = vmax.f32 %v291_v32, 0.0  ;;  %v361_v41 = vmax.f32 %v344_v33, 0.0 }
 0x101   :  { %v378_v42 = vpack.c.bf16 %v358_v36, %v354_v34  ;;  %v380_v43 = vpack.c.bf16 %v360_v37, %v356_v35 }
 0x102   :  { %v379_v44 = vpack.c.bf16 %v359_v40, %v355_v38  ;;  %v381_v45 = vpack.c.bf16 %v361_v41, %v357_v39 }
 0x104   :  { %439 = vmatprep.subr.bf16.mxu0 %v379_v44  ;;  %502 = vmatprep.subr.bf16.mxu1 %v381_v45 }
 0x105   :  { %440 = vmatpush1.bf16.msra.mxu0 %v378_v42  ;;  %503 = vmatpush1.bf16.msra.mxu1 %v380_v43  ;;  %v405_v42 = vpop.permute.xlu0 %404  ;;  %v410_v43 = vpop.permute.xlu1 %409 }
 0x108   :  { %1355 = vmatmul.mubr.msk.bf16.vlgmr.msra.gmra.mrb[8].mxu0 %vm427_vm1, %v1423_v46  ;;  %1358 = vmatmul.mubr.msk.bf16.vlgmr.msra.gmra.mrb[8].mxu1 %vm427_vm1, %v1423_v46 }
 0x109   :  { %479 = vmatprep.mubr.bf16.mxu0 %v1430_v1  ;;  %542 = vmatprep.mubr.bf16.mxu1 %v1430_v1 }
 0x110   :  { %1356 = vmatmul.mubr.msk.bf16.gmra.mrb[12].mxu0 %vm427_vm1, %v1424_v47  ;;  %1359 = vmatmul.mubr.msk.bf16.gmra.mrb[12].mxu1 %vm427_vm1, %v1424_v47 }
 0x111   :  { %489 = vmatprep.mubr.bf16.mxu0 %v1430_v1  ;;  %552 = vmatprep.mubr.bf16.mxu1 %v1430_v1 }
 0x118   :  { %1357 = vmatmul.mubr.msk.bf16.gmra.mrb[16].mxu0 %vm427_vm1, %v1425_v48  ;;  %1360 = vmatmul.mubr.msk.bf16.gmra.mrb[16].mxu1 %vm427_vm1, %v1425_v48 }
 0x119   :  { %720 = vmatprep.mubr.bf16.mxu0 %v1430_v1  ;;  %793 = vmatprep.mubr.bf16.mxu1 %v1430_v1 }
 0x1db   :  { %v471_v51 = vpop.f32.mrb[8].mxu0  ;;  %v534_v52 = vpop.f32.mrb[8].mxu1 }
 0x1dc   :  { %v472_v53 = vadd.f32 %v471_v51, %v385_v49  ;;  %v535_v54 = vadd.f32 %v534_v52, %v385_v49  ;;  %v473_v55 = vpop.f32.mrb[9].mxu0  ;;  %v536_v56 = vpop.f32.mrb[9].mxu1 }
 0x1dd   :  { %v474_v57 = vadd.f32 %v473_v55, %v385_v49  ;;  %v537_v58 = vadd.f32 %v536_v56, %v385_v49  ;;  %v475_v59 = vpop.f32.mrb[10].mxu0  ;;  %v538_v60 = vpop.f32.mrb[10].mxu1 }
 0x1de   :  { %v476_v61 = vadd.f32 %v475_v59, %v390_v50  ;;  %v539_v62 = vadd.f32 %v538_v60, %v390_v50  ;;  %v477_v63 = vpop.f32.mrb[11].mxu0  ;;  %v540_v0 = vpop.f32.mrb[11].mxu1  ;;  %v563_v4 = vmax.f32 %v472_v53, 0.0  ;;  %v565_v5 = vmax.f32 %v535_v54, 0.0 }
 0x1df   :  { %v478_v2 = vadd.f32 %v477_v63, %v390_v50  ;;  %v541_v3 = vadd.f32 %v540_v0, %v390_v50  ;;  %v564_v8 = vmax.f32 %v474_v57, 0.0  ;;  %v566_v9 = vmax.f32 %v537_v58, 0.0 }
 0x1e0   :  { %v567_v6 = vmax.f32 %v476_v61, 0.0  ;;  %v569_v7 = vmax.f32 %v539_v62, 0.0 }
 0x1e1   :  { %v568_v10 = vmax.f32 %v478_v2, 0.0  ;;  %v570_v11 = vmax.f32 %v541_v3, 0.0 }
 0x1e2   :  { %v603_v14 = vpack.c.bf16 %v567_v6, %v563_v4  ;;  %v605_v15 = vpack.c.bf16 %v569_v7, %v565_v5 }
 0x1e3   :  { %v604_v16 = vpack.c.bf16 %v568_v10, %v564_v8  ;;  %v606_v17 = vpack.c.bf16 %v570_v11, %v566_v9  ;;  %v481_v18 = vpop.f32.mrb[12].mxu0  ;;  %v544_v19 = vpop.f32.mrb[12].mxu1 }
 0x1e4   :  { %v482_v20 = vadd.f32 %v481_v18, %v395_v12  ;;  %v545_v21 = vadd.f32 %v544_v19, %v395_v12  ;;  %v483_v22 = vpop.f32.mrb[13].mxu0  ;;  %v546_v23 = vpop.f32.mrb[13].mxu1 }
 0x1e5   :  { %v484_v24 = vadd.f32 %v483_v22, %v395_v12  ;;  %v547_v25 = vadd.f32 %v546_v23, %v395_v12  ;;  %v485_v26 = vpop.f32.mrb[14].mxu0  ;;  %v548_v27 = vpop.f32.mrb[14].mxu1  ;;  %688 = vmatprep.subr.bf16.mxu0 %v604_v16  ;;  %761 = vmatprep.subr.bf16.mxu1 %v606_v17  ;;  %v1429_v16 = vld [vmem:[%s2126_s5 + $0x18] sm:$0xff]  }
 0x1e6   :  { %v486_v28 = vadd.f32 %v485_v26, %v400_v13  ;;  %v549_v29 = vadd.f32 %v548_v27, %v400_v13  ;;  %v487_v30 = vpop.f32.mrb[15].mxu0  ;;  %v550_v31 = vpop.f32.mrb[15].mxu1  ;;  %689 = vmatpush1.bf16.msra.mxu0 %v603_v14  ;;  %762 = vmatpush1.bf16.msra.mxu1 %v605_v15  ;;  %v571_v34 = vmax.f32 %v482_v20, 0.0  ;;  %v573_v35 = vmax.f32 %v545_v21, 0.0  ;;  %v1427_v14 = vld [vmem:[%s2126_s5 + $0x8] sm:$0xff]   ;;  %v1428_v15 = vld [vmem:[%s2126_s5 + $0x10] sm:$0xff]  }
 0x1e7   :  { %v488_v32 = vadd.f32 %v487_v30, %v400_v13  ;;  %v551_v33 = vadd.f32 %v550_v31, %v400_v13  ;;  %v572_v38 = vmax.f32 %v484_v24, 0.0  ;;  %v574_v39 = vmax.f32 %v547_v25, 0.0  ;;  %v1426_v13 = vld [vmem:[%s2126_s5] sm:$0xff]   ;;  %v1677_v17 = vpop.permute.xlu0 %617  ;;  %v1679_v18 = vpop.permute.xlu1 %622  ;;  %s1431_s5 = smov 96  }
 0x1e8   :  { %v575_v36 = vmax.f32 %v486_v28, 0.0  ;;  %v577_v37 = vmax.f32 %v549_v29, 0.0 }
 0x1e9   :  { %v576_v40 = vmax.f32 %v488_v32, 0.0  ;;  %v578_v41 = vmax.f32 %v551_v33, 0.0 }
 0x1ea   :  { %v607_v44 = vpack.c.bf16 %v575_v36, %v571_v34  ;;  %v609_v45 = vpack.c.bf16 %v577_v37, %v573_v35 }
 0x1eb   :  { %v608_v46 = vpack.c.bf16 %v576_v40, %v572_v38  ;;  %v610_v47 = vpack.c.bf16 %v578_v41, %v574_v39  ;;  %v491_v48 = vpop.f32.mrb[16].mxu0  ;;  %v554_v49 = vpop.f32.mrb[16].mxu1 }
 0x1ec   :  { %v492_v50 = vadd.f32 %v491_v48, %v405_v42  ;;  %v555_v51 = vadd.f32 %v554_v49, %v405_v42  ;;  %v493_v52 = vpop.f32.mrb[17].mxu0  ;;  %v556_v53 = vpop.f32.mrb[17].mxu1 }
 0x1ed   :  { %v494_v54 = vadd.f32 %v493_v52, %v405_v42  ;;  %v557_v55 = vadd.f32 %v556_v53, %v405_v42  ;;  %v495_v56 = vpop.f32.mrb[18].mxu0  ;;  %v558_v57 = vpop.f32.mrb[18].mxu1  ;;  %690 = vmatprep.subr.bf16.mxu0 %v608_v46  ;;  %763 = vmatprep.subr.bf16.mxu1 %v610_v47 }
 0x1ee   :  { %v496_v58 = vadd.f32 %v495_v56, %v410_v43  ;;  %v559_v59 = vadd.f32 %v558_v57, %v410_v43  ;;  %v497_v60 = vpop.f32.mrb[19].mxu0  ;;  %v560_v61 = vpop.f32.mrb[19].mxu1  ;;  %691 = vmatpush1.bf16.msra.mxu0 %v607_v44  ;;  %764 = vmatpush1.bf16.msra.mxu1 %v609_v45  ;;  %v579_v0 = vmax.f32 %v492_v50, 0.0  ;;  %v581_v2 = vmax.f32 %v555_v51, 0.0 }
 0x1ef   :  { %v498_v62 = vadd.f32 %v497_v60, %v410_v43  ;;  %v561_v63 = vadd.f32 %v560_v61, %v410_v43  ;;  %v580_v5 = vmax.f32 %v494_v54, 0.0  ;;  %v582_v6 = vmax.f32 %v557_v55, 0.0  ;;  %v1691_v30 = vpop.permute.xlu0 %627  ;;  %v1693_v31 = vpop.permute.xlu1 %632 }
 0x1f0   :  { %v583_v3 = vmax.f32 %v496_v58, 0.0  ;;  %v585_v4 = vmax.f32 %v559_v59, 0.0 }
 0x1f1   :  { %v584_v7 = vmax.f32 %v498_v62, 0.0  ;;  %v586_v8 = vmax.f32 %v561_v63, 0.0 }
 0x1f2   :  { %v611_v9 = vpack.c.bf16 %v583_v3, %v579_v0  ;;  %v613_v10 = vpack.c.bf16 %v585_v4, %v581_v2 }
 0x1f3   :  { %v612_v11 = vpack.c.bf16 %v584_v7, %v580_v5  ;;  %v614_v12 = vpack.c.bf16 %v586_v8, %v582_v6  ;;  %v1719_v42 = vpop.permute.xlu0 %637  ;;  %v1721_v43 = vpop.permute.xlu1 %642 }
 0x1f5   :  { %692 = vmatprep.subr.bf16.mxu0 %v612_v11  ;;  %765 = vmatprep.subr.bf16.mxu1 %v614_v12 }
 0x1f6   :  { %693 = vmatpush1.bf16.msra.mxu0 %v611_v9  ;;  %766 = vmatpush1.bf16.msra.mxu1 %v613_v10 }
 0x1f7   :  { %v1751_v54 = vpop.permute.xlu0 %647  ;;  %v1753_v55 = vpop.permute.xlu1 %652 }
 0x1f9   :  { %1365 = vmatmul.mubr.msk.bf16.vlgmr.msra.gmra.mrb[20].mxu0 %vm675_vm2, %v1426_v13  ;;  %1369 = vmatmul.mubr.msk.bf16.vlgmr.msra.gmra.mrb[20].mxu1 %vm675_vm2, %v1426_v13 }
 0x1fa   :  { %730 = vmatprep.mubr.bf16.mxu0 %v1430_v1  ;;  %803 = vmatprep.mubr.bf16.mxu1 %v1430_v1 }
 0x201   :  { %1366 = vmatmul.mubr.msk.bf16.gmra.mrb[24].mxu0 %vm675_vm2, %v1427_v14  ;;  %1370 = vmatmul.mubr.msk.bf16.gmra.mrb[24].mxu1 %vm675_vm2, %v1427_v14 }
 0x202   :  { %740 = vmatprep.mubr.bf16.mxu0 %v1430_v1  ;;  %813 = vmatprep.mubr.bf16.mxu1 %v1430_v1 }
 0x209   :  { %1367 = vmatmul.mubr.msk.bf16.gmra.mrb[28].mxu0 %vm675_vm2, %v1428_v15  ;;  %1371 = vmatmul.mubr.msk.bf16.gmra.mrb[28].mxu1 %vm675_vm2, %v1428_v15 }
 0x20a   :  { %750 = vmatprep.mubr.bf16.mxu0 %v1430_v1  ;;  %823 = vmatprep.mubr.bf16.mxu1 %v1430_v1 }
 0x211   :  { %1368 = vmatmul.mubr.msk.bf16.gmra.mrb[32].mxu0 %vm675_vm2, %v1429_v16  ;;  %1372 = vmatmul.mubr.msk.bf16.gmra.mrb[32].mxu1 %vm675_vm2, %v1429_v16 }
 0x2cc   :  { %v722_v19 = vpop.f32.mrb[20].mxu0  ;;  %v795_v20 = vpop.f32.mrb[20].mxu1 }
 0x2cd   :  { %v723_v21 = vadd.f32 %v722_v19, %v1677_v17  ;;  %v724_v22 = vpop.f32.mrb[21].mxu0  ;;  %v1682_v23 = vpop.f32.mrb[21].mxu1  ;;  %v796_v38 = vadd.f32 %v795_v20, %v1677_v17 }
 0x2ce   :  { %v726_v1 = vpop.f32.mrb[22].mxu0  ;;  %v799_v24 = vpop.f32.mrb[22].mxu1  ;;  %v725_v56 = vadd.f32 %v724_v22, %v1677_v17  ;;  %v798_v7 = vadd.f32 %v1682_v23, %v1677_v17 }
 0x2cf   :  { %v1684_v25 = vmax.f32 %v723_v21, 0.0  ;;  %v727_v26 = vadd.f32 %v726_v1, %v1679_v18  ;;  %v728_v27 = vpop.f32.mrb[23].mxu0  ;;  %v801_v28 = vpop.f32.mrb[23].mxu1  ;;  %v800_v41 = vadd.f32 %v799_v24, %v1679_v18  ;;  %v1723_v44 = vmax.f32 %v796_v38, 0.0 }
 0x2d0   :  { %v729_v59 = vadd.f32 %v728_v27, %v1679_v18  ;;  %v1774_v2 = vmax.f32 %v725_v56, 0.0  ;;  %v802_v8 = vadd.f32 %v801_v28, %v1679_v18  ;;  %v1798_v9 = vmax.f32 %v798_v7, 0.0 }
 0x2d1   :  { %v1687_v29 = vmax.f32 %v727_v26, 0.0  ;;  %874 = vrot.lane.b32.xlu0 %v1684_v25, %s1431_s5  ;;  %v1731_v47 = vmax.f32 %v800_v41, 0.0 }
 0x2d2   :  { %v1783_v6 = vmax.f32 %v729_v59, 0.0  ;;  %v1802_v10 = vmax.f32 %v802_v8, 0.0 }
 0x2d3   :  { %876 = vrot.lane.b32.xlu1 %v1687_v29, %s1431_s5 }
 0x2d4   :  { %v1697_v32 = vpop.f32.mrb[24].mxu0  ;;  %v1699_v33 = vpop.f32.mrb[24].mxu1 }
 0x2d5   :  { %v1701_v34 = vpop.f32.mrb[25].mxu0  ;;  %v1703_v35 = vpop.f32.mrb[25].mxu1  ;;  %906 = vrot.lane.b32.xlu0 %v1684_v25, %s1432_s11  ;;  %v733_v11 = vadd.f32 %v1697_v32, %v1691_v30  ;;  %v806_v15 = vadd.f32 %v1699_v33, %v1691_v30 }
 0x2d6   :  { %v736_v36 = vpop.f32.mrb[26].mxu0  ;;  %v1707_v37 = vpop.f32.mrb[26].mxu1  ;;  %v735_v19 = vadd.f32 %v1701_v34, %v1691_v30  ;;  %v808_v23 = vadd.f32 %v1703_v35, %v1691_v30 }
 0x2d7   :  { %v1710_v39 = vpop.f32.mrb[27].mxu0  ;;  %v1712_v40 = vpop.f32.mrb[27].mxu1  ;;  %908 = vrot.lane.b32.xlu1 %v1687_v29, %s1432_s11  ;;  %v737_v12 = vadd.f32 %v736_v36, %v1693_v31  ;;  %v1817_v13 = vmax.f32 %v733_v11, 0.0  ;;  %v810_v16 = vadd.f32 %v1707_v37, %v1693_v31  ;;  %v1837_v17 = vmax.f32 %v806_v15, 0.0 }
 0x2d8   :  { %v739_v20 = vadd.f32 %v1710_v39, %v1693_v31  ;;  %v1857_v21 = vmax.f32 %v735_v19, 0.0  ;;  %v812_v1 = vadd.f32 %v1712_v40, %v1693_v31  ;;  %v1877_v24 = vmax.f32 %v808_v23, 0.0 }
 0x2d9   :  { %938 = vrot.lane.b32.xlu0 %v1684_v25, %s1433_s12  ;;  %v1821_v14 = vmax.f32 %v737_v12, 0.0  ;;  %v1841_v18 = vmax.f32 %v810_v16, 0.0 }
 0x2da   :  { %v1861_v22 = vmax.f32 %v739_v20, 0.0  ;;  %v1881_v26 = vmax.f32 %v812_v1, 0.0 }
 0x2db   :  { %940 = vrot.lane.b32.xlu1 %v1687_v29, %s1433_s12 }
 0x2dc   :  { %v1727_v45 = vpop.f32.mrb[28].mxu0  ;;  %v1729_v46 = vpop.f32.mrb[28].mxu1 }
 0x2dd   :  { %v1733_v48 = vpop.f32.mrb[29].mxu0  ;;  %v1735_v49 = vpop.f32.mrb[29].mxu1  ;;  %1098 = vrot.lane.b32.xlu0 %v1723_v44, %s1431_s5  ;;  %v743_v27 = vadd.f32 %v1727_v45, %v1719_v42  ;;  %v816_v32 = vadd.f32 %v1729_v46, %v1719_v42 }
 0x2de   :  { %v1739_v50 = vpop.f32.mrb[30].mxu0  ;;  %v1741_v51 = vpop.f32.mrb[30].mxu1  ;;  %v745_v36 = vadd.f32 %v1733_v48, %v1719_v42 }
 0x2df   :  { %v1743_v52 = vpop.f32.mrb[31].mxu0  ;;  %v1745_v53 = vpop.f32.mrb[31].mxu1  ;;  %1100 = vrot.lane.b32.xlu1 %v1731_v47, %s1431_s5  ;;  %v747_v28 = vadd.f32 %v1739_v50, %v1721_v43  ;;  %v1897_v30 = vmax.f32 %v743_v27, 0.0  ;;  %v820_v33 = vadd.f32 %v1741_v51, %v1721_v43  ;;  %v1917_v34 = vmax.f32 %v816_v32, 0.0 }
 0x2e0   :  { %v749_v38 = vadd.f32 %v1743_v52, %v1721_v43  ;;  %v1937_v40 = vmax.f32 %v745_v36, 0.0  ;;  %v818_v51 = vadd.f32 %v1735_v49, %v1719_v42  ;;  %v822_v56 = vadd.f32 %v1745_v53, %v1721_v43 }
 0x2e1   :  { %1130 = vrot.lane.b32.xlu0 %v1723_v44, %s1432_s11  ;;  %v1901_v31 = vmax.f32 %v747_v28, 0.0  ;;  %v1921_v35 = vmax.f32 %v820_v33, 0.0 }
 0x2e2   :  { %v1941_v45 = vmax.f32 %v749_v38, 0.0  ;;  %v1961_v7 = vmax.f32 %v822_v56, 0.0 }
 0x2e3   :  { %1132 = vrot.lane.b32.xlu1 %v1731_v47, %s1432_s11 }
 0x2e4   :  { %v1758_v57 = vpop.f32.mrb[32].mxu0  ;;  %v1760_v58 = vpop.f32.mrb[32].mxu1 }
 0x2e5   :  { %v1763_v60 = vpop.f32.mrb[33].mxu0  ;;  %v827_v61 = vpop.f32.mrb[33].mxu1  ;;  %1162 = vrot.lane.b32.xlu0 %v1723_v44, %s1433_s12  ;;  %v753_v43 = vadd.f32 %v1758_v57, %v1751_v54 }
 0x2e6   :  { %v1768_v62 = vadd.f32 %v827_v61, %v1751_v54  ;;  %v1770_v63 = vpop.f32.mrb[34].mxu0  ;;  %v1772_v0 = vpop.f32.mrb[34].mxu1  ;;  %v1957_v61 = vmax.f32 %v818_v51, 0.0 }
 0x2e7   :  { %v1776_v3 = vpop.f32.mrb[35].mxu0  ;;  %v831_v4 = vpop.f32.mrb[35].mxu1  ;;  %1164 = vrot.lane.b32.xlu1 %v1731_v47, %s1433_s12  ;;  %v757_v12 = vadd.f32 %v1770_v63, %v1753_v55 }
 0x2e8   :  { %v1781_v5 = vadd.f32 %v831_v4, %v1753_v55 }
 0x2e9   :  { %986 = vrot.lane.b32.xlu0 %v1774_v2, %s1431_s5  ;;  %v1979_v23 = vmax.f32 %v757_v12, 0.0 }
 0x2eb   :  { %988 = vrot.lane.b32.xlu1 %v1783_v6, %s1431_s5 }
 0x2ed   :  { %1018 = vrot.lane.b32.xlu0 %v1774_v2, %s1432_s11 }
 0x2ef   :  { %1020 = vrot.lane.b32.xlu1 %v1783_v6, %s1432_s11 }
 0x2f1   :  { %1050 = vrot.lane.b32.xlu0 %v1774_v2, %s1433_s12 }
 0x2f3   :  { %1052 = vrot.lane.b32.xlu1 %v1783_v6, %s1433_s12 }
 0x2f5   :  { %1210 = vrot.lane.b32.xlu0 %v1798_v9, %s1431_s5 }
 0x2f7   :  { %1212 = vrot.lane.b32.xlu1 %v1802_v10, %s1431_s5 }
 0x2f9   :  { %1242 = vrot.lane.b32.xlu0 %v1798_v9, %s1432_s11 }
 0x2fb   :  { %1244 = vrot.lane.b32.xlu1 %v1802_v10, %s1432_s11 }
 0x2fd   :  { %1274 = vrot.lane.b32.xlu0 %v1798_v9, %s1433_s12 }
 0x2ff   :  { %1276 = vrot.lane.b32.xlu1 %v1802_v10, %s1433_s12 }
 0x301   :  { %878 = vrot.lane.b32.xlu0 %v1817_v13, %s1431_s5 }
 0x303   :  { %880 = vrot.lane.b32.xlu1 %v1821_v14, %s1431_s5 }
 0x305   :  { %910 = vrot.lane.b32.xlu0 %v1817_v13, %s1432_s11 }
 0x307   :  { %912 = vrot.lane.b32.xlu1 %v1821_v14, %s1432_s11 }
 0x309   :  { %942 = vrot.lane.b32.xlu0 %v1817_v13, %s1433_s12 }
 0x30b   :  { %944 = vrot.lane.b32.xlu1 %v1821_v14, %s1433_s12 }
 0x30d   :  { %1102 = vrot.lane.b32.xlu0 %v1837_v17, %s1431_s5 }
 0x30f   :  { %1104 = vrot.lane.b32.xlu1 %v1841_v18, %s1431_s5 }
 0x311   :  { %1134 = vrot.lane.b32.xlu0 %v1837_v17, %s1432_s11 }
 0x313   :  { %1136 = vrot.lane.b32.xlu1 %v1841_v18, %s1432_s11 }
 0x315   :  { %1166 = vrot.lane.b32.xlu0 %v1837_v17, %s1433_s12 }
 0x317   :  { %1168 = vrot.lane.b32.xlu1 %v1841_v18, %s1433_s12 }
 0x319   :  { %990 = vrot.lane.b32.xlu0 %v1857_v21, %s1431_s5 }
 0x31b   :  { %992 = vrot.lane.b32.xlu1 %v1861_v22, %s1431_s5 }
 0x31d   :  { %1022 = vrot.lane.b32.xlu0 %v1857_v21, %s1432_s11 }
 0x31f   :  { %1024 = vrot.lane.b32.xlu1 %v1861_v22, %s1432_s11 }
 0x321   :  { %1054 = vrot.lane.b32.xlu0 %v1857_v21, %s1433_s12 }
 0x323   :  { %1056 = vrot.lane.b32.xlu1 %v1861_v22, %s1433_s12 }
 0x325   :  { %1214 = vrot.lane.b32.xlu0 %v1877_v24, %s1431_s5 }
 0x327   :  { %1216 = vrot.lane.b32.xlu1 %v1881_v26, %s1431_s5 }
 0x329   :  { %1246 = vrot.lane.b32.xlu0 %v1877_v24, %s1432_s11 }
 0x32b   :  { %1248 = vrot.lane.b32.xlu1 %v1881_v26, %s1432_s11 }
 0x32d   :  { %1278 = vrot.lane.b32.xlu0 %v1877_v24, %s1433_s12 }
 0x32f   :  { %1280 = vrot.lane.b32.xlu1 %v1881_v26, %s1433_s12 }
 0x331   :  { %882 = vrot.lane.b32.xlu0 %v1897_v30, %s1431_s5 }
 0x333   :  { %884 = vrot.lane.b32.xlu1 %v1901_v31, %s1431_s5 }
 0x335   :  { %914 = vrot.lane.b32.xlu0 %v1897_v30, %s1432_s11 }
 0x337   :  { %916 = vrot.lane.b32.xlu1 %v1901_v31, %s1432_s11 }
 0x339   :  { %946 = vrot.lane.b32.xlu0 %v1897_v30, %s1433_s12 }
 0x33b   :  { %948 = vrot.lane.b32.xlu1 %v1901_v31, %s1433_s12 }
 0x33d   :  { %1106 = vrot.lane.b32.xlu0 %v1917_v34, %s1431_s5 }
 0x33f   :  { %1108 = vrot.lane.b32.xlu1 %v1921_v35, %s1431_s5 }
 0x341   :  { %1138 = vrot.lane.b32.xlu0 %v1917_v34, %s1432_s11 }
 0x343   :  { %1140 = vrot.lane.b32.xlu1 %v1921_v35, %s1432_s11  ;;  %v875_v37 = vpop.permute.xlu0 %874 }
 0x344   :  { %v898_v49 = vmax.f32 %v1684_v25, %v875_v37  ;;  %v1975_v25 = vmax.f32 %v753_v43, 0.0  ;;  %v826_v37 = vadd.f32 %v1760_v58, %v1751_v54 }
 0x345   :  { %v877_v39 = vpop.permute.xlu1 %876  ;;  %1170 = vrot.lane.b32.xlu0 %v1917_v34, %s1433_s12 }
 0x346   :  { %v899_v8 = vmax.f32 %v1687_v29, %v877_v39 }
 0x347   :  { %1172 = vrot.lane.b32.xlu1 %v1921_v35, %s1433_s12  ;;  %v907_v41 = vpop.permute.xlu0 %906 }
 0x348   :  { %v930_v11 = vmax.f32 %v898_v49, %v907_v41  ;;  %v830_v41 = vadd.f32 %v1772_v0, %v1753_v55 }
 0x349   :  { %v909_v46 = vpop.permute.xlu1 %908  ;;  %994 = vrot.lane.b32.xlu0 %v1937_v40, %s1431_s5 }
 0x34a   :  { %v931_v16 = vmax.f32 %v899_v8, %v909_v46  ;;  %v2003_v49 = vmax.f32 %v830_v41, 0.0 }
 0x34b   :  { %996 = vrot.lane.b32.xlu1 %v1941_v45, %s1431_s5  ;;  %v939_v48 = vpop.permute.xlu0 %938 }
 0x34c   :  { %v962_v19 = vmax.f32 %v930_v11, %v939_v48 }
 0x34d   :  { %v941_v50 = vpop.permute.xlu1 %940  ;;  %1026 = vrot.lane.b32.xlu0 %v1937_v40, %s1432_s11 }
 0x34e   :  { %v963_v20 = vmax.f32 %v931_v16, %v941_v50  ;;  %v970_v63 = vmax.f32 %v962_v19, %v1774_v2  ;;  %v1998_v50 = vmax.f32 %v826_v37, 0.0  ;;  %v755_v19 = vadd.f32 %v1763_v60, %v1751_v54 }
 0x34f   :  { %1028 = vrot.lane.b32.xlu1 %v1941_v45, %s1432_s11  ;;  %v1099_v52 = vpop.permute.xlu0 %1098 }
 0x350   :  { %v971_v28 = vmax.f32 %v963_v20, %v1783_v6 }
 0x351   :  { %v1101_v59 = vpop.permute.xlu1 %1100  ;;  %1058 = vrot.lane.b32.xlu0 %v1937_v40, %s1433_s12 }
 0x353   :  { %1060 = vrot.lane.b32.xlu1 %v1941_v45, %s1433_s12  ;;  %v1131_v4 = vpop.permute.xlu0 %1130 }
 0x355   :  { %v1133_v42 = vpop.permute.xlu1 %1132  ;;  %1218 = vrot.lane.b32.xlu0 %v1957_v61, %s1431_s5 }
 0x357   :  { %1220 = vrot.lane.b32.xlu1 %v1961_v7, %s1431_s5  ;;  %v1163_v53 = vpop.permute.xlu0 %1162 }
 0x359   :  { %v1165_v15 = vpop.permute.xlu1 %1164  ;;  %1250 = vrot.lane.b32.xlu0 %v1957_v61, %s1432_s11 }
 0x35b   :  { %1252 = vrot.lane.b32.xlu1 %v1961_v7, %s1432_s11  ;;  %v987_v57 = vpop.permute.xlu0 %986 }
 0x35c   :  { %v1010_v27 = vmax.f32 %v970_v63, %v987_v57 }
 0x35d   :  { %v989_v29 = vpop.permute.xlu1 %988  ;;  %886 = vrot.lane.b32.xlu0 %v1975_v25, %s1431_s5 }
 0x35e   :  { %v1011_v33 = vmax.f32 %v971_v28, %v989_v29 }
 0x35f   :  { %888 = vrot.lane.b32.xlu1 %v1979_v23, %s1431_s5  ;;  %v1019_v1 = vpop.permute.xlu0 %1018 }
 0x360   :  { %v1042_v36 = vmax.f32 %v1010_v27, %v1019_v1 }
 0x361   :  { %v1021_v32 = vpop.permute.xlu1 %1020  ;;  %918 = vrot.lane.b32.xlu0 %v1975_v25, %s1432_s11 }
 0x362   :  { %v1043_v38 = vmax.f32 %v1011_v33, %v1021_v32 }
 0x363   :  { %920 = vrot.lane.b32.xlu1 %v1979_v23, %s1432_s11  ;;  %v1051_v2 = vpop.permute.xlu0 %1050 }
 0x364   :  { %v1074_v39 = vmax.f32 %v1042_v36, %v1051_v2  ;;  %v2050_v36 = vmax.f32 %v1768_v62, 0.0  ;;  %v2055_v2 = vmax.f32 %v1781_v5, 0.0 }
 0x365   :  { %v1053_v46 = vpop.permute.xlu1 %1052  ;;  %950 = vrot.lane.b32.xlu0 %v1975_v25, %s1433_s12 }
 0x366   :  { %v1082_v6 = vmax.f32 %v1074_v39, %v1723_v44  ;;  %v1075_v48 = vmax.f32 %v1043_v38, %v1053_v46 }
 0x367   :  { %952 = vrot.lane.b32.xlu1 %v1979_v23, %s1433_s12  ;;  %v1211_v58 = vpop.permute.xlu0 %1210 }
 0x368   :  { %v1122_v51 = vmax.f32 %v1082_v6, %v1099_v52  ;;  %v1083_v56 = vmax.f32 %v1075_v48, %v1731_v47 }
 0x369   :  { %v1213_v43 = vpop.permute.xlu1 %1212  ;;  %1110 = vrot.lane.b32.xlu0 %v1998_v50, %s1431_s5 }
 0x36a   :  { %v1123_v0 = vmax.f32 %v1083_v56, %v1101_v59  ;;  %v1154_v8 = vmax.f32 %v1122_v51, %v1131_v4 }
 0x36b   :  { %1112 = vrot.lane.b32.xlu1 %v2003_v49, %s1431_s5  ;;  %v1243_v44 = vpop.permute.xlu0 %1242 }
 0x36c   :  { %v1186_v11 = vmax.f32 %v1154_v8, %v1163_v53  ;;  %v1155_v12 = vmax.f32 %v1123_v0, %v1133_v42  ;;  %v759_v42 = vadd.f32 %v1776_v3, %v1753_v55 }
 0x36d   :  { %v1245_v16 = vpop.permute.xlu1 %1244  ;;  %1142 = vrot.lane.b32.xlu0 %v1998_v50, %s1432_s11 }
 0x36e   :  { %v1194_v47 = vmax.f32 %v1186_v11, %v1798_v9  ;;  %v1187_v52 = vmax.f32 %v1155_v12, %v1165_v15  ;;  %v2021_v15 = vmax.f32 %v755_v19, 0.0  ;;  %v2025_v63 = vmax.f32 %v759_v42, 0.0 }
 0x36f   :  { %1144 = vrot.lane.b32.xlu1 %v2003_v49, %s1432_s11  ;;  %v1275_v59 = vpop.permute.xlu0 %1274 }
 0x370   :  { %v1234_v4 = vmax.f32 %v1194_v47, %v1211_v58  ;;  %v1195_v57 = vmax.f32 %v1187_v52, %v1802_v10 }
 0x371   :  { %v1277_v53 = vpop.permute.xlu1 %1276  ;;  %1174 = vrot.lane.b32.xlu0 %v1998_v50, %s1433_s12 }
 0x372   :  { %v1235_v20 = vmax.f32 %v1195_v57, %v1213_v43  ;;  %v1266_v9 = vmax.f32 %v1234_v4, %v1243_v44 }
 0x373   :  { %1176 = vrot.lane.b32.xlu1 %v2003_v49, %s1433_s12  ;;  %v879_v54 = vpop.permute.xlu0 %878 }
 0x374   :  { %v1267_v60 = vmax.f32 %v1235_v20, %v1245_v16  ;;  %v1298_v29 = vmax.f32 %v1266_v9, %v1275_v59  ;;  %v900_v39 = vmax.f32 %v1817_v13, %v879_v54 }
 0x375   :  { %v881_v10 = vpop.permute.xlu1 %880  ;;  %998 = vrot.lane.b32.xlu0 %v2021_v15, %s1431_s5 }
 0x376   :  { %1306 = vst.msk [vmem:[%s2127_s7] sm:$0xff] %vm427_vm1, %v1298_v29  ;;  %v1299_v55 = vmax.f32 %v1267_v60, %v1277_v53  ;;  %v901_v62 = vmax.f32 %v1821_v14, %v881_v10 }
 0x377   :  { %1000 = vrot.lane.b32.xlu1 %v2025_v63, %s1431_s5  ;;  %v911_v3 = vpop.permute.xlu0 %910 }
 0x378   :  { %1307 = vst.msk [vmem:[%s2127_s7 + $0x8] sm:$0xff] %vm427_vm1, %v1299_v55  ;;  %v932_v46 = vmax.f32 %v900_v39, %v911_v3 }
 0x379   :  { %v913_v1 = vpop.permute.xlu1 %912  ;;  %1030 = vrot.lane.b32.xlu0 %v2021_v15, %s1432_s11 }
 0x37a   :  { %v933_v48 = vmax.f32 %v901_v62, %v913_v1 }
 0x37b   :  { %1032 = vrot.lane.b32.xlu1 %v2025_v63, %s1432_s11  ;;  %v943_v27 = vpop.permute.xlu0 %942 }
 0x37c   :  { %v964_v5 = vmax.f32 %v932_v46, %v943_v27 }
 0x37d   :  { %v945_v28 = vpop.permute.xlu1 %944  ;;  %1062 = vrot.lane.b32.xlu0 %v2021_v15, %s1433_s12 }
 0x37e   :  { %v965_v51 = vmax.f32 %v933_v48, %v945_v28  ;;  %v972_v13 = vmax.f32 %v964_v5, %v1857_v21 }
 0x37f   :  { %1064 = vrot.lane.b32.xlu1 %v2025_v63, %s1433_s12  ;;  %v1103_v32 = vpop.permute.xlu0 %1102 }
 0x380   :  { %v973_v0 = vmax.f32 %v965_v51, %v1861_v22 }
 0x381   :  { %v1105_v33 = vpop.permute.xlu1 %1104  ;;  %1282 = vrot.lane.b32.xlu0 %v1957_v61, %s1433_s12 }
 0x383   :  { %1284 = vrot.lane.b32.xlu1 %v1961_v7, %s1433_s12  ;;  %v1135_v37 = vpop.permute.xlu0 %1134 }
 0x385   :  { %v1137_v38 = vpop.permute.xlu1 %1136  ;;  %1222 = vrot.lane.b32.xlu0 %v2050_v36, %s1431_s5 }
 0x387   :  { %1224 = vrot.lane.b32.xlu1 %v2055_v2, %s1431_s5  ;;  %v1167_v41 = vpop.permute.xlu0 %1166 }
 0x389   :  { %v1169_v6 = vpop.permute.xlu1 %1168  ;;  %1254 = vrot.lane.b32.xlu0 %v2050_v36, %s1432_s11 }
 0x38b   :  { %1256 = vrot.lane.b32.xlu1 %v2055_v2, %s1432_s11  ;;  %v991_v58 = vpop.permute.xlu0 %990 }
 0x38c   :  { %v1012_v43 = vmax.f32 %v972_v13, %v991_v58 }
 0x38d   :  { %v993_v56 = vpop.permute.xlu1 %992  ;;  %1286 = vrot.lane.b32.xlu0 %v2050_v36, %s1433_s12 }
 0x38e   :  { %v1013_v44 = vmax.f32 %v973_v0, %v993_v56 }
 0x38f   :  { %1288 = vrot.lane.b32.xlu1 %v2055_v2, %s1433_s12  ;;  %v1023_v14 = vpop.permute.xlu0 %1022 }
 0x390   :  { %v1044_v11 = vmax.f32 %v1012_v43, %v1023_v14 }
 0x391   :  { %v1025_v8 = vpop.permute.xlu1 %1024 }
 0x392   :  { %v1045_v16 = vmax.f32 %v1013_v44, %v1025_v8 }
 0x393   :  { %v1055_v12 = vpop.permute.xlu0 %1054 }
 0x394   :  { %v1076_v47 = vmax.f32 %v1044_v11, %v1055_v12 }
 0x395   :  { %v1057_v52 = vpop.permute.xlu1 %1056 }
 0x396   :  { %v1084_v19 = vmax.f32 %v1076_v47, %v1837_v17  ;;  %v1077_v59 = vmax.f32 %v1045_v16, %v1057_v52 }
 0x397   :  { %v1215_v4 = vpop.permute.xlu0 %1214 }
 0x398   :  { %v1124_v57 = vmax.f32 %v1084_v19, %v1103_v32  ;;  %v1085_v21 = vmax.f32 %v1077_v59, %v1841_v18 }
 0x399   :  { %v1217_v42 = vpop.permute.xlu1 %1216 }
 0x39a   :  { %v1125_v53 = vmax.f32 %v1085_v21, %v1105_v33  ;;  %v1156_v20 = vmax.f32 %v1124_v57, %v1135_v37 }
 0x39b   :  { %v1247_v9 = vpop.permute.xlu0 %1246 }
 0x39c   :  { %v1188_v54 = vmax.f32 %v1156_v20, %v1167_v41  ;;  %v1157_v22 = vmax.f32 %v1125_v53, %v1137_v38 }
 0x39d   :  { %v1249_v60 = vpop.permute.xlu1 %1248 }
 0x39e   :  { %v1196_v29 = vmax.f32 %v1188_v54, %v1877_v24  ;;  %v1189_v10 = vmax.f32 %v1157_v22, %v1169_v6 }
 0x39f   :  { %v1279_v55 = vpop.permute.xlu0 %1278 }
 0x3a0   :  { %v1236_v3 = vmax.f32 %v1196_v29, %v1215_v4  ;;  %v1197_v1 = vmax.f32 %v1189_v10, %v1881_v26 }
 0x3a1   :  { %v1281_v17 = vpop.permute.xlu1 %1280 }
 0x3a2   :  { %v1237_v27 = vmax.f32 %v1197_v1, %v1217_v42  ;;  %v1268_v28 = vmax.f32 %v1236_v3, %v1247_v9 }
 0x3a3   :  { %v883_v32 = vpop.permute.xlu0 %882 }
 0x3a4   :  { %v1269_v39 = vmax.f32 %v1237_v27, %v1249_v60  ;;  %v1300_v18 = vmax.f32 %v1268_v28, %v1279_v55  ;;  %v902_v44 = vmax.f32 %v1897_v30, %v883_v32 }
 0x3a5   :  { %v885_v62 = vpop.permute.xlu1 %884 }
 0x3a6   :  { %1308 = vst.msk [vmem:[%s2127_s7 + $0x10] sm:$0xff] %vm427_vm1, %v1300_v18  ;;  %v1301_v33 = vmax.f32 %v1269_v39, %v1281_v17  ;;  %v903_v12 = vmax.f32 %v1901_v31, %v885_v62 }
 0x3a7   :  { %v915_v37 = vpop.permute.xlu0 %914 }
 0x3a8   :  { %1309 = vst.msk [vmem:[%s2127_s7 + $0x18] sm:$0xff] %vm427_vm1, %v1301_v33  ;;  %v934_v16 = vmax.f32 %v902_v44, %v915_v37 }
 0x3a9   :  { %v917_v24 = vpop.permute.xlu1 %916 }
 0x3aa   :  { %v935_v52 = vmax.f32 %v903_v12, %v917_v24 }
 0x3ab   :  { %v947_v26 = vpop.permute.xlu0 %946 }
 0x3ac   :  { %v966_v19 = vmax.f32 %v934_v16, %v947_v26 }
 0x3ad   :  { %v949_v38 = vpop.permute.xlu1 %948 }
 0x3ae   :  { %v967_v4 = vmax.f32 %v935_v52, %v949_v38  ;;  %v974_v21 = vmax.f32 %v966_v19, %v1937_v40 }
 0x3af   :  { %v1107_v41 = vpop.permute.xlu0 %1106 }
 0x3b0   :  { %v975_v20 = vmax.f32 %v967_v4, %v1941_v45 }
 0x3b1   :  { %v1109_v46 = vpop.permute.xlu1 %1108 }
 0x3b3   :  { %v1139_v6 = vpop.permute.xlu0 %1138 }
 0x3b5   :  { %v1141_v48 = vpop.permute.xlu1 %1140 }
 0x3b7   :  { %v1171_v5 = vpop.permute.xlu0 %1170 }
 0x3b9   :  { %v1173_v58 = vpop.permute.xlu1 %1172 }
 0x3bb   :  { %v995_v51 = vpop.permute.xlu0 %994 }
 0x3bc   :  { %v1014_v53 = vmax.f32 %v974_v21, %v995_v51 }
 0x3bd   :  { %v997_v56 = vpop.permute.xlu1 %996 }
 0x3be   :  { %v1015_v54 = vmax.f32 %v975_v20, %v997_v56 }
 0x3bf   :  { %v1027_v13 = vpop.permute.xlu0 %1026 }
 0x3c0   :  { %v1046_v30 = vmax.f32 %v1014_v53, %v1027_v13 }
 0x3c1   :  { %v1029_v14 = vpop.permute.xlu1 %1028 }
 0x3c2   :  { %v1047_v60 = vmax.f32 %v1015_v54, %v1029_v14 }
 0x3c3   :  { %v1059_v43 = vpop.permute.xlu0 %1058 }
 0x3c4   :  { %v1078_v29 = vmax.f32 %v1046_v30, %v1059_v43 }
 0x3c5   :  { %v1061_v0 = vpop.permute.xlu1 %1060 }
 0x3c6   :  { %v1079_v10 = vmax.f32 %v1047_v60, %v1061_v0  ;;  %v1086_v3 = vmax.f32 %v1078_v29, %v1917_v34 }
 0x3c7   :  { %v1219_v8 = vpop.permute.xlu0 %1218 }
 0x3c8   :  { %v1087_v17 = vmax.f32 %v1079_v10, %v1921_v35  ;;  %v1126_v40 = vmax.f32 %v1086_v3, %v1107_v41 }
 0x3c9   :  { %v2086_v11 = vpop.permute.xlu1 %1220 }
 0x3ca   :  { %v1127_v32 = vmax.f32 %v1087_v17, %v1109_v46  ;;  %v1158_v45 = vmax.f32 %v1126_v40, %v1139_v6 }
 0x3cb   :  { %v1251_v47 = vpop.permute.xlu0 %1250 }
 0x3cc   :  { %v1159_v33 = vmax.f32 %v1127_v32, %v1141_v48  ;;  %v1190_v38 = vmax.f32 %v1158_v45, %v1171_v5 }
 0x3cd   :  { %v1253_v59 = vpop.permute.xlu1 %1252 }
 0x3ce   :  { %v1191_v13 = vmax.f32 %v1159_v33, %v1173_v58  ;;  %v1198_v41 = vmax.f32 %v1190_v38, %v1957_v61 }
 0x3cf   :  { %v887_v57 = vpop.permute.xlu0 %886 }
 0x3d0   :  { %v904_v18 = vmax.f32 %v1975_v25, %v887_v57  ;;  %v1199_v25 = vmax.f32 %v1191_v13, %v1961_v7  ;;  %v1238_v0 = vmax.f32 %v1198_v41, %v1219_v8 }
 0x3d1   :  { %v889_v42 = vpop.permute.xlu1 %888 }
 0x3d2   :  { %v905_v37 = vmax.f32 %v1979_v23, %v889_v42  ;;  %v1239_v16 = vmax.f32 %v1199_v25, %v2086_v11  ;;  %v1270_v4 = vmax.f32 %v1238_v0, %v1251_v47 }
 0x3d3   :  { %v919_v9 = vpop.permute.xlu0 %918 }
 0x3d4   :  { %v936_v24 = vmax.f32 %v904_v18, %v919_v9  ;;  %v1271_v21 = vmax.f32 %v1239_v16, %v1253_v59 }
 0x3d5   :  { %v921_v22 = vpop.permute.xlu1 %920 }
 0x3d6   :  { %v937_v51 = vmax.f32 %v905_v37, %v921_v22 }
 0x3d7   :  { %v951_v31 = vpop.permute.xlu0 %950 }
 0x3d8   :  { %v968_v34 = vmax.f32 %v936_v24, %v951_v31 }
 0x3d9   :  { %v953_v55 = vpop.permute.xlu1 %952 }
 0x3da   :  { %v969_v35 = vmax.f32 %v937_v51, %v953_v55  ;;  %v976_v46 = vmax.f32 %v968_v34, %v2021_v15 }
 0x3db   :  { %v1111_v1 = vpop.permute.xlu0 %1110 }
 0x3dc   :  { %v977_v48 = vmax.f32 %v969_v35, %v2025_v63 }
 0x3dd   :  { %v1113_v27 = vpop.permute.xlu1 %1112 }
 0x3df   :  { %v1143_v28 = vpop.permute.xlu0 %1142 }
 0x3e1   :  { %v1145_v39 = vpop.permute.xlu1 %1144 }
 0x3e3   :  { %v1175_v62 = vpop.permute.xlu0 %1174 }
 0x3e5   :  { %v1177_v26 = vpop.permute.xlu1 %1176 }
 0x3e7   :  { %v999_v56 = vpop.permute.xlu0 %998 }
 0x3e8   :  { %v1016_v43 = vmax.f32 %v976_v46, %v999_v56 }
 0x3e9   :  { %v1001_v14 = vpop.permute.xlu1 %1000 }
 0x3ea   :  { %v1017_v44 = vmax.f32 %v977_v48, %v1001_v14 }
 0x3eb   :  { %v1031_v6 = vpop.permute.xlu0 %1030 }
 0x3ec   :  { %v1048_v5 = vmax.f32 %v1016_v43, %v1031_v6 }
 0x3ed   :  { %v1033_v23 = vpop.permute.xlu1 %1032 }
 0x3ee   :  { %v1049_v58 = vmax.f32 %v1017_v44, %v1033_v23 }
 0x3ef   :  { %v1063_v12 = vpop.permute.xlu0 %1062 }
 0x3f0   :  { %v1080_v52 = vmax.f32 %v1048_v5, %v1063_v12 }
 0x3f1   :  { %v1065_v19 = vpop.permute.xlu1 %1064 }
 0x3f2   :  { %v1088_v61 = vmax.f32 %v1080_v52, %v1998_v50  ;;  %v1081_v15 = vmax.f32 %v1049_v58, %v1065_v19 }
 0x3f3   :  { %v1283_v57 = vpop.permute.xlu0 %1282 }
 0x3f4   :  { %v1128_v7 = vmax.f32 %v1088_v61, %v1111_v1  ;;  %v1089_v42 = vmax.f32 %v1081_v15, %v2003_v49  ;;  %v1302_v63 = vmax.f32 %v1270_v4, %v1283_v57 }
 0x3f5   :  { %v1285_v53 = vpop.permute.xlu1 %1284 }
 0x3f6   :  { %v1129_v8 = vmax.f32 %v1089_v42, %v1113_v27  ;;  %1310 = vst.msk [vmem:[%s2127_s7 + $0x20] sm:$0xff] %vm427_vm1, %v1302_v63  ;;  %v1303_v11 = vmax.f32 %v1271_v21, %v1285_v53  ;;  %v1160_v20 = vmax.f32 %v1128_v7, %v1143_v28 }
 0x3f7   :  { %v1223_v9 = vpop.permute.xlu0 %1222 }
 0x3f8   :  { %1311 = vst.msk [vmem:[%s2127_s7 + $0x28] sm:$0xff] %vm427_vm1, %v1303_v11  ;;  %v1192_v50 = vmax.f32 %v1160_v20, %v1175_v62  ;;  %v1161_v47 = vmax.f32 %v1129_v8, %v1145_v39 }
 0x3f9   :  { %v1225_v59 = vpop.permute.xlu1 %1224 }
 0x3fa   :  { %v1200_v49 = vmax.f32 %v1192_v50, %v2050_v36  ;;  %v1193_v54 = vmax.f32 %v1161_v47, %v1177_v26 }
 0x3fb   :  { %v1255_v30 = vpop.permute.xlu0 %1254 }
 0x3fc   :  { %v1240_v22 = vmax.f32 %v1200_v49, %v1223_v9  ;;  %v1201_v60 = vmax.f32 %v1193_v54, %v2055_v2 }
 0x3fd   :  { %v1257_v29 = vpop.permute.xlu1 %1256 }
 0x3fe   :  { %v1241_v31 = vmax.f32 %v1201_v60, %v1225_v59  ;;  %v1272_v10 = vmax.f32 %v1240_v22, %v1255_v30 }
 0x3ff   :  { %v1287_v55 = vpop.permute.xlu0 %1286 }
 0x400   :  { %v1273_v3 = vmax.f32 %v1241_v31, %v1257_v29  ;;  %v1304_v1 = vmax.f32 %v1272_v10, %v1287_v55 }
 0x401   :  { %v1289_v17 = vpop.permute.xlu1 %1288 }
 0x402   :  { %1312 = vst.msk [vmem:[%s2127_s7 + $0x30] sm:$0xff] %vm427_vm1, %v1304_v1  ;;  %v1305_v27 = vmax.f32 %v1273_v3, %v1289_v17 }
 0x404   :  { %1313 = vst.msk [vmem:[%s2127_s7 + $0x38] sm:$0xff] %vm427_vm1, %v1305_v27 }

// kernel: forward.13
= control target key start
LH: loop header
LB: loop body
LE: loop exit
PB: predicated region body
PF: predicated region fallthrough
CT: control target
= control target key end

     0   :  { %v1371_v1 = vmov 0   ;;  %vm233_vm0 = vcmask 916480   ;;  %vm408_vm1 = vcmask 261120   ;;  %s1373_s28 = smov 64   ;;  %s1374_s29 = smov 32   ;;  %s2048_s0 = inlined_call_operand.vmem [shape: bf16[112,512], index: 0, kind: input, shape index: {}]   ;;  %s2049_s1 = inlined_call_operand.vmem [shape: bf16[32,112], index: 1, kind: input, shape index: {}]   ;;  %s2050_s2 = inlined_call_operand.vmem [shape: f32[32,1], index: 2, kind: input, shape index: {}, may-alias: {2,4}]   ;;  %s2051_s4 = inlined_call_operand.vmem [shape: f32[32,1], index: 4, kind: input, shape index: {}, may-alias: {2,4}]   ;;  %s2052_s6 = inlined_call_operand.vmem [shape: f32[64,1], index: 6, kind: input, shape index: {}]   ;;  %s2053_s3 = inlined_call_operand.vmem [shape: bf16[32,32], index: 3, kind: input, shape index: {}]   ;;  %s2054_s5 = inlined_call_operand.vmem [shape: bf16[64,32], index: 5, kind: input, shape index: {}]   ;;  %s2055_s7 = inlined_call_operand.vmem [shape: f32[64,32], index: 7, kind: output, shape index: {}]  }
   0x1   :  { %v1321_v0 = vld [vmem:[%s2048_s0 + $0x4] ss:$16 sps:$4 sm:$0xff]   ;;  %272 = vmatprep.mubr.bf16.mxu0 %v1371_v1  ;;  %325 = vmatprep.mubr.bf16.mxu1 %v1371_v1  ;;  %v1323_v2 = vld [vmem:[%s2048_s0 + $0xc] ss:$16 sps:$4 sm:$0xff]   ;;  %v1325_v3 = vld [vmem:[%s2048_s0] ss:$16 sps:$4 sm:$0xff]  }
   0x2   :  { %1319 = vset.pattern.permute.xlu0 %v1371_v1  ;;  %1320 = vset.pattern.permute.xlu1 %v1371_v1  ;;  %v1326_v4 = vld [vmem:[%s2048_s0 + $0x8] ss:$16 sps:$4 sm:$0xff]   ;;  %v1327_v5 = vld [vmem:[%s2048_s0 + $0x24] ss:$16 sps:$4 sm:$0xff]   ;;  %v1329_v6 = vld [vmem:[%s2048_s0 + $0x2c] ss:$16 sps:$4 sm:$0xff]  }
   0x3   :  { %240 = vmatprep.subr.bf16.mxu0 %v1321_v0  ;;  %293 = vmatprep.subr.bf16.mxu1 %v1323_v2  ;;  %v1331_v7 = vld [vmem:[%s2048_s0 + $0x20] ss:$16 sps:$4 sm:$0xff]   ;;  %v1332_v8 = vld [vmem:[%s2048_s0 + $0x28] ss:$16 sps:$4 sm:$0xff]   ;;  %v1333_v9 = vld [vmem:[%s2048_s0 + $0x44] ss:$16 sps:$4 sm:$0xff]  }
   0x4   :  { %241 = vmatpush1.bf16.msra.mxu0 %v1325_v3  ;;  %294 = vmatpush1.bf16.msra.mxu1 %v1326_v4  ;;  %v1335_v10 = vld [vmem:[%s2048_s0 + $0x4c] ss:$16 sps:$4 sm:$0xff]   ;;  %v1337_v11 = vld [vmem:[%s2048_s0 + $0x40] ss:$16 sps:$4 sm:$0xff]   ;;  %v1338_v12 = vld [vmem:[%s2048_s0 + $0x48] ss:$16 sps:$4 sm:$0xff]  }
   0x5   :  { %242 = vmatprep.subr.bf16.mxu0 %v1327_v5  ;;  %295 = vmatprep.subr.bf16.mxu1 %v1329_v6  ;;  %v1339_v13 = vld [vmem:[%s2048_s0 + $0x64] ss:$16 sps:$4 sm:$0xff]   ;;  %v1341_v14 = vld [vmem:[%s2048_s0 + $0x6c] ss:$16 sps:$4 sm:$0xff]   ;;  %v1343_v15 = vld [vmem:[%s2048_s0 + $0x60] ss:$16 sps:$4 sm:$0xff]  }
   0x6   :  { %v1344_v16 = vld [vmem:[%s2048_s0 + $0x68] ss:$16 sps:$4 sm:$0xff]   ;;  %v1345_v17 = vld [vmem:[%s2048_s0 + $0x84] ss:$16 sps:$4 sm:$0xff]   ;;  %v1347_v18 = vld [vmem:[%s2048_s0 + $0x8c] ss:$16 sps:$4 sm:$0xff]  }
   0x7   :  { %v1349_v19 = vld [vmem:[%s2048_s0 + $0x80] ss:$16 sps:$4 sm:$0xff]   ;;  %v1350_v20 = vld [vmem:[%s2048_s0 + $0x88] ss:$16 sps:$4 sm:$0xff]   ;;  %v1351_v21 = vld [vmem:[%s2048_s0 + $0xa4] ss:$16 sps:$4 sm:$0xff]  }
   0x8   :  { %243 = vmatpush1.bf16.msra.mxu0 %v1331_v7  ;;  %296 = vmatpush1.bf16.msra.mxu1 %v1332_v8  ;;  %v1353_v22 = vld [vmem:[%s2048_s0 + $0xac] ss:$16 sps:$4 sm:$0xff]   ;;  %v1355_v23 = vld [vmem:[%s2048_s0 + $0xa0] ss:$16 sps:$4 sm:$0xff]   ;;  %v1356_v24 = vld [vmem:[%s2048_s0 + $0xa8] ss:$16 sps:$4 sm:$0xff]  }
   0x9   :  { %244 = vmatprep.subr.bf16.mxu0 %v1333_v9  ;;  %297 = vmatprep.subr.bf16.mxu1 %v1335_v10  ;;  %v59_v25 = vld [vmem:[%s2050_s2] sm:$0xff]  ;;  %v1359_v27 = vld [vmem:[%s2048_s0 + $0xcc] ss:$16 sps:$4 sm:$0xff]   ;;  %v61_v28 = vld [vmem:[%s2050_s2 + $0x10] sm:$0xff] }
   0xa   :  { %v1357_v26 = vld [vmem:[%s2048_s0 + $0xc4] ss:$16 sps:$4 sm:$0xff]   ;;  %65 = vperm.xlu0 %1319, %v59_v25   ;;  %75 = vperm.xlu1 %1320, %v61_v28   ;;  %v60_v29 = vld [vmem:[%s2050_s2 + $0x8] sm:$0xff]  ;;  %v62_v30 = vld [vmem:[%s2050_s2 + $0x18] sm:$0xff] }
   0xb   :  { %v1361_v31 = vld [vmem:[%s2048_s0 + $0xc0] ss:$16 sps:$4 sm:$0xff]   ;;  %v1362_v32 = vld [vmem:[%s2048_s0 + $0xc8] ss:$16 sps:$4 sm:$0xff]  }
   0xc   :  { %245 = vmatpush1.bf16.msra.mxu0 %v1337_v11  ;;  %298 = vmatpush1.bf16.msra.mxu1 %v1338_v12  ;;  %v1363_v33 = vld [vmem:[%s2049_s1] sm:$0xff]   ;;  %v367_v35 = vld [vmem:[%s2051_s4 + $0x8] sm:$0xff]  ;;  %v368_v36 = vld [vmem:[%s2051_s4 + $0x10] sm:$0xff] }
   0xd   :  { %246 = vmatprep.subr.bf16.mxu0 %v1339_v13  ;;  %299 = vmatprep.subr.bf16.mxu1 %v1341_v14  ;;  %v366_v34 = vld [vmem:[%s2051_s4] sm:$0xff]  ;;  %v369_v37 = vld [vmem:[%s2051_s4 + $0x18] sm:$0xff]  ;;  %v1364_v38 = vld [vmem:[%s2049_s1 + $0x8] sm:$0xff]  }
   0xe   :  { %70 = vperm.xlu0 %1319, %v60_v29   ;;  %80 = vperm.xlu1 %1320, %v62_v30   ;;  %v545_v39 = vld [vmem:[%s2052_s6] sm:$0xff]  ;;  %v546_v40 = vld [vmem:[%s2052_s6 + $0x8] sm:$0xff]  ;;  %v547_v41 = vld [vmem:[%s2052_s6 + $0x10] sm:$0xff] }
   0xf   :  { %v548_v42 = vld [vmem:[%s2052_s6 + $0x18] sm:$0xff]  ;;  %v549_v43 = vld [vmem:[%s2052_s6 + $0x20] sm:$0xff]  ;;  %v550_v44 = vld [vmem:[%s2052_s6 + $0x28] sm:$0xff] }
  0x10   :  { %247 = vmatpush1.bf16.msra.mxu0 %v1343_v15  ;;  %300 = vmatpush1.bf16.msra.mxu1 %v1344_v16  ;;  %v551_v45 = vld [vmem:[%s2052_s6 + $0x30] sm:$0xff]  ;;  %v552_v46 = vld [vmem:[%s2052_s6 + $0x38] sm:$0xff] }
  0x11   :  { %248 = vmatprep.subr.bf16.mxu0 %v1345_v17  ;;  %301 = vmatprep.subr.bf16.mxu1 %v1347_v18 }
  0x12   :  { %380 = vperm.xlu0 %1319, %v366_v34   ;;  %385 = vperm.xlu1 %1320, %v367_v35  }
  0x14   :  { %249 = vmatpush1.bf16.msra.mxu0 %v1349_v19  ;;  %302 = vmatpush1.bf16.msra.mxu1 %v1350_v20 }
  0x15   :  { %250 = vmatprep.subr.bf16.mxu0 %v1351_v21  ;;  %303 = vmatprep.subr.bf16.mxu1 %v1353_v22 }
  0x16   :  { %390 = vperm.xlu0 %1319, %v368_v36   ;;  %395 = vperm.xlu1 %1320, %v369_v37  }
  0x18   :  { %251 = vmatpush1.bf16.msra.mxu0 %v1355_v23  ;;  %304 = vmatpush1.bf16.msra.mxu1 %v1356_v24 }
  0x19   :  { %252 = vmatprep.subr.bf16.mxu0 %v1357_v26  ;;  %305 = vmatprep.subr.bf16.mxu1 %v1359_v27 }
  0x1a   :  { %563 = vperm.xlu0 %1319, %v545_v39   ;;  %568 = vperm.xlu1 %1320, %v546_v40  }
  0x1c   :  { %253 = vmatpush1.bf16.msra.mxu0 %v1361_v31  ;;  %306 = vmatpush1.bf16.msra.mxu1 %v1362_v32 }
  0x1e   :  { %573 = vperm.xlu0 %1319, %v547_v41   ;;  %578 = vperm.xlu1 %1320, %v548_v42  }
  0x1f   :  { %1293 = vmatmul.mubr.msk.bf16.vlgmr.msra.gmra.mrb[0].mxu0 %vm233_vm0, %v1363_v33  ;;  %1295 = vmatmul.mubr.msk.bf16.vlgmr.msra.gmra.mrb[0].mxu1 %vm233_vm0, %v1363_v33 }
  0x20   :  { %282 = vmatprep.mubr.bf16.mxu0 %v1371_v1  ;;  %335 = vmatprep.mubr.bf16.mxu1 %v1371_v1 }
  0x22   :  { %583 = vperm.xlu0 %1319, %v549_v43   ;;  %588 = vperm.xlu1 %1320, %v550_v44   ;;  %v1365_v44 = vld [vmem:[%s2053_s3] sm:$0xff]  }
  0x26   :  { %593 = vperm.xlu0 %1319, %v551_v45   ;;  %598 = vperm.xlu1 %1320, %v552_v46   ;;  %v1366_v45 = vld [vmem:[%s2053_s3 + $0x8] sm:$0xff]  }
  0x27   :  { %1294 = vmatmul.mubr.msk.bf16.gmra.mrb[4].mxu0 %vm233_vm0, %v1364_v38  ;;  %1296 = vmatmul.mubr.msk.bf16.gmra.mrb[4].mxu1 %vm233_vm0, %v1364_v38 }
  0x28   :  { %447 = vmatprep.mubr.bf16.mxu0 %v1371_v1  ;;  %500 = vmatprep.mubr.bf16.mxu1 %v1371_v1 }
  0x89   :  { %v66_v47 = vpop.permute.xlu0 %65  ;;  %v76_v49 = vpop.permute.xlu1 %75 }
  0x8d   :  { %v71_v48 = vpop.permute.xlu0 %70  ;;  %v81_v11 = vpop.permute.xlu1 %80 }
  0x91   :  { %v381_v46 = vpop.permute.xlu0 %380 }
  0xf2   :  { %v274_v50 = vpop.f32.mrb[0].mxu0  ;;  %v327_v51 = vpop.f32.mrb[0].mxu1 }
  0xf3   :  { %v275_v52 = vadd.f32 %v274_v50, %v66_v47  ;;  %v328_v53 = vadd.f32 %v327_v51, %v66_v47  ;;  %v276_v54 = vpop.f32.mrb[1].mxu0  ;;  %v329_v55 = vpop.f32.mrb[1].mxu1 }
  0xf4   :  { %v277_v56 = vadd.f32 %v276_v54, %v66_v47  ;;  %v330_v57 = vadd.f32 %v329_v55, %v66_v47  ;;  %v278_v58 = vpop.f32.mrb[2].mxu0  ;;  %v331_v59 = vpop.f32.mrb[2].mxu1 }
  0xf5   :  { %v348_v60 = vmax.f32 %v328_v53, 0.0  ;;  %v279_v61 = vadd.f32 %v278_v58, %v71_v48  ;;  %v332_v62 = vadd.f32 %v331_v59, %v71_v48  ;;  %v280_v63 = vpop.f32.mrb[3].mxu0  ;;  %v333_v0 = vpop.f32.mrb[3].mxu1  ;;  %v346_v5 = vmax.f32 %v275_v52, 0.0 }
  0xf6   :  { %v349_v2 = vmax.f32 %v330_v57, 0.0  ;;  %v281_v3 = vadd.f32 %v280_v63, %v71_v48  ;;  %v334_v4 = vadd.f32 %v333_v0, %v71_v48  ;;  %v347_v8 = vmax.f32 %v277_v56, 0.0  ;;  %v386_v47 = vpop.permute.xlu1 %385 }
  0xf7   :  { %v350_v6 = vmax.f32 %v279_v61, 0.0  ;;  %v352_v7 = vmax.f32 %v332_v62, 0.0 }
  0xf8   :  { %v351_v9 = vmax.f32 %v281_v3, 0.0  ;;  %v353_v10 = vmax.f32 %v334_v4, 0.0 }
  0xf9   :  { %v370_v12 = vpack.c.bf16 %v350_v6, %v346_v5  ;;  %v372_v13 = vpack.c.bf16 %v352_v7, %v348_v60 }
  0xfa   :  { %v371_v14 = vpack.c.bf16 %v351_v9, %v347_v8  ;;  %v373_v15 = vpack.c.bf16 %v353_v10, %v349_v2  ;;  %v284_v16 = vpop.f32.mrb[4].mxu0  ;;  %v337_v17 = vpop.f32.mrb[4].mxu1 }
  0xfb   :  { %v285_v18 = vadd.f32 %v284_v16, %v76_v49  ;;  %v338_v19 = vadd.f32 %v337_v17, %v76_v49  ;;  %v286_v20 = vpop.f32.mrb[5].mxu0  ;;  %v339_v21 = vpop.f32.mrb[5].mxu1 }
  0xfc   :  { %v287_v22 = vadd.f32 %v286_v20, %v76_v49  ;;  %v340_v23 = vadd.f32 %v339_v21, %v76_v49  ;;  %v288_v24 = vpop.f32.mrb[6].mxu0  ;;  %v341_v25 = vpop.f32.mrb[6].mxu1  ;;  %415 = vmatprep.subr.bf16.mxu0 %v371_v14  ;;  %468 = vmatprep.subr.bf16.mxu1 %v373_v15 }
  0xfd   :  { %v289_v26 = vadd.f32 %v288_v24, %v81_v11  ;;  %v342_v27 = vadd.f32 %v341_v25, %v81_v11  ;;  %v290_v28 = vpop.f32.mrb[7].mxu0  ;;  %v343_v29 = vpop.f32.mrb[7].mxu1  ;;  %416 = vmatpush1.bf16.msra.mxu0 %v370_v12  ;;  %469 = vmatpush1.bf16.msra.mxu1 %v372_v13  ;;  %v354_v32 = vmax.f32 %v285_v18, 0.0  ;;  %v356_v33 = vmax.f32 %v338_v19, 0.0 }
  0xfe   :  { %v291_v30 = vadd.f32 %v290_v28, %v81_v11  ;;  %v344_v31 = vadd.f32 %v343_v29, %v81_v11  ;;  %v355_v36 = vmax.f32 %v287_v22, 0.0  ;;  %v357_v37 = vmax.f32 %v340_v23, 0.0  ;;  %v391_v9 = vpop.permute.xlu0 %390  ;;  %v396_v10 = vpop.permute.xlu1 %395 }
  0xff   :  { %v358_v34 = vmax.f32 %v289_v26, 0.0  ;;  %v360_v35 = vmax.f32 %v342_v27, 0.0 }
 0x100   :  { %v359_v38 = vmax.f32 %v291_v30, 0.0  ;;  %v361_v39 = vmax.f32 %v344_v31, 0.0 }
 0x101   :  { %v374_v40 = vpack.c.bf16 %v358_v34, %v354_v32  ;;  %v376_v41 = vpack.c.bf16 %v360_v35, %v356_v33 }
 0x102   :  { %v375_v42 = vpack.c.bf16 %v359_v38, %v355_v36  ;;  %v377_v43 = vpack.c.bf16 %v361_v39, %v357_v37 }
 0x104   :  { %417 = vmatprep.subr.bf16.mxu0 %v375_v42  ;;  %470 = vmatprep.subr.bf16.mxu1 %v377_v43  ;;  %v1367_v43 = vld [vmem:[%s2054_s5] sm:$0xff]  }
 0x105   :  { %418 = vmatpush1.bf16.msra.mxu0 %v374_v40  ;;  %471 = vmatpush1.bf16.msra.mxu1 %v376_v41 }
 0x108   :  { %1299 = vmatmul.mubr.msk.bf16.vlgmr.msra.gmra.mrb[8].mxu0 %vm408_vm1, %v1365_v44  ;;  %1301 = vmatmul.mubr.msk.bf16.vlgmr.msra.gmra.mrb[8].mxu1 %vm408_vm1, %v1365_v44  ;;  %v1368_v44 = vld [vmem:[%s2054_s5 + $0x8] sm:$0xff]  }
 0x109   :  { %457 = vmatprep.mubr.bf16.mxu0 %v1371_v1  ;;  %510 = vmatprep.mubr.bf16.mxu1 %v1371_v1 }
 0x110   :  { %1300 = vmatmul.mubr.msk.bf16.gmra.mrb[12].mxu0 %vm408_vm1, %v1366_v45  ;;  %1302 = vmatmul.mubr.msk.bf16.gmra.mrb[12].mxu1 %vm408_vm1, %v1366_v45  ;;  %v1369_v45 = vld [vmem:[%s2054_s5 + $0x10] sm:$0xff]  }
 0x111   :  { %665 = vmatprep.mubr.bf16.mxu0 %v1371_v1  ;;  %738 = vmatprep.mubr.bf16.mxu1 %v1371_v1 }
 0x1db   :  { %v449_v48 = vpop.f32.mrb[8].mxu0  ;;  %v502_v49 = vpop.f32.mrb[8].mxu1 }
 0x1dc   :  { %v450_v50 = vadd.f32 %v449_v48, %v381_v46  ;;  %v503_v51 = vadd.f32 %v502_v49, %v381_v46  ;;  %v451_v52 = vpop.f32.mrb[9].mxu0  ;;  %v504_v53 = vpop.f32.mrb[9].mxu1 }
 0x1dd   :  { %v452_v54 = vadd.f32 %v451_v52, %v381_v46  ;;  %v505_v55 = vadd.f32 %v504_v53, %v381_v46  ;;  %v453_v56 = vpop.f32.mrb[10].mxu0  ;;  %v506_v57 = vpop.f32.mrb[10].mxu1  ;;  %v1370_v46 = vld [vmem:[%s2054_s5 + $0x18] sm:$0xff]   ;;  %s1372_s5 = smov 96  }
 0x1de   :  { %v454_v58 = vadd.f32 %v453_v56, %v386_v47  ;;  %v507_v59 = vadd.f32 %v506_v57, %v386_v47  ;;  %v455_v60 = vpop.f32.mrb[11].mxu0  ;;  %v508_v61 = vpop.f32.mrb[11].mxu1  ;;  %v521_v0 = vmax.f32 %v450_v50, 0.0  ;;  %v523_v2 = vmax.f32 %v503_v51, 0.0 }
 0x1df   :  { %v456_v62 = vadd.f32 %v455_v60, %v386_v47  ;;  %v509_v63 = vadd.f32 %v508_v61, %v386_v47  ;;  %v522_v5 = vmax.f32 %v452_v54, 0.0  ;;  %v524_v6 = vmax.f32 %v505_v55, 0.0  ;;  %v1605_v47 = vpop.permute.xlu0 %563  ;;  %v1607_v48 = vpop.permute.xlu1 %568 }
 0x1e0   :  { %v525_v3 = vmax.f32 %v454_v58, 0.0  ;;  %v527_v4 = vmax.f32 %v507_v59, 0.0 }
 0x1e1   :  { %v526_v7 = vmax.f32 %v456_v62, 0.0  ;;  %v528_v8 = vmax.f32 %v509_v63, 0.0 }
 0x1e2   :  { %v553_v11 = vpack.c.bf16 %v525_v3, %v521_v0  ;;  %v555_v12 = vpack.c.bf16 %v527_v4, %v523_v2 }
 0x1e3   :  { %v554_v13 = vpack.c.bf16 %v526_v7, %v522_v5  ;;  %v556_v14 = vpack.c.bf16 %v528_v8, %v524_v6  ;;  %v459_v15 = vpop.f32.mrb[12].mxu0  ;;  %v512_v16 = vpop.f32.mrb[12].mxu1 }
 0x1e4   :  { %v460_v17 = vadd.f32 %v459_v15, %v391_v9  ;;  %v513_v18 = vadd.f32 %v512_v16, %v391_v9  ;;  %v461_v19 = vpop.f32.mrb[13].mxu0  ;;  %v514_v20 = vpop.f32.mrb[13].mxu1 }
 0x1e5   :  { %v462_v21 = vadd.f32 %v461_v19, %v391_v9  ;;  %v515_v22 = vadd.f32 %v514_v20, %v391_v9  ;;  %v463_v23 = vpop.f32.mrb[14].mxu0  ;;  %v516_v24 = vpop.f32.mrb[14].mxu1  ;;  %633 = vmatprep.subr.bf16.mxu0 %v554_v13  ;;  %706 = vmatprep.subr.bf16.mxu1 %v556_v14 }
 0x1e6   :  { %v464_v25 = vadd.f32 %v463_v23, %v396_v10  ;;  %v517_v26 = vadd.f32 %v516_v24, %v396_v10  ;;  %v465_v27 = vpop.f32.mrb[15].mxu0  ;;  %v518_v28 = vpop.f32.mrb[15].mxu1  ;;  %634 = vmatpush1.bf16.msra.mxu0 %v553_v11  ;;  %707 = vmatpush1.bf16.msra.mxu1 %v555_v12  ;;  %v529_v31 = vmax.f32 %v460_v17, 0.0  ;;  %v531_v32 = vmax.f32 %v513_v18, 0.0 }
 0x1e7   :  { %v466_v29 = vadd.f32 %v465_v27, %v396_v10  ;;  %v519_v30 = vadd.f32 %v518_v28, %v396_v10  ;;  %v530_v35 = vmax.f32 %v462_v21, 0.0  ;;  %v532_v36 = vmax.f32 %v515_v22, 0.0  ;;  %v1619_v60 = vpop.permute.xlu0 %573  ;;  %v1621_v61 = vpop.permute.xlu1 %578 }
 0x1e8   :  { %v533_v33 = vmax.f32 %v464_v25, 0.0  ;;  %v535_v34 = vmax.f32 %v517_v26, 0.0 }
 0x1e9   :  { %v534_v37 = vmax.f32 %v466_v29, 0.0  ;;  %v536_v38 = vmax.f32 %v519_v30, 0.0 }
 0x1ea   :  { %v557_v39 = vpack.c.bf16 %v533_v33, %v529_v31  ;;  %v559_v40 = vpack.c.bf16 %v535_v34, %v531_v32 }
 0x1eb   :  { %v558_v41 = vpack.c.bf16 %v534_v37, %v530_v35  ;;  %v560_v42 = vpack.c.bf16 %v536_v38, %v532_v36  ;;  %v1647_v9 = vpop.permute.xlu0 %583  ;;  %v1649_v10 = vpop.permute.xlu1 %588 }
 0x1ed   :  { %635 = vmatprep.subr.bf16.mxu0 %v558_v41  ;;  %708 = vmatprep.subr.bf16.mxu1 %v560_v42 }
 0x1ee   :  { %636 = vmatpush1.bf16.msra.mxu0 %v557_v39  ;;  %709 = vmatpush1.bf16.msra.mxu1 %v559_v40 }
 0x1ef   :  { %v1679_v21 = vpop.permute.xlu0 %593  ;;  %v1681_v22 = vpop.permute.xlu1 %598 }
 0x1f1   :  { %1307 = vmatmul.mubr.msk.bf16.vlgmr.msra.gmra.mrb[16].mxu0 %vm408_vm1, %v1367_v43  ;;  %1311 = vmatmul.mubr.msk.bf16.vlgmr.msra.gmra.mrb[16].mxu1 %vm408_vm1, %v1367_v43 }
 0x1f2   :  { %675 = vmatprep.mubr.bf16.mxu0 %v1371_v1  ;;  %748 = vmatprep.mubr.bf16.mxu1 %v1371_v1 }
 0x1f9   :  { %1308 = vmatmul.mubr.msk.bf16.gmra.mrb[20].mxu0 %vm408_vm1, %v1368_v44  ;;  %1312 = vmatmul.mubr.msk.bf16.gmra.mrb[20].mxu1 %vm408_vm1, %v1368_v44 }
 0x1fa   :  { %685 = vmatprep.mubr.bf16.mxu0 %v1371_v1  ;;  %758 = vmatprep.mubr.bf16.mxu1 %v1371_v1 }
 0x201   :  { %1309 = vmatmul.mubr.msk.bf16.gmra.mrb[24].mxu0 %vm408_vm1, %v1369_v45  ;;  %1313 = vmatmul.mubr.msk.bf16.gmra.mrb[24].mxu1 %vm408_vm1, %v1369_v45 }
 0x202   :  { %695 = vmatprep.mubr.bf16.mxu0 %v1371_v1  ;;  %768 = vmatprep.mubr.bf16.mxu1 %v1371_v1 }
 0x209   :  { %1310 = vmatmul.mubr.msk.bf16.gmra.mrb[28].mxu0 %vm408_vm1, %v1370_v46  ;;  %1314 = vmatmul.mubr.msk.bf16.gmra.mrb[28].mxu1 %vm408_vm1, %v1370_v46 }
 0x2c4   :  { %v667_v49 = vpop.f32.mrb[16].mxu0  ;;  %v740_v50 = vpop.f32.mrb[16].mxu1 }
 0x2c5   :  { %v668_v51 = vadd.f32 %v667_v49, %v1605_v47  ;;  %v669_v52 = vpop.f32.mrb[17].mxu0  ;;  %v1610_v53 = vpop.f32.mrb[17].mxu1  ;;  %v741_v5 = vadd.f32 %v740_v50, %v1605_v47 }
 0x2c6   :  { %v671_v1 = vpop.f32.mrb[18].mxu0  ;;  %v744_v54 = vpop.f32.mrb[18].mxu1  ;;  %v670_v23 = vadd.f32 %v669_v52, %v1605_v47  ;;  %v743_v37 = vadd.f32 %v1610_v53, %v1605_v47 }
 0x2c7   :  { %v1612_v55 = vmax.f32 %v668_v51, 0.0  ;;  %v672_v56 = vadd.f32 %v671_v1, %v1607_v48  ;;  %v673_v57 = vpop.f32.mrb[19].mxu0  ;;  %v746_v58 = vpop.f32.mrb[19].mxu1  ;;  %v745_v8 = vadd.f32 %v744_v54, %v1607_v48  ;;  %v1651_v11 = vmax.f32 %v741_v5, 0.0 }
 0x2c8   :  { %v674_v26 = vadd.f32 %v673_v57, %v1607_v48  ;;  %v1702_v32 = vmax.f32 %v670_v23, 0.0  ;;  %v747_v38 = vadd.f32 %v746_v58, %v1607_v48  ;;  %v1726_v39 = vmax.f32 %v743_v37, 0.0 }
 0x2c9   :  { %v1615_v59 = vmax.f32 %v672_v56, 0.0  ;;  %819 = vrot.lane.b32.xlu0 %v1612_v55, %s1372_s5  ;;  %v1659_v14 = vmax.f32 %v745_v8, 0.0 }
 0x2ca   :  { %v1711_v36 = vmax.f32 %v674_v26, 0.0  ;;  %v1730_v40 = vmax.f32 %v747_v38, 0.0 }
 0x2cb   :  { %821 = vrot.lane.b32.xlu1 %v1615_v59, %s1372_s5 }
 0x2cc   :  { %v1625_v62 = vpop.f32.mrb[20].mxu0  ;;  %v1627_v63 = vpop.f32.mrb[20].mxu1 }
 0x2cd   :  { %v1629_v0 = vpop.f32.mrb[21].mxu0  ;;  %v1631_v2 = vpop.f32.mrb[21].mxu1  ;;  %851 = vrot.lane.b32.xlu0 %v1612_v55, %s1373_s28  ;;  %v678_v41 = vadd.f32 %v1625_v62, %v1619_v60  ;;  %v751_v45 = vadd.f32 %v1627_v63, %v1619_v60 }
 0x2ce   :  { %v681_v3 = vpop.f32.mrb[22].mxu0  ;;  %v1635_v4 = vpop.f32.mrb[22].mxu1  ;;  %v680_v49 = vadd.f32 %v1629_v0, %v1619_v60  ;;  %v753_v53 = vadd.f32 %v1631_v2, %v1619_v60 }
 0x2cf   :  { %v1638_v6 = vpop.f32.mrb[23].mxu0  ;;  %v1640_v7 = vpop.f32.mrb[23].mxu1  ;;  %853 = vrot.lane.b32.xlu1 %v1615_v59, %s1373_s28  ;;  %v682_v42 = vadd.f32 %v681_v3, %v1621_v61  ;;  %v1745_v43 = vmax.f32 %v678_v41, 0.0  ;;  %v755_v46 = vadd.f32 %v1635_v4, %v1621_v61  ;;  %v1765_v47 = vmax.f32 %v751_v45, 0.0 }
 0x2d0   :  { %v684_v50 = vadd.f32 %v1638_v6, %v1621_v61  ;;  %v1785_v51 = vmax.f32 %v680_v49, 0.0  ;;  %v757_v1 = vadd.f32 %v1640_v7, %v1621_v61  ;;  %v1805_v54 = vmax.f32 %v753_v53, 0.0 }
 0x2d1   :  { %883 = vrot.lane.b32.xlu0 %v1612_v55, %s1374_s29  ;;  %v1749_v44 = vmax.f32 %v682_v42, 0.0  ;;  %v1769_v48 = vmax.f32 %v755_v46, 0.0 }
 0x2d2   :  { %v1789_v52 = vmax.f32 %v684_v50, 0.0  ;;  %v1809_v56 = vmax.f32 %v757_v1, 0.0 }
 0x2d3   :  { %885 = vrot.lane.b32.xlu1 %v1615_v59, %s1374_s29 }
 0x2d4   :  { %v1655_v12 = vpop.f32.mrb[24].mxu0  ;;  %v1657_v13 = vpop.f32.mrb[24].mxu1 }
 0x2d5   :  { %v1661_v15 = vpop.f32.mrb[25].mxu0  ;;  %v1663_v16 = vpop.f32.mrb[25].mxu1  ;;  %1043 = vrot.lane.b32.xlu0 %v1651_v11, %s1372_s5  ;;  %v688_v57 = vadd.f32 %v1655_v12, %v1647_v9  ;;  %v761_v62 = vadd.f32 %v1657_v13, %v1647_v9 }
 0x2d6   :  { %v1667_v17 = vpop.f32.mrb[26].mxu0  ;;  %v1669_v18 = vpop.f32.mrb[26].mxu1  ;;  %v690_v3 = vadd.f32 %v1661_v15, %v1647_v9 }
 0x2d7   :  { %v1671_v19 = vpop.f32.mrb[27].mxu0  ;;  %v1673_v20 = vpop.f32.mrb[27].mxu1  ;;  %1045 = vrot.lane.b32.xlu1 %v1659_v14, %s1372_s5  ;;  %v692_v58 = vadd.f32 %v1667_v17, %v1649_v10  ;;  %v1825_v60 = vmax.f32 %v688_v57, 0.0  ;;  %v765_v63 = vadd.f32 %v1669_v18, %v1649_v10  ;;  %v1845_v0 = vmax.f32 %v761_v62, 0.0 }
 0x2d8   :  { %v694_v5 = vadd.f32 %v1671_v19, %v1649_v10  ;;  %v1865_v7 = vmax.f32 %v690_v3, 0.0  ;;  %v763_v18 = vadd.f32 %v1663_v16, %v1647_v9  ;;  %v767_v23 = vadd.f32 %v1673_v20, %v1649_v10 }
 0x2d9   :  { %1075 = vrot.lane.b32.xlu0 %v1651_v11, %s1373_s28  ;;  %v1829_v61 = vmax.f32 %v692_v58, 0.0  ;;  %v1849_v2 = vmax.f32 %v765_v63, 0.0 }
 0x2da   :  { %v1869_v12 = vmax.f32 %v694_v5, 0.0  ;;  %v1889_v37 = vmax.f32 %v767_v23, 0.0 }
 0x2db   :  { %1077 = vrot.lane.b32.xlu1 %v1659_v14, %s1373_s28 }
 0x2dc   :  { %v1686_v24 = vpop.f32.mrb[28].mxu0  ;;  %v1688_v25 = vpop.f32.mrb[28].mxu1 }
 0x2dd   :  { %v1691_v27 = vpop.f32.mrb[29].mxu0  ;;  %v772_v28 = vpop.f32.mrb[29].mxu1  ;;  %1107 = vrot.lane.b32.xlu0 %v1651_v11, %s1374_s29  ;;  %v698_v10 = vadd.f32 %v1686_v24, %v1679_v21 }
 0x2de   :  { %v1696_v29 = vadd.f32 %v772_v28, %v1679_v21  ;;  %v1698_v30 = vpop.f32.mrb[30].mxu0  ;;  %v1700_v31 = vpop.f32.mrb[30].mxu1  ;;  %v1885_v28 = vmax.f32 %v763_v18, 0.0 }
 0x2df   :  { %v1704_v33 = vpop.f32.mrb[31].mxu0  ;;  %v776_v34 = vpop.f32.mrb[31].mxu1  ;;  %1109 = vrot.lane.b32.xlu1 %v1659_v14, %s1374_s29  ;;  %v702_v42 = vadd.f32 %v1698_v30, %v1681_v22 }
 0x2e0   :  { %v1709_v35 = vadd.f32 %v776_v34, %v1681_v22 }
 0x2e1   :  { %931 = vrot.lane.b32.xlu0 %v1702_v32, %s1372_s5  ;;  %v1907_v53 = vmax.f32 %v702_v42, 0.0 }
 0x2e3   :  { %933 = vrot.lane.b32.xlu1 %v1711_v36, %s1372_s5 }
 0x2e5   :  { %963 = vrot.lane.b32.xlu0 %v1702_v32, %s1373_s28 }
 0x2e7   :  { %965 = vrot.lane.b32.xlu1 %v1711_v36, %s1373_s28 }
 0x2e9   :  { %995 = vrot.lane.b32.xlu0 %v1702_v32, %s1374_s29 }
 0x2eb   :  { %997 = vrot.lane.b32.xlu1 %v1711_v36, %s1374_s29 }
 0x2ed   :  { %1155 = vrot.lane.b32.xlu0 %v1726_v39, %s1372_s5 }
 0x2ef   :  { %1157 = vrot.lane.b32.xlu1 %v1730_v40, %s1372_s5 }
 0x2f1   :  { %1187 = vrot.lane.b32.xlu0 %v1726_v39, %s1373_s28 }
 0x2f3   :  { %1189 = vrot.lane.b32.xlu1 %v1730_v40, %s1373_s28 }
 0x2f5   :  { %1219 = vrot.lane.b32.xlu0 %v1726_v39, %s1374_s29 }
 0x2f7   :  { %1221 = vrot.lane.b32.xlu1 %v1730_v40, %s1374_s29 }
 0x2f9   :  { %823 = vrot.lane.b32.xlu0 %v1745_v43, %s1372_s5 }
 0x2fb   :  { %825 = vrot.lane.b32.xlu1 %v1749_v44, %s1372_s5 }
 0x2fd   :  { %855 = vrot.lane.b32.xlu0 %v1745_v43, %s1373_s28 }
 0x2ff   :  { %857 = vrot.lane.b32.xlu1 %v1749_v44, %s1373_s28 }
 0x301   :  { %887 = vrot.lane.b32.xlu0 %v1745_v43, %s1374_s29 }
 0x303   :  { %889 = vrot.lane.b32.xlu1 %v1749_v44, %s1374_s29 }
 0x305   :  { %1047 = vrot.lane.b32.xlu0 %v1765_v47, %s1372_s5 }
 0x307   :  { %1049 = vrot.lane.b32.xlu1 %v1769_v48, %s1372_s5 }
 0x309   :  { %1079 = vrot.lane.b32.xlu0 %v1765_v47, %s1373_s28 }
 0x30b   :  { %1081 = vrot.lane.b32.xlu1 %v1769_v48, %s1373_s28 }
 0x30d   :  { %1111 = vrot.lane.b32.xlu0 %v1765_v47, %s1374_s29 }
 0x30f   :  { %1113 = vrot.lane.b32.xlu1 %v1769_v48, %s1374_s29 }
 0x311   :  { %935 = vrot.lane.b32.xlu0 %v1785_v51, %s1372_s5 }
 0x313   :  { %937 = vrot.lane.b32.xlu1 %v1789_v52, %s1372_s5 }
 0x315   :  { %967 = vrot.lane.b32.xlu0 %v1785_v51, %s1373_s28 }
 0x317   :  { %969 = vrot.lane.b32.xlu1 %v1789_v52, %s1373_s28 }
 0x319   :  { %999 = vrot.lane.b32.xlu0 %v1785_v51, %s1374_s29 }
 0x31b   :  { %1001 = vrot.lane.b32.xlu1 %v1789_v52, %s1374_s29 }
 0x31d   :  { %1159 = vrot.lane.b32.xlu0 %v1805_v54, %s1372_s5 }
 0x31f   :  { %1161 = vrot.lane.b32.xlu1 %v1809_v56, %s1372_s5 }
 0x321   :  { %1191 = vrot.lane.b32.xlu0 %v1805_v54, %s1373_s28 }
 0x323   :  { %1193 = vrot.lane.b32.xlu1 %v1809_v56, %s1373_s28 }
 0x325   :  { %1223 = vrot.lane.b32.xlu0 %v1805_v54, %s1374_s29 }
 0x327   :  { %1225 = vrot.lane.b32.xlu1 %v1809_v56, %s1374_s29 }
 0x329   :  { %827 = vrot.lane.b32.xlu0 %v1825_v60, %s1372_s5 }
 0x32b   :  { %829 = vrot.lane.b32.xlu1 %v1829_v61, %s1372_s5 }
 0x32d   :  { %859 = vrot.lane.b32.xlu0 %v1825_v60, %s1373_s28 }
 0x32f   :  { %861 = vrot.lane.b32.xlu1 %v1829_v61, %s1373_s28 }
 0x331   :  { %891 = vrot.lane.b32.xlu0 %v1825_v60, %s1374_s29 }
 0x333   :  { %893 = vrot.lane.b32.xlu1 %v1829_v61, %s1374_s29 }
 0x335   :  { %1051 = vrot.lane.b32.xlu0 %v1845_v0, %s1372_s5 }
 0x337   :  { %1053 = vrot.lane.b32.xlu1 %v1849_v2, %s1372_s5 }
 0x339   :  { %1083 = vrot.lane.b32.xlu0 %v1845_v0, %s1373_s28 }
 0x33b   :  { %1085 = vrot.lane.b32.xlu1 %v1849_v2, %s1373_s28  ;;  %v820_v4 = vpop.permute.xlu0 %819 }
 0x33c   :  { %v843_v16 = vmax.f32 %v1612_v55, %v820_v4  ;;  %v1903_v55 = vmax.f32 %v698_v10, 0.0  ;;  %v771_v4 = vadd.f32 %v1688_v25, %v1679_v21 }
 0x33d   :  { %v822_v6 = vpop.permute.xlu1 %821  ;;  %1115 = vrot.lane.b32.xlu0 %v1845_v0, %s1374_s29 }
 0x33e   :  { %v844_v38 = vmax.f32 %v1615_v59, %v822_v6 }
 0x33f   :  { %1117 = vrot.lane.b32.xlu1 %v1849_v2, %s1374_s29  ;;  %v852_v8 = vpop.permute.xlu0 %851 }
 0x340   :  { %v875_v41 = vmax.f32 %v843_v16, %v852_v8  ;;  %v775_v8 = vadd.f32 %v1700_v31, %v1681_v22 }
 0x341   :  { %v854_v13 = vpop.permute.xlu1 %853  ;;  %939 = vrot.lane.b32.xlu0 %v1865_v7, %s1372_s5 }
 0x342   :  { %v876_v46 = vmax.f32 %v844_v38, %v854_v13  ;;  %v1931_v16 = vmax.f32 %v775_v8, 0.0 }
 0x343   :  { %941 = vrot.lane.b32.xlu1 %v1869_v12, %s1372_s5  ;;  %v884_v15 = vpop.permute.xlu0 %883 }
 0x344   :  { %v907_v49 = vmax.f32 %v875_v41, %v884_v15 }
 0x345   :  { %v886_v17 = vpop.permute.xlu1 %885  ;;  %971 = vrot.lane.b32.xlu0 %v1865_v7, %s1373_s28 }
 0x346   :  { %v908_v50 = vmax.f32 %v876_v46, %v886_v17  ;;  %v915_v30 = vmax.f32 %v907_v49, %v1702_v32  ;;  %v1926_v17 = vmax.f32 %v771_v4, 0.0  ;;  %v700_v49 = vadd.f32 %v1691_v27, %v1679_v21 }
 0x347   :  { %973 = vrot.lane.b32.xlu1 %v1869_v12, %s1373_s28  ;;  %v1044_v19 = vpop.permute.xlu0 %1043 }
 0x348   :  { %v916_v58 = vmax.f32 %v908_v50, %v1711_v36 }
 0x349   :  { %v1046_v26 = vpop.permute.xlu1 %1045  ;;  %1003 = vrot.lane.b32.xlu0 %v1865_v7, %s1374_s29 }
 0x34b   :  { %1005 = vrot.lane.b32.xlu1 %v1869_v12, %s1374_s29  ;;  %v1076_v34 = vpop.permute.xlu0 %1075 }
 0x34d   :  { %v1078_v9 = vpop.permute.xlu1 %1077  ;;  %1163 = vrot.lane.b32.xlu0 %v1885_v28, %s1372_s5 }
 0x34f   :  { %1165 = vrot.lane.b32.xlu1 %v1889_v37, %s1372_s5  ;;  %v1108_v20 = vpop.permute.xlu0 %1107 }
 0x351   :  { %v1110_v45 = vpop.permute.xlu1 %1109  ;;  %1195 = vrot.lane.b32.xlu0 %v1885_v28, %s1373_s28 }
 0x353   :  { %1197 = vrot.lane.b32.xlu1 %v1889_v37, %s1373_s28  ;;  %v932_v24 = vpop.permute.xlu0 %931 }
 0x354   :  { %v955_v57 = vmax.f32 %v915_v30, %v932_v24 }
 0x355   :  { %v934_v59 = vpop.permute.xlu1 %933  ;;  %831 = vrot.lane.b32.xlu0 %v1903_v55, %s1372_s5 }
 0x356   :  { %v956_v63 = vmax.f32 %v916_v58, %v934_v59 }
 0x357   :  { %833 = vrot.lane.b32.xlu1 %v1907_v53, %s1372_s5  ;;  %v964_v1 = vpop.permute.xlu0 %963 }
 0x358   :  { %v987_v3 = vmax.f32 %v955_v57, %v964_v1 }
 0x359   :  { %v966_v62 = vpop.permute.xlu1 %965  ;;  %863 = vrot.lane.b32.xlu0 %v1903_v55, %s1373_s28 }
 0x35a   :  { %v988_v5 = vmax.f32 %v956_v63, %v966_v62 }
 0x35b   :  { %865 = vrot.lane.b32.xlu1 %v1907_v53, %s1373_s28  ;;  %v996_v32 = vpop.permute.xlu0 %995 }
 0x35c   :  { %v1019_v6 = vmax.f32 %v987_v3, %v996_v32  ;;  %v1978_v3 = vmax.f32 %v1696_v29, 0.0  ;;  %v1983_v32 = vmax.f32 %v1709_v35, 0.0 }
 0x35d   :  { %v998_v13 = vpop.permute.xlu1 %997  ;;  %895 = vrot.lane.b32.xlu0 %v1903_v55, %s1374_s29 }
 0x35e   :  { %v1027_v36 = vmax.f32 %v1019_v6, %v1651_v11  ;;  %v1020_v15 = vmax.f32 %v988_v5, %v998_v13 }
 0x35f   :  { %897 = vrot.lane.b32.xlu1 %v1907_v53, %s1374_s29  ;;  %v1156_v25 = vpop.permute.xlu0 %1155 }
 0x360   :  { %v1067_v18 = vmax.f32 %v1027_v36, %v1044_v19  ;;  %v1028_v23 = vmax.f32 %v1020_v15, %v1659_v14 }
 0x361   :  { %v1158_v10 = vpop.permute.xlu1 %1157  ;;  %1055 = vrot.lane.b32.xlu0 %v1926_v17, %s1372_s5 }
 0x362   :  { %v1068_v31 = vmax.f32 %v1028_v23, %v1046_v26  ;;  %v1099_v38 = vmax.f32 %v1067_v18, %v1076_v34 }
 0x363   :  { %1057 = vrot.lane.b32.xlu1 %v1931_v16, %s1372_s5  ;;  %v1188_v11 = vpop.permute.xlu0 %1187 }
 0x364   :  { %v1131_v41 = vmax.f32 %v1099_v38, %v1108_v20  ;;  %v1100_v42 = vmax.f32 %v1068_v31, %v1078_v9  ;;  %v704_v9 = vadd.f32 %v1704_v33, %v1681_v22 }
 0x365   :  { %v1190_v46 = vpop.permute.xlu1 %1189  ;;  %1087 = vrot.lane.b32.xlu0 %v1926_v17, %s1373_s28 }
 0x366   :  { %v1139_v14 = vmax.f32 %v1131_v41, %v1726_v39  ;;  %v1132_v19 = vmax.f32 %v1100_v42, %v1110_v45  ;;  %v1949_v45 = vmax.f32 %v700_v49, 0.0  ;;  %v1953_v30 = vmax.f32 %v704_v9, 0.0 }
 0x367   :  { %1089 = vrot.lane.b32.xlu1 %v1931_v16, %s1373_s28  ;;  %v1220_v26 = vpop.permute.xlu0 %1219 }
 0x368   :  { %v1179_v34 = vmax.f32 %v1139_v14, %v1156_v25  ;;  %v1140_v24 = vmax.f32 %v1132_v19, %v1730_v40 }
 0x369   :  { %v1222_v20 = vpop.permute.xlu1 %1221  ;;  %1119 = vrot.lane.b32.xlu0 %v1926_v17, %s1374_s29 }
 0x36a   :  { %v1180_v50 = vmax.f32 %v1140_v24, %v1158_v10  ;;  %v1211_v39 = vmax.f32 %v1179_v34, %v1188_v11 }
 0x36b   :  { %1121 = vrot.lane.b32.xlu1 %v1931_v16, %s1374_s29  ;;  %v824_v21 = vpop.permute.xlu0 %823 }
 0x36c   :  { %v1212_v27 = vmax.f32 %v1180_v50, %v1190_v46  ;;  %v1243_v59 = vmax.f32 %v1211_v39, %v1220_v26  ;;  %v845_v6 = vmax.f32 %v1745_v43, %v824_v21 }
 0x36d   :  { %v826_v40 = vpop.permute.xlu1 %825  ;;  %943 = vrot.lane.b32.xlu0 %v1949_v45, %s1372_s5 }
 0x36e   :  { %1251 = vst.msk [vmem:[%s2055_s7] sm:$0xff] %vm408_vm1, %v1243_v59  ;;  %v1244_v22 = vmax.f32 %v1212_v27, %v1222_v20  ;;  %v846_v29 = vmax.f32 %v1749_v44, %v826_v40 }
 0x36f   :  { %945 = vrot.lane.b32.xlu1 %v1953_v30, %s1372_s5  ;;  %v856_v33 = vpop.permute.xlu0 %855 }
 0x370   :  { %1252 = vst.msk [vmem:[%s2055_s7 + $0x8] sm:$0xff] %vm408_vm1, %v1244_v22  ;;  %v877_v13 = vmax.f32 %v845_v6, %v856_v33 }
 0x371   :  { %v858_v1 = vpop.permute.xlu1 %857  ;;  %975 = vrot.lane.b32.xlu0 %v1949_v45, %s1373_s28 }
 0x372   :  { %v878_v15 = vmax.f32 %v846_v29, %v858_v1 }
 0x373   :  { %977 = vrot.lane.b32.xlu1 %v1953_v30, %s1373_s28  ;;  %v888_v57 = vpop.permute.xlu0 %887 }
 0x374   :  { %v909_v35 = vmax.f32 %v877_v13, %v888_v57 }
 0x375   :  { %v890_v58 = vpop.permute.xlu1 %889  ;;  %1007 = vrot.lane.b32.xlu0 %v1949_v45, %s1374_s29 }
 0x376   :  { %v910_v18 = vmax.f32 %v878_v15, %v890_v58  ;;  %v917_v43 = vmax.f32 %v909_v35, %v1785_v51 }
 0x377   :  { %1009 = vrot.lane.b32.xlu1 %v1953_v30, %s1374_s29  ;;  %v1048_v62 = vpop.permute.xlu0 %1047 }
 0x378   :  { %v918_v31 = vmax.f32 %v910_v18, %v1789_v52 }
 0x379   :  { %v1050_v63 = vpop.permute.xlu1 %1049  ;;  %1227 = vrot.lane.b32.xlu0 %v1885_v28, %s1374_s29 }
 0x37b   :  { %1229 = vrot.lane.b32.xlu1 %v1889_v37, %s1374_s29  ;;  %v1080_v4 = vpop.permute.xlu0 %1079 }
 0x37d   :  { %v1082_v5 = vpop.permute.xlu1 %1081  ;;  %1167 = vrot.lane.b32.xlu0 %v1978_v3, %s1372_s5 }
 0x37f   :  { %1169 = vrot.lane.b32.xlu1 %v1983_v32, %s1372_s5  ;;  %v1112_v8 = vpop.permute.xlu0 %1111 }
 0x381   :  { %v1114_v36 = vpop.permute.xlu1 %1113  ;;  %1199 = vrot.lane.b32.xlu0 %v1978_v3, %s1373_s28 }
 0x383   :  { %1201 = vrot.lane.b32.xlu1 %v1983_v32, %s1373_s28  ;;  %v936_v25 = vpop.permute.xlu0 %935 }
 0x384   :  { %v957_v10 = vmax.f32 %v917_v43, %v936_v25 }
 0x385   :  { %v938_v23 = vpop.permute.xlu1 %937  ;;  %1231 = vrot.lane.b32.xlu0 %v1978_v3, %s1374_s29 }
 0x386   :  { %v958_v11 = vmax.f32 %v918_v31, %v938_v23 }
 0x387   :  { %1233 = vrot.lane.b32.xlu1 %v1983_v32, %s1374_s29  ;;  %v968_v44 = vpop.permute.xlu0 %967 }
 0x388   :  { %v989_v41 = vmax.f32 %v957_v10, %v968_v44 }
 0x389   :  { %v970_v38 = vpop.permute.xlu1 %969 }
 0x38a   :  { %v990_v46 = vmax.f32 %v958_v11, %v970_v38 }
 0x38b   :  { %v1000_v42 = vpop.permute.xlu0 %999 }
 0x38c   :  { %v1021_v14 = vmax.f32 %v989_v41, %v1000_v42 }
 0x38d   :  { %v1002_v19 = vpop.permute.xlu1 %1001 }
 0x38e   :  { %v1029_v49 = vmax.f32 %v1021_v14, %v1765_v47  ;;  %v1022_v26 = vmax.f32 %v990_v46, %v1002_v19 }
 0x38f   :  { %v1160_v34 = vpop.permute.xlu0 %1159 }
 0x390   :  { %v1069_v24 = vmax.f32 %v1029_v49, %v1048_v62  ;;  %v1030_v51 = vmax.f32 %v1022_v26, %v1769_v48 }
 0x391   :  { %v1162_v9 = vpop.permute.xlu1 %1161 }
 0x392   :  { %v1070_v20 = vmax.f32 %v1030_v51, %v1050_v63  ;;  %v1101_v50 = vmax.f32 %v1069_v24, %v1080_v4 }
 0x393   :  { %v1192_v39 = vpop.permute.xlu0 %1191 }
 0x394   :  { %v1133_v21 = vmax.f32 %v1101_v50, %v1112_v8  ;;  %v1102_v52 = vmax.f32 %v1070_v20, %v1082_v5 }
 0x395   :  { %v1194_v27 = vpop.permute.xlu1 %1193 }
 0x396   :  { %v1141_v59 = vmax.f32 %v1133_v21, %v1805_v54  ;;  %v1134_v40 = vmax.f32 %v1102_v52, %v1114_v36 }
 0x397   :  { %v1224_v22 = vpop.permute.xlu0 %1223 }
 0x398   :  { %v1181_v33 = vmax.f32 %v1141_v59, %v1160_v34  ;;  %v1142_v1 = vmax.f32 %v1134_v40, %v1809_v56 }
 0x399   :  { %v1226_v47 = vpop.permute.xlu1 %1225 }
 0x39a   :  { %v1182_v57 = vmax.f32 %v1142_v1, %v1162_v9  ;;  %v1213_v58 = vmax.f32 %v1181_v33, %v1192_v39 }
 0x39b   :  { %v828_v62 = vpop.permute.xlu0 %827 }
 0x39c   :  { %v1214_v6 = vmax.f32 %v1182_v57, %v1194_v27  ;;  %v1245_v48 = vmax.f32 %v1213_v58, %v1224_v22  ;;  %v847_v11 = vmax.f32 %v1825_v60, %v828_v62 }
 0x39d   :  { %v830_v29 = vpop.permute.xlu1 %829 }
 0x39e   :  { %1253 = vst.msk [vmem:[%s2055_s7 + $0x10] sm:$0xff] %vm408_vm1, %v1245_v48  ;;  %v1246_v63 = vmax.f32 %v1214_v6, %v1226_v47  ;;  %v848_v42 = vmax.f32 %v1829_v61, %v830_v29 }
 0x39f   :  { %v860_v4 = vpop.permute.xlu0 %859 }
 0x3a0   :  { %1254 = vst.msk [vmem:[%s2055_s7 + $0x18] sm:$0xff] %vm408_vm1, %v1246_v63  ;;  %v879_v46 = vmax.f32 %v847_v11, %v860_v4 }
 0x3a1   :  { %v862_v54 = vpop.permute.xlu1 %861 }
 0x3a2   :  { %v880_v19 = vmax.f32 %v848_v42, %v862_v54 }
 0x3a3   :  { %v892_v56 = vpop.permute.xlu0 %891 }
 0x3a4   :  { %v911_v49 = vmax.f32 %v879_v46, %v892_v56 }
 0x3a5   :  { %v894_v5 = vpop.permute.xlu1 %893 }
 0x3a6   :  { %v912_v34 = vmax.f32 %v880_v19, %v894_v5  ;;  %v919_v51 = vmax.f32 %v911_v49, %v1865_v7 }
 0x3a7   :  { %v1052_v8 = vpop.permute.xlu0 %1051 }
 0x3a8   :  { %v920_v50 = vmax.f32 %v912_v34, %v1869_v12 }
 0x3a9   :  { %v1054_v13 = vpop.permute.xlu1 %1053 }
 0x3ab   :  { %v1084_v36 = vpop.permute.xlu0 %1083 }
 0x3ad   :  { %v1086_v15 = vpop.permute.xlu1 %1085 }
 0x3af   :  { %v1116_v35 = vpop.permute.xlu0 %1115 }
 0x3b1   :  { %v1118_v25 = vpop.permute.xlu1 %1117 }
 0x3b3   :  { %v940_v18 = vpop.permute.xlu0 %939 }
 0x3b4   :  { %v959_v20 = vmax.f32 %v919_v51, %v940_v18 }
 0x3b5   :  { %v942_v23 = vpop.permute.xlu1 %941 }
 0x3b6   :  { %v960_v21 = vmax.f32 %v920_v50, %v942_v23 }
 0x3b7   :  { %v972_v43 = vpop.permute.xlu0 %971 }
 0x3b8   :  { %v991_v60 = vmax.f32 %v959_v20, %v972_v43 }
 0x3b9   :  { %v974_v44 = vpop.permute.xlu1 %973 }
 0x3ba   :  { %v992_v27 = vmax.f32 %v960_v21, %v974_v44 }
 0x3bb   :  { %v1004_v10 = vpop.permute.xlu0 %1003 }
 0x3bc   :  { %v1023_v59 = vmax.f32 %v991_v60, %v1004_v10 }
 0x3bd   :  { %v1006_v31 = vpop.permute.xlu1 %1005 }
 0x3be   :  { %v1024_v40 = vmax.f32 %v992_v27, %v1006_v31  ;;  %v1031_v33 = vmax.f32 %v1023_v59, %v1845_v0 }
 0x3bf   :  { %v1164_v38 = vpop.permute.xlu0 %1163 }
 0x3c0   :  { %v1032_v47 = vmax.f32 %v1024_v40, %v1849_v2  ;;  %v1071_v7 = vmax.f32 %v1031_v33, %v1052_v8 }
 0x3c1   :  { %v2014_v41 = vpop.permute.xlu1 %1165 }
 0x3c2   :  { %v1072_v62 = vmax.f32 %v1032_v47, %v1054_v13  ;;  %v1103_v12 = vmax.f32 %v1071_v7, %v1084_v36 }
 0x3c3   :  { %v1196_v14 = vpop.permute.xlu0 %1195 }
 0x3c4   :  { %v1104_v63 = vmax.f32 %v1072_v62, %v1086_v15  ;;  %v1135_v5 = vmax.f32 %v1103_v12, %v1116_v35 }
 0x3c5   :  { %v1198_v26 = vpop.permute.xlu1 %1197 }
 0x3c6   :  { %v1136_v43 = vmax.f32 %v1104_v63, %v1118_v25  ;;  %v1143_v8 = vmax.f32 %v1135_v5, %v1885_v28 }
 0x3c7   :  { %v832_v24 = vpop.permute.xlu0 %831 }
 0x3c8   :  { %v849_v48 = vmax.f32 %v1903_v55, %v832_v24  ;;  %v1144_v55 = vmax.f32 %v1136_v43, %v1889_v37  ;;  %v1183_v31 = vmax.f32 %v1143_v8, %v1164_v38 }
 0x3c9   :  { %v834_v9 = vpop.permute.xlu1 %833 }
 0x3ca   :  { %v850_v4 = vmax.f32 %v1907_v53, %v834_v9  ;;  %v1184_v46 = vmax.f32 %v1144_v55, %v2014_v41  ;;  %v1215_v34 = vmax.f32 %v1183_v31, %v1196_v14 }
 0x3cb   :  { %v864_v39 = vpop.permute.xlu0 %863 }
 0x3cc   :  { %v881_v54 = vmax.f32 %v849_v48, %v864_v39  ;;  %v1216_v51 = vmax.f32 %v1184_v46, %v1198_v26 }
 0x3cd   :  { %v866_v52 = vpop.permute.xlu1 %865 }
 0x3ce   :  { %v882_v18 = vmax.f32 %v850_v4, %v866_v52 }
 0x3cf   :  { %v896_v61 = vpop.permute.xlu0 %895 }
 0x3d0   :  { %v913_v0 = vmax.f32 %v881_v54, %v896_v61 }
 0x3d1   :  { %v898_v22 = vpop.permute.xlu1 %897 }
 0x3d2   :  { %v914_v2 = vmax.f32 %v882_v18, %v898_v22  ;;  %v921_v13 = vmax.f32 %v913_v0, %v1949_v45 }
 0x3d3   :  { %v1056_v1 = vpop.permute.xlu0 %1055 }
 0x3d4   :  { %v922_v15 = vmax.f32 %v914_v2, %v1953_v30 }
 0x3d5   :  { %v1058_v57 = vpop.permute.xlu1 %1057 }
 0x3d7   :  { %v1088_v58 = vpop.permute.xlu0 %1087 }
 0x3d9   :  { %v1090_v6 = vpop.permute.xlu1 %1089 }
 0x3db   :  { %v1120_v29 = vpop.permute.xlu0 %1119 }
 0x3dd   :  { %v1122_v56 = vpop.permute.xlu1 %1121 }
 0x3df   :  { %v944_v23 = vpop.permute.xlu0 %943 }
 0x3e0   :  { %v961_v10 = vmax.f32 %v921_v13, %v944_v23 }
 0x3e1   :  { %v946_v44 = vpop.permute.xlu1 %945 }
 0x3e2   :  { %v962_v11 = vmax.f32 %v922_v15, %v946_v44 }
 0x3e3   :  { %v976_v36 = vpop.permute.xlu0 %975 }
 0x3e4   :  { %v993_v35 = vmax.f32 %v961_v10, %v976_v36 }
 0x3e5   :  { %v978_v53 = vpop.permute.xlu1 %977 }
 0x3e6   :  { %v994_v25 = vmax.f32 %v962_v11, %v978_v53 }
 0x3e7   :  { %v1008_v42 = vpop.permute.xlu0 %1007 }
 0x3e8   :  { %v1025_v19 = vmax.f32 %v993_v35, %v1008_v42 }
 0x3e9   :  { %v1010_v49 = vpop.permute.xlu1 %1009 }
 0x3ea   :  { %v1033_v28 = vmax.f32 %v1025_v19, %v1926_v17  ;;  %v1026_v45 = vmax.f32 %v994_v25, %v1010_v49 }
 0x3eb   :  { %v1228_v24 = vpop.permute.xlu0 %1227 }
 0x3ec   :  { %v1073_v37 = vmax.f32 %v1033_v28, %v1056_v1  ;;  %v1034_v9 = vmax.f32 %v1026_v45, %v1931_v16  ;;  %v1247_v30 = vmax.f32 %v1215_v34, %v1228_v24 }
 0x3ed   :  { %v1230_v20 = vpop.permute.xlu1 %1229 }
 0x3ee   :  { %v1074_v38 = vmax.f32 %v1034_v9, %v1058_v57  ;;  %1255 = vst.msk [vmem:[%s2055_s7 + $0x20] sm:$0xff] %vm408_vm1, %v1247_v30  ;;  %v1248_v41 = vmax.f32 %v1216_v51, %v1230_v20  ;;  %v1105_v50 = vmax.f32 %v1073_v37, %v1088_v58 }
 0x3ef   :  { %v1168_v39 = vpop.permute.xlu0 %1167 }
 0x3f0   :  { %1256 = vst.msk [vmem:[%s2055_s7 + $0x28] sm:$0xff] %vm408_vm1, %v1248_v41  ;;  %v1137_v17 = vmax.f32 %v1105_v50, %v1120_v29  ;;  %v1106_v14 = vmax.f32 %v1074_v38, %v1090_v6 }
 0x3f1   :  { %v1170_v26 = vpop.permute.xlu1 %1169 }
 0x3f2   :  { %v1145_v16 = vmax.f32 %v1137_v17, %v1978_v3  ;;  %v1138_v21 = vmax.f32 %v1106_v14, %v1122_v56 }
 0x3f3   :  { %v1200_v60 = vpop.permute.xlu0 %1199 }
 0x3f4   :  { %v1185_v52 = vmax.f32 %v1145_v16, %v1168_v39  ;;  %v1146_v27 = vmax.f32 %v1138_v21, %v1983_v32 }
 0x3f5   :  { %v1202_v59 = vpop.permute.xlu1 %1201 }
 0x3f6   :  { %v1186_v61 = vmax.f32 %v1146_v27, %v1170_v26  ;;  %v1217_v40 = vmax.f32 %v1185_v52, %v1200_v60 }
 0x3f7   :  { %v1232_v22 = vpop.permute.xlu0 %1231 }
 0x3f8   :  { %v1218_v33 = vmax.f32 %v1186_v61, %v1202_v59  ;;  %v1249_v1 = vmax.f32 %v1217_v40, %v1232_v22 }
 0x3f9   :  { %v1234_v47 = vpop.permute.xlu1 %1233 }
 0x3fa   :  { %1257 = vst.msk [vmem:[%s2055_s7 + $0x30] sm:$0xff] %vm408_vm1, %v1249_v1  ;;  %v1250_v57 = vmax.f32 %v1218_v33, %v1234_v47 }
 0x3fc   :  { %1258 = vst.msk [vmem:[%s2055_s7 + $0x38] sm:$0xff] %vm408_vm1, %v1250_v57 }

// kernel: neg.24
= control target key start
LH: loop header
LB: loop body
LE: loop exit
PB: predicated region body
PF: predicated region fallthrough
CT: control target
= control target key end

     0   :  { %s72_s0 = inlined_call_operand.vmem [shape: f32[2,32,16], index: 0, kind: input, shape index: {}]   ;;  %s73_s1 = inlined_call_operand.vmem [shape: f32[2,32,16], index: 1, kind: output, shape index: {}]  }
   0x1   :  { %v2_v0 = vld [vmem:[%s72_s0] sm:$0xff]  ;;  %v32_v1 = vld [vmem:[%s72_s0 + $0x10] sm:$0xff]  ;;  %v34_v2 = vld [vmem:[%s72_s0 + $0x8] sm:$0xff] }
   0x2   :  { %v5_v3 = vxor.u32 2147483648, %v2_v0  ;;  %v12_v4 = vxor.u32 2147483648, %v32_v1  ;;  %v20_v5 = vxor.u32 2147483648, %v34_v2  ;;  %v36_v6 = vld [vmem:[%s72_s0 + $0x18] sm:$0xff] }
   0x3   :  { %v28_v7 = vxor.u32 2147483648, %v36_v6 }
   0x4   :  { %7 = vst [vmem:[%s73_s1] sm:$0xff] %v5_v3  ;;  %33 = vst [vmem:[%s73_s1 + $0x10] sm:$0xff] %v12_v4 }
   0x5   :  { %35 = vst [vmem:[%s73_s1 + $0x8] sm:$0xff] %v20_v5  ;;  %37 = vst [vmem:[%s73_s1 + $0x18] sm:$0xff] %v28_v7 }

// kernel: forward.15
= control target key start
LH: loop header
LB: loop body
LE: loop exit
PB: predicated region body
PF: predicated region fallthrough
CT: control target
= control target key end

     0   :  { %v1012_v0 = vmov 0   ;;  %vm191_vm0 = vcmask 130048   ;;  %vm357_vm1 = vcmask 523264   ;;  %vm801_vm2 = vcmask 261248   ;;  %s1415_s0 = inlined_call_operand.vmem [shape: bf16[144,32], index: 0, kind: input, shape index: {}]   ;;  %s1416_s1 = inlined_call_operand.vmem [shape: bf16[64,144], index: 1, kind: input, shape index: {}]   ;;  %s1417_s2 = inlined_call_operand.vmem [shape: f32[64,1], index: 2, kind: input, shape index: {}, may-alias: {2,4}]   ;;  %s1418_s4 = inlined_call_operand.vmem [shape: f32[64,1], index: 4, kind: input, shape index: {}, may-alias: {2,4}]   ;;  %s1419_s6 = inlined_call_operand.vmem [shape: f32[128,1], index: 6, kind: input, shape index: {}]   ;;  %s1420_s3 = inlined_call_operand.vmem [shape: bf16[64,64], index: 3, kind: input, shape index: {}]   ;;  %s1421_s5 = inlined_call_operand.vmem [shape: bf16[128,64], index: 5, kind: input, shape index: {}]   ;;  %s1422_s7 = inlined_call_operand.vmem [shape: f32[128,2], index: 7, kind: output, shape index: {}]  }
   0x1   :  { %204 = vmatprep.subr.bf16.mxu0 %v1012_v0  ;;  %v979_v1 = vld [vmem:[%s1415_s0] sm:$0xff]   ;;  %977 = vset.pattern.permute.xlu0 %v1012_v0  ;;  %v980_v2 = vld [vmem:[%s1415_s0 + $0x8] sm:$0xff]   ;;  %v981_v3 = vld [vmem:[%s1415_s0 + $0x10] sm:$0xff]   ;;  %vm784_vm3 = vcmask 7168   ;;  %vm850_vm4 = vcmask 15368  }
   0x2   :  { %978 = vset.pattern.permute.xlu1 %v1012_v0  ;;  %205 = vmatpush1.bf16.msra.mxu0 %v979_v1  ;;  %v982_v4 = vld [vmem:[%s1415_s0 + $0x18] sm:$0xff]   ;;  %v990_v5 = vld [vmem:[%s1416_s1 + $0x4] ss:$8 sps:$4 sm:$0xff]   ;;  %v55_v8 = vld [vmem:[%s1417_s2 + $0x10] sm:$0xff] }
   0x3   :  { %206 = vmatprep.subr.bf16.mxu0 %v1012_v0  ;;  %888 = vmatprep.mubr.msk.bf16.mxu0 %vm191_vm0, %v990_v5  ;;  %v983_v6 = vld [vmem:[%s1415_s0 + $0x20] sm:$0xff]   ;;  %v54_v9 = vld [vmem:[%s1417_s2 + $0x8] sm:$0xff]  ;;  %v56_v10 = vld [vmem:[%s1417_s2 + $0x18] sm:$0xff] }
   0x4   :  { %v53_v7 = vld [vmem:[%s1417_s2] sm:$0xff]  ;;  %73 = vperm.xlu1 %978, %v55_v8   ;;  %v984_v11 = vld [vmem:[%s1415_s0 + $0x28] sm:$0xff]   ;;  %v985_v14 = vld [vmem:[%s1415_s0 + $0x30] sm:$0xff]  }
   0x5   :  { %63 = vperm.xlu0 %977, %v53_v7   ;;  %v57_v12 = vld [vmem:[%s1417_s2 + $0x20] sm:$0xff]  ;;  %v58_v13 = vld [vmem:[%s1417_s2 + $0x28] sm:$0xff]  ;;  %v59_v15 = vld [vmem:[%s1417_s2 + $0x30] sm:$0xff] }
   0x6   :  { %207 = vmatpush1.bf16.msra.mxu0 %v980_v2  ;;  %v60_v16 = vld [vmem:[%s1417_s2 + $0x38] sm:$0xff]  ;;  %v285_v18 = vld [vmem:[%s1418_s4] sm:$0xff]  ;;  %v286_v19 = vld [vmem:[%s1418_s4 + $0x8] sm:$0xff] }
   0x7   :  { %208 = vmatprep.subr.bf16.mxu0 %v1012_v0  ;;  %v986_v17 = vld [vmem:[%s1415_s0 + $0x38] sm:$0xff]   ;;  %v987_v20 = vld [vmem:[%s1415_s0 + $0x40] sm:$0xff]   ;;  %v287_v21 = vld [vmem:[%s1418_s4 + $0x10] sm:$0xff] }
   0x8   :  { %78 = vperm.xlu1 %978, %v56_v10   ;;  %v988_v22 = vld [vmem:[%s1416_s1] ss:$8 sps:$4 sm:$0xff]   ;;  %v288_v23 = vld [vmem:[%s1418_s4 + $0x18] sm:$0xff]  ;;  %v291_v27 = vld [vmem:[%s1418_s4 + $0x30] sm:$0xff] }
   0x9   :  { %68 = vperm.xlu0 %977, %v54_v9   ;;  %v991_v24 = vld [vmem:[%s1416_s1 + $0x14] ss:$8 sps:$4 sm:$0xff]   ;;  %v289_v25 = vld [vmem:[%s1418_s4 + $0x20] sm:$0xff]  ;;  %v290_v26 = vld [vmem:[%s1418_s4 + $0x28] sm:$0xff] }
   0xa   :  { %209 = vmatpush1.bf16.msra.mxu0 %v981_v3  ;;  %v993_v28 = vld [vmem:[%s1416_s1 + $0x10] ss:$8 sps:$4 sm:$0xff]   ;;  %v994_v30 = vld [vmem:[%s1416_s1 + $0x24] ss:$8 sps:$4 sm:$0xff]   ;;  %v996_v34 = vld [vmem:[%s1416_s1 + $0x20] ss:$8 sps:$4 sm:$0xff]  }
   0xb   :  { %210 = vmatprep.subr.bf16.mxu0 %v1012_v0  ;;  %v292_v29 = vld [vmem:[%s1418_s4 + $0x38] sm:$0xff]  ;;  %v459_v31 = vld [vmem:[%s1419_s6] sm:$0xff]  ;;  %v460_v32 = vld [vmem:[%s1419_s6 + $0x8] sm:$0xff] }
   0xc   :  { %88 = vperm.xlu1 %978, %v58_v13   ;;  %v461_v33 = vld [vmem:[%s1419_s6 + $0x10] sm:$0xff]  ;;  %v462_v35 = vld [vmem:[%s1419_s6 + $0x18] sm:$0xff]  ;;  %v463_v37 = vld [vmem:[%s1419_s6 + $0x20] sm:$0xff] }
   0xd   :  { %83 = vperm.xlu0 %977, %v57_v12   ;;  %v997_v36 = vld [vmem:[%s1416_s1 + $0x34] ss:$8 sps:$4 sm:$0xff]   ;;  %v464_v38 = vld [vmem:[%s1419_s6 + $0x28] sm:$0xff]  ;;  %v999_v40 = vld [vmem:[%s1416_s1 + $0x30] ss:$8 sps:$4 sm:$0xff]  }
   0xe   :  { %211 = vmatpush1.bf16.msra.mxu0 %v982_v4  ;;  %v465_v39 = vld [vmem:[%s1419_s6 + $0x30] sm:$0xff]  ;;  %v466_v41 = vld [vmem:[%s1419_s6 + $0x38] sm:$0xff]  ;;  %v467_v42 = vld [vmem:[%s1419_s6 + $0x40] sm:$0xff] }
   0xf   :  { %212 = vmatprep.subr.bf16.mxu0 %v1012_v0  ;;  %v468_v43 = vld [vmem:[%s1419_s6 + $0x48] sm:$0xff]  ;;  %v469_v44 = vld [vmem:[%s1419_s6 + $0x50] sm:$0xff]  ;;  %v470_v45 = vld [vmem:[%s1419_s6 + $0x58] sm:$0xff] }
  0x10   :  { %98 = vperm.xlu1 %978, %v60_v16   ;;  %v471_v46 = vld [vmem:[%s1419_s6 + $0x60] sm:$0xff]  ;;  %v472_v47 = vld [vmem:[%s1419_s6 + $0x68] sm:$0xff]  ;;  %v473_v48 = vld [vmem:[%s1419_s6 + $0x70] sm:$0xff] }
  0x11   :  { %93 = vperm.xlu0 %977, %v59_v15   ;;  %v474_v49 = vld [vmem:[%s1419_s6 + $0x78] sm:$0xff]  ;;  %v1000_v50 = vld [vmem:[%s1420_s3] sm:$0xff]  }
  0x12   :  { %213 = vmatpush1.bf16.msra.mxu0 %v983_v6  ;;  %944 = vmatprep.mubr.msk.bf16.mxu1 %vm357_vm1, %v1000_v50 }
  0x13   :  { %214 = vmatprep.subr.bf16.mxu0 %v1012_v0 }
  0x14   :  { %304 = vperm.xlu1 %978, %v286_v19  }
  0x15   :  { %299 = vperm.xlu0 %977, %v285_v18  }
  0x16   :  { %215 = vmatpush1.bf16.msra.mxu0 %v984_v11 }
  0x17   :  { %216 = vmatprep.subr.bf16.mxu0 %v1012_v0 }
  0x18   :  { %314 = vperm.xlu1 %978, %v288_v23  }
  0x19   :  { %309 = vperm.xlu0 %977, %v287_v21  }
  0x1a   :  { %217 = vmatpush1.bf16.msra.mxu0 %v985_v14 }
  0x1b   :  { %218 = vmatprep.subr.bf16.mxu0 %v1012_v0 }
  0x1c   :  { %324 = vperm.xlu1 %978, %v290_v26  }
  0x1d   :  { %319 = vperm.xlu0 %977, %v289_v25  }
  0x1e   :  { %219 = vmatpush1.bf16.msra.mxu0 %v986_v17 }
  0x1f   :  { %220 = vmatprep.subr.bf16.mxu0 %v1012_v0 }
  0x20   :  { %334 = vperm.xlu1 %978, %v292_v29  }
  0x21   :  { %329 = vperm.xlu0 %977, %v291_v27  }
  0x22   :  { %221 = vmatpush1.bf16.msra.mxu0 %v987_v20 }
  0x24   :  { %486 = vperm.xlu1 %978, %v460_v32   ;;  %v1002_v32 = vld [vmem:[%s1420_s3 + $0x10] sm:$0xff]  }
  0x25   :  { %237 = vmatmul.mubr.bf16.vlgmr.msra.gmra.mrb[0].mxu0 %v988_v22  ;;  %481 = vperm.xlu0 %977, %v459_v31   ;;  %v1001_v31 = vld [vmem:[%s1420_s3 + $0x8] sm:$0xff]  }
  0x26   :  { %889 = vmatprep.mubr.msk.bf16.mxu0 %vm191_vm0, %v991_v24 }
  0x28   :  { %496 = vperm.xlu1 %978, %v462_v35  }
  0x29   :  { %491 = vperm.xlu0 %977, %v461_v33   ;;  %v1003_v33 = vld [vmem:[%s1420_s3 + $0x18] sm:$0xff]  }
  0x2c   :  { %506 = vperm.xlu1 %978, %v464_v38  }
  0x2d   :  { %245 = vmatmul.mubr.bf16.gmra.mrb[4].mxu0 %v993_v28  ;;  %501 = vperm.xlu0 %977, %v463_v37  }
  0x2e   :  { %890 = vmatprep.mubr.msk.bf16.mxu0 %vm191_vm0, %v994_v30 }
  0x30   :  { %516 = vperm.xlu1 %978, %v466_v41  }
  0x31   :  { %511 = vperm.xlu0 %977, %v465_v39  }
  0x34   :  { %526 = vperm.xlu1 %978, %v468_v43  }
  0x35   :  { %253 = vmatmul.mubr.bf16.gmra.mrb[8].mxu0 %v996_v34  ;;  %521 = vperm.xlu0 %977, %v467_v42   ;;  %v1004_v34 = vld [vmem:[%s1421_s5] sm:$0xff]  }
  0x36   :  { %891 = vmatprep.mubr.msk.bf16.mxu0 %vm191_vm0, %v997_v36 }
  0x38   :  { %536 = vperm.xlu1 %978, %v470_v45  }
  0x39   :  { %531 = vperm.xlu0 %977, %v469_v44  }
  0x3c   :  { %546 = vperm.xlu1 %978, %v472_v47  }
  0x3d   :  { %261 = vmatmul.mubr.bf16.gmra.mrb[12].mxu0 %v999_v40  ;;  %541 = vperm.xlu0 %977, %v471_v46  }
  0x40   :  { %556 = vperm.xlu1 %978, %v474_v49  }
  0x41   :  { %551 = vperm.xlu0 %977, %v473_v48  }
  0x83   :  { %v74_v59 = vpop.permute.xlu1 %73 }
  0x84   :  { %v64_v51 = vpop.permute.xlu0 %63 }
  0x87   :  { %v79_v2 = vpop.permute.xlu1 %78 }
  0x88   :  { %v69_v55 = vpop.permute.xlu0 %68 }
  0x8b   :  { %v89_v13 = vpop.permute.xlu1 %88 }
  0x8c   :  { %v84_v9 = vpop.permute.xlu0 %83 }
  0x8f   :  { %v99_v24 = vpop.permute.xlu1 %98 }
  0x90   :  { %v94_v20 = vpop.permute.xlu0 %93 }
  0x93   :  { %v305_v36 = vpop.permute.xlu1 %304 }
  0x94   :  { %v300_v35 = vpop.permute.xlu0 %299 }
  0x97   :  { %v315_v38 = vpop.permute.xlu1 %314 }
  0x98   :  { %v310_v37 = vpop.permute.xlu0 %309 }
  0x9b   :  { %v325_v47 = vpop.permute.xlu1 %324 }
  0x9c   :  { %v320_v42 = vpop.permute.xlu0 %319 }
  0xf8   :  { %v238_v52 = vpop.f32.mrb[0].mxu0 }
  0xf9   :  { %v239_v53 = vadd.f32 %v238_v52, %v64_v51  ;;  %v240_v54 = vpop.f32.mrb[1].mxu0 }
  0xfa   :  { %v241_v56 = vpop.f32.mrb[2].mxu0  ;;  %v330_v54 = vpop.permute.xlu0 %329 }
  0xfb   :  { %v242_v57 = vadd.f32 %v241_v56, %v69_v55  ;;  %v243_v58 = vpop.f32.mrb[3].mxu0  ;;  %v269_v60 = vmax.f32 %v239_v53, 0.0 }
  0xfd   :  { %v270_v61 = vmax.f32 %v242_v57, 0.0 }
  0xff   :  { %v293_v62 = vpack.c.bf16 %v270_v61, %v269_v60 }
 0x100   :  { %v246_v63 = vpop.f32.mrb[4].mxu0 }
 0x101   :  { %v247_v0 = vadd.f32 %v246_v63, %v74_v59  ;;  %v248_v1 = vpop.f32.mrb[5].mxu0  ;;  %936 = vmatprep.subr.bf16.mxu1 %v293_v62  ;;  %v335_v59 = vpop.permute.xlu1 %334 }
 0x102   :  { %v249_v3 = vpop.f32.mrb[6].mxu0  ;;  %937 = vmatpush3.bf16.msra.mxu1 %v293_v62 }
 0x103   :  { %v250_v4 = vadd.f32 %v249_v3, %v79_v2  ;;  %v251_v5 = vpop.f32.mrb[7].mxu0  ;;  %v271_v6 = vmax.f32 %v247_v0, 0.0 }
 0x105   :  { %v272_v7 = vmax.f32 %v250_v4, 0.0 }
 0x107   :  { %v294_v8 = vpack.c.bf16 %v272_v7, %v271_v6  ;;  %v1005_v7 = vld [vmem:[%s1421_s5 + $0x8] sm:$0xff]  }
 0x108   :  { %v254_v10 = vpop.f32.mrb[8].mxu0 }
 0x109   :  { %v255_v11 = vadd.f32 %v254_v10, %v84_v9  ;;  %v256_v12 = vpop.f32.mrb[9].mxu0  ;;  %938 = vmatprep.subr.bf16.mxu1 %v294_v8  ;;  %v1007_v9 = vld [vmem:[%s1421_s5 + $0x18] sm:$0xff]   ;;  %v1008_v10 = vld [vmem:[%s1421_s5 + $0x20] sm:$0xff]  }
 0x10a   :  { %v257_v14 = vpop.f32.mrb[10].mxu0  ;;  %939 = vmatpush3.bf16.msra.mxu1 %v294_v8  ;;  %v1006_v8 = vld [vmem:[%s1421_s5 + $0x10] sm:$0xff]  }
 0x10b   :  { %v258_v15 = vadd.f32 %v257_v14, %v89_v13  ;;  %v259_v16 = vpop.f32.mrb[11].mxu0  ;;  %v273_v17 = vmax.f32 %v255_v11, 0.0  ;;  %v1009_v11 = vld [vmem:[%s1421_s5 + $0x28] sm:$0xff]   ;;  %v1010_v12 = vld [vmem:[%s1421_s5 + $0x30] sm:$0xff]   ;;  %v1011_v13 = vld [vmem:[%s1421_s5 + $0x38] sm:$0xff]   ;;  %v487_v14 = vpop.permute.xlu1 %486 }
 0x10d   :  { %v274_v18 = vmax.f32 %v258_v15, 0.0  ;;  %v482_v15 = vpop.permute.xlu0 %481 }
 0x10f   :  { %v295_v19 = vpack.c.bf16 %v274_v18, %v273_v17  ;;  %v497_v16 = vpop.permute.xlu1 %496 }
 0x110   :  { %v262_v21 = vpop.f32.mrb[12].mxu0 }
 0x111   :  { %v263_v22 = vadd.f32 %v262_v21, %v94_v20  ;;  %v264_v23 = vpop.f32.mrb[13].mxu0  ;;  %940 = vmatprep.subr.bf16.mxu1 %v295_v19  ;;  %v492_v17 = vpop.permute.xlu0 %491 }
 0x112   :  { %v265_v25 = vpop.f32.mrb[14].mxu0  ;;  %941 = vmatpush3.bf16.msra.mxu1 %v295_v19 }
 0x113   :  { %v266_v26 = vadd.f32 %v265_v25, %v99_v24  ;;  %v267_v27 = vpop.f32.mrb[15].mxu0  ;;  %v275_v28 = vmax.f32 %v263_v22, 0.0  ;;  %v507_v18 = vpop.permute.xlu1 %506 }
 0x115   :  { %v276_v29 = vmax.f32 %v266_v26, 0.0  ;;  %v502_v20 = vpop.permute.xlu0 %501 }
 0x117   :  { %v296_v30 = vpack.c.bf16 %v276_v29, %v275_v28  ;;  %v517_v23 = vpop.permute.xlu1 %516 }
 0x119   :  { %942 = vmatprep.subr.bf16.mxu1 %v296_v30 }
 0x11a   :  { %943 = vmatpush3.bf16.msra.mxu1 %v296_v30 }
 0x11d   :  { %945 = vmatmul.mubr.msk.bf16.vlgmr.msra.gmra.mrb[0].mxu1 %vm357_vm1, %v1001_v31 }
 0x11e   :  { %948 = vmatprep.mubr.msk.bf16.mxu1 %vm357_vm1, %v1002_v32 }
 0x125   :  { %949 = vmatmul.mubr.msk.bf16.gmra.mrb[4].mxu1 %vm357_vm1, %v1003_v33  ;;  %v512_v33 = vpop.permute.xlu0 %511 }
 0x126   :  { %960 = vmatprep.mubr.msk.bf16.mxu1 %vm357_vm1, %v1004_v34  ;;  %v1254_v34 = vpop.permute.xlu1 %526 }
 0x1f0   :  { %v946_v39 = vpop.f32.mrb[0].mxu1 }
 0x1f1   :  { %v413_v40 = vadd.f32 %v946_v39, %v310_v37  ;;  %v404_v41 = vpop.f32.mrb[1].mxu1 }
 0x1f2   :  { %v405_v43 = vadd.f32 %v404_v41, %v300_v35  ;;  %v947_v44 = vpop.f32.mrb[2].mxu1 }
 0x1f3   :  { %v416_v45 = vadd.f32 %v947_v44, %v315_v38  ;;  %v407_v46 = vpop.f32.mrb[3].mxu1  ;;  %v437_v49 = vmax.f32 %v413_v40, 0.0 }
 0x1f4   :  { %v408_v48 = vadd.f32 %v407_v46, %v305_v36  ;;  %v435_v51 = vmax.f32 %v405_v43, 0.0 }
 0x1f5   :  { %v438_v50 = vmax.f32 %v416_v45, 0.0 }
 0x1f6   :  { %v436_v52 = vmax.f32 %v408_v48, 0.0 }
 0x1f7   :  { %v476_v53 = vpack.c.bf16 %v438_v50, %v437_v49 }
 0x1f8   :  { %v475_v55 = vpack.c.bf16 %v436_v52, %v435_v51  ;;  %v950_v56 = vpop.f32.mrb[4].mxu1 }
 0x1f9   :  { %v429_v57 = vadd.f32 %v950_v56, %v330_v54  ;;  %v420_v58 = vpop.f32.mrb[5].mxu1  ;;  %v522_v54 = vpop.permute.xlu0 %521 }
 0x1fa   :  { %v421_v60 = vadd.f32 %v420_v58, %v320_v42  ;;  %v951_v61 = vpop.f32.mrb[6].mxu1  ;;  %952 = vmatprep.subr.bf16.mxu1 %v475_v55 }
 0x1fb   :  { %v432_v62 = vadd.f32 %v951_v61, %v335_v59  ;;  %v423_v63 = vpop.f32.mrb[7].mxu1  ;;  %953 = vmatpush3.bf16.msra.mxu1 %v475_v55  ;;  %v441_v1 = vmax.f32 %v429_v57, 0.0 }
 0x1fc   :  { %v424_v0 = vadd.f32 %v423_v63, %v325_v47  ;;  %954 = vmatprep.subr.bf16.mxu1 %v476_v53  ;;  %v439_v3 = vmax.f32 %v421_v60, 0.0  ;;  %v537_v47 = vpop.permute.xlu1 %536 }
 0x1fd   :  { %v442_v2 = vmax.f32 %v432_v62, 0.0  ;;  %v532_v62 = vpop.permute.xlu0 %531 }
 0x1fe   :  { %v440_v4 = vmax.f32 %v424_v0, 0.0 }
 0x1ff   :  { %v478_v5 = vpack.c.bf16 %v442_v2, %v441_v1  ;;  %955 = vmatpush3.bf16.msra.mxu1 %v476_v53 }
 0x200   :  { %v477_v6 = vpack.c.bf16 %v440_v4, %v439_v3  ;;  %v547_v57 = vpop.permute.xlu1 %546 }
 0x202   :  { %956 = vmatprep.subr.bf16.mxu1 %v477_v6 }
 0x203   :  { %957 = vmatpush3.bf16.msra.mxu1 %v477_v6 }
 0x204   :  { %958 = vmatprep.subr.bf16.mxu1 %v478_v5 }
 0x207   :  { %959 = vmatpush3.bf16.msra.mxu1 %v478_v5  ;;  %v557_v5 = vpop.permute.xlu1 %556 }
 0x20a   :  { %961 = vmatmul.mubr.msk.bf16.vlgmr.msra.gmra.mrb[8].mxu1 %vm357_vm1, %v1005_v7 }
 0x20b   :  { %964 = vmatprep.mubr.msk.bf16.mxu1 %vm357_vm1, %v1006_v8 }
 0x212   :  { %965 = vmatmul.mubr.msk.bf16.gmra.mrb[12].mxu1 %vm357_vm1, %v1007_v9 }
 0x213   :  { %968 = vmatprep.mubr.msk.bf16.mxu1 %vm357_vm1, %v1008_v10 }
 0x21a   :  { %969 = vmatmul.mubr.msk.bf16.gmra.mrb[16].mxu1 %vm357_vm1, %v1009_v11 }
 0x21b   :  { %972 = vmatprep.mubr.msk.bf16.mxu1 %vm357_vm1, %v1010_v12 }
 0x222   :  { %973 = vmatmul.mubr.msk.bf16.gmra.mrb[20].mxu1 %vm357_vm1, %v1011_v13 }
 0x2dd   :  { %v962_v19 = vpop.f32.mrb[8].mxu1 }
 0x2de   :  { %v666_v21 = vadd.f32 %v962_v19, %v492_v17  ;;  %v657_v22 = vpop.f32.mrb[9].mxu1  ;;  %v542_v19 = vpop.permute.xlu0 %541 }
 0x2df   :  { %v658_v24 = vadd.f32 %v657_v22, %v482_v15  ;;  %v963_v25 = vpop.f32.mrb[10].mxu1 }
 0x2e0   :  { %v722_v26 = vmax.f32 %v666_v21, 0.0  ;;  %v660_v27 = vpop.f32.mrb[11].mxu1  ;;  %v669_v28 = vadd.f32 %v963_v25, %v497_v16 }
 0x2e1   :  { %v720_v29 = vmax.f32 %v658_v24, 0.0  ;;  %v661_v30 = vadd.f32 %v660_v27, %v487_v14 }
 0x2e2   :  { %v808_v31 = vsel %vm801_vm2, %v722_v26, -inf  ;;  %v742_v32 = vsel %vm191_vm0, %v722_v26, -inf  ;;  %v723_v35 = vmax.f32 %v669_v28, 0.0  ;;  %v552_v24 = vpop.permute.xlu0 %551 }
 0x2e3   :  { %809 = vmax.xlane.f32.xlu1 %v808_v31  ;;  %743 = vmax.xlane.f32.xlu0 %v742_v32  ;;  %v721_v37 = vmax.f32 %v661_v30, 0.0  ;;  %v802_v40 = vsel %vm801_vm2, %v720_v29, -inf  ;;  %v736_v41 = vsel %vm191_vm0, %v720_v29, -inf }
 0x2e4   :  { %v745_v46 = vsel %vm191_vm0, %v723_v35, -inf  ;;  %v811_v53 = vsel %vm801_vm2, %v723_v35, -inf }
 0x2e5   :  { %v966_v36 = vpop.f32.mrb[12].mxu1  ;;  %v739_v45 = vsel %vm191_vm0, %v721_v37, -inf  ;;  %v805_v61 = vsel %vm801_vm2, %v721_v37, -inf }
 0x2e6   :  { %v682_v38 = vadd.f32 %v966_v36, %v512_v33  ;;  %v673_v39 = vpop.f32.mrb[13].mxu1 }
 0x2e7   :  { %v967_v42 = vpop.f32.mrb[14].mxu1  ;;  %803 = vmax.xlane.f32.xlu1 %v802_v40  ;;  %737 = vmax.xlane.f32.xlu0 %v736_v41  ;;  %v674_v49 = vadd.f32 %v673_v39, %v502_v20 }
 0x2e8   :  { %v676_v43 = vpop.f32.mrb[15].mxu1  ;;  %v726_v44 = vmax.f32 %v682_v38, 0.0  ;;  %v685_v50 = vadd.f32 %v967_v42, %v517_v23 }
 0x2e9   :  { %v724_v58 = vmax.f32 %v674_v49, 0.0  ;;  %v677_v63 = vadd.f32 %v676_v43, %v507_v18 }
 0x2ea   :  { %v754_v52 = vsel %vm191_vm0, %v726_v44, -inf  ;;  %v727_v59 = vmax.f32 %v685_v50, 0.0  ;;  %v820_v60 = vsel %vm801_vm2, %v726_v44, -inf }
 0x2eb   :  { %740 = vmax.xlane.f32.xlu1 %v739_v45  ;;  %746 = vmax.xlane.f32.xlu0 %v745_v46  ;;  %v748_v3 = vsel %vm191_vm0, %v724_v58, -inf  ;;  %v725_v9 = vmax.f32 %v677_v63, 0.0  ;;  %v814_v12 = vsel %vm801_vm2, %v724_v58, -inf }
 0x2ec   :  { %v757_v4 = vsel %vm191_vm0, %v727_v59, -inf  ;;  %v823_v13 = vsel %vm801_vm2, %v727_v59, -inf }
 0x2ed   :  { %v970_v48 = vpop.f32.mrb[16].mxu1  ;;  %v751_v18 = vsel %vm191_vm0, %v725_v9, -inf  ;;  %v817_v23 = vsel %vm801_vm2, %v725_v9, -inf }
 0x2ee   :  { %v689_v51 = vpop.f32.mrb[17].mxu1  ;;  %v698_v1 = vadd.f32 %v970_v48, %v532_v62 }
 0x2ef   :  { %v971_v55 = vpop.f32.mrb[18].mxu1  ;;  %755 = vmax.xlane.f32.xlu1 %v754_v52  ;;  %812 = vmax.xlane.f32.xlu0 %v811_v53  ;;  %v690_v15 = vadd.f32 %v689_v51, %v522_v54 }
 0x2f0   :  { %v692_v56 = vpop.f32.mrb[19].mxu1  ;;  %v730_v10 = vmax.f32 %v698_v1, 0.0  ;;  %v701_v16 = vadd.f32 %v971_v55, %v537_v47 }
 0x2f1   :  { %v728_v20 = vmax.f32 %v690_v15, 0.0  ;;  %v693_v25 = vadd.f32 %v692_v56, %v1254_v34 }
 0x2f2   :  { %v766_v17 = vsel %vm191_vm0, %v730_v10, -inf  ;;  %v731_v21 = vmax.f32 %v701_v16, 0.0  ;;  %v832_v22 = vsel %vm801_vm2, %v730_v10, -inf }
 0x2f3   :  { %821 = vmax.xlane.f32.xlu1 %v820_v60  ;;  %806 = vmax.xlane.f32.xlu0 %v805_v61  ;;  %v760_v27 = vsel %vm191_vm0, %v728_v20, -inf  ;;  %v729_v29 = vmax.f32 %v693_v25, 0.0  ;;  %v826_v32 = vsel %vm801_vm2, %v728_v20, -inf }
 0x2f4   :  { %v769_v28 = vsel %vm191_vm0, %v731_v21, -inf  ;;  %v835_v33 = vsel %vm801_vm2, %v731_v21, -inf }
 0x2f5   :  { %v974_v0 = vpop.f32.mrb[20].mxu1  ;;  %v763_v34 = vsel %vm191_vm0, %v729_v29, -inf  ;;  %v829_v39 = vsel %vm801_vm2, %v729_v29, -inf }
 0x2f6   :  { %v705_v2 = vpop.f32.mrb[21].mxu1  ;;  %v714_v26 = vadd.f32 %v974_v0, %v552_v24 }
 0x2f7   :  { %v975_v6 = vpop.f32.mrb[22].mxu1  ;;  %749 = vmax.xlane.f32.xlu1 %v748_v3  ;;  %758 = vmax.xlane.f32.xlu0 %v757_v4  ;;  %v706_v31 = vadd.f32 %v705_v2, %v542_v19 }
 0x2f8   :  { %v717_v7 = vadd.f32 %v975_v6, %v557_v5  ;;  %v708_v8 = vpop.f32.mrb[23].mxu1  ;;  %v734_v30 = vmax.f32 %v714_v26, 0.0 }
 0x2f9   :  { %v732_v35 = vmax.f32 %v706_v31, 0.0  ;;  %v709_v37 = vadd.f32 %v708_v8, %v547_v57 }
 0x2fa   :  { %v735_v11 = vmax.f32 %v717_v7, 0.0  ;;  %v778_v36 = vsel %vm191_vm0, %v734_v30, -inf  ;;  %v844_v43 = vsel %vm801_vm2, %v734_v30, -inf }
 0x2fb   :  { %815 = vmax.xlane.f32.xlu1 %v814_v12  ;;  %824 = vmax.xlane.f32.xlu0 %v823_v13  ;;  %v772_v38 = vsel %vm191_vm0, %v732_v35, -inf  ;;  %v733_v40 = vmax.f32 %v709_v37, 0.0  ;;  %v838_v41 = vsel %vm801_vm2, %v732_v35, -inf }
 0x2fc   :  { %v847_v14 = vsel %vm801_vm2, %v735_v11, -inf  ;;  %v781_v42 = vsel %vm191_vm0, %v735_v11, -inf }
 0x2fd   :  { %v775_v44 = vsel %vm191_vm0, %v733_v40, -inf  ;;  %v841_v45 = vsel %vm801_vm2, %v733_v40, -inf }
 0x2ff   :  { %767 = vmax.xlane.f32.xlu1 %v766_v17  ;;  %752 = vmax.xlane.f32.xlu0 %v751_v18 }
 0x303   :  { %833 = vmax.xlane.f32.xlu1 %v832_v22  ;;  %818 = vmax.xlane.f32.xlu0 %v817_v23 }
 0x307   :  { %761 = vmax.xlane.f32.xlu1 %v760_v27  ;;  %770 = vmax.xlane.f32.xlu0 %v769_v28 }
 0x30b   :  { %827 = vmax.xlane.f32.xlu1 %v826_v32  ;;  %836 = vmax.xlane.f32.xlu0 %v835_v33 }
 0x30f   :  { %779 = vmax.xlane.f32.xlu1 %v778_v36  ;;  %764 = vmax.xlane.f32.xlu0 %v763_v34 }
 0x313   :  { %773 = vmax.xlane.f32.xlu1 %v772_v38  ;;  %830 = vmax.xlane.f32.xlu0 %v829_v39 }
 0x317   :  { %839 = vmax.xlane.f32.xlu1 %v838_v41  ;;  %782 = vmax.xlane.f32.xlu0 %v781_v42 }
 0x31b   :  { %845 = vmax.xlane.f32.xlu1 %v844_v43  ;;  %776 = vmax.xlane.f32.xlu0 %v775_v44 }
 0x31f   :  { %842 = vmax.xlane.f32.xlu0 %v841_v45 }
 0x323   :  { %848 = vmax.xlane.f32.xlu0 %v847_v14 }
 0x370   :  { %v810_v46 = vpop.xlane.xlu1 %809  ;;  %v744_v47 = vpop.xlane.xlu0 %743 }
 0x371   :  { %787 = vst.msk [vmem:[%s1422_s7 + $0x10] sm:$0xff] %vm784_vm3, %v744_v47 }
 0x372   :  { %853 = vst.msk [vmem:[%s1422_s7 + $0x10] sm:$0xff] %vm850_vm4, %v810_v46 }
 0x374   :  { %v804_v48 = vpop.xlane.xlu1 %803  ;;  %v738_v49 = vpop.xlane.xlu0 %737 }
 0x375   :  { %785 = vst.msk [vmem:[%s1422_s7] sm:$0xff] %vm784_vm3, %v738_v49 }
 0x376   :  { %851 = vst.msk [vmem:[%s1422_s7] sm:$0xff] %vm850_vm4, %v804_v48 }
 0x378   :  { %v741_v50 = vpop.xlane.xlu1 %740  ;;  %v747_v51 = vpop.xlane.xlu0 %746 }
 0x379   :  { %786 = vst.msk [vmem:[%s1422_s7 + $0x8] sm:$0xff] %vm784_vm3, %v741_v50  ;;  %788 = vst.msk [vmem:[%s1422_s7 + $0x18] sm:$0xff] %vm784_vm3, %v747_v51 }
 0x37c   :  { %v756_v52 = vpop.xlane.xlu1 %755  ;;  %v813_v53 = vpop.xlane.xlu0 %812 }
 0x37d   :  { %791 = vst.msk [vmem:[%s1422_s7 + $0x30] sm:$0xff] %vm784_vm3, %v756_v52 }
 0x37e   :  { %854 = vst.msk [vmem:[%s1422_s7 + $0x18] sm:$0xff] %vm850_vm4, %v813_v53 }
 0x380   :  { %v822_v54 = vpop.xlane.xlu1 %821  ;;  %v807_v55 = vpop.xlane.xlu0 %806 }
 0x381   :  { %857 = vst.msk [vmem:[%s1422_s7 + $0x30] sm:$0xff] %vm850_vm4, %v822_v54  ;;  %852 = vst.msk [vmem:[%s1422_s7 + $0x8] sm:$0xff] %vm850_vm4, %v807_v55 }
 0x384   :  { %v750_v56 = vpop.xlane.xlu1 %749  ;;  %v759_v57 = vpop.xlane.xlu0 %758 }
 0x385   :  { %789 = vst.msk [vmem:[%s1422_s7 + $0x20] sm:$0xff] %vm784_vm3, %v750_v56  ;;  %792 = vst.msk [vmem:[%s1422_s7 + $0x38] sm:$0xff] %vm784_vm3, %v759_v57 }
 0x388   :  { %v816_v58 = vpop.xlane.xlu1 %815  ;;  %v825_v59 = vpop.xlane.xlu0 %824 }
 0x389   :  { %855 = vst.msk [vmem:[%s1422_s7 + $0x20] sm:$0xff] %vm850_vm4, %v816_v58  ;;  %858 = vst.msk [vmem:[%s1422_s7 + $0x38] sm:$0xff] %vm850_vm4, %v825_v59 }
 0x38c   :  { %v768_v60 = vpop.xlane.xlu1 %767  ;;  %v753_v61 = vpop.xlane.xlu0 %752 }
 0x38d   :  { %795 = vst.msk [vmem:[%s1422_s7 + $0x50] sm:$0xff] %vm784_vm3, %v768_v60  ;;  %790 = vst.msk [vmem:[%s1422_s7 + $0x28] sm:$0xff] %vm784_vm3, %v753_v61 }
 0x390   :  { %v834_v62 = vpop.xlane.xlu1 %833  ;;  %v819_v63 = vpop.xlane.xlu0 %818 }
 0x391   :  { %861 = vst.msk [vmem:[%s1422_s7 + $0x50] sm:$0xff] %vm850_vm4, %v834_v62  ;;  %856 = vst.msk [vmem:[%s1422_s7 + $0x28] sm:$0xff] %vm850_vm4, %v819_v63 }
 0x394   :  { %v762_v0 = vpop.xlane.xlu1 %761  ;;  %v771_v1 = vpop.xlane.xlu0 %770 }
 0x395   :  { %793 = vst.msk [vmem:[%s1422_s7 + $0x40] sm:$0xff] %vm784_vm3, %v762_v0  ;;  %796 = vst.msk [vmem:[%s1422_s7 + $0x58] sm:$0xff] %vm784_vm3, %v771_v1 }
 0x398   :  { %v828_v2 = vpop.xlane.xlu1 %827  ;;  %v837_v3 = vpop.xlane.xlu0 %836 }
 0x399   :  { %859 = vst.msk [vmem:[%s1422_s7 + $0x40] sm:$0xff] %vm850_vm4, %v828_v2  ;;  %862 = vst.msk [vmem:[%s1422_s7 + $0x58] sm:$0xff] %vm850_vm4, %v837_v3 }
 0x39c   :  { %v780_v4 = vpop.xlane.xlu1 %779  ;;  %v765_v5 = vpop.xlane.xlu0 %764 }
 0x39d   :  { %799 = vst.msk [vmem:[%s1422_s7 + $0x70] sm:$0xff] %vm784_vm3, %v780_v4  ;;  %794 = vst.msk [vmem:[%s1422_s7 + $0x48] sm:$0xff] %vm784_vm3, %v765_v5 }
 0x3a0   :  { %v774_v6 = vpop.xlane.xlu1 %773  ;;  %v831_v7 = vpop.xlane.xlu0 %830 }
 0x3a1   :  { %797 = vst.msk [vmem:[%s1422_s7 + $0x60] sm:$0xff] %vm784_vm3, %v774_v6 }
 0x3a2   :  { %860 = vst.msk [vmem:[%s1422_s7 + $0x48] sm:$0xff] %vm850_vm4, %v831_v7 }
 0x3a4   :  { %v840_v8 = vpop.xlane.xlu1 %839  ;;  %v783_v9 = vpop.xlane.xlu0 %782 }
 0x3a5   :  { %863 = vst.msk [vmem:[%s1422_s7 + $0x60] sm:$0xff] %vm850_vm4, %v840_v8 }
 0x3a6   :  { %800 = vst.msk [vmem:[%s1422_s7 + $0x78] sm:$0xff] %vm784_vm3, %v783_v9 }
 0x3a8   :  { %v846_v10 = vpop.xlane.xlu1 %845  ;;  %v777_v11 = vpop.xlane.xlu0 %776 }
 0x3a9   :  { %865 = vst.msk [vmem:[%s1422_s7 + $0x70] sm:$0xff] %vm850_vm4, %v846_v10 }
 0x3aa   :  { %798 = vst.msk [vmem:[%s1422_s7 + $0x68] sm:$0xff] %vm784_vm3, %v777_v11 }
 0x3ac   :  { %v843_v12 = vpop.xlane.xlu0 %842 }
 0x3ad   :  { %864 = vst.msk [vmem:[%s1422_s7 + $0x68] sm:$0xff] %vm850_vm4, %v843_v12 }
 0x3b0   :  { %v849_v13 = vpop.xlane.xlu0 %848 }
 0x3b1   :  { %866 = vst.msk [vmem:[%s1422_s7 + $0x78] sm:$0xff] %vm850_vm4, %v849_v13 }

// kernel: forward.16
= control target key start
LH: loop header
LB: loop body
LE: loop exit
PB: predicated region body
PF: predicated region fallthrough
CT: control target
= control target key end

     0   :  { %v628_v1 = vmov 0   ;;  %vm398_vm0 = vcmask 523264   ;;  %vm484_vm1 = vcmask 261120   ;;  %s827_s0 = inlined_call_operand.vmem [shape: bf16[256,32], index: 0, kind: input, shape index: {}]   ;;  %s828_s1 = inlined_call_operand.vmem [shape: bf16[64,256], index: 1, kind: input, shape index: {}]   ;;  %s829_s2 = inlined_call_operand.vmem [shape: f32[64,1], index: 2, kind: input, shape index: {}, may-alias: {2,4}]   ;;  %s830_s4 = inlined_call_operand.vmem [shape: f32[64,1], index: 4, kind: input, shape index: {}, may-alias: {2,4}]   ;;  %s831_s3 = inlined_call_operand.vmem [shape: bf16[64,64], index: 3, kind: input, shape index: {}]   ;;  %s832_s5 = inlined_call_operand.vmem [shape: f32[64,32], index: 5, kind: output, shape index: {}]  }
   0x1   :  { %v596_v0 = vld [vmem:[%s827_s0 + $0x40] sm:$0xff]   ;;  %594 = vset.pattern.permute.xlu0 %v628_v1  ;;  %595 = vset.pattern.permute.xlu1 %v628_v1  ;;  %v598_v3 = vld [vmem:[%s827_s0 + $0x48] sm:$0xff]   ;;  %v600_v5 = vld [vmem:[%s827_s0 + $0x50] sm:$0xff]  }
   0x2   :  { %v597_v2 = vld [vmem:[%s827_s0] sm:$0xff]   ;;  %529 = vmatprep.subr.bf16.mxu0 %v596_v0  ;;  %v599_v4 = vld [vmem:[%s827_s0 + $0x8] sm:$0xff]   ;;  %v601_v6 = vld [vmem:[%s827_s0 + $0x10] sm:$0xff]  }
   0x3   :  { %530 = vmatpush3.bf16.msra.mxu0 %v597_v2  ;;  %v602_v7 = vld [vmem:[%s827_s0 + $0x58] sm:$0xff]   ;;  %v604_v9 = vld [vmem:[%s827_s0 + $0x60] sm:$0xff]   ;;  %v606_v11 = vld [vmem:[%s827_s0 + $0x68] sm:$0xff]  }
   0x4   :  { %531 = vmatprep.subr.bf16.mxu0 %v598_v3  ;;  %v603_v8 = vld [vmem:[%s827_s0 + $0x18] sm:$0xff]   ;;  %v605_v10 = vld [vmem:[%s827_s0 + $0x20] sm:$0xff]   ;;  %v607_v13 = vld [vmem:[%s827_s0 + $0x28] sm:$0xff]  }
   0x5   :  { %v614_v12 = vld [vmem:[%s828_s1 + $0x4] ss:$8 sps:$4 sm:$0xff]   ;;  %v608_v14 = vld [vmem:[%s827_s0 + $0x70] sm:$0xff]   ;;  %v64_v19 = vld [vmem:[%s829_s2 + $0x18] sm:$0xff] }
   0x6   :  { %277 = vmatprep.mubr.bf16.mxu0 %v614_v12  ;;  %v61_v15 = vld [vmem:[%s829_s2] sm:$0xff]  ;;  %v63_v16 = vld [vmem:[%s829_s2 + $0x10] sm:$0xff]  ;;  %v62_v18 = vld [vmem:[%s829_s2 + $0x8] sm:$0xff] }
   0x7   :  { %532 = vmatpush3.bf16.msra.mxu0 %v599_v4  ;;  %71 = vperm.xlu0 %594, %v61_v15   ;;  %v609_v17 = vld [vmem:[%s827_s0 + $0x30] sm:$0xff]   ;;  %v610_v20 = vld [vmem:[%s827_s0 + $0x78] sm:$0xff]   ;;  %v65_v22 = vld [vmem:[%s829_s2 + $0x20] sm:$0xff] }
   0x8   :  { %533 = vmatprep.subr.bf16.mxu0 %v600_v5  ;;  %81 = vperm.xlu1 %595, %v63_v16   ;;  %v611_v21 = vld [vmem:[%s827_s0 + $0x38] sm:$0xff]   ;;  %v66_v23 = vld [vmem:[%s829_s2 + $0x28] sm:$0xff]  ;;  %v67_v26 = vld [vmem:[%s829_s2 + $0x30] sm:$0xff] }
   0x9   :  { %v612_v24 = vld [vmem:[%s828_s1] ss:$8 sps:$4 sm:$0xff]   ;;  %v615_v25 = vld [vmem:[%s828_s1 + $0x14] ss:$8 sps:$4 sm:$0xff]   ;;  %v617_v30 = vld [vmem:[%s828_s1 + $0x10] ss:$8 sps:$4 sm:$0xff]  }
   0xa   :  { %v68_v27 = vld [vmem:[%s829_s2 + $0x38] sm:$0xff]  ;;  %v326_v28 = vld [vmem:[%s830_s4] sm:$0xff]  ;;  %v327_v29 = vld [vmem:[%s830_s4 + $0x8] sm:$0xff] }
   0xb   :  { %534 = vmatpush3.bf16.msra.mxu0 %v601_v6  ;;  %76 = vperm.xlu0 %594, %v62_v18   ;;  %v618_v31 = vld [vmem:[%s828_s1 + $0x24] ss:$8 sps:$4 sm:$0xff]   ;;  %v328_v32 = vld [vmem:[%s830_s4 + $0x10] sm:$0xff]  ;;  %v329_v33 = vld [vmem:[%s830_s4 + $0x18] sm:$0xff] }
   0xc   :  { %535 = vmatprep.subr.bf16.mxu0 %v602_v7  ;;  %86 = vperm.xlu1 %595, %v64_v19   ;;  %v330_v34 = vld [vmem:[%s830_s4 + $0x20] sm:$0xff]  ;;  %v331_v35 = vld [vmem:[%s830_s4 + $0x28] sm:$0xff]  ;;  %v621_v37 = vld [vmem:[%s828_s1 + $0x34] ss:$8 sps:$4 sm:$0xff]  }
   0xd   :  { %v620_v36 = vld [vmem:[%s828_s1 + $0x20] ss:$8 sps:$4 sm:$0xff]   ;;  %v332_v38 = vld [vmem:[%s830_s4 + $0x30] sm:$0xff]  ;;  %v333_v39 = vld [vmem:[%s830_s4 + $0x38] sm:$0xff] }
   0xe   :  { %v623_v40 = vld [vmem:[%s828_s1 + $0x30] ss:$8 sps:$4 sm:$0xff]   ;;  %v624_v41 = vld [vmem:[%s831_s3] sm:$0xff]  }
   0xf   :  { %536 = vmatpush3.bf16.msra.mxu0 %v603_v8  ;;  %91 = vperm.xlu0 %594, %v65_v22  }
  0x10   :  { %537 = vmatprep.subr.bf16.mxu0 %v604_v9  ;;  %96 = vperm.xlu1 %595, %v66_v23  }
  0x11   :  { %585 = vmatprep.mubr.msk.bf16.mxu1 %vm398_vm0, %v624_v41 }
  0x13   :  { %538 = vmatpush3.bf16.msra.mxu0 %v605_v10  ;;  %101 = vperm.xlu0 %594, %v67_v26  }
  0x14   :  { %539 = vmatprep.subr.bf16.mxu0 %v606_v11  ;;  %106 = vperm.xlu1 %595, %v68_v27  }
  0x17   :  { %540 = vmatpush3.bf16.msra.mxu0 %v607_v13  ;;  %340 = vperm.xlu0 %594, %v326_v28  }
  0x18   :  { %541 = vmatprep.subr.bf16.mxu0 %v608_v14  ;;  %345 = vperm.xlu1 %595, %v327_v29  }
  0x1b   :  { %542 = vmatpush3.bf16.msra.mxu0 %v609_v17  ;;  %350 = vperm.xlu0 %594, %v328_v32   ;;  %v627_v32 = vld [vmem:[%s831_s3 + $0x18] sm:$0xff]  }
  0x1c   :  { %543 = vmatprep.subr.bf16.mxu0 %v610_v20  ;;  %355 = vperm.xlu1 %595, %v329_v33  }
  0x1f   :  { %544 = vmatpush3.bf16.msra.mxu0 %v611_v21  ;;  %360 = vperm.xlu0 %594, %v330_v34  }
  0x20   :  { %365 = vperm.xlu1 %595, %v331_v35  }
  0x22   :  { %278 = vmatmul.mubr.bf16.vlgmr.msra.gmra.mrb[0].mxu0 %v612_v24 }
  0x23   :  { %285 = vmatprep.mubr.bf16.mxu0 %v615_v25  ;;  %370 = vperm.xlu0 %594, %v332_v38  }
  0x24   :  { %375 = vperm.xlu1 %595, %v333_v39  }
  0x2a   :  { %286 = vmatmul.mubr.bf16.gmra.mrb[4].mxu0 %v617_v30  ;;  %v625_v30 = vld [vmem:[%s831_s3 + $0x8] sm:$0xff]  }
  0x2b   :  { %293 = vmatprep.mubr.bf16.mxu0 %v618_v31  ;;  %v626_v31 = vld [vmem:[%s831_s3 + $0x10] sm:$0xff]  }
  0x32   :  { %294 = vmatmul.mubr.bf16.gmra.mrb[8].mxu0 %v620_v36 }
  0x33   :  { %301 = vmatprep.mubr.bf16.mxu0 %v621_v37 }
  0x3a   :  { %302 = vmatmul.mubr.bf16.gmra.mrb[12].mxu0 %v623_v40 }
  0x86   :  { %v72_v42 = vpop.permute.xlu0 %71 }
  0x87   :  { %v82_v52 = vpop.permute.xlu1 %81 }
  0x8a   :  { %v77_v50 = vpop.permute.xlu0 %76 }
  0x8b   :  { %v87_v63 = vpop.permute.xlu1 %86 }
  0x8e   :  { %v92_v8 = vpop.permute.xlu0 %91 }
  0x8f   :  { %v97_v12 = vpop.permute.xlu1 %96 }
  0x92   :  { %v102_v21 = vpop.permute.xlu0 %101 }
  0x93   :  { %v107_v25 = vpop.permute.xlu1 %106 }
  0x96   :  { %v341_v33 = vpop.permute.xlu0 %340 }
  0x97   :  { %v346_v34 = vpop.permute.xlu1 %345 }
  0x9a   :  { %v351_v35 = vpop.permute.xlu0 %350 }
  0x9b   :  { %v356_v36 = vpop.permute.xlu1 %355 }
  0x9e   :  { %v361_v40 = vpop.permute.xlu0 %360 }
  0xf5   :  { %v545_v43 = vpop.f32.mrb[0].mxu0 }
  0xf6   :  { %v546_v44 = vpop.f32.mrb[1].mxu0 }
  0xf7   :  { %v547_v45 = vadd.f32 %v546_v44, %v545_v43  ;;  %v548_v46 = vpop.f32.mrb[2].mxu0 }
  0xf8   :  { %v549_v47 = vpop.f32.mrb[3].mxu0 }
  0xf9   :  { %v280_v48 = vadd.f32 %v547_v45, %v72_v42  ;;  %v550_v49 = vadd.f32 %v549_v47, %v548_v46  ;;  %v366_v46 = vpop.permute.xlu1 %365 }
  0xfb   :  { %v283_v51 = vadd.f32 %v550_v49, %v77_v50  ;;  %v310_v53 = vmax.f32 %v280_v48, 0.0 }
  0xfd   :  { %v311_v54 = vmax.f32 %v283_v51, 0.0  ;;  %v551_v55 = vpop.f32.mrb[4].mxu0  ;;  %v371_v51 = vpop.permute.xlu0 %370 }
  0xfe   :  { %v552_v56 = vpop.f32.mrb[5].mxu0 }
  0xff   :  { %v553_v57 = vadd.f32 %v552_v56, %v551_v55  ;;  %v554_v58 = vpop.f32.mrb[6].mxu0  ;;  %v334_v59 = vpack.c.bf16 %v311_v54, %v310_v53  ;;  %v376_v55 = vpop.permute.xlu1 %375 }
 0x100   :  { %v555_v60 = vpop.f32.mrb[7].mxu0 }
 0x101   :  { %v288_v61 = vadd.f32 %v553_v57, %v82_v52  ;;  %v556_v62 = vadd.f32 %v555_v60, %v554_v58  ;;  %577 = vmatprep.subr.bf16.mxu1 %v334_v59 }
 0x102   :  { %578 = vmatpush3.bf16.msra.mxu1 %v334_v59 }
 0x103   :  { %v291_v0 = vadd.f32 %v556_v62, %v87_v63  ;;  %v312_v1 = vmax.f32 %v288_v61, 0.0 }
 0x105   :  { %v313_v2 = vmax.f32 %v291_v0, 0.0  ;;  %v557_v3 = vpop.f32.mrb[8].mxu0 }
 0x106   :  { %v558_v4 = vpop.f32.mrb[9].mxu0 }
 0x107   :  { %v559_v5 = vadd.f32 %v558_v4, %v557_v3  ;;  %v560_v6 = vpop.f32.mrb[10].mxu0  ;;  %v335_v7 = vpack.c.bf16 %v313_v2, %v312_v1 }
 0x108   :  { %v561_v9 = vpop.f32.mrb[11].mxu0 }
 0x109   :  { %v296_v10 = vadd.f32 %v559_v5, %v92_v8  ;;  %v562_v11 = vadd.f32 %v561_v9, %v560_v6  ;;  %579 = vmatprep.subr.bf16.mxu1 %v335_v7 }
 0x10a   :  { %580 = vmatpush3.bf16.msra.mxu1 %v335_v7 }
 0x10b   :  { %v299_v13 = vadd.f32 %v562_v11, %v97_v12  ;;  %v314_v14 = vmax.f32 %v296_v10, 0.0 }
 0x10d   :  { %v315_v15 = vmax.f32 %v299_v13, 0.0  ;;  %v563_v16 = vpop.f32.mrb[12].mxu0 }
 0x10e   :  { %v564_v17 = vpop.f32.mrb[13].mxu0 }
 0x10f   :  { %v565_v18 = vadd.f32 %v564_v17, %v563_v16  ;;  %v566_v19 = vpop.f32.mrb[14].mxu0  ;;  %v336_v20 = vpack.c.bf16 %v315_v15, %v314_v14 }
 0x110   :  { %v567_v22 = vpop.f32.mrb[15].mxu0 }
 0x111   :  { %v304_v23 = vadd.f32 %v565_v18, %v102_v21  ;;  %v568_v24 = vadd.f32 %v567_v22, %v566_v19  ;;  %581 = vmatprep.subr.bf16.mxu1 %v336_v20 }
 0x112   :  { %582 = vmatpush3.bf16.msra.mxu1 %v336_v20 }
 0x113   :  { %v307_v26 = vadd.f32 %v568_v24, %v107_v25  ;;  %v316_v27 = vmax.f32 %v304_v23, 0.0 }
 0x115   :  { %v317_v28 = vmax.f32 %v307_v26, 0.0 }
 0x117   :  { %v337_v29 = vpack.c.bf16 %v317_v28, %v316_v27 }
 0x119   :  { %583 = vmatprep.subr.bf16.mxu1 %v337_v29 }
 0x11a   :  { %584 = vmatpush3.bf16.msra.mxu1 %v337_v29 }
 0x11d   :  { %586 = vmatmul.mubr.msk.bf16.vlgmr.msra.gmra.mrb[0].mxu1 %vm398_vm0, %v625_v30 }
 0x11e   :  { %589 = vmatprep.mubr.msk.bf16.mxu1 %vm398_vm0, %v626_v31 }
 0x125   :  { %590 = vmatmul.mubr.msk.bf16.gmra.mrb[4].mxu1 %vm398_vm0, %v627_v32 }
 0x1f0   :  { %v587_v37 = vpop.f32.mrb[0].mxu1 }
 0x1f1   :  { %v454_v38 = vadd.f32 %v587_v37, %v351_v35  ;;  %v445_v39 = vpop.f32.mrb[1].mxu1 }
 0x1f2   :  { %v446_v41 = vadd.f32 %v445_v39, %v341_v33  ;;  %v588_v42 = vpop.f32.mrb[2].mxu1 }
 0x1f3   :  { %v478_v43 = vmax.f32 %v454_v38, 0.0  ;;  %v457_v44 = vadd.f32 %v588_v42, %v356_v36  ;;  %v448_v45 = vpop.f32.mrb[3].mxu1 }
 0x1f4   :  { %v476_v47 = vmax.f32 %v446_v41, 0.0  ;;  %v449_v48 = vadd.f32 %v448_v45, %v346_v34 }
 0x1f5   :  { %487 = vst.msk [vmem:[%s832_s5 + $0x10] sm:$0xff] %vm484_vm1, %v478_v43  ;;  %v479_v49 = vmax.f32 %v457_v44, 0.0 }
 0x1f6   :  { %485 = vst.msk [vmem:[%s832_s5] sm:$0xff] %vm484_vm1, %v476_v47  ;;  %v477_v50 = vmax.f32 %v449_v48, 0.0 }
 0x1f7   :  { %488 = vst.msk [vmem:[%s832_s5 + $0x18] sm:$0xff] %vm484_vm1, %v479_v49 }
 0x1f8   :  { %486 = vst.msk [vmem:[%s832_s5 + $0x8] sm:$0xff] %vm484_vm1, %v477_v50  ;;  %v591_v52 = vpop.f32.mrb[4].mxu1 }
 0x1f9   :  { %v470_v53 = vadd.f32 %v591_v52, %v371_v51  ;;  %v461_v54 = vpop.f32.mrb[5].mxu1 }
 0x1fa   :  { %v462_v56 = vadd.f32 %v461_v54, %v361_v40  ;;  %v592_v57 = vpop.f32.mrb[6].mxu1 }
 0x1fb   :  { %v482_v58 = vmax.f32 %v470_v53, 0.0  ;;  %v473_v59 = vadd.f32 %v592_v57, %v376_v55  ;;  %v464_v60 = vpop.f32.mrb[7].mxu1 }
 0x1fc   :  { %v480_v61 = vmax.f32 %v462_v56, 0.0  ;;  %v465_v62 = vadd.f32 %v464_v60, %v366_v46 }
 0x1fd   :  { %491 = vst.msk [vmem:[%s832_s5 + $0x30] sm:$0xff] %vm484_vm1, %v482_v58  ;;  %v483_v63 = vmax.f32 %v473_v59, 0.0 }
 0x1fe   :  { %489 = vst.msk [vmem:[%s832_s5 + $0x20] sm:$0xff] %vm484_vm1, %v480_v61  ;;  %v481_v0 = vmax.f32 %v465_v62, 0.0 }
 0x1ff   :  { %492 = vst.msk [vmem:[%s832_s5 + $0x38] sm:$0xff] %vm484_vm1, %v483_v63 }
 0x200   :  { %490 = vst.msk [vmem:[%s832_s5 + $0x28] sm:$0xff] %vm484_vm1, %v481_v0 }

// kernel: neg.26
= control target key start
LH: loop header
LB: loop body
LE: loop exit
PB: predicated region body
PF: predicated region fallthrough
CT: control target
= control target key end

     0   :  { %s136_s0 = inlined_call_operand.vmem [shape: f32[2,128,32], index: 0, kind: input, shape index: {}]   ;;  %s137_s1 = inlined_call_operand.vmem [shape: f32[2,128,32], index: 1, kind: output, shape index: {}]  }
   0x1   :  { %v2_v0 = vld [vmem:[%s136_s0] sm:$0xff]  ;;  %v66_v2 = vld [vmem:[%s136_s0 + $0x8] sm:$0xff]  ;;  %v70_v7 = vld [vmem:[%s136_s0 + $0x10] sm:$0xff] }
   0x2   :  { %v64_v1 = vld [vmem:[%s136_s0 + $0x20] sm:$0xff]  ;;  %v5_v3 = vxor.u32 2147483648, %v2_v0  ;;  %v20_v5 = vxor.u32 2147483648, %v66_v2  ;;  %v68_v6 = vld [vmem:[%s136_s0 + $0x28] sm:$0xff]  ;;  %v72_v8 = vld [vmem:[%s136_s0 + $0x30] sm:$0xff]  ;;  %v36_v10 = vxor.u32 2147483648, %v70_v7 }
   0x3   :  { %v12_v4 = vxor.u32 2147483648, %v64_v1  ;;  %v28_v9 = vxor.u32 2147483648, %v68_v6  ;;  %v44_v11 = vxor.u32 2147483648, %v72_v8  ;;  %v74_v12 = vld [vmem:[%s136_s0 + $0x18] sm:$0xff] }
   0x4   :  { %v76_v13 = vld [vmem:[%s136_s0 + $0x38] sm:$0xff]  ;;  %7 = vst [vmem:[%s137_s1] sm:$0xff] %v5_v3  ;;  %67 = vst [vmem:[%s137_s1 + $0x8] sm:$0xff] %v20_v5  ;;  %v52_v14 = vxor.u32 2147483648, %v74_v12 }
   0x5   :  { %65 = vst [vmem:[%s137_s1 + $0x20] sm:$0xff] %v12_v4  ;;  %v60_v15 = vxor.u32 2147483648, %v76_v13  ;;  %69 = vst [vmem:[%s137_s1 + $0x28] sm:$0xff] %v28_v9 }
   0x6   :  { %71 = vst [vmem:[%s137_s1 + $0x10] sm:$0xff] %v36_v10  ;;  %73 = vst [vmem:[%s137_s1 + $0x30] sm:$0xff] %v44_v11 }
   0x7   :  { %75 = vst [vmem:[%s137_s1 + $0x18] sm:$0xff] %v52_v14  ;;  %77 = vst [vmem:[%s137_s1 + $0x38] sm:$0xff] %v60_v15 }

// kernel: forward.17
= control target key start
LH: loop header
LB: loop body
LE: loop exit
PB: predicated region body
PF: predicated region fallthrough
CT: control target
= control target key end

     0   :  { %v460_v0 = vmov 0   ;;  %vm193_vm0 = vcmask 261120   ;;  %vm321_vm1 = vcmask 523264   ;;  %s609_s0 = inlined_call_operand.vmem [shape: bf16[160,64], index: 0, kind: input, shape index: {}]   ;;  %s610_s1 = inlined_call_operand.vmem [shape: bf16[64,160], index: 1, kind: input, shape index: {}]   ;;  %s611_s2 = inlined_call_operand.vmem [shape: f32[64,1], index: 2, kind: input, shape index: {}]   ;;  %s612_s4 = inlined_call_operand.vmem [shape: f32[32,1], index: 4, kind: input, shape index: {}]   ;;  %s613_s3 = inlined_call_operand.vmem [shape: bf16[32,64], index: 3, kind: input, shape index: {}]   ;;  %s614_s5 = inlined_call_operand.vmem [shape: f32[32,64], index: 5, kind: output, shape index: {}]  }
   0x1   :  { %206 = vmatprep.subr.bf16.mxu0 %v460_v0  ;;  %v436_v1 = vld [vmem:[%s609_s0] sm:$0xff]   ;;  %434 = vset.pattern.permute.xlu0 %v460_v0  ;;  %v437_v2 = vld [vmem:[%s609_s0 + $0x8] sm:$0xff]   ;;  %v438_v3 = vld [vmem:[%s609_s0 + $0x10] sm:$0xff]  }
   0x2   :  { %435 = vset.pattern.permute.xlu1 %v460_v0  ;;  %207 = vmatpush1.bf16.msra.mxu0 %v436_v1  ;;  %v439_v4 = vld [vmem:[%s609_s0 + $0x18] sm:$0xff]   ;;  %v448_v5 = vld [vmem:[%s610_s1 + $0x4] ss:$8 sps:$4 sm:$0xff]   ;;  %v51_v8 = vld [vmem:[%s611_s2 + $0x10] sm:$0xff] }
   0x3   :  { %208 = vmatprep.subr.bf16.mxu0 %v460_v0  ;;  %407 = vmatprep.mubr.msk.bf16.mxu0 %vm193_vm0, %v448_v5  ;;  %v440_v6 = vld [vmem:[%s609_s0 + $0x20] sm:$0xff]   ;;  %v50_v9 = vld [vmem:[%s611_s2 + $0x8] sm:$0xff]  ;;  %v52_v10 = vld [vmem:[%s611_s2 + $0x18] sm:$0xff] }
   0x4   :  { %v49_v7 = vld [vmem:[%s611_s2] sm:$0xff]  ;;  %69 = vperm.xlu1 %435, %v51_v8   ;;  %v441_v11 = vld [vmem:[%s609_s0 + $0x28] sm:$0xff]   ;;  %v442_v14 = vld [vmem:[%s609_s0 + $0x30] sm:$0xff]  }
   0x5   :  { %59 = vperm.xlu0 %434, %v49_v7   ;;  %v53_v12 = vld [vmem:[%s611_s2 + $0x20] sm:$0xff]  ;;  %v54_v13 = vld [vmem:[%s611_s2 + $0x28] sm:$0xff]  ;;  %v55_v15 = vld [vmem:[%s611_s2 + $0x30] sm:$0xff] }
   0x6   :  { %209 = vmatpush1.bf16.msra.mxu0 %v437_v2  ;;  %v56_v16 = vld [vmem:[%s611_s2 + $0x38] sm:$0xff]  ;;  %v283_v18 = vld [vmem:[%s612_s4] sm:$0xff]  ;;  %v284_v19 = vld [vmem:[%s612_s4 + $0x8] sm:$0xff] }
   0x7   :  { %210 = vmatprep.subr.bf16.mxu0 %v460_v0  ;;  %v443_v17 = vld [vmem:[%s609_s0 + $0x38] sm:$0xff]   ;;  %v444_v20 = vld [vmem:[%s609_s0 + $0x40] sm:$0xff]   ;;  %v285_v21 = vld [vmem:[%s612_s4 + $0x10] sm:$0xff] }
   0x8   :  { %74 = vperm.xlu1 %435, %v52_v10   ;;  %v286_v22 = vld [vmem:[%s612_s4 + $0x18] sm:$0xff]  ;;  %v445_v23 = vld [vmem:[%s609_s0 + $0x48] sm:$0xff]   ;;  %v458_v31 = vld [vmem:[%s613_s3] sm:$0xff]  }
   0x9   :  { %64 = vperm.xlu0 %434, %v50_v9   ;;  %v446_v24 = vld [vmem:[%s610_s1] ss:$8 sps:$4 sm:$0xff]   ;;  %v449_v25 = vld [vmem:[%s610_s1 + $0x14] ss:$8 sps:$4 sm:$0xff]   ;;  %v451_v26 = vld [vmem:[%s610_s1 + $0x10] ss:$8 sps:$4 sm:$0xff]   ;;  %429 = vmatprep.mubr.msk.bf16.mxu1 %vm321_vm1, %v458_v31 }
   0xa   :  { %211 = vmatpush1.bf16.msra.mxu0 %v438_v3  ;;  %v452_v27 = vld [vmem:[%s610_s1 + $0x24] ss:$8 sps:$4 sm:$0xff]   ;;  %v454_v28 = vld [vmem:[%s610_s1 + $0x20] ss:$8 sps:$4 sm:$0xff]   ;;  %v455_v29 = vld [vmem:[%s610_s1 + $0x34] ss:$8 sps:$4 sm:$0xff]  }
   0xb   :  { %212 = vmatprep.subr.bf16.mxu0 %v460_v0  ;;  %v457_v30 = vld [vmem:[%s610_s1 + $0x30] ss:$8 sps:$4 sm:$0xff]  }
   0xc   :  { %84 = vperm.xlu1 %435, %v54_v13  }
   0xd   :  { %79 = vperm.xlu0 %434, %v53_v12   ;;  %v459_v12 = vld [vmem:[%s613_s3 + $0x8] sm:$0xff]  }
   0xe   :  { %213 = vmatpush1.bf16.msra.mxu0 %v439_v4 }
   0xf   :  { %214 = vmatprep.subr.bf16.mxu0 %v460_v0 }
  0x10   :  { %94 = vperm.xlu1 %435, %v56_v16  }
  0x11   :  { %89 = vperm.xlu0 %434, %v55_v15  }
  0x12   :  { %215 = vmatpush1.bf16.msra.mxu0 %v440_v6 }
  0x13   :  { %216 = vmatprep.subr.bf16.mxu0 %v460_v0 }
  0x14   :  { %298 = vperm.xlu1 %435, %v284_v19  }
  0x15   :  { %293 = vperm.xlu0 %434, %v283_v18  }
  0x16   :  { %217 = vmatpush1.bf16.msra.mxu0 %v441_v11 }
  0x17   :  { %218 = vmatprep.subr.bf16.mxu0 %v460_v0 }
  0x18   :  { %308 = vperm.xlu1 %435, %v286_v22  }
  0x19   :  { %303 = vperm.xlu0 %434, %v285_v21  }
  0x1a   :  { %219 = vmatpush1.bf16.msra.mxu0 %v442_v14 }
  0x1b   :  { %220 = vmatprep.subr.bf16.mxu0 %v460_v0 }
  0x1e   :  { %221 = vmatpush1.bf16.msra.mxu0 %v443_v17 }
  0x1f   :  { %222 = vmatprep.subr.bf16.mxu0 %v460_v0 }
  0x22   :  { %223 = vmatpush1.bf16.msra.mxu0 %v444_v20 }
  0x23   :  { %224 = vmatprep.subr.bf16.mxu0 %v460_v0 }
  0x26   :  { %225 = vmatpush1.bf16.msra.mxu0 %v445_v23 }
  0x29   :  { %239 = vmatmul.mubr.bf16.vlgmr.msra.gmra.mrb[0].mxu0 %v446_v24 }
  0x2a   :  { %408 = vmatprep.mubr.msk.bf16.mxu0 %vm193_vm0, %v449_v25 }
  0x31   :  { %247 = vmatmul.mubr.bf16.gmra.mrb[4].mxu0 %v451_v26 }
  0x32   :  { %409 = vmatprep.mubr.msk.bf16.mxu0 %vm193_vm0, %v452_v27 }
  0x39   :  { %255 = vmatmul.mubr.bf16.gmra.mrb[8].mxu0 %v454_v28 }
  0x3a   :  { %410 = vmatprep.mubr.msk.bf16.mxu0 %vm193_vm0, %v455_v29 }
  0x41   :  { %263 = vmatmul.mubr.bf16.gmra.mrb[12].mxu0 %v457_v30 }
  0x83   :  { %v70_v40 = vpop.permute.xlu1 %69 }
  0x84   :  { %v60_v32 = vpop.permute.xlu0 %59 }
  0x87   :  { %v75_v47 = vpop.permute.xlu1 %74 }
  0x88   :  { %v65_v36 = vpop.permute.xlu0 %64 }
  0x8b   :  { %v85_v58 = vpop.permute.xlu1 %84 }
  0x8c   :  { %v80_v54 = vpop.permute.xlu0 %79 }
  0x8f   :  { %v95_v5 = vpop.permute.xlu1 %94 }
  0x90   :  { %v90_v1 = vpop.permute.xlu0 %89 }
  0x93   :  { %v299_v14 = vpop.permute.xlu1 %298 }
  0x94   :  { %v294_v13 = vpop.permute.xlu0 %293 }
  0x97   :  { %v309_v19 = vpop.permute.xlu1 %308 }
  0x98   :  { %v304_v15 = vpop.permute.xlu0 %303 }
  0xfc   :  { %v240_v33 = vpop.f32.mrb[0].mxu0 }
  0xfd   :  { %v241_v34 = vadd.f32 %v240_v33, %v60_v32  ;;  %v242_v35 = vpop.f32.mrb[1].mxu0 }
  0xfe   :  { %v243_v37 = vpop.f32.mrb[2].mxu0 }
  0xff   :  { %v244_v38 = vadd.f32 %v243_v37, %v65_v36  ;;  %v245_v39 = vpop.f32.mrb[3].mxu0  ;;  %v271_v41 = vmax.f32 %v241_v34, 0.0 }
 0x101   :  { %v272_v42 = vmax.f32 %v244_v38, 0.0 }
 0x103   :  { %v287_v43 = vpack.c.bf16 %v272_v42, %v271_v41 }
 0x104   :  { %v248_v44 = vpop.f32.mrb[4].mxu0 }
 0x105   :  { %v249_v45 = vadd.f32 %v248_v44, %v70_v40  ;;  %v250_v46 = vpop.f32.mrb[5].mxu0  ;;  %421 = vmatprep.subr.bf16.mxu1 %v287_v43 }
 0x106   :  { %v251_v48 = vpop.f32.mrb[6].mxu0  ;;  %422 = vmatpush3.bf16.msra.mxu1 %v287_v43 }
 0x107   :  { %v252_v49 = vadd.f32 %v251_v48, %v75_v47  ;;  %v253_v50 = vpop.f32.mrb[7].mxu0  ;;  %v273_v51 = vmax.f32 %v249_v45, 0.0 }
 0x109   :  { %v274_v52 = vmax.f32 %v252_v49, 0.0 }
 0x10b   :  { %v288_v53 = vpack.c.bf16 %v274_v52, %v273_v51 }
 0x10c   :  { %v256_v55 = vpop.f32.mrb[8].mxu0 }
 0x10d   :  { %v257_v56 = vadd.f32 %v256_v55, %v80_v54  ;;  %v258_v57 = vpop.f32.mrb[9].mxu0  ;;  %423 = vmatprep.subr.bf16.mxu1 %v288_v53 }
 0x10e   :  { %v259_v59 = vpop.f32.mrb[10].mxu0  ;;  %424 = vmatpush3.bf16.msra.mxu1 %v288_v53 }
 0x10f   :  { %v260_v60 = vadd.f32 %v259_v59, %v85_v58  ;;  %v261_v61 = vpop.f32.mrb[11].mxu0  ;;  %v275_v62 = vmax.f32 %v257_v56, 0.0 }
 0x111   :  { %v276_v63 = vmax.f32 %v260_v60, 0.0 }
 0x113   :  { %v289_v0 = vpack.c.bf16 %v276_v63, %v275_v62 }
 0x114   :  { %v264_v2 = vpop.f32.mrb[12].mxu0 }
 0x115   :  { %v265_v3 = vadd.f32 %v264_v2, %v90_v1  ;;  %v266_v4 = vpop.f32.mrb[13].mxu0  ;;  %425 = vmatprep.subr.bf16.mxu1 %v289_v0 }
 0x116   :  { %v267_v6 = vpop.f32.mrb[14].mxu0  ;;  %426 = vmatpush3.bf16.msra.mxu1 %v289_v0 }
 0x117   :  { %v268_v7 = vadd.f32 %v267_v6, %v95_v5  ;;  %v269_v8 = vpop.f32.mrb[15].mxu0  ;;  %v277_v9 = vmax.f32 %v265_v3, 0.0 }
 0x119   :  { %v278_v10 = vmax.f32 %v268_v7, 0.0 }
 0x11b   :  { %v290_v11 = vpack.c.bf16 %v278_v10, %v277_v9 }
 0x11d   :  { %427 = vmatprep.subr.bf16.mxu1 %v290_v11 }
 0x11e   :  { %428 = vmatpush3.bf16.msra.mxu1 %v290_v11 }
 0x121   :  { %430 = vmatmul.mubr.msk.bf16.vlgmr.msra.gmra.mrb[0].mxu1 %vm321_vm1, %v459_v12 }
 0x1f4   :  { %v431_v16 = vpop.f32.mrb[0].mxu1 }
 0x1f5   :  { %v371_v17 = vadd.f32 %v431_v16, %v304_v15  ;;  %v362_v18 = vpop.f32.mrb[1].mxu1 }
 0x1f6   :  { %v363_v20 = vadd.f32 %v362_v18, %v294_v13  ;;  %v432_v21 = vpop.f32.mrb[2].mxu1 }
 0x1f7   :  { %v379_v22 = vmax.f32 %v371_v17, 0.0  ;;  %v374_v23 = vadd.f32 %v432_v21, %v309_v19  ;;  %v365_v24 = vpop.f32.mrb[3].mxu1 }
 0x1f8   :  { %v377_v25 = vmax.f32 %v363_v20, 0.0  ;;  %v366_v26 = vadd.f32 %v365_v24, %v299_v14 }
 0x1f9   :  { %383 = vst.msk [vmem:[%s614_s5 + $0x10] sm:$0xff] %vm321_vm1, %v379_v22  ;;  %v380_v27 = vmax.f32 %v374_v23, 0.0 }
 0x1fa   :  { %381 = vst.msk [vmem:[%s614_s5] sm:$0xff] %vm321_vm1, %v377_v25  ;;  %v378_v28 = vmax.f32 %v366_v26, 0.0 }
 0x1fb   :  { %384 = vst.msk [vmem:[%s614_s5 + $0x18] sm:$0xff] %vm321_vm1, %v380_v27 }
 0x1fc   :  { %382 = vst.msk [vmem:[%s614_s5 + $0x8] sm:$0xff] %vm321_vm1, %v378_v28 }

// kernel: forward.18
= control target key start
LH: loop header
LB: loop body
LE: loop exit
PB: predicated region body
PF: predicated region fallthrough
CT: control target
= control target key end

     0   :  { %v315_v1 = vmov 0   ;;  %vm95_vm0 = vcmask 392192   ;;  %vm205_vm1 = vcmask 261120   ;;  %s430_s0 = inlined_call_operand.vmem [shape: bf16[48,256], index: 0, kind: input, shape index: {}]   ;;  %s431_s1 = inlined_call_operand.vmem [shape: bf16[32,48], index: 1, kind: input, shape index: {}]   ;;  %s432_s2 = inlined_call_operand.vmem [shape: f32[32,1], index: 2, kind: input, shape index: {}, may-alias: {2,4}]   ;;  %s433_s4 = inlined_call_operand.vmem [shape: f32[32,1], index: 4, kind: input, shape index: {}, may-alias: {2,4}]   ;;  %s434_s3 = inlined_call_operand.vmem [shape: bf16[32,32], index: 3, kind: input, shape index: {}]   ;;  %s435_s5 = inlined_call_operand.vmem [shape: f32[32,256], index: 5, kind: output, shape index: {}]  }
   0x1   :  { %v302_v0 = vld [vmem:[%s430_s0 + $0x4] ss:$8 sps:$4 sm:$0xff]   ;;  %134 = vmatprep.mubr.bf16.mxu0 %v315_v1  ;;  %300 = vset.pattern.permute.xlu0 %v315_v1  ;;  %v304_v2 = vld [vmem:[%s430_s0] ss:$8 sps:$4 sm:$0xff]   ;;  %v305_v3 = vld [vmem:[%s430_s0 + $0x14] ss:$8 sps:$4 sm:$0xff]  }
   0x2   :  { %301 = vset.pattern.permute.xlu1 %v315_v1  ;;  %244 = vmatprep.mubr.bf16.mxu1 %v315_v1  ;;  %v307_v4 = vld [vmem:[%s430_s0 + $0x10] ss:$8 sps:$4 sm:$0xff]   ;;  %v308_v5 = vld [vmem:[%s430_s0 + $0x24] ss:$8 sps:$4 sm:$0xff]   ;;  %v310_v8 = vld [vmem:[%s430_s0 + $0x20] ss:$8 sps:$4 sm:$0xff]  }
   0x3   :  { %102 = vmatprep.subr.bf16.mxu0 %v302_v0  ;;  %v31_v6 = vld [vmem:[%s432_s2] sm:$0xff]  ;;  %v33_v7 = vld [vmem:[%s432_s2 + $0x10] sm:$0xff]  ;;  %v32_v9 = vld [vmem:[%s432_s2 + $0x8] sm:$0xff] }
   0x4   :  { %103 = vmatpush1.bf16.msra.mxu0 %v304_v2  ;;  %37 = vperm.xlu0 %300, %v31_v6   ;;  %v34_v10 = vld [vmem:[%s432_s2 + $0x18] sm:$0xff]  ;;  %v311_v11 = vld [vmem:[%s431_s1] sm:$0xff]   ;;  %v168_v13 = vld [vmem:[%s433_s4 + $0x8] sm:$0xff] }
   0x5   :  { %104 = vmatprep.subr.bf16.mxu0 %v305_v3  ;;  %47 = vperm.xlu1 %301, %v33_v7   ;;  %v167_v12 = vld [vmem:[%s433_s4] sm:$0xff]  ;;  %v169_v14 = vld [vmem:[%s433_s4 + $0x10] sm:$0xff]  ;;  %v170_v15 = vld [vmem:[%s433_s4 + $0x18] sm:$0xff] }
   0x6   :  { %v312_v16 = vld [vmem:[%s431_s1 + $0x8] sm:$0xff]   ;;  %v313_v49 = vld [vmem:[%s434_s3] sm:$0xff]  }
   0x7   :  { %v314_v50 = vld [vmem:[%s434_s3 + $0x8] sm:$0xff]  }
   0x8   :  { %105 = vmatpush1.bf16.msra.mxu0 %v307_v4  ;;  %42 = vperm.xlu0 %300, %v32_v9  }
   0x9   :  { %106 = vmatprep.subr.bf16.mxu0 %v308_v5  ;;  %52 = vperm.xlu1 %301, %v34_v10  }
   0xc   :  { %107 = vmatpush1.bf16.msra.mxu0 %v310_v8  ;;  %177 = vperm.xlu0 %300, %v167_v12  }
   0xd   :  { %182 = vperm.xlu1 %301, %v168_v13  }
   0xf   :  { %293 = vmatmul.mubr.msk.bf16.vlgmr.msra.gmra.mrb[0].mxu0 %vm95_vm0, %v311_v11 }
  0x10   :  { %144 = vmatprep.mubr.bf16.mxu0 %v315_v1  ;;  %187 = vperm.xlu0 %300, %v169_v14  }
  0x11   :  { %192 = vperm.xlu1 %301, %v170_v15  }
  0x17   :  { %294 = vmatmul.mubr.msk.bf16.gmra.mrb[4].mxu0 %vm95_vm0, %v312_v16 }
  0x83   :  { %v38_v17 = vpop.permute.xlu0 %37 }
  0x84   :  { %v48_v26 = vpop.permute.xlu1 %47 }
  0x87   :  { %v43_v21 = vpop.permute.xlu0 %42 }
  0x88   :  { %v53_v37 = vpop.permute.xlu1 %52 }
  0x8b   :  { %v178_v51 = vpop.permute.xlu0 %177 }
  0x8c   :  { %v183_v55 = vpop.permute.xlu1 %182 }
  0x90   :  { %v193_v5 = vpop.permute.xlu1 %192 }
  0xe2   :  { %v136_v18 = vpop.f32.mrb[0].mxu0 }
  0xe3   :  { %v137_v19 = vadd.f32 %v136_v18, %v38_v17  ;;  %v138_v20 = vpop.f32.mrb[1].mxu0 }
  0xe4   :  { %v139_v22 = vadd.f32 %v138_v20, %v38_v17  ;;  %v140_v23 = vpop.f32.mrb[2].mxu0 }
  0xe5   :  { %v141_v24 = vadd.f32 %v140_v23, %v43_v21  ;;  %v142_v25 = vpop.f32.mrb[3].mxu0  ;;  %v155_v28 = vmax.f32 %v137_v19, 0.0 }
  0xe6   :  { %v143_v27 = vadd.f32 %v142_v25, %v43_v21  ;;  %v156_v30 = vmax.f32 %v139_v22, 0.0 }
  0xe7   :  { %v157_v29 = vmax.f32 %v141_v24, 0.0 }
  0xe8   :  { %v158_v31 = vmax.f32 %v143_v27, 0.0 }
  0xe9   :  { %v171_v32 = vpack.c.bf16 %v157_v29, %v155_v28 }
  0xea   :  { %v146_v33 = vpop.f32.mrb[4].mxu0  ;;  %v172_v34 = vpack.c.bf16 %v158_v31, %v156_v30 }
  0xeb   :  { %v147_v35 = vadd.f32 %v146_v33, %v48_v26  ;;  %v148_v36 = vpop.f32.mrb[5].mxu0 }
  0xec   :  { %v149_v38 = vadd.f32 %v148_v36, %v48_v26  ;;  %v150_v39 = vpop.f32.mrb[6].mxu0  ;;  %212 = vmatprep.subr.bf16.mxu1 %v172_v34 }
  0xed   :  { %v151_v40 = vadd.f32 %v150_v39, %v53_v37  ;;  %v152_v41 = vpop.f32.mrb[7].mxu0  ;;  %213 = vmatpush1.bf16.msra.mxu1 %v171_v32  ;;  %v159_v43 = vmax.f32 %v147_v35, 0.0 }
  0xee   :  { %v153_v42 = vadd.f32 %v152_v41, %v53_v37  ;;  %v160_v45 = vmax.f32 %v149_v38, 0.0 }
  0xef   :  { %v161_v44 = vmax.f32 %v151_v40, 0.0 }
  0xf0   :  { %v162_v46 = vmax.f32 %v153_v42, 0.0 }
  0xf1   :  { %v173_v47 = vpack.c.bf16 %v161_v44, %v159_v43 }
  0xf2   :  { %v174_v48 = vpack.c.bf16 %v162_v46, %v160_v45 }
  0xf4   :  { %214 = vmatprep.subr.bf16.mxu1 %v174_v48 }
  0xf5   :  { %215 = vmatpush1.bf16.msra.mxu1 %v173_v47 }
  0xf8   :  { %297 = vmatmul.mubr.msk.bf16.vlgmr.msra.gmra.mrb[0].mxu1 %vm205_vm1, %v313_v49 }
  0xf9   :  { %254 = vmatprep.mubr.bf16.mxu1 %v315_v1  ;;  %v188_v1 = vpop.permute.xlu0 %187 }
 0x100   :  { %298 = vmatmul.mubr.msk.bf16.gmra.mrb[4].mxu1 %vm205_vm1, %v314_v50 }
 0x1cb   :  { %v246_v52 = vpop.f32.mrb[0].mxu1 }
 0x1cc   :  { %v247_v53 = vadd.f32 %v246_v52, %v178_v51  ;;  %v248_v54 = vpop.f32.mrb[1].mxu1 }
 0x1cd   :  { %v249_v56 = vadd.f32 %v248_v54, %v178_v51  ;;  %v250_v57 = vpop.f32.mrb[2].mxu1 }
 0x1ce   :  { %v265_v58 = vmax.f32 %v247_v53, 0.0  ;;  %v251_v59 = vadd.f32 %v250_v57, %v183_v55  ;;  %v252_v60 = vpop.f32.mrb[3].mxu1 }
 0x1cf   :  { %v266_v61 = vmax.f32 %v249_v56, 0.0  ;;  %v253_v62 = vadd.f32 %v252_v60, %v183_v55 }
 0x1d0   :  { %273 = vst [vmem:[%s435_s5] sm:$0xff] %v265_v58  ;;  %v267_v63 = vmax.f32 %v251_v59, 0.0 }
 0x1d1   :  { %274 = vst [vmem:[%s435_s5 + $0x8] sm:$0xff] %v266_v61  ;;  %v268_v0 = vmax.f32 %v253_v62, 0.0 }
 0x1d2   :  { %275 = vst [vmem:[%s435_s5 + $0x10] sm:$0xff] %v267_v63 }
 0x1d3   :  { %276 = vst [vmem:[%s435_s5 + $0x18] sm:$0xff] %v268_v0  ;;  %v256_v2 = vpop.f32.mrb[4].mxu1 }
 0x1d4   :  { %v257_v3 = vadd.f32 %v256_v2, %v188_v1  ;;  %v258_v4 = vpop.f32.mrb[5].mxu1 }
 0x1d5   :  { %v259_v6 = vadd.f32 %v258_v4, %v188_v1  ;;  %v260_v7 = vpop.f32.mrb[6].mxu1 }
 0x1d6   :  { %v269_v8 = vmax.f32 %v257_v3, 0.0  ;;  %v261_v9 = vadd.f32 %v260_v7, %v193_v5  ;;  %v262_v10 = vpop.f32.mrb[7].mxu1 }
 0x1d7   :  { %v270_v11 = vmax.f32 %v259_v6, 0.0  ;;  %v263_v12 = vadd.f32 %v262_v10, %v193_v5 }
 0x1d8   :  { %277 = vst [vmem:[%s435_s5 + $0x20] sm:$0xff] %v269_v8  ;;  %v271_v13 = vmax.f32 %v261_v9, 0.0 }
 0x1d9   :  { %278 = vst [vmem:[%s435_s5 + $0x28] sm:$0xff] %v270_v11  ;;  %v272_v14 = vmax.f32 %v263_v12, 0.0 }
 0x1da   :  { %279 = vst [vmem:[%s435_s5 + $0x30] sm:$0xff] %v271_v13 }
 0x1db   :  { %280 = vst [vmem:[%s435_s5 + $0x38] sm:$0xff] %v272_v14 }

// kernel: forward.19
= control target key start
LH: loop header
LB: loop body
LE: loop exit
PB: predicated region body
PF: predicated region fallthrough
CT: control target
= control target key end

     0   :  { %v232_v1 = vmov 0   ;;  %vm83_vm0 = vcmask 261120   ;;  %s308_s0 = inlined_call_operand.vmem [shape: bf16[32,256], index: 0, kind: input, shape index: {}]   ;;  %s309_s1 = inlined_call_operand.vmem [shape: bf16[32,32], index: 1, kind: input, shape index: {}]   ;;  %s310_s2 = inlined_call_operand.vmem [shape: f32[32,1], index: 2, kind: input, shape index: {}]   ;;  %s311_s4 = inlined_call_operand.vmem [shape: f32[6,1], index: 4, kind: input, shape index: {}]   ;;  %s312_s3 = inlined_call_operand.vmem [shape: bf16[6,32], index: 3, kind: input, shape index: {}]   ;;  %s313_s5 = inlined_call_operand.vmem [shape: f32[6,256], index: 5, kind: output, shape index: {}]  }
   0x1   :  { %v224_v0 = vld [vmem:[%s308_s0 + $0x4] ss:$8 sps:$4 sm:$0xff]   ;;  %122 = vmatprep.mubr.bf16.mxu0 %v232_v1  ;;  %222 = vset.pattern.permute.xlu0 %v232_v1  ;;  %v226_v2 = vld [vmem:[%s308_s0] ss:$8 sps:$4 sm:$0xff]   ;;  %v227_v3 = vld [vmem:[%s308_s0 + $0x14] ss:$8 sps:$4 sm:$0xff]  }
   0x2   :  { %223 = vset.pattern.permute.xlu1 %v232_v1  ;;  %197 = vmatprep.mubr.bf16.mxu1 %v232_v1  ;;  %v229_v4 = vld [vmem:[%s308_s0 + $0x10] ss:$8 sps:$4 sm:$0xff]   ;;  %v29_v5 = vld [vmem:[%s310_s2] sm:$0xff]  ;;  %v30_v8 = vld [vmem:[%s310_s2 + $0x8] sm:$0xff] }
   0x3   :  { %90 = vmatprep.subr.bf16.mxu0 %v224_v0  ;;  %35 = vperm.xlu0 %222, %v29_v5   ;;  %v31_v6 = vld [vmem:[%s310_s2 + $0x10] sm:$0xff]  ;;  %v230_v7 = vld [vmem:[%s309_s1] sm:$0xff]   ;;  %v32_v9 = vld [vmem:[%s310_s2 + $0x18] sm:$0xff] }
   0x4   :  { %91 = vmatpush1.bf16.msra.mxu0 %v226_v2  ;;  %45 = vperm.xlu1 %223, %v31_v6   ;;  %v152_v10 = vld [vmem:[%s311_s4] sm:$0x3f]  ;;  %v231_v11 = vld [vmem:[%s309_s1 + $0x8] sm:$0xff]  }
   0x5   :  { %92 = vmatprep.subr.bf16.mxu0 %v227_v3  ;;  %v151_v44 = vld [vmem:[%s312_s3] sm:$0x7] }
   0x7   :  { %40 = vperm.xlu0 %222, %v30_v8  }
   0x8   :  { %93 = vmatpush1.bf16.msra.mxu0 %v229_v4  ;;  %50 = vperm.xlu1 %223, %v32_v9  }
   0xb   :  { %218 = vmatmul.mubr.msk.bf16.vlgmr.msra.gmra.mrb[0].mxu0 %vm83_vm0, %v230_v7  ;;  %159 = vperm.xlu0 %222, %v152_v10  }
   0xc   :  { %132 = vmatprep.mubr.bf16.mxu0 %v232_v1 }
  0x13   :  { %219 = vmatmul.mubr.msk.bf16.gmra.mrb[4].mxu0 %vm83_vm0, %v231_v11 }
  0x82   :  { %v36_v12 = vpop.permute.xlu0 %35 }
  0x83   :  { %v46_v21 = vpop.permute.xlu1 %45 }
  0x86   :  { %v41_v16 = vpop.permute.xlu0 %40 }
  0x87   :  { %v51_v32 = vpop.permute.xlu1 %50 }
  0x8a   :  { %v160_v45 = vpop.permute.xlu0 %159 }
  0xde   :  { %v124_v13 = vpop.f32.mrb[0].mxu0 }
  0xdf   :  { %v125_v14 = vadd.f32 %v124_v13, %v36_v12  ;;  %v126_v15 = vpop.f32.mrb[1].mxu0 }
  0xe0   :  { %v127_v17 = vadd.f32 %v126_v15, %v36_v12  ;;  %v128_v18 = vpop.f32.mrb[2].mxu0 }
  0xe1   :  { %v129_v19 = vadd.f32 %v128_v18, %v41_v16  ;;  %v130_v20 = vpop.f32.mrb[3].mxu0  ;;  %v143_v23 = vmax.f32 %v125_v14, 0.0 }
  0xe2   :  { %v131_v22 = vadd.f32 %v130_v20, %v41_v16  ;;  %v144_v25 = vmax.f32 %v127_v17, 0.0 }
  0xe3   :  { %v145_v24 = vmax.f32 %v129_v19, 0.0 }
  0xe4   :  { %v146_v26 = vmax.f32 %v131_v22, 0.0 }
  0xe5   :  { %v153_v27 = vpack.c.bf16 %v145_v24, %v143_v23 }
  0xe6   :  { %v134_v28 = vpop.f32.mrb[4].mxu0  ;;  %v154_v29 = vpack.c.bf16 %v146_v26, %v144_v25 }
  0xe7   :  { %v135_v30 = vadd.f32 %v134_v28, %v46_v21  ;;  %v136_v31 = vpop.f32.mrb[5].mxu0 }
  0xe8   :  { %v137_v33 = vadd.f32 %v136_v31, %v46_v21  ;;  %v138_v34 = vpop.f32.mrb[6].mxu0  ;;  %165 = vmatprep.subr.bf16.mxu1 %v154_v29 }
  0xe9   :  { %v139_v35 = vadd.f32 %v138_v34, %v51_v32  ;;  %v140_v36 = vpop.f32.mrb[7].mxu0  ;;  %166 = vmatpush1.bf16.msra.mxu1 %v153_v27  ;;  %v147_v38 = vmax.f32 %v135_v30, 0.0 }
  0xea   :  { %v141_v37 = vadd.f32 %v140_v36, %v51_v32  ;;  %v148_v40 = vmax.f32 %v137_v33, 0.0 }
  0xeb   :  { %v149_v39 = vmax.f32 %v139_v35, 0.0 }
  0xec   :  { %v150_v41 = vmax.f32 %v141_v37, 0.0 }
  0xed   :  { %v155_v42 = vpack.c.bf16 %v149_v39, %v147_v38 }
  0xee   :  { %v156_v43 = vpack.c.bf16 %v150_v41, %v148_v40 }
  0xf0   :  { %167 = vmatprep.subr.bf16.mxu1 %v156_v43 }
  0xf1   :  { %168 = vmatpush1.bf16.msra.mxu1 %v155_v42 }
  0xf4   :  { %220 = vmatmul.mubr.msk.bf16.vlgmr.msra.gmra.mrb[0].mxu1 %vm83_vm0, %v151_v44 }
 0x1c7   :  { %v199_v46 = vpop.f32.mrb[0].mxu1 }
 0x1c8   :  { %v200_v47 = vadd.f32 %v199_v46, %v160_v45  ;;  %v201_v48 = vpop.f32.mrb[1].mxu1 }
 0x1c9   :  { %v202_v49 = vadd.f32 %v201_v48, %v160_v45  ;;  %v203_v50 = vpop.f32.mrb[2].mxu1 }
 0x1ca   :  { %206 = vst [vmem:[%s313_s5] sm:$0x3f] %v200_v47  ;;  %v204_v51 = vpop.f32.mrb[3].mxu1 }
 0x1cb   :  { %207 = vst [vmem:[%s313_s5 + $0x8] sm:$0x3f] %v202_v49 }

</bundles_post_ra>
